<compile_context>
chip_gen: v6e
topology: v6e:2x2x1
jax: 0.10.0
libtpu: 0.0.40
codegen_flags: <defaults>
</compile_context>

<pallas_src>
import functools

import jax
import jax.numpy as jnp
from jax.experimental import pallas as pl
from jax.experimental.pallas import tpu as pltpu

LANES = 128   # lane width; padded width for the hidden-100 / out-1 dims
H1 = 8        # packed width for the 4-wide concatenated fc1 output


# ---------------------------------------------------------------------------
# Kernel: fused 4-layer MLP.  2 (+1 tiny) lane-aligned MXU dots, all weights
# resident in VMEM, batch tiled over the grid.
# ---------------------------------------------------------------------------
def image_net_kernel(x_ref, y_ref, w1x_ref, w1y_ref, w2_ref, w3_ref, o_ref):
    # fc1x: (tb, x_dim) @ (x_dim, 8) -> cols 0:2 live, cols 2:8 exact zeros.
    hx = jnp.dot(x_ref[...].astype(jnp.bfloat16), w1x_ref[...],
                 preferred_element_type=jnp.float32)

    # fc1y contribution lands in cols 2:4 (disjoint from fc1x's cols), so a
    # single ReLU over the sum reproduces cat(relu(fc1x), relu(fc1y)).
    y_b = y_ref[...].astype(jnp.bfloat16)
    if y_b.shape[1] == 1:
        # y_dim == 1 (the module's case): broadcast MAC on the VPU, no tiny-K
        # matmul needed.  bf16*bf16 products are exact in f32.
        hy = y_b.astype(jnp.float32) * w1y_ref[...].astype(jnp.float32)
    else:
        hy = jnp.dot(y_b, w1y_ref[...], preferred_element_type=jnp.float32)

    h1 = jnp.maximum(hx + hy, 0.0)                      # (tb, 8)

    # fc2: (tb, 8) @ (8, 128); pad rows/cols of w2 are zero.
    h2 = jnp.maximum(
        jnp.dot(h1.astype(jnp.bfloat16), w2_ref[...],
                preferred_element_type=jnp.float32),
        0.0)

    # fc3 -> lane 0 of the lane-dense (tb, 128) f32 output tile.
    o_ref[...] = jnp.dot(h2.astype(jnp.bfloat16), w3_ref[...],
                         preferred_element_type=jnp.float32)


# ---------------------------------------------------------------------------
# One-time parameter packing (hoisted out of the forward pass).
# ---------------------------------------------------------------------------
def pack_params(params):
    w1x_t = params["w1x"].T                 # (x_dim, 2)
    w1y_t = params["w1y"].T                 # (y_dim, 2)
    x_dim = w1x_t.shape[0]
    y_dim = w1y_t.shape[0]

    w1x = jnp.zeros((x_dim, H1), jnp.float32).at[:, 0:2].set(w1x_t)
    w1y = jnp.zeros((y_dim, H1), jnp.float32).at[:, 2:4].set(w1y_t)
    w2 = jnp.zeros((H1, LANES), jnp.float32).at[0:4, 0:100].set(params["w2"].T)
    w3 = jnp.zeros((LANES, LANES), jnp.float32).at[0:100, 0:1].set(params["w3"].T)

    return {
        "w1x": w1x.astype(jnp.bfloat16),
        "w1y": w1y.astype(jnp.bfloat16),
        "w2": w2.astype(jnp.bfloat16),
        "w3": w3.astype(jnp.bfloat16),
    }


# ---------------------------------------------------------------------------
# Forward: batch-tiled pallas_call, x/y fed directly (no slab).
# ---------------------------------------------------------------------------
@functools.partial(jax.jit, static_argnames=("tile_b",))
def image_network_forward(x, y, w1x, w1y, w2, w3, *, tile_b=256):
    """x: (B, x_dim) f32, y: (B, y_dim) f32 -> (B, 1) f32."""
    B, x_dim = x.shape
    _, y_dim = y.shape

    # tb must be the full batch or a multiple of 8 (sublane rule).
    if B <= tile_b:
        tb = B
    else:
        tb = max(8, (tile_b // 8) * 8)

    out = pl.pallas_call(
        image_net_kernel,
        out_shape=jax.ShapeDtypeStruct((B, LANES), jnp.float32),
        grid=(pl.cdiv(B, tb),),
        in_specs=[
            pl.BlockSpec((tb, x_dim), lambda i: (i, 0)),      # x   (batch-tiled)
            pl.BlockSpec((tb, y_dim), lambda i: (i, 0)),      # y   (batch-tiled)
            pl.BlockSpec((x_dim, H1), lambda i: (0, 0)),      # W1x (resident)
            pl.BlockSpec((y_dim, H1), lambda i: (0, 0)),      # W1y (resident)
            pl.BlockSpec((H1, LANES), lambda i: (0, 0)),      # W2  (resident)
            pl.BlockSpec((LANES, LANES), lambda i: (0, 0)),   # W3  (resident)
        ],
        out_specs=pl.BlockSpec((tb, LANES), lambda i: (i, 0)),
        compiler_params=pltpu.CompilerParams(
            dimension_semantics=("parallel",),   # 2 steps -> both v7x TCs busy
            vmem_limit_bytes=32 * 1024 * 1024),
    )(x, y, w1x, w1y, w2, w3)

    # Only lane 0 is live.  (Padded rows of a ragged last block never reach
    # here because out has exactly B rows.)
    return out[:, 0:1]


# ---------------------------------------------------------------------------
# Deterministic init (PyTorch Linear default: U(-1/sqrt(in), +1/sqrt(in))).
# ---------------------------------------------------------------------------
def init_params(key, x_dim, y_dim):
    ks = jax.random.split(key, 4)

    def lin(k, out_f, in_f):
        bound = 1.0 / (in_f ** 0.5)
        return jax.random.uniform(k, (out_f, in_f), jnp.float32, -bound, bound)

    return {
        "w1x": lin(ks[0], 2, x_dim),   # fc1x: Linear(x_dim, 2, bias=False)
        "w1y": lin(ks[1], 2, y_dim),   # fc1y: Linear(y_dim, 2, bias=False)
        "w2":  lin(ks[2], 100, 4),     # fc2:  Linear(4, 100, bias=False)
        "w3":  lin(ks[3], 1, 100),     # fc3:  Linear(100, 1, bias=False)
    }


def reference_forward(x, y, p):
    # Mirrors the kernel's deliberate bf16-operand / f32-accumulate choice so
    # the check validates kernel structure rather than bf16 rounding.
    bf = lambda a: a.astype(jnp.bfloat16)
    hx = jax.nn.relu(jnp.dot(bf(x), bf(p["w1x"]).T,
                             preferred_element_type=jnp.float32))
    hy = jax.nn.relu(jnp.dot(bf(y), bf(p["w1y"]).T,
                             preferred_element_type=jnp.float32))
    h = jnp.concatenate([hx, hy], axis=1)
    h = jax.nn.relu(jnp.dot(bf(h), bf(p["w2"]).T,
                            preferred_element_type=jnp.float32))
    return jnp.dot(bf(h), bf(p["w3"]).T, preferred_element_type=jnp.float32)


if __name__ == "__main__":
    X_DIM = (224 // 5) * (224 // 5) * 3   # 5808, as in the original script
    Y_DIM = 1
    B = 512                               # grid of 2 blocks of 256 rows

    key = jax.random.PRNGKey(0)
    k_p, k_x, k_y = jax.random.split(key, 3)

    params = init_params(k_p, X_DIM, Y_DIM)
    packed = pack_params(params)          # one-time packing
    x = jax.random.normal(k_x, (B, X_DIM), jnp.float32)
    y = jax.random.normal(k_y, (B, Y_DIM), jnp.float32)

    out = jax.block_until_ready(
        image_network_forward(x, y, packed["w1x"], packed["w1y"],
                              packed["w2"], packed["w3"]))
    ref = jax.block_until_ready(reference_forward(x, y, params))

    assert out.shape == (B, 1)
    assert bool(jnp.allclose(out, ref, atol=2e-3, rtol=2e-3)), \
        float(jnp.max(jnp.abs(out - ref)))
    print("KERNEL_OK")
</pallas_src>

<mosaic_0001>
module attributes {stable_mosaic.version = 11 : i64} {
  func.func @image_net_kernel(%arg0: i32, %arg1: memref<256x5808xf32, #tpu.memory_space<vmem>>, %arg2: memref<256x1xf32, #tpu.memory_space<vmem>>, %arg3: memref<5808x8xbf16, #tpu.memory_space<vmem>>, %arg4: memref<1x8xbf16, #tpu.memory_space<vmem>>, %arg5: memref<8x128xbf16, #tpu.memory_space<vmem>>, %arg6: memref<128x128xbf16, #tpu.memory_space<vmem>>, %arg7: memref<256x128xf32, #tpu.memory_space<vmem>>) attributes {dimension_semantics = [#tpu.dimension_semantics<parallel>], iteration_bounds = array<i64: 2>, scalar_prefetch = 0 : i64, scratch_operands = 0 : i64, tpu.core_type = #tpu.core_type<tc>, window_params = [{transform_indices = @transform_0, window_bounds = array<i64: 256, 5808>}, {transform_indices = @transform_1, window_bounds = array<i64: 256, 1>}, {pipeline_mode = #tpu.pipeline_mode<synchronous>, transform_indices = @transform_2, window_bounds = array<i64: 5808, 8>}, {pipeline_mode = #tpu.pipeline_mode<synchronous>, transform_indices = @transform_3, window_bounds = array<i64: 1, 8>}, {pipeline_mode = #tpu.pipeline_mode<synchronous>, transform_indices = @transform_4, window_bounds = array<i64: 8, 128>}, {pipeline_mode = #tpu.pipeline_mode<synchronous>, transform_indices = @transform_5, window_bounds = array<i64: 128, 128>}, {transform_indices = @transform_6, window_bounds = array<i64: 256, 128>}]} {
    %c0 = arith.constant 0 : index
    %c0_0 = arith.constant 0 : index
    %0 = vector.load %arg1[%c0, %c0_0] : memref<256x5808xf32, #tpu.memory_space<vmem>>, vector<256x5808xf32>
    %1 = arith.truncf %0 : vector<256x5808xf32> to vector<256x5808xbf16>
    %c0_1 = arith.constant 0 : index
    %c0_2 = arith.constant 0 : index
    %2 = vector.load %arg3[%c0_1, %c0_2] : memref<5808x8xbf16, #tpu.memory_space<vmem>>, vector<5808x8xbf16>
    %cst = arith.constant dense<0.000000e+00> : vector<256x8xf32>
    %3 = tpu.matmul %1, %2, %cst {dimension_numbers = #tpu.dot_dimension_numbers<[1], [0], [0], [1], [0, 0, 1, 1], [], []>} : vector<256x5808xbf16>, vector<5808x8xbf16>, vector<256x8xf32> -> vector<256x8xf32>
    %c0_3 = arith.constant 0 : index
    %c0_4 = arith.constant 0 : index
    %4 = vector.load %arg2[%c0_3, %c0_4] : memref<256x1xf32, #tpu.memory_space<vmem>>, vector<256x1xf32>
    %5 = arith.truncf %4 : vector<256x1xf32> to vector<256x1xbf16>
    %6 = arith.extf %5 : vector<256x1xbf16> to vector<256x1xf32>
    %c0_5 = arith.constant 0 : index
    %c0_6 = arith.constant 0 : index
    %7 = vector.load %arg4[%c0_5, %c0_6] : memref<1x8xbf16, #tpu.memory_space<vmem>>, vector<1x8xbf16>
    %8 = arith.extf %7 : vector<1x8xbf16> to vector<1x8xf32>
    %9 = vector.broadcast %6 : vector<256x1xf32> to vector<256x8xf32>
    %10 = vector.broadcast %8 : vector<1x8xf32> to vector<256x8xf32>
    %11 = arith.mulf %9, %10 : vector<256x8xf32>
    %12 = arith.addf %3, %11 : vector<256x8xf32>
    %cst_7 = arith.constant 0.000000e+00 : f32
    %13 = vector.broadcast %cst_7 : f32 to vector<256x8xf32>
    %14 = arith.maximumf %12, %13 : vector<256x8xf32>
    %15 = arith.truncf %14 : vector<256x8xf32> to vector<256x8xbf16>
    %c0_8 = arith.constant 0 : index
    %c0_9 = arith.constant 0 : index
    %16 = vector.load %arg5[%c0_8, %c0_9] : memref<8x128xbf16, #tpu.memory_space<vmem>>, vector<8x128xbf16>
    %cst_10 = arith.constant dense<0.000000e+00> : vector<256x128xf32>
    %17 = tpu.matmul %15, %16, %cst_10 {dimension_numbers = #tpu.dot_dimension_numbers<[1], [0], [0], [1], [0, 0, 1, 1], [], []>} : vector<256x8xbf16>, vector<8x128xbf16>, vector<256x128xf32> -> vector<256x128xf32>
    %cst_11 = arith.constant 0.000000e+00 : f32
    %18 = vector.broadcast %cst_11 : f32 to vector<256x128xf32>
    %19 = arith.maximumf %17, %18 : vector<256x128xf32>
    %20 = arith.truncf %19 : vector<256x128xf32> to vector<256x128xbf16>
    %c0_12 = arith.constant 0 : index
    %c0_13 = arith.constant 0 : index
    %21 = vector.load %arg6[%c0_12, %c0_13] : memref<128x128xbf16, #tpu.memory_space<vmem>>, vector<128x128xbf16>
    %cst_14 = arith.constant dense<0.000000e+00> : vector<256x128xf32>
    %22 = tpu.matmul %20, %21, %cst_14 {dimension_numbers = #tpu.dot_dimension_numbers<[1], [0], [0], [1], [0, 0, 1, 1], [], []>} : vector<256x128xbf16>, vector<128x128xbf16>, vector<256x128xf32> -> vector<256x128xf32>
    %c0_15 = arith.constant 0 : index
    %c0_16 = arith.constant 0 : index
    %23 = vector.load %arg7[%c0_15, %c0_16] : memref<256x128xf32, #tpu.memory_space<vmem>>, vector<256x128xf32>
    tpu.vector_store %arg7[%c0_15, %c0_16], %22 {strides = array<i32>} : memref<256x128xf32, #tpu.memory_space<vmem>>, vector<256x128xf32>,
    return
  }
  func.func @transform_0(%arg0: i32) -> (i32, i32) {
    %c0_i32 = arith.constant 0 : i32
    %c0_i32_0 = arith.constant 0 : i32
    return %arg0, %c0_i32 : i32, i32
  }
  func.func @transform_1(%arg0: i32) -> (i32, i32) {
    %c0_i32 = arith.constant 0 : i32
    %c0_i32_0 = arith.constant 0 : i32
    return %arg0, %c0_i32 : i32, i32
  }
  func.func @transform_2(%arg0: i32) -> (i32, i32) {
    %c0_i32 = arith.constant 0 : i32
    %c0_i32_0 = arith.constant 0 : i32
    %c0_i32_1 = arith.constant 0 : i32
    return %c0_i32, %c0_i32_0 : i32, i32
  }
  func.func @transform_3(%arg0: i32) -> (i32, i32) {
    %c0_i32 = arith.constant 0 : i32
    %c0_i32_0 = arith.constant 0 : i32
    %c0_i32_1 = arith.constant 0 : i32
    return %c0_i32, %c0_i32_0 : i32, i32
  }
  func.func @transform_4(%arg0: i32) -> (i32, i32) {
    %c0_i32 = arith.constant 0 : i32
    %c0_i32_0 = arith.constant 0 : i32
    %c0_i32_1 = arith.constant 0 : i32
    return %c0_i32, %c0_i32_0 : i32, i32
  }
  func.func @transform_5(%arg0: i32) -> (i32, i32) {
    %c0_i32 = arith.constant 0 : i32
    %c0_i32_0 = arith.constant 0 : i32
    %c0_i32_1 = arith.constant 0 : i32
    return %c0_i32, %c0_i32_0 : i32, i32
  }
  func.func @transform_6(%arg0: i32) -> (i32, i32) {
    %c0_i32 = arith.constant 0 : i32
    %c0_i32_0 = arith.constant 0 : i32
    return %arg0, %c0_i32 : i32, i32
  }
}

</mosaic_0001>

<bundles_post_ra>
// kernel: image_network_forward.1
= control target key start
LH: loop header
LB: loop body
LE: loop exit
PB: predicated region body
PF: predicated region fallthrough
CT: control target
= control target key end

     0   :  { %s13570_s21 = smov 0   ;;  %s17570_s0 = inlined_call_operand.vmem [shape: f32[512,5808], index: 0, kind: input, shape index: {}]   ;;  %s17571_s1 = inlined_call_operand.vmem [shape: f32[512,1], index: 1, kind: input, shape index: {}]   ;;  %s17572_s2 = inlined_call_operand.vmem [shape: bf16[5808,8], index: 2, kind: input, shape index: {}]   ;;  %s17573_s3 = inlined_call_operand.vmem [shape: bf16[1,8], index: 3, kind: input, shape index: {}]   ;;  %s17574_s4 = inlined_call_operand.vmem [shape: bf16[8,128], index: 4, kind: input, shape index: {}]   ;;  %s17575_s5 = inlined_call_operand.vmem [shape: bf16[128,128], index: 5, kind: input, shape index: {}]   ;;  %s17576_s6 = inlined_call_operand.vmem [shape: f32[512,128], index: 6, kind: output, shape index: {}]  }
   0x1 LB: > { %s10059_s22 = sadd.s32 4294967295, %s13532_s21   ;;  %p10063_p0 = scmp.ge.s32.totalorder %s13532_s21, 1  ;;  %s13532_s21 = sphi %s13570_s21, %s16_s21  }
   0x2   : > { %p225_p1 = scmp.lt.s32.totalorder %s13532_s21, 3 }
   0x4   : > { %p226_p2 = pnand %p10063_p0, %p225_p1 }
   0x6   : > { %229 = sbr.rel (%p226_p2) target bundleno = 2179 (0x883), region = 44 }
   0xb   : > { %v13155_v0 = vld [vmem:[%s17572_s2 + $0x78] sm:$0xff]   ;;  %v13534_v4 = vmov 0   ;;  %v13159_v5 = vld [vmem:[%s17572_s2 + $0x70] sm:$0xff]   ;;  %v13163_v9 = vld [vmem:[%s17572_s2 + $0x68] sm:$0xff]   ;;  %s10064_s29 = sshll.u32 %s10059_s22, 5  ;;  %vm5671_vm0 = vcmask 392192  }
   0xc   : > { %v13156_v1 = vld [vmem:[%s17572_s2 + $0x38] sm:$0xff]   ;;  %10475 = vmatprep.subr.bf16.mxu0 %v13155_v0  ;;  %13073 = vset.pattern.permute.xlu0 %v13534_v4  ;;  %v13160_v6 = vld [vmem:[%s17572_s2 + $0x30] sm:$0xff]   ;;  %v13164_v10 = vld [vmem:[%s17572_s2 + $0x28] sm:$0xff]   ;;  %p262_p3 = scmp.lt.s32.totalorder %s10064_s29, 63  ;;  %vm9521_vm1 = vcmask 1043456   ;;  %vm9472_vm2 = vcmask 64512  }
   0xd   : > { %v13157_v2 = vld [vmem:[%s17572_s2 + $0xf8] sm:$0xff]   ;;  %10476 = vmatpush3.bf16.msra.mxu0 %v13156_v1  ;;  %13084 = vset.pattern.permute.xlu1 %v13534_v4  ;;  %v13161_v7 = vld [vmem:[%s17572_s2 + $0xf0] sm:$0xff]   ;;  %v13165_v11 = vld [vmem:[%s17572_s2 + $0xe8] sm:$0xff]  }
   0xe   : > { %v13158_v3 = vld [vmem:[%s17572_s2 + $0xb8] sm:$0xff]   ;;  %10587 = vmatprep.subr.bf16.mxu1 %v13157_v2  ;;  %10477 = vmatprep.subr.bf16.mxu0 %v13159_v5  ;;  %v13162_v8 = vld [vmem:[%s17572_s2 + $0xb0] sm:$0xff]   ;;  %v13166_v12 = vld [vmem:[%s17572_s2 + $0xa8] sm:$0xff]   ;;  %s17608_s29 = smov (!%p262_p3, %s10064_s29), 63 }
   0xf   : > { %10588 = vmatpush3.bf16.msra.mxu1 %v13158_v3  ;;  %v13167_v13 = vld [vmem:[%s17572_s2 + $0x60] sm:$0xff]   ;;  %v13171_v17 = vld [vmem:[%s17572_s2 + $0x58] sm:$0xff]   ;;  %v13175_v21 = vld [vmem:[%s17572_s2 + $0x50] sm:$0xff]   ;;  %s13063_s30 = smul.u32 368, %s17608_s29  ;;  %s10067_s18 = sshll.u32 %s17608_s29, 3 }
  0x10   : > { %10589 = vmatprep.subr.bf16.mxu1 %v13161_v7  ;;  %v13168_v14 = vld [vmem:[%s17572_s2 + $0x20] sm:$0xff]   ;;  %v13172_v18 = vld [vmem:[%s17572_s2 + $0x18] sm:$0xff]   ;;  %v13176_v22 = vld [vmem:[%s17572_s2 + $0x10] sm:$0xff]   ;;  %s13760_s25 = scalar_lea.vmem %s17571_s1, %s10067_s18  ;;  %s17533_s10 = scalar_lea.vmem %s17576_s6, %s10067_s18 }
  0x11   : > { %10478 = vmatpush3.bf16.msra.mxu0 %v13160_v6  ;;  %v13169_v15 = vld [vmem:[%s17572_s2 + $0xe0] sm:$0xff]   ;;  %v13173_v19 = vld [vmem:[%s17572_s2 + $0xd8] sm:$0xff]   ;;  %v13177_v23 = vld [vmem:[%s17572_s2 + $0xd0] sm:$0xff]   ;;  %s13675_s16 = scalar_lea.vmem %s17570_s0, %s13063_s30 }
  0x12   : > { %10479 = vmatprep.subr.bf16.mxu0 %v13163_v9  ;;  %v13170_v16 = vld [vmem:[%s17572_s2 + $0xa0] sm:$0xff]   ;;  %v13174_v20 = vld [vmem:[%s17572_s2 + $0x98] sm:$0xff]   ;;  %v13178_v24 = vld [vmem:[%s17572_s2 + $0x90] sm:$0xff]  }
  0x13   : > { %10590 = vmatpush3.bf16.msra.mxu1 %v13162_v8  ;;  %v13179_v25 = vld [vmem:[%s17572_s2 + $0x48] sm:$0xff]   ;;  %v13183_v29 = vld [vmem:[%s17572_s2 + $0x40] sm:$0xff]   ;;  %v328_v33 = vld [vmem:[%s13675_s16 + $0x178] sm:$0xff] }
  0x14   : > { %10591 = vmatprep.subr.bf16.mxu1 %v13165_v11  ;;  %v13180_v26 = vld [vmem:[%s17572_s2 + $0x8] sm:$0xff]   ;;  %v13184_v30 = vld [vmem:[%s17572_s2] sm:$0xff]   ;;  %v327_v37 = vld [vmem:[%s13675_s16 + $0x170] sm:$0xff] }
  0x15   : > { %10480 = vmatpush3.bf16.msra.mxu0 %v13164_v10  ;;  %v13181_v27 = vld [vmem:[%s17572_s2 + $0xc8] sm:$0xff]   ;;  %v13185_v31 = vld [vmem:[%s17572_s2 + $0xc0] sm:$0xff]   ;;  %v13187_v39 = vld [vmem:[%s17572_s2 + $0x178] sm:$0xff]  }
  0x16   : > { %10481 = vmatprep.subr.bf16.mxu0 %v13167_v13  ;;  %v13182_v28 = vld [vmem:[%s17572_s2 + $0x88] sm:$0xff]   ;;  %v13186_v35 = vld [vmem:[%s17572_s2 + $0x80] sm:$0xff]   ;;  %v284_v40 = vld [vmem:[%s13675_s16 + $0x18] sm:$0xff] }
  0x17   : > { %10592 = vmatpush3.bf16.msra.mxu1 %v13166_v12  ;;  %v282_v32 = vld [vmem:[%s13675_s16 + $0x8] sm:$0xff]  ;;  %v281_v36 = vld [vmem:[%s13675_s16] sm:$0xff]  ;;  %v13188_v43 = vld [vmem:[%s17572_s2 + $0x138] sm:$0xff]  }
  0x18   : > { %10593 = vmatprep.subr.bf16.mxu1 %v13169_v15  ;;  %v1754_v34 = vpack.c.bf16 %v328_v33, %v282_v32  ;;  %v1753_v38 = vpack.c.bf16 %v327_v37, %v281_v36  ;;  %v330_v41 = vld [vmem:[%s13675_s16 + $0x188] sm:$0xff]  ;;  %v283_v44 = vld [vmem:[%s13675_s16 + $0x10] sm:$0xff]  ;;  %v329_v45 = vld [vmem:[%s13675_s16 + $0x180] sm:$0xff] }
  0x19   : > { %10482 = vmatpush3.bf16.msra.mxu0 %v13168_v14  ;;  %v1756_v42 = vpack.c.bf16 %v330_v41, %v284_v40  ;;  %v374_v46 = vld [vmem:[%s13675_s16 + $0x2e8] sm:$0xff]  ;;  %v1755_v47 = vpack.c.bf16 %v329_v45, %v283_v44  ;;  %v420_v48 = vld [vmem:[%s13675_s16 + $0x458] sm:$0xff]  ;;  %v373_v49 = vld [vmem:[%s13675_s16 + $0x2e0] sm:$0xff] }
  0x1a   : > { %10483 = vmatprep.subr.bf16.mxu0 %v13171_v17  ;;  %5752 = vmatprep.mubr.bf16.mxu0 %v1754_v34  ;;  %v419_v50 = vld [vmem:[%s13675_s16 + $0x450] sm:$0xff]  ;;  %v1800_v51 = vpack.c.bf16 %v420_v48, %v374_v46  ;;  %v376_v52 = vld [vmem:[%s13675_s16 + $0x2f8] sm:$0xff]  ;;  %v422_v53 = vld [vmem:[%s13675_s16 + $0x468] sm:$0xff] }
  0x1b   : > { %10594 = vmatpush3.bf16.msra.mxu1 %v13170_v16  ;;  %5913 = vmatprep.mubr.bf16.mxu1 %v1756_v42  ;;  %v1802_v54 = vpack.c.bf16 %v422_v53, %v376_v52  ;;  %v466_v55 = vld [vmem:[%s13675_s16 + $0x5c8] sm:$0xff]  ;;  %v512_v56 = vld [vmem:[%s13675_s16 + $0x738] sm:$0xff]  ;;  %v1799_v57 = vpack.c.bf16 %v419_v50, %v373_v49  ;;  %v375_v58 = vld [vmem:[%s13675_s16 + $0x2f0] sm:$0xff] }
  0x1c   : > { %10595 = vmatprep.subr.bf16.mxu1 %v13173_v19  ;;  %v421_v59 = vld [vmem:[%s13675_s16 + $0x460] sm:$0xff]  ;;  %v1846_v60 = vpack.c.bf16 %v512_v56, %v466_v55  ;;  %v13189_v61 = vld [vmem:[%s17572_s2 + $0x170] sm:$0xff]   ;;  %v468_v62 = vld [vmem:[%s13675_s16 + $0x5d8] sm:$0xff] }
  0x1d   : > { %10484 = vmatpush3.bf16.msra.mxu0 %v13172_v18  ;;  %v514_v63 = vld [vmem:[%s13675_s16 + $0x748] sm:$0xff]  ;;  %v1801_v0 = vpack.c.bf16 %v421_v59, %v375_v58  ;;  %v13190_v1 = vld [vmem:[%s17572_s2 + $0x130] sm:$0xff]   ;;  %v465_v3 = vld [vmem:[%s13675_s16 + $0x5c0] sm:$0xff] }
  0x1e   : > { %10485 = vmatprep.subr.bf16.mxu0 %v13175_v21  ;;  %v1848_v2 = vpack.c.bf16 %v514_v63, %v468_v62  ;;  %v511_v5 = vld [vmem:[%s13675_s16 + $0x730] sm:$0xff]  ;;  %v558_v6 = vld [vmem:[%s13675_s16 + $0x8a8] sm:$0xff]  ;;  %v604_v7 = vld [vmem:[%s13675_s16 + $0xa18] sm:$0xff] }
  0x1f   : > { %10596 = vmatpush3.bf16.msra.mxu1 %v13174_v20  ;;  %v467_v8 = vld [vmem:[%s13675_s16 + $0x5d0] sm:$0xff]  ;;  %v513_v9 = vld [vmem:[%s13675_s16 + $0x740] sm:$0xff]  ;;  %v1845_v10 = vpack.c.bf16 %v511_v5, %v465_v3  ;;  %v13191_v11 = vld [vmem:[%s17572_s2 + $0x168] sm:$0xff]   ;;  %v1892_v12 = vpack.c.bf16 %v604_v7, %v558_v6 }
  0x20   : > { %10597 = vmatprep.subr.bf16.mxu1 %v13177_v23  ;;  %v560_v13 = vld [vmem:[%s13675_s16 + $0x8b8] sm:$0xff]  ;;  %v606_v14 = vld [vmem:[%s13675_s16 + $0xa28] sm:$0xff]  ;;  %v1847_v16 = vpack.c.bf16 %v513_v9, %v467_v8  ;;  %v557_v18 = vld [vmem:[%s13675_s16 + $0x8a0] sm:$0xff] }
  0x21   : > { %10486 = vmatpush3.bf16.msra.mxu0 %v13176_v22  ;;  %v13192_v15 = vld [vmem:[%s17572_s2 + $0x128] sm:$0xff]   ;;  %v1894_v17 = vpack.c.bf16 %v606_v14, %v560_v13  ;;  %v603_v19 = vld [vmem:[%s13675_s16 + $0xa10] sm:$0xff]  ;;  %v696_v22 = vld [vmem:[%s13675_s16 + $0xcf8] sm:$0xff] }
  0x22   : > { %10487 = vmatprep.subr.bf16.mxu0 %v13179_v25  ;;  %v559_v20 = vld [vmem:[%s13675_s16 + $0x8b0] sm:$0xff]  ;;  %v650_v21 = vld [vmem:[%s13675_s16 + $0xb88] sm:$0xff]  ;;  %v605_v23 = vld [vmem:[%s13675_s16 + $0xa20] sm:$0xff] }
  0x23   : > { %10598 = vmatpush3.bf16.msra.mxu1 %v13178_v24  ;;  %v1891_v24 = vpack.c.bf16 %v603_v19, %v557_v18  ;;  %v652_v25 = vld [vmem:[%s13675_s16 + $0xb98] sm:$0xff]  ;;  %v649_v32 = vld [vmem:[%s13675_s16 + $0xb80] sm:$0xff]  ;;  %v695_v33 = vld [vmem:[%s13675_s16 + $0xcf0] sm:$0xff] }
  0x24   : > { %10599 = vmatprep.subr.bf16.mxu1 %v13181_v27  ;;  %v13193_v27 = vld [vmem:[%s17572_s2 + $0x160] sm:$0xff]   ;;  %v742_v34 = vld [vmem:[%s13675_s16 + $0xe68] sm:$0xff]  ;;  %v651_v36 = vld [vmem:[%s13675_s16 + $0xb90] sm:$0xff] }
  0x25   : > { %10488 = vmatpush3.bf16.msra.mxu0 %v13180_v26  ;;  %v698_v26 = vld [vmem:[%s13675_s16 + $0xd08] sm:$0xff]  ;;  %v13195_v37 = vld [vmem:[%s17572_s2 + $0x158] sm:$0xff]   ;;  %v3215_v44 = vld [vmem:[%s13760_s25] sm:$0xff] }
  0x26   : > { %10489 = vmatprep.subr.bf16.mxu0 %v13183_v29  ;;  %v13194_v29 = vld [vmem:[%s17572_s2 + $0x120] sm:$0xff]   ;;  %v744_v41 = vld [vmem:[%s13675_s16 + $0xe78] sm:$0xff]  ;;  %v790_v42 = vld [vmem:[%s13675_s16 + $0xfe8] sm:$0xff] }
  0x27   : > { %10600 = vmatpush3.bf16.msra.mxu1 %v13182_v28  ;;  %v1938_v28 = vpack.c.bf16 %v696_v22, %v650_v21  ;;  %v3216_v45 = vld [vmem:[%s13760_s25 + $0x8] sm:$0xff]  ;;  %v1986_v48 = vpack.c.bf16 %v790_v42, %v744_v41  ;;  %v787_v49 = vld [vmem:[%s13675_s16 + $0xfd0] sm:$0xff]  ;;  %v789_v55 = vld [vmem:[%s13675_s16 + $0xfe0] sm:$0xff] }
  0x28   : > { %10601 = vmatprep.subr.bf16.mxu1 %v13185_v31  ;;  %v1940_v31 = vpack.c.bf16 %v698_v26, %v652_v25  ;;  %v3217_v50 = vld [vmem:[%s13760_s25 + $0x10] sm:$0xff]  ;;  %v834_v53 = vld [vmem:[%s13675_s16 + $0x1148] sm:$0xff]  ;;  %v13074_v56 = vpack.i.bf16 %v3216_v45, %v3215_v44  ;;  %v836_v58 = vld [vmem:[%s13675_s16 + $0x1158] sm:$0xff] }
  0x29   : > { %10490 = vmatpush3.bf16.msra.mxu0 %v13184_v30  ;;  %v1893_v30 = vpack.c.bf16 %v605_v23, %v559_v20  ;;  %v743_v52 = vld [vmem:[%s13675_s16 + $0xe70] sm:$0xff]  ;;  %v882_v59 = vld [vmem:[%s13675_s16 + $0x12c8] sm:$0xff]  ;;  %v833_v5 = vld [vmem:[%s13675_s16 + $0x1140] sm:$0xff] }
  0x2a   : > { %10699 = vmatprep.subr.bf16.mxu0 %v13187_v39  ;;  %v697_v39 = vld [vmem:[%s13675_s16 + $0xd00] sm:$0xff]  ;;  %13075 = vperm.xlu0 %13073, %v13074_v56   ;;  %v13198_v62 = vld [vmem:[%s17572_s2 + $0x110] sm:$0xff]   ;;  %v2032_v3 = vpack.c.bf16 %v882_v59, %v836_v58  ;;  %v926_v7 = vld [vmem:[%s13675_s16 + $0x1428] sm:$0xff] }
  0x2b   : > { %10602 = vmatpush3.bf16.msra.mxu1 %v13186_v35  ;;  %v788_v35 = vld [vmem:[%s13675_s16 + $0xfd8] sm:$0xff]  ;;  %v1939_v46 = vpack.c.bf16 %v697_v39, %v651_v36  ;;  %v879_v6 = vld [vmem:[%s13675_s16 + $0x12b0] sm:$0xff]  ;;  %v974_v18 = vld [vmem:[%s13675_s16 + $0x15a8] sm:$0xff] }
  0x2c   : > { %5753 = vmatmul.mubr.bf16.vlgmr.msra.gmra.mxu0 %v1753_v38  ;;  %v1937_v38 = vpack.c.bf16 %v695_v33, %v649_v32  ;;  %v1984_v40 = vpack.c.bf16 %v788_v35, %v742_v34  ;;  %v972_v8 = vld [vmem:[%s13675_s16 + $0x1598] sm:$0xff]  ;;  %v3221_v9 = vld [vmem:[%s13760_s25 + $0x30] sm:$0xff]  ;;  %v2029_v13 = vpack.c.bf16 %v879_v6, %v833_v5  ;;  %v13200_v19 = vld [vmem:[%s17572_s2 + $0x108] sm:$0xff]  }
  0x2d   : > { %10700 = vmatpush3.bf16.msra.mxu0 %v13188_v43  ;;  %5760 = vmatprep.mubr.bf16.mxu0 %v1800_v51  ;;  %v13196_v43 = vld [vmem:[%s17572_s2 + $0x118] sm:$0xff]   ;;  %v925_v21 = vld [vmem:[%s13675_s16 + $0x1420] sm:$0xff]  ;;  %v971_v22 = vld [vmem:[%s13675_s16 + $0x1590] sm:$0xff] }
  0x2e   : > { %5914 = vmatmul.mubr.bf16.vlgmr.msra.gmra.mxu1 %v1755_v47  ;;  %10701 = vmatprep.subr.bf16.mxu0 %v13189_v61  ;;  %v741_v47 = vld [vmem:[%s13675_s16 + $0xe60] sm:$0xff]  ;;  %v3218_v51 = vld [vmem:[%s13760_s25 + $0x18] sm:$0xff]  ;;  %v1018_v25 = vld [vmem:[%s13675_s16 + $0x1708] sm:$0xff]  ;;  %v2075_v32 = vpack.c.bf16 %v971_v22, %v925_v21 }
  0x2f   : > { %5921 = vmatprep.mubr.bf16.mxu1 %v1802_v54  ;;  %v880_v54 = vld [vmem:[%s13675_s16 + $0x12b8] sm:$0xff]  ;;  %v13079_v63 = vpack.i.bf16 %v3218_v51, %v3217_v50  ;;  %v927_v33 = vld [vmem:[%s13675_s16 + $0x1430] sm:$0xff]  ;;  %v973_v34 = vld [vmem:[%s13675_s16 + $0x15a0] sm:$0xff] }
  0x30   : > { %v2030_v61 = vpack.c.bf16 %v880_v54, %v834_v53  ;;  %v1064_v26 = vld [vmem:[%s13675_s16 + $0x1878] sm:$0xff]  ;;  %v1017_v41 = vld [vmem:[%s13675_s16 + $0x1700] sm:$0xff]  ;;  %v1063_v42 = vld [vmem:[%s13675_s16 + $0x1870] sm:$0xff] }
  0x31   : > { %10702 = vmatpush3.bf16.msra.mxu0 %v13190_v1  ;;  %v1985_v1 = vpack.c.bf16 %v789_v55, %v743_v52  ;;  %13080 = vperm.xlu0 %13073, %v13079_v63   ;;  %v2122_v35 = vpack.c.bf16 %v1064_v26, %v1018_v25  ;;  %v1020_v36 = vld [vmem:[%s13675_s16 + $0x1718] sm:$0xff]  ;;  %v13206_v45 = vld [vmem:[%s17572_s2 + $0x1a8] sm:$0xff]   ;;  %v13207_v51 = vld [vmem:[%s17572_s2 + $0x1e0] sm:$0xff]   ;;  %v2121_v53 = vpack.c.bf16 %v1063_v42, %v1017_v41 }
  0x32   : > { %10703 = vmatprep.subr.bf16.mxu0 %v13191_v11  ;;  %v835_v11 = vld [vmem:[%s13675_s16 + $0x1150] sm:$0xff]  ;;  %v1156_v50 = vld [vmem:[%s13675_s16 + $0x1b58] sm:$0xff]  ;;  %v1065_v52 = vld [vmem:[%s13675_s16 + $0x1880] sm:$0xff] }
  0x33   : > { %v1112_v54 = vld [vmem:[%s13675_s16 + $0x19f8] sm:$0xff]  ;;  %v1158_v55 = vld [vmem:[%s13675_s16 + $0x1b68] sm:$0xff]  ;;  %v13209_v58 = vld [vmem:[%s17572_s2 + $0x140] sm:$0xff]  }
  0x34   : > { %5761 = vmatmul.mubr.bf16.gmra.mxu0 %v1799_v57  ;;  %v1983_v57 = vpack.c.bf16 %v787_v49, %v741_v47  ;;  %v3226_v47 = vld [vmem:[%s13760_s25 + $0x58] sm:$0xff]  ;;  %v1110_v49 = vld [vmem:[%s13675_s16 + $0x19e8] sm:$0xff]  ;;  %v13210_v63 = vld [vmem:[%s17572_s2 + $0x100] sm:$0xff]  }
  0x35   : > { %5768 = vmatprep.mubr.bf16.mxu0 %v1846_v60  ;;  %10704 = vmatpush3.bf16.msra.mxu0 %v13192_v15  ;;  %v13197_v60 = vld [vmem:[%s17572_s2 + $0x150] sm:$0xff]   ;;  %v13199_v15 = vld [vmem:[%s17572_s2 + $0x148] sm:$0xff]   ;;  %v2168_v56 = vpack.c.bf16 %v1156_v50, %v1110_v49  ;;  %v13212_v5 = vld [vmem:[%s17572_s2 + $0x198] sm:$0xff]  }
  0x36   : > { %5922 = vmatmul.mubr.bf16.gmra.mxu1 %v1801_v0  ;;  %10705 = vmatprep.subr.bf16.mxu0 %v13193_v27  ;;  %v3219_v0 = vld [vmem:[%s13760_s25 + $0x20] sm:$0xff]  ;;  %v13201_v27 = vld [vmem:[%s17572_s2 + $0x1f8] sm:$0xff]   ;;  %v1294_v21 = vld [vmem:[%s13675_s16 + $0x1fa8] sm:$0xff] }
  0x37   : > { %5929 = vmatprep.mubr.bf16.mxu1 %v1848_v2  ;;  %v3220_v2 = vld [vmem:[%s13760_s25 + $0x28] sm:$0xff]  ;;  %10811 = vmatprep.subr.bf16.mxu1 %v13201_v27  ;;  %v3227_v6 = vld [vmem:[%s13760_s25 + $0x60] sm:$0xff]  ;;  %v3230_v25 = vld [vmem:[%s13760_s25 + $0x78] sm:$0xff] }
  0x38   : > { %v13085_v14 = vpack.i.bf16 %v3220_v2, %v3219_v0  ;;  %v2170_v0 = vpack.c.bf16 %v1158_v55, %v1112_v54  ;;  %v1248_v2 = vld [vmem:[%s13675_s16 + $0x1e38] sm:$0xff]  ;;  %v13215_v22 = vld [vmem:[%s17572_s2 + $0x1c8] sm:$0xff]   ;;  %v1203_v27 = vld [vmem:[%s13675_s16 + $0x1cd0] sm:$0xff] }
  0x39   : > { %10706 = vmatpush3.bf16.msra.mxu0 %v13194_v29  ;;  %v3223_v29 = vld [vmem:[%s13760_s25 + $0x40] sm:$0xff]  ;;  %v13216_v26 = vld [vmem:[%s17572_s2 + $0x188] sm:$0xff]   ;;  %v1339_v41 = vld [vmem:[%s13675_s16 + $0x2110] sm:$0xff] }
  0x3a   : > { %10707 = vmatprep.subr.bf16.mxu0 %v13195_v37  ;;  %13086 = vperm.xlu1 %13084, %v13085_v14   ;;  %v1066_v37 = vld [vmem:[%s13675_s16 + $0x1888] sm:$0xff]  ;;  %v3234_v49 = vld [vmem:[%s13760_s25 + $0x98] sm:$0xff]  ;;  %v1385_v55 = vld [vmem:[%s13675_s16 + $0x2280] sm:$0xff] }
  0x3b   : > { %v2124_v44 = vpack.c.bf16 %v1066_v37, %v1020_v36  ;;  %v1250_v14 = vld [vmem:[%s13675_s16 + $0x1e48] sm:$0xff]  ;;  %v13219_v36 = vld [vmem:[%s17572_s2 + $0x278] sm:$0xff]  }
  0x3c   : > { %5769 = vmatmul.mubr.bf16.gmra.mxu0 %v1845_v10  ;;  %v3222_v10 = vld [vmem:[%s13760_s25 + $0x38] sm:$0xff]  ;;  %v3232_v42 = vld [vmem:[%s13760_s25 + $0x88] sm:$0xff] }
  0x3d   : > { %5776 = vmatprep.mubr.bf16.mxu0 %v1892_v12  ;;  %10708 = vmatpush3.bf16.msra.mxu0 %v13196_v43  ;;  %v881_v12 = vld [vmem:[%s13675_s16 + $0x12c0] sm:$0xff]  ;;  %v13090_v23 = vpack.i.bf16 %v3222_v10, %v3221_v9  ;;  %v13205_v43 = vld [vmem:[%s17572_s2 + $0x1e8] sm:$0xff]   ;;  %v13213_v9 = vld [vmem:[%s17572_s2 + $0x1d0] sm:$0xff]  }
  0x3e   : > { %5930 = vmatmul.mubr.bf16.gmra.mxu1 %v1847_v16  ;;  %10709 = vmatprep.subr.bf16.mxu0 %v13197_v60  ;;  %v2076_v16 = vpack.c.bf16 %v972_v8, %v926_v7  ;;  %v2031_v20 = vpack.c.bf16 %v881_v12, %v835_v11  ;;  %v3228_v7 = vld [vmem:[%s13760_s25 + $0x68] sm:$0xff]  ;;  %v1111_v8 = vld [vmem:[%s13675_s16 + $0x19f0] sm:$0xff]  ;;  %v1157_v11 = vld [vmem:[%s13675_s16 + $0x1b60] sm:$0xff] }
  0x3f   : > { %5937 = vmatprep.mubr.bf16.mxu1 %v1894_v17  ;;  %v928_v17 = vld [vmem:[%s13675_s16 + $0x1438] sm:$0xff]  ;;  %13091 = vperm.xlu1 %13084, %v13090_v23  }
  0x40   : > { %v1340_v23 = vld [vmem:[%s13675_s16 + $0x2118] sm:$0xff] }
  0x41   : > { %10710 = vmatpush3.bf16.msra.mxu0 %v13198_v62  ;;  %v1155_v62 = vld [vmem:[%s13675_s16 + $0x1b50] sm:$0xff] }
  0x42   : > { %10711 = vmatprep.subr.bf16.mxu0 %v13199_v15  ;;  %v13214_v15 = vld [vmem:[%s17572_s2 + $0x190] sm:$0xff]  }
  0x44   : > { %5777 = vmatmul.mubr.bf16.gmra.mxu0 %v1891_v24  ;;  %v2078_v24 = vpack.c.bf16 %v974_v18, %v928_v17  ;;  %v1201_v17 = vld [vmem:[%s13675_s16 + $0x1cc0] sm:$0xff]  ;;  %v1247_v18 = vld [vmem:[%s13675_s16 + $0x1e30] sm:$0xff] }
  0x45   : > { %5784 = vmatprep.mubr.bf16.mxu0 %v1938_v28  ;;  %10712 = vmatpush3.bf16.msra.mxu0 %v13200_v19  ;;  %v13202_v28 = vld [vmem:[%s17572_s2 + $0x1b8] sm:$0xff]   ;;  %v13105_v19 = vpack.i.bf16 %v3228_v7, %v3227_v6  ;;  %v1526_v6 = vld [vmem:[%s13675_s16 + $0x26e8] sm:$0xff] }
  0x46   : > { %5938 = vmatmul.mubr.bf16.gmra.mxu1 %v1893_v30  ;;  %v3224_v30 = vld [vmem:[%s13760_s25 + $0x48] sm:$0xff]  ;;  %10713 = vmatprep.subr.bf16.mxu0 %v13209_v58  ;;  %v3238_v7 = vld [vmem:[%s13760_s25 + $0xb8] sm:$0xff] }
  0x47   : > { %5945 = vmatprep.mubr.bf16.mxu1 %v1940_v31  ;;  %v13203_v31 = vld [vmem:[%s17572_s2 + $0x1f0] sm:$0xff]   ;;  %10812 = vmatpush3.bf16.msra.mxu1 %v13202_v28  ;;  %v13095_v39 = vpack.i.bf16 %v3224_v30, %v3223_v29  ;;  %v13217_v28 = vld [vmem:[%s17572_s2 + $0x1c0] sm:$0xff]   ;;  %v2213_v29 = vpack.c.bf16 %v1247_v18, %v1201_v17  ;;  %v3240_v17 = vld [vmem:[%s13760_s25 + $0xc8] sm:$0xff] }
  0x48   : > { %10813 = vmatprep.subr.bf16.mxu1 %v13203_v31  ;;  %v1249_v30 = vld [vmem:[%s13675_s16 + $0x1e40] sm:$0xff]  ;;  %v1296_v31 = vld [vmem:[%s13675_s16 + $0x1fb8] sm:$0xff] }
  0x49   : > { %13096 = vperm.xlu0 %13073, %v13095_v39   ;;  %10714 = vmatpush3.bf16.msra.mxu0 %v13210_v63  ;;  %v2215_v37 = vpack.c.bf16 %v1249_v30, %v1203_v27  ;;  %v3231_v39 = vld [vmem:[%s13760_s25 + $0x80] sm:$0xff]  ;;  %v1615_v30 = vld [vmem:[%s13675_s16 + $0x29b0] sm:$0xff] }
  0x4a   : > { %10923 = vmatprep.subr.bf16.mxu0 %v13219_v36 }
  0x4c   : > { %5785 = vmatmul.mubr.bf16.gmra.mxu0 %v1937_v38  ;;  %v13204_v38 = vld [vmem:[%s17572_s2 + $0x1b0] sm:$0xff]  }
  0x4d   : > { %5792 = vmatprep.mubr.bf16.mxu0 %v1984_v40  ;;  %v2077_v40 = vpack.c.bf16 %v973_v34, %v927_v33  ;;  %10814 = vmatpush3.bf16.msra.mxu1 %v13204_v38  ;;  %v1342_v33 = vld [vmem:[%s13675_s16 + $0x2128] sm:$0xff] }
  0x4e   : > { %5946 = vmatmul.mubr.bf16.gmra.mxu1 %v1939_v46  ;;  %v3225_v46 = vld [vmem:[%s13760_s25 + $0x50] sm:$0xff]  ;;  %10815 = vmatprep.subr.bf16.mxu1 %v13205_v43  ;;  %v2262_v38 = vpack.c.bf16 %v1342_v33, %v1296_v31  ;;  %v1386_v43 = vld [vmem:[%s13675_s16 + $0x2288] sm:$0xff] }
  0x4f   : > { %5953 = vmatprep.mubr.bf16.mxu1 %v1986_v48  ;;  %v1019_v48 = vld [vmem:[%s13675_s16 + $0x1710] sm:$0xff]  ;;  %v13100_v59 = vpack.i.bf16 %v3226_v47, %v3225_v46  ;;  %13106 = vperm.xlu0 %13073, %v13105_v19   ;;  %v1341_v47 = vld [vmem:[%s13675_s16 + $0x2120] sm:$0xff]  ;;  %v1662_v31 = vld [vmem:[%s13675_s16 + $0x2b28] sm:$0xff] }
  0x50   : > { %v2123_v60 = vpack.c.bf16 %v1065_v52, %v1019_v48  ;;  %v3233_v48 = vld [vmem:[%s13760_s25 + $0x90] sm:$0xff]  ;;  %v1434_v52 = vld [vmem:[%s13675_s16 + $0x2408] sm:$0xff] }
  0x51   : > { %10816 = vmatpush3.bf16.msra.mxu1 %v13206_v45  ;;  %13101 = vperm.xlu1 %13084, %v13100_v59   ;;  %v1295_v45 = vld [vmem:[%s13675_s16 + $0x1fb0] sm:$0xff]  ;;  %v13120_v58 = vpack.i.bf16 %v3234_v49, %v3233_v48  ;;  %v3235_v59 = vld [vmem:[%s13760_s25 + $0xa0] sm:$0xff]  ;;  %v286_v49 = vld [vmem:[%s13675_s16 + $0x28] sm:$0xff] }
  0x52   : > { %10817 = vmatprep.subr.bf16.mxu1 %v13207_v51  ;;  %v1388_v51 = vld [vmem:[%s13675_s16 + $0x2298] sm:$0xff]  ;;  %v2261_v54 = vpack.c.bf16 %v1341_v47, %v1295_v45  ;;  %v1479_v19 = vld [vmem:[%s13675_s16 + $0x2570] sm:$0xff]  ;;  %v1661_v47 = vld [vmem:[%s13675_s16 + $0x2b20] sm:$0xff] }
  0x53   : > { %v1707_v48 = vld [vmem:[%s13675_s16 + $0x2c90] sm:$0xff] }
  0x54   : > { %5793 = vmatmul.mubr.bf16.gmra.mxu0 %v1983_v57  ;;  %v13208_v57 = vld [vmem:[%s17572_s2 + $0x1a0] sm:$0xff]  }
  0x55   : > { %5800 = vmatprep.mubr.bf16.mxu0 %v2030_v61  ;;  %v1109_v61 = vld [vmem:[%s13675_s16 + $0x19e0] sm:$0xff]  ;;  %10818 = vmatpush3.bf16.msra.mxu1 %v13208_v57  ;;  %v1431_v57 = vld [vmem:[%s13675_s16 + $0x23f0] sm:$0xff] }
  0x56   : > { %5954 = vmatmul.mubr.bf16.gmra.mxu1 %v1985_v1  ;;  %v1202_v1 = vld [vmem:[%s13675_s16 + $0x1cc8] sm:$0xff]  ;;  %v2167_v10 = vpack.c.bf16 %v1155_v62, %v1109_v61  ;;  %v1524_v62 = vld [vmem:[%s13675_s16 + $0x26d8] sm:$0xff]  ;;  %v2305_v63 = vpack.c.bf16 %v1431_v57, %v1385_v55 }
  0x57   : > { %5961 = vmatprep.mubr.bf16.mxu1 %v2032_v3  ;;  %v13211_v3 = vld [vmem:[%s17572_s2 + $0x1d8] sm:$0xff]   ;;  %v2214_v12 = vpack.c.bf16 %v1248_v2, %v1202_v1  ;;  %v1478_v61 = vld [vmem:[%s13675_s16 + $0x2568] sm:$0xff]  ;;  %v1433_v1 = vld [vmem:[%s13675_s16 + $0x2400] sm:$0xff] }
  0x58   : > { %10819 = vmatprep.subr.bf16.mxu1 %v13211_v3  ;;  %v3237_v2 = vld [vmem:[%s13760_s25 + $0xb0] sm:$0xff]  ;;  %v2352_v3 = vpack.c.bf16 %v1524_v62, %v1478_v61  ;;  %v334_v57 = vld [vmem:[%s13675_s16 + $0x1a8] sm:$0xff] }
  0x59   : > { %10820 = vmatpush3.bf16.msra.mxu1 %v13212_v5  ;;  %v1480_v5 = vld [vmem:[%s13675_s16 + $0x2578] sm:$0xff]  ;;  %v331_v61 = vld [vmem:[%s13675_s16 + $0x190] sm:$0xff]  ;;  %v378_v62 = vld [vmem:[%s13675_s16 + $0x308] sm:$0xff] }
  0x5a   : > { %10821 = vmatprep.subr.bf16.mxu1 %v13213_v9 }
  0x5c   : > { %5801 = vmatmul.mubr.bf16.gmra.mxu0 %v2029_v13  ;;  %v1204_v13 = vld [vmem:[%s13675_s16 + $0x1cd8] sm:$0xff] }
  0x5d   : > { %5808 = vmatprep.mubr.bf16.mxu0 %v2076_v16  ;;  %v2169_v16 = vpack.c.bf16 %v1157_v11, %v1111_v8  ;;  %10822 = vmatpush3.bf16.msra.mxu1 %v13214_v15  ;;  %v1477_v11 = vld [vmem:[%s13675_s16 + $0x2560] sm:$0xff]  ;;  %v13130_v15 = vpack.i.bf16 %v3238_v7, %v3237_v2  ;;  %v426_v7 = vld [vmem:[%s13675_s16 + $0x488] sm:$0xff] }
  0x5e   : > { %5962 = vmatmul.mubr.bf16.gmra.mxu1 %v2031_v20  ;;  %v2216_v20 = vpack.c.bf16 %v1250_v14, %v1204_v13  ;;  %10823 = vmatprep.subr.bf16.mxu1 %v13215_v22  ;;  %v1570_v13 = vld [vmem:[%s13675_s16 + $0x2848] sm:$0xff]  ;;  %v1616_v14 = vld [vmem:[%s13675_s16 + $0x29b8] sm:$0xff]  ;;  %v333_v2 = vld [vmem:[%s13675_s16 + $0x1a0] sm:$0xff] }
  0x5f   : > { %5969 = vmatprep.mubr.bf16.mxu1 %v2078_v24  ;;  %v3229_v24 = vld [vmem:[%s13760_s25 + $0x70] sm:$0xff]  ;;  %v2398_v22 = vpack.c.bf16 %v1616_v14, %v1570_v13  ;;  %v470_v13 = vld [vmem:[%s13675_s16 + $0x5e8] sm:$0xff]  ;;  %v516_v14 = vld [vmem:[%s13675_s16 + $0x758] sm:$0xff] }
  0x60   : > { %v13110_v34 = vpack.i.bf16 %v3230_v25, %v3229_v24  ;;  %v3241_v24 = vld [vmem:[%s13760_s25 + $0xd0] sm:$0xff]  ;;  %v3242_v25 = vld [vmem:[%s13760_s25 + $0xd8] sm:$0xff] }
  0x61   : > { %10824 = vmatpush3.bf16.msra.mxu1 %v13216_v26  ;;  %v13140_v33 = vpack.i.bf16 %v3242_v25, %v3241_v24  ;;  %v1850_v24 = vpack.c.bf16 %v516_v14, %v470_v13  ;;  %v13224_v25 = vld [vmem:[%s17572_s2 + $0x228] sm:$0xff]  }
  0x62   : > { %10825 = vmatprep.subr.bf16.mxu1 %v13217_v28  ;;  %13111 = vperm.xlu1 %13084, %v13110_v34   ;;  %v1569_v28 = vld [vmem:[%s13675_s16 + $0x2840] sm:$0xff]  ;;  %v13247_v13 = vld [vmem:[%s17572_s2 + $0x2c8] sm:$0xff]  }
  0x63   : > { %v3243_v34 = vld [vmem:[%s13760_s25 + $0xe0] sm:$0xff]  ;;  %v2397_v36 = vpack.c.bf16 %v1615_v30, %v1569_v28  ;;  %v13236_v28 = vld [vmem:[%s17572_s2 + $0x2b0] sm:$0xff]   ;;  %v13248_v14 = vld [vmem:[%s17572_s2 + $0x288] sm:$0xff]  }
  0x64   : > { %5809 = vmatmul.mubr.bf16.gmra.mxu0 %v2075_v32  ;;  %v2260_v32 = vpack.c.bf16 %v1340_v23, %v1294_v21  ;;  %v1572_v21 = vld [vmem:[%s13675_s16 + $0x2858] sm:$0xff]  ;;  %v1618_v23 = vld [vmem:[%s13675_s16 + $0x29c8] sm:$0xff]  ;;  %v469_v30 = vld [vmem:[%s13675_s16 + $0x5e0] sm:$0xff] }
  0x65   : > { %5816 = vmatprep.mubr.bf16.mxu0 %v2122_v35  ;;  %v13218_v35 = vld [vmem:[%s17572_s2 + $0x180] sm:$0xff]  }
  0x66   : > { %5970 = vmatmul.mubr.bf16.gmra.mxu1 %v2077_v40  ;;  %v1293_v40 = vld [vmem:[%s13675_s16 + $0x1fa0] sm:$0xff]  ;;  %13121 = vperm.xlu1 %13084, %v13120_v58  }
  0x67   : > { %5977 = vmatprep.mubr.bf16.mxu1 %v2124_v44  ;;  %v1432_v44 = vld [vmem:[%s13675_s16 + $0x23f8] sm:$0xff]  ;;  %10826 = vmatpush3.bf16.msra.mxu1 %v13218_v35  ;;  %v2259_v46 = vpack.c.bf16 %v1339_v41, %v1293_v40  ;;  %v3244_v35 = vld [vmem:[%s13760_s25 + $0xe8] sm:$0xff] }
  0x68   : > { %v2306_v50 = vpack.c.bf16 %v1432_v44, %v1386_v43  ;;  %v1664_v40 = vld [vmem:[%s13675_s16 + $0x2b38] sm:$0xff]  ;;  %v1710_v41 = vld [vmem:[%s13675_s16 + $0x2ca8] sm:$0xff] }
  0x69   : > { %v3246_v43 = vld [vmem:[%s13760_s25 + $0xf8] sm:$0xff]  ;;  %v2446_v45 = vpack.c.bf16 %v1710_v41, %v1664_v40  ;;  %v13238_v40 = vld [vmem:[%s17572_s2 + $0x2a8] sm:$0xff]   ;;  %v13239_v41 = vld [vmem:[%s17572_s2 + $0x2e0] sm:$0xff]  }
  0x6a   : > { %13131 = vperm.xlu1 %13084, %v13130_v15   ;;  %v13222_v15 = vld [vmem:[%s17572_s2 + $0x230] sm:$0xff]  }
  0x6c   : > { %5817 = vmatmul.mubr.bf16.gmra.mxu0 %v2121_v53  ;;  %v13115_v53 = vpack.i.bf16 %v3232_v42, %v3231_v39  ;;  %v3245_v42 = vld [vmem:[%s13760_s25 + $0xf0] sm:$0xff] }
  0x6d   : > { %5824 = vmatprep.mubr.bf16.mxu0 %v2168_v56  ;;  %v2308_v56 = vpack.c.bf16 %v1434_v52, %v1388_v51  ;;  %v13150_v51 = vpack.i.bf16 %v3246_v43, %v3245_v42  ;;  %v2443_v52 = vpack.c.bf16 %v1707_v48, %v1661_v47  ;;  %v564_v43 = vld [vmem:[%s13675_s16 + $0x8d8] sm:$0xff]  ;;  %v13229_v47 = vld [vmem:[%s17572_s2 + $0x250] sm:$0xff]   ;;  %v13240_v48 = vld [vmem:[%s17572_s2 + $0x2a0] sm:$0xff]  }
  0x6e   : > { %5978 = vmatmul.mubr.bf16.gmra.mxu1 %v2123_v60  ;;  %13116 = vperm.xlu0 %13073, %v13115_v53   ;;  %v3236_v60 = vld [vmem:[%s13760_s25 + $0xa8] sm:$0xff]  ;;  %v1663_v53 = vld [vmem:[%s13675_s16 + $0x2b30] sm:$0xff] }
  0x6f   : > { %5985 = vmatprep.mubr.bf16.mxu1 %v2170_v0  ;;  %v1387_v0 = vld [vmem:[%s13675_s16 + $0x2290] sm:$0xff]  ;;  %v13125_v8 = vpack.i.bf16 %v3236_v60, %v3235_v59  ;;  %13141 = vperm.xlu1 %13084, %v13140_v33   ;;  %v285_v59 = vld [vmem:[%s13675_s16 + $0x20] sm:$0xff]  ;;  %v562_v33 = vld [vmem:[%s13675_s16 + $0x8c8] sm:$0xff] }
  0x70   : > { %v2307_v9 = vpack.c.bf16 %v1433_v1, %v1387_v0  ;;  %v1757_v0 = vpack.c.bf16 %v331_v61, %v285_v59  ;;  %v287_v1 = vld [vmem:[%s13675_s16 + $0x30] sm:$0xff]  ;;  %v13243_v59 = vld [vmem:[%s17572_s2 + $0x2d8] sm:$0xff]  }
  0x71   : > { %v13244_v61 = vld [vmem:[%s17572_s2 + $0x298] sm:$0xff]  }
  0x72   : > { %13126 = vperm.xlu0 %13073, %v13125_v8   ;;  %v13221_v8 = vld [vmem:[%s17572_s2 + $0x270] sm:$0xff]  }
  0x73   : > { %13151 = vperm.xlu1 %13084, %v13150_v51   ;;  %v607_v51 = vld [vmem:[%s13675_s16 + $0xa30] sm:$0xff] }
  0x74   : > { %5825 = vmatmul.mubr.bf16.gmra.mxu0 %v2167_v10  ;;  %v2354_v10 = vpack.c.bf16 %v1526_v6, %v1480_v5  ;;  %v380_v6 = vld [vmem:[%s13675_s16 + $0x318] sm:$0xff] }
  0x75   : > { %5832 = vmatprep.mubr.bf16.mxu0 %v2214_v12  ;;  %v1523_v12 = vld [vmem:[%s13675_s16 + $0x26d0] sm:$0xff] }
  0x76   : > { %5986 = vmatmul.mubr.bf16.gmra.mxu1 %v2169_v16  ;;  %v3239_v16 = vld [vmem:[%s13760_s25 + $0xc0] sm:$0xff]  ;;  %v2351_v18 = vpack.c.bf16 %v1523_v12, %v1477_v11  ;;  %v423_v11 = vld [vmem:[%s13675_s16 + $0x470] sm:$0xff]  ;;  %v1806_v12 = vpack.c.bf16 %v426_v7, %v380_v6 }
  0x77   : > { %5993 = vmatprep.mubr.bf16.mxu1 %v2216_v20  ;;  %v1525_v20 = vld [vmem:[%s13675_s16 + $0x26e0] sm:$0xff]  ;;  %v13135_v27 = vpack.i.bf16 %v3240_v17, %v3239_v16  ;;  %v379_v16 = vld [vmem:[%s13675_s16 + $0x310] sm:$0xff] }
  0x78   : > { %v2353_v26 = vpack.c.bf16 %v1525_v20, %v1479_v19  ;;  %v425_v17 = vld [vmem:[%s13675_s16 + $0x480] sm:$0xff]  ;;  %v472_v19 = vld [vmem:[%s13675_s16 + $0x5f8] sm:$0xff]  ;;  %v518_v20 = vld [vmem:[%s13675_s16 + $0x768] sm:$0xff] }
  0x79   : > { %13136 = vperm.xlu0 %13073, %v13135_v27   ;;  %v13235_v27 = vld [vmem:[%s17572_s2 + $0x2f0] sm:$0xff]   ;;  %v653_v7 = vld [vmem:[%s13675_s16 + $0xba0] sm:$0xff] }
  0x7c   : > { %5833 = vmatmul.mubr.bf16.gmra.mxu0 %v2213_v29  ;;  %v2400_v29 = vpack.c.bf16 %v1618_v23, %v1572_v21  ;;  %v13233_v21 = vld [vmem:[%s17572_s2 + $0x2f8] sm:$0xff]  }
  0x7d   : > { %5840 = vmatprep.mubr.bf16.mxu0 %v2260_v32  ;;  %v1708_v32 = vld [vmem:[%s13675_s16 + $0x2c98] sm:$0xff]  ;;  %11035 = vmatprep.subr.bf16.mxu1 %v13233_v21  ;;  %v794_v21 = vld [vmem:[%s13675_s16 + $0x1008] sm:$0xff] }
  0x7e   : > { %5994 = vmatmul.mubr.bf16.gmra.mxu1 %v2215_v37  ;;  %v1571_v37 = vld [vmem:[%s13675_s16 + $0x2850] sm:$0xff]  ;;  %v2444_v39 = vpack.c.bf16 %v1708_v32, %v1662_v31  ;;  %v13234_v23 = vld [vmem:[%s17572_s2 + $0x2b8] sm:$0xff]   ;;  %v1852_v32 = vpack.c.bf16 %v518_v20, %v472_v19 }
  0x7f   : > { %6001 = vmatprep.mubr.bf16.mxu1 %v2262_v38  ;;  %v1617_v38 = vld [vmem:[%s13675_s16 + $0x29c0] sm:$0xff]  ;;  %v515_v31 = vld [vmem:[%s13675_s16 + $0x750] sm:$0xff]  ;;  %v748_v20 = vld [vmem:[%s13675_s16 + $0xe98] sm:$0xff] }
  0x80   : > { %v2399_v44 = vpack.c.bf16 %v1617_v38, %v1571_v37  ;;  %v13237_v37 = vld [vmem:[%s17572_s2 + $0x2e8] sm:$0xff]   ;;  %v471_v38 = vld [vmem:[%s13675_s16 + $0x5f0] sm:$0xff]  ;;  %v1849_v42 = vpack.c.bf16 %v515_v31, %v469_v30 }
  0x81   : > { %v747_v31 = vld [vmem:[%s13675_s16 + $0xe90] sm:$0xff] }
  0x84   : > { %5841 = vmatmul.mubr.bf16.gmra.mxu0 %v2259_v46  ;;  %v13145_v46 = vpack.i.bf16 %v3244_v35, %v3243_v34  ;;  %v608_v34 = vld [vmem:[%s13675_s16 + $0xa38] sm:$0xff]  ;;  %v13226_v35 = vld [vmem:[%s17572_s2 + $0x220] sm:$0xff]  }
  0x85   : > { %5848 = vmatprep.mubr.bf16.mxu0 %v2306_v50  ;;  %v332_v50 = vld [vmem:[%s13675_s16 + $0x198] sm:$0xff] }
  0x86   : > { %6002 = vmatmul.mubr.bf16.gmra.mxu1 %v2261_v54  ;;  %13146 = vperm.xlu0 %13073, %v13145_v46   ;;  %v1709_v54 = vld [vmem:[%s13675_s16 + $0x2ca0] sm:$0xff]  ;;  %v1758_v55 = vpack.c.bf16 %v332_v50, %v286_v49  ;;  %v13228_v46 = vld [vmem:[%s17572_s2 + $0x218] sm:$0xff]  }
  0x87   : > { %6009 = vmatprep.mubr.bf16.mxu1 %v2308_v56  ;;  %v288_v56 = vld [vmem:[%s13675_s16 + $0x38] sm:$0xff]  ;;  %v2445_v58 = vpack.c.bf16 %v1709_v54, %v1663_v53  ;;  %v561_v50 = vld [vmem:[%s13675_s16 + $0x8c0] sm:$0xff]  ;;  %v654_v53 = vld [vmem:[%s13675_s16 + $0xba8] sm:$0xff] }
  0x88   : > { %v1760_v60 = vpack.c.bf16 %v334_v57, %v288_v56  ;;  %v700_v54 = vld [vmem:[%s13675_s16 + $0xd18] sm:$0xff]  ;;  %v13231_v56 = vld [vmem:[%s17572_s2 + $0x248] sm:$0xff]   ;;  %v563_v57 = vld [vmem:[%s13675_s16 + $0x8d0] sm:$0xff] }
  0x8c   : > { %5849 = vmatmul.mubr.bf16.gmra.mxu0 %v2305_v63  ;;  %v424_v63 = vld [vmem:[%s13675_s16 + $0x478] sm:$0xff] }
  0x8d   : > { %5856 = vmatprep.mubr.bf16.mxu0 %v2352_v3  ;;  %v13220_v3 = vld [vmem:[%s17572_s2 + $0x238] sm:$0xff]   ;;  %v1804_v5 = vpack.c.bf16 %v424_v63, %v378_v62  ;;  %v1895_v62 = vpack.c.bf16 %v607_v51, %v561_v50  ;;  %v702_v63 = vld [vmem:[%s13675_s16 + $0xd28] sm:$0xff]  ;;  %v929_v50 = vld [vmem:[%s13675_s16 + $0x1440] sm:$0xff] }
  0x8e   : > { %6010 = vmatmul.mubr.bf16.gmra.mxu1 %v2307_v9  ;;  %v1759_v9 = vpack.c.bf16 %v333_v2, %v287_v1  ;;  %v1942_v1 = vpack.c.bf16 %v700_v54, %v654_v53  ;;  %v13232_v2 = vld [vmem:[%s17572_s2 + $0x208] sm:$0xff]   ;;  %v975_v51 = vld [vmem:[%s13675_s16 + $0x15b0] sm:$0xff]  ;;  %v1068_v54 = vld [vmem:[%s13675_s16 + $0x1898] sm:$0xff] }
  0x8f   : > { %6017 = vmatprep.mubr.bf16.mxu1 %v2354_v10  ;;  %v377_v10 = vld [vmem:[%s13675_s16 + $0x300] sm:$0xff]  ;;  %v1022_v53 = vld [vmem:[%s13675_s16 + $0x1728] sm:$0xff] }
  0x94   : > { %5857 = vmatmul.mubr.bf16.gmra.mxu0 %v2351_v18  ;;  %v13223_v18 = vld [vmem:[%s17572_s2 + $0x268] sm:$0xff]  }
  0x95   : > { %5864 = vmatprep.mubr.bf16.mxu0 %v2398_v22  ;;  %v1803_v22 = vpack.c.bf16 %v423_v11, %v377_v10  ;;  %v746_v10 = vld [vmem:[%s13675_s16 + $0xe88] sm:$0xff]  ;;  %v792_v11 = vld [vmem:[%s13675_s16 + $0xff8] sm:$0xff] }
  0x96   : > { %6018 = vmatmul.mubr.bf16.gmra.mxu1 %v2353_v26  ;;  %v13225_v26 = vld [vmem:[%s17572_s2 + $0x260] sm:$0xff]   ;;  %v1988_v19 = vpack.c.bf16 %v792_v11, %v746_v10 }
  0x97   : > { %6025 = vmatprep.mubr.bf16.mxu1 %v2400_v29  ;;  %v1805_v29 = vpack.c.bf16 %v425_v17, %v379_v16  ;;  %v13249_v16 = vld [vmem:[%s17572_s2 + $0x2c0] sm:$0xff]  }
  0x98   : > { %v1069_v10 = vld [vmem:[%s13675_s16 + $0x18a0] sm:$0xff] }
  0x9c   : > { %5865 = vmatmul.mubr.bf16.gmra.mxu0 %v2397_v36  ;;  %v13227_v36 = vld [vmem:[%s17572_s2 + $0x258] sm:$0xff]  }
  0x9d   : > { %5872 = vmatprep.mubr.bf16.mxu0 %v2444_v39  ;;  %v517_v39 = vld [vmem:[%s13675_s16 + $0x760] sm:$0xff] }
  0x9e   : > { %6026 = vmatmul.mubr.bf16.gmra.mxu1 %v2399_v44  ;;  %v610_v44 = vld [vmem:[%s13675_s16 + $0xa48] sm:$0xff]  ;;  %v1851_v49 = vpack.c.bf16 %v517_v39, %v471_v38  ;;  %v837_v38 = vld [vmem:[%s13675_s16 + $0x1160] sm:$0xff]  ;;  %v883_v39 = vld [vmem:[%s13675_s16 + $0x12d0] sm:$0xff] }
  0x9f   : > { %6033 = vmatprep.mubr.bf16.mxu1 %v2446_v45  ;;  %v1896_v45 = vpack.c.bf16 %v608_v34, %v562_v33  ;;  %v840_v33 = vld [vmem:[%s13675_s16 + $0x1178] sm:$0xff] }
  0xa4   : > { %5873 = vmatmul.mubr.bf16.gmra.mxu0 %v2443_v52  ;;  %v1898_v52 = vpack.c.bf16 %v610_v44, %v564_v43  ;;  %v2033_v43 = vpack.c.bf16 %v883_v39, %v837_v38  ;;  %v885_v44 = vld [vmem:[%s13675_s16 + $0x12e0] sm:$0xff]  ;;  %v1208_v39 = vld [vmem:[%s13675_s16 + $0x1cf8] sm:$0xff] }
  0xa5   : > { %6074 = vmatprep.mubr.bf16.mxu0 %v1758_v55  ;;  %v13230_v55 = vld [vmem:[%s17572_s2 + $0x210] sm:$0xff]  }
  0xa6   : > { %6034 = vmatmul.mubr.bf16.gmra.mxu1 %v2445_v58  ;;  %v609_v58 = vld [vmem:[%s13675_s16 + $0xa40] sm:$0xff] }
  0xa7   : > { %6235 = vmatprep.mubr.bf16.mxu1 %v1760_v60  ;;  %v656_v60 = vld [vmem:[%s13675_s16 + $0xbb8] sm:$0xff]  ;;  %v1897_v6 = vpack.c.bf16 %v609_v58, %v563_v57  ;;  %v977_v57 = vld [vmem:[%s13675_s16 + $0x15c0] sm:$0xff] }
  0xa8   : > { %v1024_v58 = vld [vmem:[%s13675_s16 + $0x1738] sm:$0xff] }
  0xac   : > { %6075 = vmatmul.mubr.bf16.vlgmr.msra.gmra.mxu0 %v1757_v0  ;;  %v13245_v0 = vld [vmem:[%s17572_s2 + $0x2d0] sm:$0xff]  }
  0xad   : > { %10924 = vmatpush3.bf16.msra.mxu0 %v13220_v3  ;;  %6082 = vmatprep.mubr.bf16.mxu0 %v1804_v5  ;;  %v13241_v3 = vld [vmem:[%s17572_s2 + $0x240] sm:$0xff]   ;;  %v13246_v5 = vld [vmem:[%s17572_s2 + $0x290] sm:$0xff]  }
  0xae   : > { %10925 = vmatprep.subr.bf16.mxu0 %v13221_v8  ;;  %6236 = vmatmul.mubr.bf16.vlgmr.msra.gmra.mxu1 %v1759_v9  ;;  %v699_v8 = vld [vmem:[%s13675_s16 + $0xd10] sm:$0xff]  ;;  %v1944_v9 = vpack.c.bf16 %v702_v63, %v656_v60 }
  0xaf   : > { %6243 = vmatprep.mubr.bf16.mxu1 %v1806_v12  ;;  %11036 = vmatpush3.bf16.msra.mxu1 %v13234_v23  ;;  %v13242_v12 = vld [vmem:[%s17572_s2 + $0x200] sm:$0xff]   ;;  %v1941_v17 = vpack.c.bf16 %v699_v8, %v653_v7  ;;  %v13251_v23 = vld [vmem:[%s17572_s2 + $0x378] sm:$0xff]   ;;  %v13076_v8 = vpop.permute.xlu0 %13075 }
  0xb0   : > { %11037 = vmatprep.subr.bf16.mxu1 %v13235_v27  ;;  %v791_v27 = vld [vmem:[%s13675_s16 + $0xff0] sm:$0xff]  ;;  %v1160_v7 = vld [vmem:[%s13675_s16 + $0x1b78] sm:$0xff] }
  0xb1   : > { %10926 = vmatpush3.bf16.msra.mxu0 %v13222_v15  ;;  %v655_v15 = vld [vmem:[%s13675_s16 + $0xbb0] sm:$0xff] }
  0xb2   : > { %10927 = vmatprep.subr.bf16.mxu0 %v13223_v18  ;;  %v701_v18 = vld [vmem:[%s13675_s16 + $0xd20] sm:$0xff] }
  0xb3   : > { %11038 = vmatpush3.bf16.msra.mxu1 %v13236_v28  ;;  %v838_v28 = vld [vmem:[%s13675_s16 + $0x1168] sm:$0xff] }
  0xb4   : > { %6083 = vmatmul.mubr.bf16.gmra.mxu0 %v1803_v22  ;;  %11039 = vmatprep.subr.bf16.mxu1 %v13237_v37  ;;  %v13250_v22 = vld [vmem:[%s17572_s2 + $0x280] sm:$0xff]  }
  0xb5   : > { %6090 = vmatprep.mubr.bf16.mxu0 %v1850_v24  ;;  %10928 = vmatpush3.bf16.msra.mxu0 %v13224_v25  ;;  %v1943_v24 = vpack.c.bf16 %v701_v18, %v655_v15  ;;  %v1990_v25 = vpack.c.bf16 %v794_v21, %v748_v20  ;;  %v1116_v15 = vld [vmem:[%s13675_s16 + $0x1a18] sm:$0xff]  ;;  %v1113_v18 = vld [vmem:[%s13675_s16 + $0x1a00] sm:$0xff] }
  0xb6   : > { %10929 = vmatprep.subr.bf16.mxu0 %v13225_v26  ;;  %6244 = vmatmul.mubr.bf16.gmra.mxu1 %v1805_v29  ;;  %v745_v26 = vld [vmem:[%s13675_s16 + $0xe80] sm:$0xff]  ;;  %v884_v29 = vld [vmem:[%s13675_s16 + $0x12d8] sm:$0xff] }
  0xb7   : > { %6251 = vmatprep.mubr.bf16.mxu1 %v1852_v32  ;;  %11040 = vmatpush3.bf16.msra.mxu1 %v13238_v40  ;;  %v1987_v30 = vpack.c.bf16 %v791_v27, %v745_v26  ;;  %v793_v32 = vld [vmem:[%s13675_s16 + $0x1000] sm:$0xff]  ;;  %v2034_v34 = vpack.c.bf16 %v884_v29, %v838_v28  ;;  %v930_v40 = vld [vmem:[%s13675_s16 + $0x1448] sm:$0xff]  ;;  %v13081_v27 = vpop.permute.xlu0 %13080 }
  0xb8   : > { %11041 = vmatprep.subr.bf16.mxu1 %v13239_v41  ;;  %v976_v41 = vld [vmem:[%s13675_s16 + $0x15b8] sm:$0xff] }
  0xb9   : > { %10930 = vmatpush3.bf16.msra.mxu0 %v13226_v35  ;;  %v886_v35 = vld [vmem:[%s13675_s16 + $0x12e8] sm:$0xff] }
  0xba   : > { %10931 = vmatprep.subr.bf16.mxu0 %v13227_v36  ;;  %v1989_v36 = vpack.c.bf16 %v793_v32, %v747_v31  ;;  %v2036_v37 = vpack.c.bf16 %v886_v35, %v840_v33  ;;  %v1115_v32 = vld [vmem:[%s13675_s16 + $0x1a10] sm:$0xff]  ;;  %v1161_v33 = vld [vmem:[%s13675_s16 + $0x1b80] sm:$0xff] }
  0xbb   : > { %11042 = vmatpush3.bf16.msra.mxu1 %v13240_v48 }
  0xbc   : > { %6091 = vmatmul.mubr.bf16.gmra.mxu0 %v1849_v42  ;;  %11043 = vmatprep.subr.bf16.mxu1 %v13243_v59  ;;  %v839_v42 = vld [vmem:[%s13675_s16 + $0x1170] sm:$0xff]  ;;  %v2126_v59 = vpack.c.bf16 %v1068_v54, %v1022_v53  ;;  %v13083_v54 = vunpack.i.h.bf16 %v13081_v27 }
  0xbd   : > { %6098 = vmatprep.mubr.bf16.mxu0 %v1896_v45  ;;  %10932 = vmatpush3.bf16.msra.mxu0 %v13228_v46  ;;  %v2080_v45 = vpack.c.bf16 %v976_v41, %v930_v40  ;;  %v932_v46 = vld [vmem:[%s13675_s16 + $0x1458] sm:$0xff]  ;;  %v2035_v48 = vpack.c.bf16 %v885_v44, %v839_v42  ;;  %v1254_v40 = vld [vmem:[%s13675_s16 + $0x1e68] sm:$0xff] }
  0xbe   : > { %10933 = vmatprep.subr.bf16.mxu0 %v13229_v47  ;;  %6252 = vmatmul.mubr.bf16.gmra.mxu1 %v1851_v49  ;;  %v978_v47 = vld [vmem:[%s13675_s16 + $0x15c8] sm:$0xff] }
  0xbf   : > { %6259 = vmatprep.mubr.bf16.mxu1 %v1898_v52  ;;  %11044 = vmatpush3.bf16.msra.mxu1 %v13244_v61  ;;  %v2082_v49 = vpack.c.bf16 %v978_v47, %v932_v46  ;;  %v3457_v52 = vlaneseq  ;;  %v1070_v61 = vld [vmem:[%s13675_s16 + $0x18a8] sm:$0xff]  ;;  %v1205_v46 = vld [vmem:[%s13675_s16 + $0x1ce0] sm:$0xff]  ;;  %v1251_v47 = vld [vmem:[%s13675_s16 + $0x1e50] sm:$0xff] }
  0xc0   : > { %11045 = vmatprep.subr.bf16.mxu1 %v13245_v0  ;;  %v1021_v0 = vld [vmem:[%s13675_s16 + $0x1720] sm:$0xff] }
  0xc1   : > { %10934 = vmatpush3.bf16.msra.mxu0 %v13230_v55  ;;  %v931_v55 = vld [vmem:[%s13675_s16 + $0x1450] sm:$0xff]  ;;  %v3458_v60 = vshrl.u32 %v3457_v52, 7  ;;  %v1344_v52 = vld [vmem:[%s13675_s16 + $0x2138] sm:$0xff] }
  0xc2   : > { %10935 = vmatprep.subr.bf16.mxu0 %v13231_v56  ;;  %v2079_v56 = vpack.c.bf16 %v975_v51, %v929_v50  ;;  %v2081_v63 = vpack.c.bf16 %v977_v57, %v931_v55  ;;  %v2220_v50 = vpack.c.bf16 %v1254_v40, %v1208_v39  ;;  %v1298_v51 = vld [vmem:[%s13675_s16 + $0x1fc8] sm:$0xff] }
  0xc3   : > { %11046 = vmatpush3.bf16.msra.mxu1 %v13246_v5  ;;  %v3459_v5 = vsub.s32 0, %v3458_v60  ;;  %v1207_v60 = vld [vmem:[%s13675_s16 + $0x1cf0] sm:$0xff] }
  0xc4   : > { %6099 = vmatmul.mubr.bf16.gmra.mxu0 %v1895_v62  ;;  %11047 = vmatprep.subr.bf16.mxu1 %v13247_v13  ;;  %v3295_v62 = vld [vmem:[%s17573_s3] sm:$0x1]  ;;  %v13077_v13 = vunpack.i.l.bf16 %v13076_v8 }
  0xc5   : > { %6106 = vmatprep.mubr.bf16.mxu0 %v1942_v1  ;;  %10936 = vmatpush3.bf16.msra.mxu0 %v13232_v2  ;;  %v1067_v1 = vld [vmem:[%s13675_s16 + $0x1890] sm:$0xff]  ;;  %v2128_v2 = vpack.c.bf16 %v1070_v61, %v1024_v58  ;;  %v1253_v61 = vld [vmem:[%s13675_s16 + $0x1e60] sm:$0xff] }
  0xc6   : > { %10937 = vmatprep.subr.bf16.mxu0 %v13241_v3  ;;  %6260 = vmatmul.mubr.bf16.gmra.mxu1 %v1897_v6  ;;  %v3296_v3 = vunpack.c.l.bf16 %v3295_v62  ;;  %v1114_v6 = vld [vmem:[%s13675_s16 + $0x1a08] sm:$0xff]  ;;  %v2125_v11 = vpack.c.bf16 %v1067_v1, %v1021_v0 }
  0xc7   : > { %6267 = vmatprep.mubr.bf16.mxu1 %v1944_v9  ;;  %11048 = vmatpush3.bf16.msra.mxu1 %v13248_v14  ;;  %v1023_v9 = vld [vmem:[%s13675_s16 + $0x1730] sm:$0xff]  ;;  %v2172_v14 = vpack.c.bf16 %v1160_v7, %v1114_v6 }
  0xc8   : > { %11049 = vmatprep.subr.bf16.mxu1 %v13249_v16  ;;  %v1162_v16 = vld [vmem:[%s13675_s16 + $0x1b88] sm:$0xff] }
  0xc9   : > { %10938 = vmatpush3.bf16.msra.mxu0 %v13242_v12  ;;  %v14126_v12 = vrot.slane %v3296_v3, %v3459_v5  ;;  %v2174_v21 = vpack.c.bf16 %v1162_v16, %v1116_v15  ;;  %v2219_v16 = vpack.c.bf16 %v1253_v61, %v1207_v60 }
  0xca   : > { %11147 = vmatprep.subr.bf16.mxu0 %v13251_v23  ;;  %v1252_v23 = vld [vmem:[%s13675_s16 + $0x1e58] sm:$0xff] }
  0xcb   : > { %11050 = vmatpush3.bf16.msra.mxu1 %v13250_v22  ;;  %v1206_v22 = vld [vmem:[%s13675_s16 + $0x1ce8] sm:$0xff]  ;;  %v3464_v3 = vmul.f32 %v13083_v54, %v14126_v12 }
  0xcc   : > { %6107 = vmatmul.mubr.bf16.gmra.mxu0 %v1941_v17  ;;  %v2127_v17 = vpack.c.bf16 %v1069_v10, %v1023_v9  ;;  %v2218_v38 = vpack.c.bf16 %v1252_v23, %v1206_v22  ;;  %v1300_v9 = vld [vmem:[%s13675_s16 + $0x1fd8] sm:$0xff]  ;;  %v1346_v10 = vld [vmem:[%s13675_s16 + $0x2148] sm:$0xff] }
  0xcd   : > { %6114 = vmatprep.mubr.bf16.mxu0 %v1988_v19  ;;  %v1159_v19 = vld [vmem:[%s13675_s16 + $0x1b70] sm:$0xff]  ;;  %v1390_v22 = vld [vmem:[%s13675_s16 + $0x22a8] sm:$0xff]  ;;  %v1436_v23 = vld [vmem:[%s13675_s16 + $0x2418] sm:$0xff] }
  0xce   : > { %6268 = vmatmul.mubr.bf16.gmra.mxu1 %v1943_v24  ;;  %v13078_v24 = vunpack.i.h.bf16 %v13076_v8  ;;  %v2171_v31 = vpack.c.bf16 %v1159_v19, %v1113_v18  ;;  %v2264_v8 = vpack.c.bf16 %v1344_v52, %v1298_v51  ;;  %v1343_v18 = vld [vmem:[%s13675_s16 + $0x2130] sm:$0xff]  ;;  %v1389_v51 = vld [vmem:[%s13675_s16 + $0x22a0] sm:$0xff] }
  0xcf   : > { %6275 = vmatprep.mubr.bf16.mxu1 %v1990_v25  ;;  %v3461_v25 = vmul.f32 %v13077_v13, %v14126_v12  ;;  %v1435_v52 = vld [vmem:[%s13675_s16 + $0x2410] sm:$0xff] }
  0xd4   : > { %6115 = vmatmul.mubr.bf16.gmra.mxu0 %v1987_v30 }
  0xd5   : > { %6122 = vmatprep.mubr.bf16.mxu0 %v2034_v34  ;;  %v3462_v34 = vmul.f32 %v13078_v24, %v14126_v12 }
  0xd6   : > { %6276 = vmatmul.mubr.bf16.gmra.mxu1 %v1989_v36 }
  0xd7   : > { %6283 = vmatprep.mubr.bf16.mxu1 %v2036_v37  ;;  %v13082_v37 = vunpack.i.l.bf16 %v13081_v27 }
  0xd9   : > { %v3463_v55 = vmul.f32 %v13082_v37, %v14126_v12  ;;  %v1345_v37 = vld [vmem:[%s13675_s16 + $0x2140] sm:$0xff] }
  0xdc   : > { %6123 = vmatmul.mubr.bf16.gmra.mxu0 %v2033_v43 }
  0xdd   : > { %6130 = vmatprep.mubr.bf16.mxu0 %v2080_v45  ;;  %v2173_v45 = vpack.c.bf16 %v1161_v33, %v1115_v32 }
  0xde   : > { %6284 = vmatmul.mubr.bf16.gmra.mxu1 %v2035_v48 }
  0xdf   : > { %6291 = vmatprep.mubr.bf16.mxu1 %v2082_v49 }
  0xe4   : > { %6131 = vmatmul.mubr.bf16.gmra.mxu0 %v2079_v56 }
  0xe5   : > { %6138 = vmatprep.mubr.bf16.mxu0 %v2126_v59  ;;  %v13087_v59 = vpop.permute.xlu1 %13086 }
  0xe6   : > { %6292 = vmatmul.mubr.bf16.gmra.mxu1 %v2081_v63  ;;  %v13088_v7 = vunpack.i.l.bf16 %v13087_v59 }
  0xe7   : > { %6299 = vmatprep.mubr.bf16.mxu1 %v2128_v2  ;;  %v2217_v2 = vpack.c.bf16 %v1251_v47, %v1205_v46 }
  0xec   : > { %v10491_v20 = vpop.f32.mrf.mxu0  ;;  %6139 = vmatmul.mubr.bf16.gmra.mxu0 %v2125_v11 }
  0xed   : > { %6146 = vmatprep.mubr.bf16.mxu0 %v2172_v14 }
  0xee   : > { %v10492_v26 = vpop.f32.mrf.mxu0  ;;  %v10603_v29 = vpop.f32.mrf.mxu1  ;;  %6300 = vmatmul.mubr.bf16.gmra.mxu1 %v2127_v17  ;;  %v1297_v17 = vld [vmem:[%s13675_s16 + $0x1fc0] sm:$0xff] }
  0xef   : > { %v10493_v28 = vadd.f32 %v10492_v26, %v10491_v20  ;;  %6307 = vmatprep.mubr.bf16.mxu1 %v2174_v21  ;;  %v2266_v21 = vpack.c.bf16 %v1346_v10, %v1300_v9  ;;  %v3465_v26 = vmul.f32 %v13088_v7, %v14126_v12  ;;  %v2309_v9 = vpack.c.bf16 %v1435_v52, %v1389_v51 }
  0xf0   : > { %v10494_v30 = vpop.f32.mrf.mxu0  ;;  %v10604_v36 = vpop.f32.mrf.mxu1 }
  0xf1   : > { %v5755_v35 = vadd.f32 %v10493_v28, %v3461_v25  ;;  %v10605_v41 = vadd.f32 %v10604_v36, %v10603_v29  ;;  %v13089_v25 = vunpack.i.h.bf16 %v13087_v59  ;;  %v1299_v36 = vld [vmem:[%s13675_s16 + $0x1fd0] sm:$0xff] }
  0xf2   : > { %v10495_v42 = vpop.f32.mrf.mxu0  ;;  %v10606_v44 = vpop.f32.mrf.mxu1 }
  0xf3   : > { %v10496_v43 = vadd.f32 %v10495_v42, %v10494_v30  ;;  %v14142_v48 = vadd.f32 %v10605_v41, %v5755_v35  ;;  %v13092_v30 = vpop.permute.xlu1 %13091  ;;  %v2263_v35 = vpack.c.bf16 %v1343_v18, %v1297_v17  ;;  %v2310_v42 = vpack.c.bf16 %v1436_v23, %v1390_v22  ;;  %v1530_v17 = vld [vmem:[%s13675_s16 + $0x2708] sm:$0xff] }
  0xf4   : > { %v10497_v49 = vpop.f32.mrf.mxu0  ;;  %6147 = vmatmul.mubr.bf16.gmra.mxu0 %v2171_v31  ;;  %v10607_v56 = vpop.f32.mrf.mxu1  ;;  %v13093_v41 = vunpack.i.l.bf16 %v13092_v30  ;;  %v13094_v59 = vunpack.i.h.bf16 %v13092_v30 }
  0xf5   : > { %v5758_v53 = vadd.f32 %v10496_v43, %v3462_v34  ;;  %6154 = vmatprep.mubr.bf16.mxu0 %v2218_v38  ;;  %v10608_v57 = vadd.f32 %v10607_v56, %v10606_v44  ;;  %v3466_v38 = vmul.f32 %v13089_v25, %v14126_v12  ;;  %v1392_v43 = vld [vmem:[%s13675_s16 + $0x22b8] sm:$0xff]  ;;  %v1438_v44 = vld [vmem:[%s13675_s16 + $0x2428] sm:$0xff] }
  0xf6   : > { %v10498_v58 = vpop.f32.mrf.mxu0  ;;  %v10609_v63 = vpop.f32.mrf.mxu1  ;;  %6308 = vmatmul.mubr.bf16.gmra.mxu1 %v2173_v45  ;;  %v1482_v56 = vld [vmem:[%s13675_s16 + $0x2588] sm:$0xff]  ;;  %v3467_v60 = vmul.f32 %v13093_v41, %v14126_v12  ;;  %v3468_v10 = vmul.f32 %v13094_v59, %v14126_v12 }
  0xf7   : > { %v10499_v62 = vadd.f32 %v10498_v58, %v10497_v49  ;;  %v14149_v0 = vadd.f32 %v10608_v57, %v5758_v53  ;;  %6315 = vmatprep.mubr.bf16.mxu1 %v2220_v50  ;;  %v2265_v50 = vpack.c.bf16 %v1345_v37, %v1299_v36  ;;  %v1528_v57 = vld [vmem:[%s13675_s16 + $0x26f8] sm:$0xff] }
  0xf8   : > { %v10500_v1 = vpop.f32.mrf.mxu0  ;;  %v10610_v6 = vpop.f32.mrf.mxu1 }
  0xf9   : > { %v5763_v5 = vadd.f32 %v10499_v62, %v3463_v55  ;;  %v10611_v11 = vadd.f32 %v10610_v6, %v10609_v63  ;;  %v2312_v55 = vpack.c.bf16 %v1438_v44, %v1392_v43 }
  0xfa   : > { %v10501_v13 = vpop.f32.mrf.mxu0  ;;  %v10612_v15 = vpop.f32.mrf.mxu1 }
  0xfb   : > { %v10502_v14 = vadd.f32 %v10501_v13, %v10500_v1  ;;  %v14156_v19 = vadd.f32 %v10611_v11, %v5763_v5  ;;  %v13097_v1 = vpop.permute.xlu0 %13096 }
  0xfc   : > { %v10503_v20 = vpop.f32.mrf.mxu0  ;;  %6155 = vmatmul.mubr.bf16.gmra.mxu0 %v2217_v2  ;;  %v10613_v27 = vpop.f32.mrf.mxu1  ;;  %v1391_v2 = vld [vmem:[%s13675_s16 + $0x22b0] sm:$0xff] }
  0xfd   : > { %v5766_v24 = vadd.f32 %v10502_v14, %v3464_v3  ;;  %6162 = vmatprep.mubr.bf16.mxu0 %v2264_v8  ;;  %v10614_v28 = vadd.f32 %v10613_v27, %v10612_v15  ;;  %v1437_v3 = vld [vmem:[%s13675_s16 + $0x2420] sm:$0xff]  ;;  %v13098_v14 = vunpack.i.l.bf16 %v13097_v1  ;;  %v2356_v15 = vpack.c.bf16 %v1528_v57, %v1482_v56  ;;  %v1527_v27 = vld [vmem:[%s13675_s16 + $0x26f0] sm:$0xff] }
  0xfe   : > { %v10504_v29 = vpop.f32.mrf.mxu0  ;;  %v10615_v32 = vpop.f32.mrf.mxu1  ;;  %6316 = vmatmul.mubr.bf16.gmra.mxu1 %v2219_v16  ;;  %v1484_v16 = vld [vmem:[%s13675_s16 + $0x2598] sm:$0xff]  ;;  %v2311_v23 = vpack.c.bf16 %v1437_v3, %v1391_v2 }
  0xff   : > { %v10505_v31 = vadd.f32 %v10504_v29, %v10503_v20  ;;  %v14161_v33 = vadd.f32 %v10614_v28, %v5766_v24  ;;  %6323 = vmatprep.mubr.bf16.mxu1 %v2266_v21  ;;  %v1481_v24 = vld [vmem:[%s13675_s16 + $0x2580] sm:$0xff]  ;;  %v2358_v28 = vpack.c.bf16 %v1530_v17, %v1484_v16  ;;  %v1574_v29 = vld [vmem:[%s13675_s16 + $0x2868] sm:$0xff]  ;;  %v1712_v16 = vld [vmem:[%s13675_s16 + $0x2cb8] sm:$0xff] }
 0x100   : > { %v10506_v34 = vpop.f32.mrf.mxu0  ;;  %v10616_v40 = vpop.f32.mrf.mxu1  ;;  %v2355_v44 = vpack.c.bf16 %v1527_v27, %v1481_v24 }
 0x101   : > { %v5771_v39 = vadd.f32 %v10505_v31, %v3465_v26  ;;  %v10617_v45 = vadd.f32 %v10616_v40, %v10615_v32  ;;  %v13099_v31 = vunpack.i.h.bf16 %v13097_v1  ;;  %v3469_v32 = vmul.f32 %v13098_v14, %v14126_v12  ;;  %v1619_v1 = vld [vmem:[%s13675_s16 + $0x29d0] sm:$0xff] }
 0x102   : > { %v10507_v46 = vpop.f32.mrf.mxu0  ;;  %v10618_v49 = vpop.f32.mrf.mxu1  ;;  %v1575_v14 = vld [vmem:[%s13675_s16 + $0x2870] sm:$0xff] }
 0x103   : > { %v10508_v47 = vadd.f32 %v10507_v46, %v10506_v34  ;;  %v14170_v53 = vadd.f32 %v10617_v45, %v5771_v39  ;;  %v1620_v39 = vld [vmem:[%s13675_s16 + $0x29d8] sm:$0xff]  ;;  %v1483_v45 = vld [vmem:[%s13675_s16 + $0x2590] sm:$0xff]  ;;  %v1529_v46 = vld [vmem:[%s13675_s16 + $0x2700] sm:$0xff] }
 0x104   : > { %v10509_v54 = vpop.f32.mrf.mxu0  ;;  %6163 = vmatmul.mubr.bf16.gmra.mxu0 %v2263_v35  ;;  %v10619_v61 = vpop.f32.mrf.mxu1  ;;  %v13265_v35 = vld [vmem:[%s17572_s2 + $0x3f8] sm:$0xff]   ;;  %v2402_v52 = vpack.c.bf16 %v1620_v39, %v1574_v29  ;;  %v1665_v39 = vld [vmem:[%s13675_s16 + $0x2b40] sm:$0xff] }
 0x105   : > { %v5774_v58 = vadd.f32 %v10508_v47, %v3466_v38  ;;  %6170 = vmatprep.mubr.bf16.mxu0 %v2310_v42  ;;  %v10620_v62 = vadd.f32 %v10619_v61, %v10618_v49  ;;  %v13102_v38 = vpop.permute.xlu1 %13101  ;;  %11259 = vmatprep.subr.bf16.mxu1 %v13265_v35  ;;  %v3470_v47 = vmul.f32 %v13099_v31, %v14126_v12  ;;  %v1668_v29 = vld [vmem:[%s13675_s16 + $0x2b58] sm:$0xff] }
 0x106   : > { %v10510_v63 = vpop.f32.mrf.mxu0  ;;  %v10621_v6 = vpop.f32.mrf.mxu1  ;;  %6324 = vmatmul.mubr.bf16.gmra.mxu1 %v2265_v50  ;;  %v13103_v51 = vunpack.i.l.bf16 %v13102_v38 }
 0x107   : > { %v10511_v5 = vadd.f32 %v10510_v63, %v10509_v54  ;;  %v14177_v7 = vadd.f32 %v10620_v62, %v5774_v58  ;;  %6331 = vmatprep.mubr.bf16.mxu1 %v2312_v55  ;;  %v1576_v54 = vld [vmem:[%s13675_s16 + $0x2878] sm:$0xff]  ;;  %v1622_v55 = vld [vmem:[%s13675_s16 + $0x29e8] sm:$0xff]  ;;  %v1573_v63 = vld [vmem:[%s13675_s16 + $0x2860] sm:$0xff] }
 0x108   : > { %v10512_v8 = vpop.f32.mrf.mxu0  ;;  %v10622_v13 = vpop.f32.mrf.mxu1  ;;  %v2404_v2 = vpack.c.bf16 %v1622_v55, %v1576_v54 }
 0x109   : > { %v5779_v11 = vadd.f32 %v10511_v5, %v3467_v60  ;;  %v10623_v18 = vadd.f32 %v10622_v13, %v10621_v6  ;;  %v2357_v60 = vpack.c.bf16 %v1529_v46, %v1483_v45  ;;  %v13104_v5 = vunpack.i.h.bf16 %v13102_v38  ;;  %v13107_v13 = vpop.permute.xlu0 %13106 }
 0x10a   : > { %v10513_v20 = vpop.f32.mrf.mxu0  ;;  %v10624_v22 = vpop.f32.mrf.mxu1  ;;  %v3471_v6 = vmul.f32 %v13103_v51, %v14126_v12  ;;  %v13108_v27 = vunpack.i.l.bf16 %v13107_v13 }
 0x10b   : > { %v10514_v21 = vadd.f32 %v10513_v20, %v10512_v8  ;;  %v14183_v25 = vadd.f32 %v10623_v18, %v5779_v11  ;;  %v13112_v51 = vpop.permute.xlu1 %13111 }
 0x10c   : > { %v10515_v26 = vpop.f32.mrf.mxu0  ;;  %6171 = vmatmul.mubr.bf16.gmra.mxu0 %v2309_v9  ;;  %v10625_v34 = vpop.f32.mrf.mxu1  ;;  %v1666_v9 = vld [vmem:[%s13675_s16 + $0x2b48] sm:$0xff]  ;;  %v3473_v45 = vmul.f32 %v13108_v27, %v14126_v12 }
 0x10d   : > { %v5782_v30 = vadd.f32 %v10514_v21, %v3468_v10  ;;  %6178 = vmatprep.mubr.bf16.mxu0 %v2356_v15  ;;  %v10626_v36 = vadd.f32 %v10625_v34, %v10624_v22  ;;  %v1621_v15 = vld [vmem:[%s13675_s16 + $0x29e0] sm:$0xff]  ;;  %v2401_v22 = vpack.c.bf16 %v1619_v1, %v1573_v63 }
 0x10e   : > { %v10516_v37 = vpop.f32.mrf.mxu0  ;;  %v10627_v41 = vpop.f32.mrf.mxu1  ;;  %6332 = vmatmul.mubr.bf16.gmra.mxu1 %v2311_v23  ;;  %v3472_v23 = vmul.f32 %v13104_v5, %v14126_v12  ;;  %v292_v5 = vld [vmem:[%s13675_s16 + $0x58] sm:$0xff] }
 0x10f   : > { %v10517_v40 = vadd.f32 %v10516_v37, %v10515_v26  ;;  %v14192_v42 = vadd.f32 %v10626_v36, %v5782_v30  ;;  %6339 = vmatprep.mubr.bf16.mxu1 %v2358_v28  ;;  %v2448_v28 = vpack.c.bf16 %v1712_v16, %v1666_v9  ;;  %v1714_v30 = vld [vmem:[%s13675_s16 + $0x2cc8] sm:$0xff]  ;;  %v2403_v36 = vpack.c.bf16 %v1621_v15, %v1575_v14  ;;  %v289_v16 = vld [vmem:[%s13675_s16 + $0x40] sm:$0xff] }
 0x110   : > { %v10518_v43 = vpop.f32.mrf.mxu0  ;;  %v10628_v50 = vpop.f32.mrf.mxu1 }
 0x111   : > { %v5787_v49 = vadd.f32 %v10517_v40, %v3469_v32  ;;  %v10629_v56 = vadd.f32 %v10628_v50, %v10627_v41  ;;  %v1711_v40 = vld [vmem:[%s13675_s16 + $0x2cb0] sm:$0xff]  ;;  %v2450_v41 = vpack.c.bf16 %v1714_v30, %v1668_v29  ;;  %v13117_v29 = vpop.permute.xlu0 %13116 }
 0x112   : > { %v10519_v57 = vpop.f32.mrf.mxu0  ;;  %v10630_v59 = vpop.f32.mrf.mxu1  ;;  %v291_v30 = vld [vmem:[%s13675_s16 + $0x50] sm:$0xff] }
 0x113   : > { %v10520_v58 = vadd.f32 %v10519_v57, %v10518_v43  ;;  %v14199_v61 = vadd.f32 %v10629_v56, %v5787_v49 }
 0x114   : > { %v10521_v62 = vpop.f32.mrf.mxu0  ;;  %6179 = vmatmul.mubr.bf16.gmra.mxu0 %v2355_v44  ;;  %v10631_v8 = vpop.f32.mrf.mxu1  ;;  %v13109_v44 = vunpack.i.h.bf16 %v13107_v13 }
 0x115   : > { %v5790_v3 = vadd.f32 %v10520_v58, %v3470_v47  ;;  %6186 = vmatprep.mubr.bf16.mxu0 %v2402_v52  ;;  %v10632_v10 = vadd.f32 %v10631_v8, %v10630_v59  ;;  %v290_v47 = vld [vmem:[%s13675_s16 + $0x48] sm:$0xff]  ;;  %v336_v52 = vld [vmem:[%s13675_s16 + $0x1b8] sm:$0xff]  ;;  %v2447_v58 = vpack.c.bf16 %v1711_v40, %v1665_v39  ;;  %v1667_v59 = vld [vmem:[%s13675_s16 + $0x2b50] sm:$0xff] }
 0x116   : > { %v10522_v11 = vpop.f32.mrf.mxu0  ;;  %v10633_v18 = vpop.f32.mrf.mxu1  ;;  %6340 = vmatmul.mubr.bf16.gmra.mxu1 %v2357_v60  ;;  %v1713_v60 = vld [vmem:[%s13675_s16 + $0x2cc0] sm:$0xff] }
 0x117   : > { %v10523_v17 = vadd.f32 %v10522_v11, %v10521_v62  ;;  %v14208_v20 = vadd.f32 %v10632_v10, %v5790_v3  ;;  %6347 = vmatprep.mubr.bf16.mxu1 %v2404_v2  ;;  %v3474_v62 = vmul.f32 %v13109_v44, %v14126_v12  ;;  %v13113_v2 = vunpack.i.l.bf16 %v13112_v51 }
 0x118   : > { %v10524_v21 = vpop.f32.mrf.mxu0  ;;  %v10634_v26 = vpop.f32.mrf.mxu1  ;;  %v1762_v3 = vpack.c.bf16 %v336_v52, %v290_v47  ;;  %v2449_v13 = vpack.c.bf16 %v1713_v60, %v1667_v59  ;;  %v13118_v44 = vunpack.i.l.bf16 %v13117_v29  ;;  %v384_v47 = vld [vmem:[%s13675_s16 + $0x338] sm:$0xff]  ;;  %v13253_v52 = vld [vmem:[%s17572_s2 + $0x370] sm:$0xff]  }
 0x119   : > { %v5795_v24 = vadd.f32 %v10523_v17, %v3471_v6  ;;  %v10635_v31 = vadd.f32 %v10634_v26, %v10633_v18  ;;  %v338_v6 = vld [vmem:[%s13675_s16 + $0x1c8] sm:$0xff]  ;;  %v335_v17 = vld [vmem:[%s13675_s16 + $0x1b0] sm:$0xff] }
 0x11a   : > { %v10525_v32 = vpop.f32.mrf.mxu0  ;;  %v10636_v35 = vpop.f32.mrf.mxu1  ;;  %v1764_v18 = vpack.c.bf16 %v338_v6, %v292_v5  ;;  %v382_v26 = vld [vmem:[%s13675_s16 + $0x328] sm:$0xff]  ;;  %v1761_v39 = vpack.c.bf16 %v335_v17, %v289_v16  ;;  %v427_v59 = vld [vmem:[%s13675_s16 + $0x490] sm:$0xff]  ;;  %v13266_v6 = vld [vmem:[%s17572_s2 + $0x3b8] sm:$0xff]  }
 0x11b   : > { %v10526_v34 = vadd.f32 %v10525_v32, %v10524_v21  ;;  %v14213_v37 = vadd.f32 %v10635_v31, %v5795_v24  ;;  %v337_v31 = vld [vmem:[%s13675_s16 + $0x1c0] sm:$0xff]  ;;  %v428_v32 = vld [vmem:[%s13675_s16 + $0x498] sm:$0xff]  ;;  %v13254_v60 = vld [vmem:[%s17572_s2 + $0x330] sm:$0xff]   ;;  %v14266_v17 = vpop.permute.xlu1 %13121 }
 0x11c   : > { %v10527_v38 = vpop.f32.mrf.mxu0  ;;  %6187 = vmatmul.mubr.bf16.gmra.mxu0 %v2401_v22  ;;  %v10637_v46 = vpop.f32.mrf.mxu1  ;;  %v13114_v22 = vunpack.i.h.bf16 %v13112_v51  ;;  %v13255_v5 = vld [vmem:[%s17572_s2 + $0x368] sm:$0xff]  }
 0x11d   : > { %v5798_v43 = vadd.f32 %v10526_v34, %v3472_v23  ;;  %6194 = vmatprep.mubr.bf16.mxu0 %v2448_v28  ;;  %v10638_v49 = vadd.f32 %v10637_v46, %v10636_v35  ;;  %v3475_v23 = vmul.f32 %v13113_v2, %v14126_v12  ;;  %v1808_v46 = vpack.c.bf16 %v428_v32, %v382_v26  ;;  %v474_v2 = vld [vmem:[%s13675_s16 + $0x608] sm:$0xff] }
 0x11e   : > { %v10528_v50 = vpop.f32.mrf.mxu0  ;;  %v10639_v55 = vpop.f32.mrf.mxu1  ;;  %6348 = vmatmul.mubr.bf16.gmra.mxu1 %v2403_v36  ;;  %v3476_v40 = vmul.f32 %v13114_v22, %v14126_v12 }
 0x11f   : > { %v10529_v54 = vadd.f32 %v10528_v50, %v10527_v38  ;;  %v14220_v56 = vadd.f32 %v10638_v49, %v5798_v43  ;;  %6355 = vmatprep.mubr.bf16.mxu1 %v2450_v41  ;;  %v430_v49 = vld [vmem:[%s13675_s16 + $0x4a8] sm:$0xff] }
 0x120   : > { %v10530_v57 = vpop.f32.mrf.mxu0  ;;  %v10640_v1 = vpop.f32.mrf.mxu1 }
 0x121   : > { %v5803_v63 = vadd.f32 %v10529_v54, %v3473_v45  ;;  %v10641_v8 = vadd.f32 %v10640_v1, %v10639_v55  ;;  %v13252_v45 = vld [vmem:[%s17572_s2 + $0x338] sm:$0xff]   ;;  %v1810_v1 = vpack.c.bf16 %v430_v49, %v384_v47  ;;  %v473_v49 = vld [vmem:[%s13675_s16 + $0x600] sm:$0xff] }
 0x122   : > { %v10531_v9 = vpop.f32.mrf.mxu0  ;;  %v10642_v11 = vpop.f32.mrf.mxu1 }
 0x123   : > { %v10532_v10 = vadd.f32 %v10531_v9, %v10530_v57  ;;  %v14227_v14 = vadd.f32 %v10641_v8, %v5803_v63  ;;  %v1763_v57 = vpack.c.bf16 %v337_v31, %v291_v30  ;;  %v13267_v8 = vld [vmem:[%s17572_s2 + $0x3f0] sm:$0xff]  }
 0x124   : > { %v10533_v15 = vpop.f32.mrf.mxu0  ;;  %6195 = vmatmul.mubr.bf16.gmra.mxu0 %v2447_v58  ;;  %v10643_v24 = vpop.f32.mrf.mxu1  ;;  %v381_v58 = vld [vmem:[%s13675_s16 + $0x320] sm:$0xff] }
 0x125   : > { %v5806_v21 = vadd.f32 %v10532_v10, %v3474_v62  ;;  %6396 = vmatprep.mubr.bf16.mxu0 %v1762_v3  ;;  %v10644_v27 = vadd.f32 %v10643_v24, %v10642_v11  ;;  %v520_v3 = vld [vmem:[%s13675_s16 + $0x778] sm:$0xff]  ;;  %v13119_v10 = vunpack.i.h.bf16 %v13117_v29  ;;  %v3477_v11 = vmul.f32 %v13118_v44, %v14126_v12  ;;  %v13268_v29 = vld [vmem:[%s17572_s2 + $0x3b0] sm:$0xff]   ;;  %v13269_v44 = vld [vmem:[%s17572_s2 + $0x3e8] sm:$0xff]  }
 0x126   : > { %v10534_v28 = vpop.f32.mrf.mxu0  ;;  %v10645_v35 = vpop.f32.mrf.mxu1  ;;  %6356 = vmatmul.mubr.bf16.gmra.mxu1 %v2449_v13 }
 0x127   : > { %v10535_v34 = vadd.f32 %v10534_v28, %v10533_v15  ;;  %v14236_v36 = vadd.f32 %v10644_v27, %v5806_v21  ;;  %6557 = vmatprep.mubr.bf16.mxu1 %v1764_v18  ;;  %v383_v18 = vld [vmem:[%s13675_s16 + $0x330] sm:$0xff]  ;;  %v429_v21 = vld [vmem:[%s13675_s16 + $0x4a0] sm:$0xff]  ;;  %v1807_v27 = vpack.c.bf16 %v427_v59, %v381_v58  ;;  %v476_v28 = vld [vmem:[%s13675_s16 + $0x618] sm:$0xff]  ;;  %v3478_v30 = vmul.f32 %v13119_v10, %v14126_v12 }
 0x128   : > { %v10536_v38 = vpop.f32.mrf.mxu0  ;;  %v10646_v43 = vpop.f32.mrf.mxu1  ;;  %v1809_v47 = vpack.c.bf16 %v429_v21, %v383_v18  ;;  %v612_v58 = vld [vmem:[%s13675_s16 + $0xa58] sm:$0xff]  ;;  %v475_v10 = vld [vmem:[%s13675_s16 + $0x610] sm:$0xff] }
 0x129   : > { %v5811_v41 = vadd.f32 %v10535_v34, %v3475_v23  ;;  %v10647_v50 = vadd.f32 %v10646_v43, %v10645_v35  ;;  %v13123_v34 = vunpack.i.l.bf16 %v14266_v17  ;;  %v1854_v35 = vpack.c.bf16 %v520_v3, %v474_v2  ;;  %v13257_v43 = vld [vmem:[%s17572_s2 + $0x360] sm:$0xff]   ;;  %v13259_v59 = vld [vmem:[%s17572_s2 + $0x358] sm:$0xff]  }
 0x12a   : > { %v10537_v51 = vpop.f32.mrf.mxu0  ;;  %v10648_v55 = vpop.f32.mrf.mxu1  ;;  %v13124_v2 = vunpack.i.h.bf16 %v14266_v17  ;;  %v568_v17 = vld [vmem:[%s13675_s16 + $0x8f8] sm:$0xff] }
 0x12b   : > { %v10538_v54 = vadd.f32 %v10537_v51, %v10536_v38  ;;  %v14252_v62 = vadd.f32 %v10647_v50, %v5811_v41  ;;  %v522_v38 = vld [vmem:[%s13675_s16 + $0x788] sm:$0xff]  ;;  %v519_v50 = vld [vmem:[%s13675_s16 + $0x770] sm:$0xff]  ;;  %v13258_v51 = vld [vmem:[%s17572_s2 + $0x320] sm:$0xff]   ;;  %v3479_v3 = vmul.f32 %v13123_v34, %v14126_v12 }
 0x12c   : > { %v10539_v63 = vpop.f32.mrf.mxu0  ;;  %6397 = vmatmul.mubr.bf16.vlgmr.msra.gmra.mxu0 %v1761_v39  ;;  %v10649_v13 = vpop.f32.mrf.mxu1  ;;  %v13256_v39 = vld [vmem:[%s17572_s2 + $0x328] sm:$0xff]  }
 0x12d   : > { %v5814_v9 = vadd.f32 %v10538_v54, %v3476_v40  ;;  %11148 = vmatpush3.bf16.msra.mxu0 %v13252_v45  ;;  %6404 = vmatprep.mubr.bf16.mxu0 %v1808_v46  ;;  %v10650_v15 = vadd.f32 %v10649_v13, %v10648_v55  ;;  %v1856_v55 = vpack.c.bf16 %v522_v38, %v476_v28  ;;  %v13272_v13 = vld [vmem:[%s17572_s2 + $0x3a0] sm:$0xff]   ;;  %v13275_v38 = vld [vmem:[%s17572_s2 + $0x3d8] sm:$0xff]  }
 0x12e   : > { %v10540_v16 = vpop.f32.mrf.mxu0  ;;  %11149 = vmatprep.subr.bf16.mxu0 %v13253_v52  ;;  %v10651_v23 = vpop.f32.mrf.mxu1  ;;  %6558 = vmatmul.mubr.bf16.vlgmr.msra.gmra.mxu1 %v1763_v57  ;;  %v14296_v57 = vld [vmem:[%s13675_s16 + $0x8e8] sm:$0xff] }
 0x12f   : > { %v10541_v22 = vadd.f32 %v10540_v16, %v10539_v63  ;;  %v14270_v24 = vadd.f32 %v10650_v15, %v5814_v9  ;;  %6565 = vmatprep.mubr.bf16.mxu1 %v1810_v1  ;;  %11260 = vmatpush3.bf16.msra.mxu1 %v13266_v6  ;;  %v13271_v63 = vld [vmem:[%s17572_s2 + $0x3e0] sm:$0xff]   ;;  %v14310_v9 = vpop.permute.xlu0 %13126 }
 0x130   : > { %v10542_v26 = vpop.f32.mrf.mxu0  ;;  %v10652_v32 = vpop.f32.mrf.mxu1  ;;  %11261 = vmatprep.subr.bf16.mxu1 %v13267_v8  ;;  %v13128_v28 = vunpack.i.l.bf16 %v14310_v9 }
 0x131   : > { %v5819_v31 = vadd.f32 %v10541_v22, %v3477_v11  ;;  %11150 = vmatpush3.bf16.msra.mxu0 %v13254_v60  ;;  %v10653_v40 = vadd.f32 %v10652_v32, %v10651_v23  ;;  %v13270_v60 = vld [vmem:[%s17572_s2 + $0x3a8] sm:$0xff]   ;;  %v521_v11 = vld [vmem:[%s13675_s16 + $0x780] sm:$0xff]  ;;  %v1853_v22 = vpack.c.bf16 %v519_v50, %v473_v49  ;;  %v3480_v23 = vmul.f32 %v13124_v2, %v14126_v12 }
 0x132   : > { %v10543_v41 = vpop.f32.mrf.mxu0  ;;  %11151 = vmatprep.subr.bf16.mxu0 %v13255_v5  ;;  %v10654_v46 = vpop.f32.mrf.mxu1  ;;  %v14341_v50 = vld [vmem:[%s13675_s16 + $0xbc8] sm:$0xff] }
 0x133   : > { %v10544_v45 = vadd.f32 %v10543_v41, %v10542_v26  ;;  %v14293_v52 = vadd.f32 %v10653_v40, %v5819_v31  ;;  %11262 = vmatpush3.bf16.msra.mxu1 %v13268_v29  ;;  %v1900_v29 = vpack.c.bf16 %v612_v58, %v14296_v57  ;;  %v13260_v31 = vld [vmem:[%s17572_s2 + $0x318] sm:$0xff]   ;;  %v1855_v41 = vpack.c.bf16 %v521_v11, %v475_v10  ;;  %v13277_v57 = vld [vmem:[%s17572_s2 + $0x3d0] sm:$0xff]  }
 0x134   : > { %v10545_v54 = vpop.f32.mrf.mxu0  ;;  %6405 = vmatmul.mubr.bf16.gmra.mxu0 %v1807_v27  ;;  %v10655_v5 = vpop.f32.mrf.mxu1  ;;  %11263 = vmatprep.subr.bf16.mxu1 %v13269_v44  ;;  %v611_v44 = vld [vmem:[%s13675_s16 + $0xa50] sm:$0xff] }
 0x135   : > { %v5822_v1 = vadd.f32 %v10544_v45, %v3478_v30  ;;  %6412 = vmatprep.mubr.bf16.mxu0 %v1854_v35  ;;  %11152 = vmatpush3.bf16.msra.mxu0 %v13256_v39  ;;  %v10656_v6 = vadd.f32 %v10655_v5, %v10654_v46  ;;  %v614_v30 = vld [vmem:[%s13675_s16 + $0xa68] sm:$0xff]  ;;  %v13261_v35 = vld [vmem:[%s17572_s2 + $0x350] sm:$0xff]  }
 0x136   : > { %v10546_v8 = vpop.f32.mrf.mxu0  ;;  %11153 = vmatprep.subr.bf16.mxu0 %v13257_v43  ;;  %v10657_v16 = vpop.f32.mrf.mxu1  ;;  %6566 = vmatmul.mubr.bf16.gmra.mxu1 %v1809_v47  ;;  %v565_v43 = vld [vmem:[%s13675_s16 + $0x8e0] sm:$0xff]  ;;  %v13262_v45 = vld [vmem:[%s17572_s2 + $0x310] sm:$0xff]   ;;  %v1902_v49 = vpack.c.bf16 %v614_v30, %v568_v17 }
 0x137   : > { %v10547_v15 = vadd.f32 %v10546_v8, %v10545_v54  ;;  %v14318_v18 = vadd.f32 %v10656_v6, %v5822_v1  ;;  %6573 = vmatprep.mubr.bf16.mxu1 %v1856_v55  ;;  %11264 = vmatpush3.bf16.msra.mxu1 %v13270_v60  ;;  %v13263_v54 = vld [vmem:[%s17572_s2 + $0x348] sm:$0xff]   ;;  %v13276_v55 = vld [vmem:[%s17572_s2 + $0x398] sm:$0xff]   ;;  %v3481_v60 = vmul.f32 %v13128_v28, %v14126_v12  ;;  %v567_v5 = vld [vmem:[%s13675_s16 + $0x8f0] sm:$0xff] }
 0x138   : > { %v10548_v21 = vpop.f32.mrf.mxu0  ;;  %v10658_v27 = vpop.f32.mrf.mxu1  ;;  %11265 = vmatprep.subr.bf16.mxu1 %v13271_v63  ;;  %v613_v6 = vld [vmem:[%s13675_s16 + $0xa60] sm:$0xff]  ;;  %v13264_v28 = vld [vmem:[%s17572_s2 + $0x308] sm:$0xff]  }
 0x139   : > { %v5827_v26 = vadd.f32 %v10547_v15, %v3479_v3  ;;  %11154 = vmatpush3.bf16.msra.mxu0 %v13258_v51  ;;  %v10659_v32 = vadd.f32 %v10658_v27, %v10657_v16  ;;  %v704_v51 = vld [vmem:[%s13675_s16 + $0xd38] sm:$0xff]  ;;  %v14355_v3 = vpop.permute.xlu1 %13131  ;;  %v13278_v16 = vld [vmem:[%s17572_s2 + $0x390] sm:$0xff]   ;;  %v706_v27 = vld [vmem:[%s13675_s16 + $0xd48] sm:$0xff] }
 0x13a   : > { %v10549_v34 = vpop.f32.mrf.mxu0  ;;  %11155 = vmatprep.subr.bf16.mxu0 %v13259_v59  ;;  %v10660_v40 = vpop.f32.mrf.mxu1  ;;  %v13129_v59 = vunpack.i.h.bf16 %v14310_v9  ;;  %v660_v15 = vld [vmem:[%s13675_s16 + $0xbd8] sm:$0xff] }
 0x13b   : > { %v10550_v39 = vadd.f32 %v10549_v34, %v10548_v21  ;;  %v14338_v46 = vadd.f32 %v10659_v32, %v5827_v26  ;;  %11266 = vmatpush3.bf16.msra.mxu1 %v13272_v13  ;;  %v1899_v13 = vpack.c.bf16 %v611_v44, %v565_v43  ;;  %v1946_v26 = vpack.c.bf16 %v704_v51, %v14341_v50  ;;  %v13279_v32 = vld [vmem:[%s17572_s2 + $0x3c8] sm:$0xff]   ;;  %v796_v50 = vld [vmem:[%s13675_s16 + $0x1018] sm:$0xff]  ;;  %v13281_v51 = vld [vmem:[%s17572_s2 + $0x3c0] sm:$0xff]  }
 0x13c   : > { %v10551_v47 = vpop.f32.mrf.mxu0  ;;  %6413 = vmatmul.mubr.bf16.gmra.mxu0 %v1853_v22  ;;  %v10661_v63 = vpop.f32.mrf.mxu1  ;;  %11267 = vmatprep.subr.bf16.mxu1 %v13275_v38  ;;  %v3482_v17 = vmul.f32 %v13129_v59, %v14126_v12  ;;  %v1901_v38 = vpack.c.bf16 %v613_v6, %v567_v5  ;;  %v13280_v43 = vld [vmem:[%s17572_s2 + $0x388] sm:$0xff]   ;;  %v705_v5 = vld [vmem:[%s13675_s16 + $0xd40] sm:$0xff] }
 0x13d   : > { %v5830_v58 = vadd.f32 %v10550_v39, %v3480_v23  ;;  %6420 = vmatprep.mubr.bf16.mxu0 %v1900_v29  ;;  %11156 = vmatpush3.bf16.msra.mxu0 %v13260_v31  ;;  %v10662_v1 = vadd.f32 %v10661_v63, %v10660_v40  ;;  %v13133_v23 = vunpack.i.l.bf16 %v14355_v3  ;;  %v13273_v31 = vld [vmem:[%s17572_s2 + $0x340] sm:$0xff]   ;;  %v703_v40 = vld [vmem:[%s13675_s16 + $0xd30] sm:$0xff] }
 0x13e   : > { %v10552_v2 = vpop.f32.mrf.mxu0  ;;  %11157 = vmatprep.subr.bf16.mxu0 %v13261_v35  ;;  %v10663_v10 = vpop.f32.mrf.mxu1  ;;  %6574 = vmatmul.mubr.bf16.gmra.mxu1 %v1855_v41  ;;  %v657_v39 = vld [vmem:[%s13675_s16 + $0xbc0] sm:$0xff] }
 0x13f   : > { %v10553_v8 = vadd.f32 %v10552_v2, %v10551_v47  ;;  %v14359_v11 = vadd.f32 %v10662_v1, %v5830_v58  ;;  %6581 = vmatprep.mubr.bf16.mxu1 %v1902_v49  ;;  %11268 = vmatpush3.bf16.msra.mxu1 %v13276_v55  ;;  %v13274_v41 = vld [vmem:[%s17572_s2 + $0x300] sm:$0xff]   ;;  %v1948_v47 = vpack.c.bf16 %v706_v27, %v660_v15  ;;  %v750_v49 = vld [vmem:[%s13675_s16 + $0xea8] sm:$0xff]  ;;  %v13137_v1 = vpop.permute.xlu0 %13136  ;;  %v659_v2 = vld [vmem:[%s13675_s16 + $0xbd0] sm:$0xff] }
 0x140   : > { %v10554_v9 = vpop.f32.mrf.mxu0  ;;  %v10664_v22 = vpop.f32.mrf.mxu1  ;;  %11269 = vmatprep.subr.bf16.mxu1 %v13277_v57  ;;  %v13134_v57 = vunpack.i.h.bf16 %v14355_v3  ;;  %v3483_v58 = vmul.f32 %v13133_v23, %v14126_v12  ;;  %v13282_v6 = vld [vmem:[%s17572_s2 + $0x380] sm:$0xff]   ;;  %v752_v23 = vld [vmem:[%s13675_s16 + $0xeb8] sm:$0xff] }
 0x141   : > { %v5835_v21 = vadd.f32 %v10553_v8, %v3481_v60  ;;  %11158 = vmatpush3.bf16.msra.mxu0 %v13262_v45  ;;  %v10665_v29 = vadd.f32 %v10664_v22, %v10663_v10  ;;  %v1992_v22 = vpack.c.bf16 %v796_v50, %v750_v49 }
 0x142   : > { %v10555_v30 = vpop.f32.mrf.mxu0  ;;  %11159 = vmatprep.subr.bf16.mxu0 %v13263_v54  ;;  %v10666_v35 = vpop.f32.mrf.mxu1  ;;  %v13283_v54 = vld [vmem:[%s17572_s2 + $0x478] sm:$0xff]   ;;  %v3484_v15 = vmul.f32 %v13134_v57, %v14126_v12 }
 0x143   : > { %v10556_v34 = vadd.f32 %v10555_v30, %v10554_v9  ;;  %v14386_v44 = vadd.f32 %v10665_v29, %v5835_v21  ;;  %11270 = vmatpush3.bf16.msra.mxu1 %v13278_v16  ;;  %v13138_v21 = vunpack.i.l.bf16 %v13137_v1 }
 0x144   : > { %v10557_v45 = vpop.f32.mrf.mxu0  ;;  %6421 = vmatmul.mubr.bf16.gmra.mxu0 %v1899_v13  ;;  %v10667_v59 = vpop.f32.mrf.mxu1  ;;  %11271 = vmatprep.subr.bf16.mxu1 %v13279_v32  ;;  %v1945_v13 = vpack.c.bf16 %v703_v40, %v657_v39  ;;  %v749_v32 = vld [vmem:[%s13675_s16 + $0xea0] sm:$0xff]  ;;  %v842_v40 = vld [vmem:[%s13675_s16 + $0x1188] sm:$0xff] }
 0x145   : > { %v5838_v55 = vadd.f32 %v10556_v34, %v3482_v17  ;;  %6428 = vmatprep.mubr.bf16.mxu0 %v1946_v26  ;;  %11160 = vmatpush3.bf16.msra.mxu0 %v13264_v28  ;;  %v10668_v60 = vadd.f32 %v10667_v59, %v10666_v35  ;;  %v798_v26 = vld [vmem:[%s13675_s16 + $0x1028] sm:$0xff]  ;;  %v795_v34 = vld [vmem:[%s13675_s16 + $0x1010] sm:$0xff] }
 0x146   : > { %v10558_v63 = vpop.f32.mrf.mxu0  ;;  %11161 = vmatprep.subr.bf16.mxu0 %v13273_v31  ;;  %v10669_v3 = vpop.f32.mrf.mxu1  ;;  %6582 = vmatmul.mubr.bf16.gmra.mxu1 %v1901_v38  ;;  %v1947_v31 = vpack.c.bf16 %v705_v5, %v659_v2  ;;  %v1994_v39 = vpack.c.bf16 %v798_v26, %v752_v23  ;;  %v841_v23 = vld [vmem:[%s13675_s16 + $0x1180] sm:$0xff]  ;;  %v887_v26 = vld [vmem:[%s13675_s16 + $0x12f0] sm:$0xff] }
 0x147   : > { %v10559_v8 = vadd.f32 %v10558_v63, %v10557_v45  ;;  %v14403_v10 = vadd.f32 %v10668_v60, %v5838_v55  ;;  %6589 = vmatprep.mubr.bf16.mxu1 %v1948_v47  ;;  %11272 = vmatpush3.bf16.msra.mxu1 %v13280_v43  ;;  %v888_v43 = vld [vmem:[%s13675_s16 + $0x12f8] sm:$0xff]  ;;  %v3485_v47 = vmul.f32 %v13138_v21, %v14126_v12  ;;  %v751_v63 = vld [vmem:[%s13675_s16 + $0xeb0] sm:$0xff] }
 0x148   : > { %v10560_v9 = vpop.f32.mrf.mxu0  ;;  %v10670_v17 = vpop.f32.mrf.mxu1  ;;  %11273 = vmatprep.subr.bf16.mxu1 %v13281_v51  ;;  %v1991_v60 = vpack.c.bf16 %v795_v34, %v749_v32 }
 0x149   : > { %v5843_v16 = vadd.f32 %v10559_v8, %v3483_v58  ;;  %11162 = vmatpush3.bf16.msra.mxu0 %v13274_v41  ;;  %v10671_v27 = vadd.f32 %v10670_v17, %v10669_v3  ;;  %v13139_v41 = vunpack.i.h.bf16 %v13137_v1  ;;  %v797_v1 = vld [vmem:[%s13675_s16 + $0x1020] sm:$0xff]  ;;  %v2038_v3 = vpack.c.bf16 %v888_v43, %v842_v40 }
 0x14a   : > { %v10561_v28 = vpop.f32.mrf.mxu0  ;;  %11371 = vmatprep.subr.bf16.mxu0 %v13283_v54  ;;  %v10672_v30 = vpop.f32.mrf.mxu1 }
 0x14b   : > { %v10562_v29 = vadd.f32 %v10561_v28, %v10560_v9  ;;  %v14410_v35 = vadd.f32 %v10671_v27, %v5843_v16  ;;  %11274 = vmatpush3.bf16.msra.mxu1 %v13282_v6  ;;  %v13142_v54 = vpop.permute.xlu1 %13141  ;;  %v3486_v2 = vmul.f32 %v13139_v41, %v14126_v12  ;;  %v844_v9 = vld [vmem:[%s13675_s16 + $0x1198] sm:$0xff]  ;;  %v843_v41 = vld [vmem:[%s13675_s16 + $0x1190] sm:$0xff] }
 0x14c   : > { %v10563_v38 = vpop.f32.mrf.mxu0  ;;  %6429 = vmatmul.mubr.bf16.gmra.mxu0 %v1945_v13  ;;  %v10673_v49 = vpop.f32.mrf.mxu1  ;;  %v13143_v8 = vunpack.i.l.bf16 %v13142_v54  ;;  %v890_v13 = vld [vmem:[%s13675_s16 + $0x1308] sm:$0xff]  ;;  %v13144_v34 = vunpack.i.h.bf16 %v13142_v54  ;;  %v2037_v54 = vpack.c.bf16 %v887_v26, %v841_v23  ;;  %v1072_v26 = vld [vmem:[%s13675_s16 + $0x18b8] sm:$0xff] }
 0x14d   : > { %v5846_v45 = vadd.f32 %v10562_v29, %v3484_v15  ;;  %6436 = vmatprep.mubr.bf16.mxu0 %v1992_v22  ;;  %v10674_v50 = vadd.f32 %v10673_v49, %v10672_v30  ;;  %v1993_v22 = vpack.c.bf16 %v797_v1, %v751_v63  ;;  %v2040_v29 = vpack.c.bf16 %v890_v13, %v844_v9  ;;  %v934_v30 = vld [vmem:[%s13675_s16 + $0x1468] sm:$0xff] }
 0x14e   : > { %v10564_v51 = vpop.f32.mrf.mxu0  ;;  %v10675_v57 = vpop.f32.mrf.mxu1  ;;  %6590 = vmatmul.mubr.bf16.gmra.mxu1 %v1947_v31  ;;  %v980_v31 = vld [vmem:[%s13675_s16 + $0x15d8] sm:$0xff]  ;;  %v1026_v23 = vld [vmem:[%s13675_s16 + $0x1748] sm:$0xff] }
 0x14f   : > { %v10565_v55 = vadd.f32 %v10564_v51, %v10563_v38  ;;  %v14415_v58 = vadd.f32 %v10674_v50, %v5846_v45  ;;  %6597 = vmatprep.mubr.bf16.mxu1 %v1994_v39  ;;  %v3487_v38 = vmul.f32 %v13143_v8, %v14126_v12  ;;  %v13147_v45 = vpop.permute.xlu0 %13146  ;;  %v2084_v1 = vpack.c.bf16 %v980_v31, %v934_v30 }
 0x150   : > { %v10566_v59 = vpop.f32.mrf.mxu0  ;;  %v10676_v6 = vpop.f32.mrf.mxu1  ;;  %v13148_v63 = vunpack.i.l.bf16 %v13147_v45 }
 0x151   : > { %v5851_v5 = vadd.f32 %v10565_v55, %v3485_v47  ;;  %v10677_v15 = vadd.f32 %v10676_v6, %v10675_v57  ;;  %v889_v47 = vld [vmem:[%s13675_s16 + $0x1300] sm:$0xff]  ;;  %v3488_v57 = vmul.f32 %v13144_v34, %v14126_v12 }
 0x152   : > { %v10567_v16 = vpop.f32.mrf.mxu0  ;;  %v10678_v21 = vpop.f32.mrf.mxu1  ;;  %v2039_v13 = vpack.c.bf16 %v889_v47, %v843_v41  ;;  %v3489_v30 = vmul.f32 %v13148_v63, %v14126_v12  ;;  %v1074_v63 = vld [vmem:[%s13675_s16 + $0x18c8] sm:$0xff] }
 0x153   : > { %v10568_v17 = vadd.f32 %v10567_v16, %v10566_v59  ;;  %v14424_v27 = vadd.f32 %v10677_v15, %v5851_v5  ;;  %v982_v5 = vld [vmem:[%s13675_s16 + $0x15e8] sm:$0xff]  ;;  %v933_v15 = vld [vmem:[%s13675_s16 + $0x1460] sm:$0xff]  ;;  %v979_v16 = vld [vmem:[%s13675_s16 + $0x15d0] sm:$0xff] }
 0x154   : > { %v10569_v28 = vpop.f32.mrf.mxu0  ;;  %6437 = vmatmul.mubr.bf16.gmra.mxu0 %v1991_v60  ;;  %v10679_v39 = vpop.f32.mrf.mxu1  ;;  %v2083_v47 = vpack.c.bf16 %v979_v16, %v933_v15 }
 0x155   : > { %v5854_v32 = vadd.f32 %v10568_v17, %v3486_v2  ;;  %6444 = vmatprep.mubr.bf16.mxu0 %v2038_v3  ;;  %v10680_v40 = vadd.f32 %v10679_v39, %v10678_v21  ;;  %v936_v2 = vld [vmem:[%s13675_s16 + $0x1478] sm:$0xff] }
 0x156   : > { %v10570_v43 = vpop.f32.mrf.mxu0  ;;  %v10681_v50 = vpop.f32.mrf.mxu1  ;;  %6598 = vmatmul.mubr.bf16.gmra.mxu1 %v1993_v22  ;;  %v2086_v22 = vpack.c.bf16 %v982_v5, %v936_v2 }
 0x157   : > { %v10571_v49 = vadd.f32 %v10570_v43, %v10569_v28  ;;  %v14431_v51 = vadd.f32 %v10680_v40, %v5854_v32  ;;  %6605 = vmatprep.mubr.bf16.mxu1 %v2040_v29  ;;  %v13149_v29 = vunpack.i.h.bf16 %v13147_v45  ;;  %v935_v45 = vld [vmem:[%s13675_s16 + $0x1470] sm:$0xff] }
 0x158   : > { %v10572_v55 = vpop.f32.mrf.mxu0  ;;  %v10682_v60 = vpop.f32.mrf.mxu1 }
 0x159   : > { %v5859_v59 = vadd.f32 %v10571_v49, %v3487_v38  ;;  %v10683_v6 = vadd.f32 %v10682_v60, %v10681_v50  ;;  %v13152_v38 = vpop.permute.xlu1 %13151  ;;  %v981_v49 = vld [vmem:[%s13675_s16 + $0x15e0] sm:$0xff]  ;;  %v3490_v50 = vmul.f32 %v13149_v29, %v14126_v12  ;;  %v1028_v60 = vld [vmem:[%s13675_s16 + $0x1758] sm:$0xff] }
 0x15a   : > { %v10573_v8 = vpop.f32.mrf.mxu0  ;;  %v10684_v9 = vpop.f32.mrf.mxu1  ;;  %v2132_v16 = vpack.c.bf16 %v1074_v63, %v1028_v60 }
 0x15b   : > { %v10574_v3 = vadd.f32 %v10573_v8, %v10572_v55  ;;  %v14438_v17 = vadd.f32 %v10683_v6, %v5859_v59  ;;  %v2130_v59 = vpack.c.bf16 %v1072_v26, %v1026_v23  ;;  %v2085_v8 = vpack.c.bf16 %v981_v49, %v935_v45 }
 0x15c   : > { %v10575_v21 = vpop.f32.mrf.mxu0  ;;  %6445 = vmatmul.mubr.bf16.gmra.mxu0 %v2037_v54  ;;  %v10685_v31 = vpop.f32.mrf.mxu1  ;;  %v13154_v23 = vunpack.i.h.bf16 %v13152_v38 }
 0x15d   : > { %v5862_v28 = vadd.f32 %v10574_v3, %v3488_v57  ;;  %6452 = vmatprep.mubr.bf16.mxu0 %v2084_v1  ;;  %v10686_v32 = vadd.f32 %v10685_v31, %v10684_v9  ;;  %v13153_v57 = vunpack.i.l.bf16 %v13152_v38  ;;  %v1025_v3 = vld [vmem:[%s13675_s16 + $0x1740] sm:$0xff]  ;;  %v1071_v9 = vld [vmem:[%s13675_s16 + $0x18b0] sm:$0xff] }
 0x15e   : > { %v10576_v34 = vpop.f32.mrf.mxu0  ;;  %v10687_v40 = vpop.f32.mrf.mxu1  ;;  %6606 = vmatmul.mubr.bf16.gmra.mxu1 %v2039_v13  ;;  %v2129_v45 = vpack.c.bf16 %v1071_v9, %v1025_v3  ;;  %v3492_v38 = vmul.f32 %v13154_v23, %v14126_v12  ;;  %v1210_v9 = vld [vmem:[%s13675_s16 + $0x1d08] sm:$0xff] }
 0x15f   : > { %v10577_v39 = vadd.f32 %v10576_v34, %v10575_v21  ;;  %v14443_v43 = vadd.f32 %v10686_v32, %v5862_v28  ;;  %6613 = vmatprep.mubr.bf16.mxu1 %v2086_v22  ;;  %v1118_v21 = vld [vmem:[%s13675_s16 + $0x1a28] sm:$0xff]  ;;  %v1164_v22 = vld [vmem:[%s13675_s16 + $0x1b98] sm:$0xff]  ;;  %v3491_v26 = vmul.f32 %v13153_v57, %v14126_v12  ;;  %v1027_v32 = vld [vmem:[%s13675_s16 + $0x1750] sm:$0xff] }
 0x160   : > { %v10578_v41 = vpop.f32.mrf.mxu0  ;;  %v10688_v54 = vpop.f32.mrf.mxu1  ;;  %v1073_v34 = vld [vmem:[%s13675_s16 + $0x18c0] sm:$0xff]  ;;  %v1166_v57 = vld [vmem:[%s13675_s16 + $0x1ba8] sm:$0xff] }
 0x161   : > { %v5867_v55 = vadd.f32 %v10577_v39, %v3489_v30  ;;  %v10689_v1 = vadd.f32 %v10688_v54, %v10687_v40  ;;  %v1120_v54 = vld [vmem:[%s13675_s16 + $0x1a38] sm:$0xff] }
 0x162   : > { %v10579_v2 = vpop.f32.mrf.mxu0  ;;  %v10690_v6 = vpop.f32.mrf.mxu1  ;;  %v2178_v12 = vpack.c.bf16 %v1166_v57, %v1120_v54 }
 0x163   : > { %v10580_v5 = vadd.f32 %v10579_v2, %v10578_v41  ;;  %v14452_v13 = vadd.f32 %v10689_v1, %v5867_v55  ;;  %v2176_v55 = vpack.c.bf16 %v1164_v22, %v1118_v21  ;;  %v2131_v2 = vpack.c.bf16 %v1073_v34, %v1027_v32  ;;  %v1119_v32 = vld [vmem:[%s13675_s16 + $0x1a30] sm:$0xff]  ;;  %v1165_v34 = vld [vmem:[%s13675_s16 + $0x1ba0] sm:$0xff] }
 0x164   : > { %v10581_v15 = vpop.f32.mrf.mxu0  ;;  %6453 = vmatmul.mubr.bf16.gmra.mxu0 %v2083_v47  ;;  %v10691_v29 = vpop.f32.mrf.mxu1  ;;  %v2177_v57 = vpack.c.bf16 %v1165_v34, %v1119_v32  ;;  %v1304_v32 = vld [vmem:[%s13675_s16 + $0x1ff8] sm:$0xff]  ;;  %v1350_v34 = vld [vmem:[%s13675_s16 + $0x2168] sm:$0xff] }
 0x165   : > { %v5870_v28 = vadd.f32 %v10580_v5, %v3490_v50  ;;  %6460 = vmatprep.mubr.bf16.mxu0 %v2130_v59  ;;  %v10692_v30 = vadd.f32 %v10691_v29, %v10690_v6  ;;  %v1117_v5 = vld [vmem:[%s13675_s16 + $0x1a20] sm:$0xff]  ;;  %v1163_v6 = vld [vmem:[%s13675_s16 + $0x1b90] sm:$0xff] }
 0x166   : > { %v10582_v31 = vpop.f32.mrf.mxu0  ;;  %v10693_v40 = vpop.f32.mrf.mxu1  ;;  %6614 = vmatmul.mubr.bf16.gmra.mxu1 %v2085_v8 }
 0x167   : > { %v10583_v39 = vadd.f32 %v10582_v31, %v10581_v15  ;;  %v14459_v41 = vadd.f32 %v10692_v30, %v5870_v28  ;;  %6621 = vmatprep.mubr.bf16.mxu1 %v2132_v16  ;;  %v1256_v15 = vld [vmem:[%s13675_s16 + $0x1e78] sm:$0xff]  ;;  %v2175_v31 = vpack.c.bf16 %v1163_v6, %v1117_v5 }
 0x168   : > { %v10584_v47 = vpop.f32.mrf.mxu0  ;;  %v10694_v50 = vpop.f32.mrf.mxu1  ;;  %v1348_v5 = vld [vmem:[%s13675_s16 + $0x2158] sm:$0xff] }
 0x169   : > { %v5875_v49 = vadd.f32 %v10583_v39, %v3491_v26  ;;  %v10695_v59 = vadd.f32 %v10694_v50, %v10693_v40 }
 0x16a   : > { %v10585_v60 = vpop.f32.mrf.mxu0  ;;  %v10696_v1 = vpop.f32.mrf.mxu1 }
 0x16b   : > { %v10586_v63 = vadd.f32 %v10585_v60, %v10584_v47  ;;  %v14466_v8 = vadd.f32 %v10695_v59, %v5875_v49  ;;  %v2222_v47 = vpack.c.bf16 %v1256_v15, %v1210_v9  ;;  %v1209_v59 = vld [vmem:[%s13675_s16 + $0x1d00] sm:$0xff]  ;;  %v1255_v60 = vld [vmem:[%s13675_s16 + $0x1e70] sm:$0xff] }
 0x16c   : > { %v10715_v3 = vpop.f32.mrf.mxu0  ;;  %6461 = vmatmul.mubr.bf16.gmra.mxu0 %v2129_v45  ;;  %v10697_v21 = vpop.f32.mrf.mxu1  ;;  %v1212_v45 = vld [vmem:[%s13675_s16 + $0x1d18] sm:$0xff]  ;;  %v1211_v15 = vld [vmem:[%s13675_s16 + $0x1d10] sm:$0xff] }
 0x16d   : > { %v5878_v16 = vadd.f32 %v10586_v63, %v3492_v38  ;;  %6468 = vmatprep.mubr.bf16.mxu0 %v2176_v55  ;;  %v10698_v22 = vadd.f32 %v10697_v21, %v10696_v1  ;;  %v1258_v38 = vld [vmem:[%s13675_s16 + $0x1e88] sm:$0xff] }
 0x16e   : > { %v10716_v28 = vpop.f32.mrf.mxu0  ;;  %v10827_v26 = vpop.f32.mrf.mxu1  ;;  %6622 = vmatmul.mubr.bf16.gmra.mxu1 %v2131_v2  ;;  %v1302_v2 = vld [vmem:[%s13675_s16 + $0x1fe8] sm:$0xff] }
 0x16f   : > { %v10717_v23 = vadd.f32 %v10716_v28, %v10715_v3  ;;  %v14470_v29 = vadd.f32 %v10698_v22, %v5878_v16  ;;  %6629 = vmatprep.mubr.bf16.mxu1 %v2178_v12  ;;  %v1257_v16 = vld [vmem:[%s13675_s16 + $0x1e80] sm:$0xff] }
 0x170   : > { %v10718_v30 = vpop.f32.mrf.mxu0  ;;  %v10828_v40 = vpop.f32.mrf.mxu1 }
 0x171   : > { %v6077_v39 = vadd.f32 %v10717_v23, %v14142_v48  ;;  %v10829_v49 = vadd.f32 %v10828_v40, %v10827_v26  ;;  %v2224_v48 = vpack.c.bf16 %v1258_v38, %v1212_v45  ;;  %v2221_v26 = vpack.c.bf16 %v1255_v60, %v1209_v59  ;;  %v1440_v59 = vld [vmem:[%s13675_s16 + $0x2438] sm:$0xff] }
 0x172   : > { %v10719_v50 = vpop.f32.mrf.mxu0  ;;  %v10830_v54 = vpop.f32.mrf.mxu1  ;;  %v2223_v38 = vpack.c.bf16 %v1257_v16, %v1211_v15  ;;  %v1303_v15 = vld [vmem:[%s13675_s16 + $0x1ff0] sm:$0xff]  ;;  %v1349_v16 = vld [vmem:[%s13675_s16 + $0x2160] sm:$0xff] }
 0x173   : > { %v10720_v55 = vadd.f32 %v10719_v50, %v10718_v30  ;;  %v14479_v63 = vadd.f32 %v10829_v49, %v6077_v39  ;;  %v1301_v49 = vld [vmem:[%s13675_s16 + $0x1fe0] sm:$0xff]  ;;  %v1347_v50 = vld [vmem:[%s13675_s16 + $0x2150] sm:$0xff] }
 0x174   : > { %v10721_v1 = vpop.f32.mrf.mxu0  ;;  %6469 = vmatmul.mubr.bf16.gmra.mxu0 %v2175_v31  ;;  %v10831_v3 = vpop.f32.mrf.mxu1  ;;  %v2268_v31 = vpack.c.bf16 %v1348_v5, %v1302_v2 }
 0x175   : > { %v6080_v6 = vadd.f32 %v10720_v55, %v14149_v0  ;;  %6476 = vmatprep.mubr.bf16.mxu0 %v2222_v47  ;;  %v10832_v12 = vadd.f32 %v10831_v3, %v10830_v54 }
 0x176   : > { %v10722_v9 = vpop.f32.mrf.mxu0  ;;  %v10833_v22 = vpop.f32.mrf.mxu1  ;;  %6630 = vmatmul.mubr.bf16.gmra.mxu1 %v2177_v57  ;;  %v2270_v57 = vpack.c.bf16 %v1350_v34, %v1304_v32  ;;  %v2269_v34 = vpack.c.bf16 %v1349_v16, %v1303_v15  ;;  %v1488_v15 = vld [vmem:[%s13675_s16 + $0x25b8] sm:$0xff]  ;;  %v1534_v16 = vld [vmem:[%s13675_s16 + $0x2728] sm:$0xff] }
 0x177   : > { %v10723_v21 = vadd.f32 %v10722_v9, %v10721_v1  ;;  %v14486_v28 = vadd.f32 %v10832_v12, %v6080_v6  ;;  %6637 = vmatprep.mubr.bf16.mxu1 %v2224_v48  ;;  %v2267_v9 = vpack.c.bf16 %v1347_v50, %v1301_v49  ;;  %v1532_v49 = vld [vmem:[%s13675_s16 + $0x2718] sm:$0xff] }
 0x178   : > { %v10724_v23 = vpop.f32.mrf.mxu0  ;;  %v10834_v30 = vpop.f32.mrf.mxu1 }
 0x179   : > { %v6085_v0 = vadd.f32 %v10723_v21, %v14156_v19  ;;  %v10835_v39 = vadd.f32 %v10834_v30, %v10833_v22  ;;  %v1394_v19 = vld [vmem:[%s13675_s16 + $0x22c8] sm:$0xff] }
 0x17a   : > { %v10725_v40 = vpop.f32.mrf.mxu0  ;;  %v10836_v45 = vpop.f32.mrf.mxu1  ;;  %v2314_v22 = vpack.c.bf16 %v1440_v59, %v1394_v19  ;;  %v1395_v59 = vld [vmem:[%s13675_s16 + $0x22d0] sm:$0xff] }
 0x17b   : > { %v10726_v47 = vadd.f32 %v10725_v40, %v10724_v23  ;;  %v14493_v55 = vadd.f32 %v10835_v39, %v6085_v0  ;;  %v1396_v23 = vld [vmem:[%s13675_s16 + $0x22d8] sm:$0xff]  ;;  %v1393_v39 = vld [vmem:[%s13675_s16 + $0x22c0] sm:$0xff]  ;;  %v1439_v40 = vld [vmem:[%s13675_s16 + $0x2430] sm:$0xff] }
 0x17c   : > { %v10727_v54 = vpop.f32.mrf.mxu0  ;;  %6477 = vmatmul.mubr.bf16.gmra.mxu0 %v2221_v26  ;;  %v10837_v1 = vpop.f32.mrf.mxu1  ;;  %v1442_v26 = vld [vmem:[%s13675_s16 + $0x2448] sm:$0xff] }
 0x17d   : > { %v6088_v60 = vadd.f32 %v10726_v47, %v14161_v33  ;;  %6484 = vmatprep.mubr.bf16.mxu0 %v2268_v31  ;;  %v10838_v48 = vadd.f32 %v10837_v1, %v10836_v45 }
 0x17e   : > { %v10728_v2 = vpop.f32.mrf.mxu0  ;;  %v10839_v6 = vpop.f32.mrf.mxu1  ;;  %6638 = vmatmul.mubr.bf16.gmra.mxu1 %v2223_v38  ;;  %v1486_v38 = vld [vmem:[%s13675_s16 + $0x25a8] sm:$0xff] }
 0x17f   : > { %v10729_v5 = vadd.f32 %v10728_v2, %v10727_v54  ;;  %v14498_v3 = vadd.f32 %v10838_v48, %v6088_v60  ;;  %6645 = vmatprep.mubr.bf16.mxu1 %v2270_v57  ;;  %v1441_v60 = vld [vmem:[%s13675_s16 + $0x2440] sm:$0xff] }
 0x180   : > { %v10730_v12 = vpop.f32.mrf.mxu0  ;;  %v10840_v21 = vpop.f32.mrf.mxu1 }
 0x181   : > { %v6093_v33 = vadd.f32 %v10729_v5, %v14170_v53  ;;  %v10841_v0 = vadd.f32 %v10840_v21, %v10839_v6  ;;  %v2316_v53 = vpack.c.bf16 %v1442_v26, %v1396_v23  ;;  %v2313_v6 = vpack.c.bf16 %v1439_v40, %v1393_v39  ;;  %v1578_v39 = vld [vmem:[%s13675_s16 + $0x2888] sm:$0xff] }
 0x182   : > { %v10731_v30 = vpop.f32.mrf.mxu0  ;;  %v10842_v32 = vpop.f32.mrf.mxu1  ;;  %v2315_v26 = vpack.c.bf16 %v1441_v60, %v1395_v59  ;;  %v1487_v59 = vld [vmem:[%s13675_s16 + $0x25b0] sm:$0xff]  ;;  %v1533_v60 = vld [vmem:[%s13675_s16 + $0x2720] sm:$0xff] }
 0x183   : > { %v10732_v31 = vadd.f32 %v10731_v30, %v10730_v12  ;;  %v14507_v47 = vadd.f32 %v10841_v0, %v6093_v33  ;;  %v1485_v0 = vld [vmem:[%s13675_s16 + $0x25a0] sm:$0xff] }
 0x184   : > { %v10733_v45 = vpop.f32.mrf.mxu0  ;;  %6485 = vmatmul.mubr.bf16.gmra.mxu0 %v2267_v9  ;;  %v10843_v54 = vpop.f32.mrf.mxu1  ;;  %v2360_v9 = vpack.c.bf16 %v1532_v49, %v1486_v38  ;;  %v1624_v49 = vld [vmem:[%s13675_s16 + $0x29f8] sm:$0xff] }
 0x185   : > { %v6096_v50 = vadd.f32 %v10732_v31, %v14177_v7  ;;  %6492 = vmatprep.mubr.bf16.mxu0 %v2314_v22  ;;  %v10844_v57 = vadd.f32 %v10843_v54, %v10842_v32  ;;  %v1531_v32 = vld [vmem:[%s13675_s16 + $0x2710] sm:$0xff] }
 0x186   : > { %v10734_v19 = vpop.f32.mrf.mxu0  ;;  %v10845_v48 = vpop.f32.mrf.mxu1  ;;  %6646 = vmatmul.mubr.bf16.gmra.mxu1 %v2269_v34  ;;  %v2362_v34 = vpack.c.bf16 %v1534_v16, %v1488_v15 }
 0x187   : > { %v10735_v1 = vadd.f32 %v10734_v19, %v10733_v45  ;;  %v14514_v2 = vadd.f32 %v10844_v57, %v6096_v50  ;;  %6653 = vmatprep.mubr.bf16.mxu1 %v2316_v53  ;;  %v13297_v45 = vld [vmem:[%s17572_s2 + $0x4f8] sm:$0xff]  }
 0x188   : > { %v10736_v5 = vpop.f32.mrf.mxu0  ;;  %v10846_v12 = vpop.f32.mrf.mxu1  ;;  %11483 = vmatprep.subr.bf16.mxu1 %v13297_v45  ;;  %v1716_v45 = vld [vmem:[%s13675_s16 + $0x2cd8] sm:$0xff] }
 0x189   : > { %v6101_v7 = vadd.f32 %v10735_v1, %v14183_v25  ;;  %v10847_v33 = vadd.f32 %v10846_v12, %v10845_v48 }
 0x18a   : > { %v10737_v21 = vpop.f32.mrf.mxu0  ;;  %v10848_v23 = vpop.f32.mrf.mxu1 }
 0x18b   : > { %v10738_v22 = vadd.f32 %v10737_v21, %v10736_v5  ;;  %v14520_v30 = vadd.f32 %v10847_v33, %v6101_v7  ;;  %v2406_v5 = vpack.c.bf16 %v1624_v49, %v1578_v39  ;;  %v1626_v7 = vld [vmem:[%s13675_s16 + $0x2a08] sm:$0xff]  ;;  %v2361_v33 = vpack.c.bf16 %v1533_v60, %v1487_v59  ;;  %v1672_v59 = vld [vmem:[%s13675_s16 + $0x2b78] sm:$0xff] }
 0x18c   : > { %v10739_v31 = vpop.f32.mrf.mxu0  ;;  %6493 = vmatmul.mubr.bf16.gmra.mxu0 %v2313_v6  ;;  %v10849_v40 = vpop.f32.mrf.mxu1  ;;  %v1580_v6 = vld [vmem:[%s13675_s16 + $0x2898] sm:$0xff]  ;;  %v1718_v60 = vld [vmem:[%s13675_s16 + $0x2ce8] sm:$0xff] }
 0x18d   : > { %v6104_v25 = vadd.f32 %v10738_v22, %v14192_v42  ;;  %6500 = vmatprep.mubr.bf16.mxu0 %v2360_v9  ;;  %v10850_v53 = vadd.f32 %v10849_v40, %v10848_v23  ;;  %v2359_v42 = vpack.c.bf16 %v1531_v32, %v1485_v0  ;;  %v1577_v23 = vld [vmem:[%s13675_s16 + $0x2880] sm:$0xff]  ;;  %v1670_v32 = vld [vmem:[%s13675_s16 + $0x2b68] sm:$0xff] }
 0x18e   : > { %v10740_v38 = vpop.f32.mrf.mxu0  ;;  %v10851_v54 = vpop.f32.mrf.mxu1  ;;  %6654 = vmatmul.mubr.bf16.gmra.mxu1 %v2315_v26  ;;  %v1623_v26 = vld [vmem:[%s13675_s16 + $0x29f0] sm:$0xff]  ;;  %v1625_v40 = vld [vmem:[%s13675_s16 + $0x2a00] sm:$0xff] }
 0x18f   : > { %v10741_v50 = vadd.f32 %v10740_v38, %v10739_v31  ;;  %v14529_v57 = vadd.f32 %v10850_v53, %v6104_v25  ;;  %6661 = vmatprep.mubr.bf16.mxu1 %v2362_v34  ;;  %v1579_v25 = vld [vmem:[%s13675_s16 + $0x2890] sm:$0xff] }
 0x190   : > { %v10742_v19 = vpop.f32.mrf.mxu0  ;;  %v10852_v48 = vpop.f32.mrf.mxu1 }
 0x191   : > { %v6109_v1 = vadd.f32 %v10741_v50, %v14199_v61  ;;  %v10853_v12 = vadd.f32 %v10852_v48, %v10851_v54  ;;  %v2408_v61 = vpack.c.bf16 %v1626_v7, %v1580_v6  ;;  %v2405_v54 = vpack.c.bf16 %v1623_v26, %v1577_v23  ;;  %v294_v23 = vld [vmem:[%s13675_s16 + $0x68] sm:$0xff] }
 0x192   : > { %v10743_v9 = vpop.f32.mrf.mxu0  ;;  %v10854_v16 = vpop.f32.mrf.mxu1  ;;  %v2407_v7 = vpack.c.bf16 %v1625_v40, %v1579_v25  ;;  %v1671_v40 = vld [vmem:[%s13675_s16 + $0x2b70] sm:$0xff] }
 0x193   : > { %v10744_v15 = vadd.f32 %v10743_v9, %v10742_v19  ;;  %v14536_v21 = vadd.f32 %v10853_v12, %v6109_v1 }
 0x194   : > { %v10745_v22 = vpop.f32.mrf.mxu0  ;;  %6501 = vmatmul.mubr.bf16.gmra.mxu0 %v2359_v42  ;;  %v10855_v31 = vpop.f32.mrf.mxu1  ;;  %v2452_v42 = vpack.c.bf16 %v1716_v45, %v1670_v32 }
 0x195   : > { %v6112_v0 = vadd.f32 %v10744_v15, %v14208_v20  ;;  %6508 = vmatprep.mubr.bf16.mxu0 %v2406_v5  ;;  %v10856_v34 = vadd.f32 %v10855_v31, %v10854_v16  ;;  %v1669_v15 = vld [vmem:[%s13675_s16 + $0x2b60] sm:$0xff]  ;;  %v1715_v16 = vld [vmem:[%s13675_s16 + $0x2cd0] sm:$0xff] }
 0x196   : > { %v10746_v39 = vpop.f32.mrf.mxu0  ;;  %v10857_v38 = vpop.f32.mrf.mxu1  ;;  %6662 = vmatmul.mubr.bf16.gmra.mxu1 %v2361_v33  ;;  %v2454_v33 = vpack.c.bf16 %v1718_v60, %v1672_v59  ;;  %v2451_v25 = vpack.c.bf16 %v1715_v16, %v1669_v15  ;;  %v386_v15 = vld [vmem:[%s13675_s16 + $0x348] sm:$0xff] }
 0x197   : > { %v10747_v53 = vadd.f32 %v10746_v39, %v10745_v22  ;;  %v14545_v49 = vadd.f32 %v10856_v34, %v6112_v0  ;;  %6669 = vmatprep.mubr.bf16.mxu1 %v2408_v61  ;;  %v340_v0 = vld [vmem:[%s13675_s16 + $0x1d8] sm:$0xff] }
 0x198   : > { %v10748_v50 = vpop.f32.mrf.mxu0  ;;  %v10858_v19 = vpop.f32.mrf.mxu1 }
 0x199   : > { %v6117_v20 = vadd.f32 %v10747_v53, %v14213_v37  ;;  %v10859_v1 = vadd.f32 %v10858_v19, %v10857_v38  ;;  %v1766_v38 = vpack.c.bf16 %v340_v0, %v294_v23  ;;  %v432_v23 = vld [vmem:[%s13675_s16 + $0x4b8] sm:$0xff] }
 0x19a   : > { %v10749_v48 = vpop.f32.mrf.mxu0  ;;  %v10860_v6 = vpop.f32.mrf.mxu1 }
 0x19b   : > { %v10750_v5 = vadd.f32 %v10749_v48, %v10748_v50  ;;  %v14550_v12 = vadd.f32 %v10859_v1, %v6117_v20  ;;  %v296_v50 = vld [vmem:[%s13675_s16 + $0x78] sm:$0xff] }
 0x19c   : > { %v10751_v9 = vpop.f32.mrf.mxu0  ;;  %6509 = vmatmul.mubr.bf16.gmra.mxu0 %v2405_v54  ;;  %v10861_v22 = vpop.f32.mrf.mxu1  ;;  %v342_v54 = vld [vmem:[%s13675_s16 + $0x1e8] sm:$0xff] }
 0x19d   : > { %v6120_v37 = vadd.f32 %v10750_v5, %v14220_v56  ;;  %6516 = vmatprep.mubr.bf16.mxu0 %v2452_v42  ;;  %v10862_v26 = vadd.f32 %v10861_v22, %v10860_v6  ;;  %v1717_v56 = vld [vmem:[%s13675_s16 + $0x2ce0] sm:$0xff]  ;;  %v339_v6 = vld [vmem:[%s13675_s16 + $0x1d0] sm:$0xff] }
 0x19e   : > { %v10752_v61 = vpop.f32.mrf.mxu0  ;;  %v10863_v32 = vpop.f32.mrf.mxu1  ;;  %6670 = vmatmul.mubr.bf16.gmra.mxu1 %v2407_v7  ;;  %v2453_v60 = vpack.c.bf16 %v1717_v56, %v1671_v40  ;;  %v293_v5 = vld [vmem:[%s13675_s16 + $0x60] sm:$0xff]  ;;  %v1812_v40 = vpack.c.bf16 %v432_v23, %v386_v15  ;;  %v388_v56 = vld [vmem:[%s13675_s16 + $0x358] sm:$0xff]  ;;  %v13299_v15 = vld [vmem:[%s17572_s2 + $0x4f0] sm:$0xff]  }
 0x19f   : > { %v10753_v31 = vadd.f32 %v10752_v61, %v10751_v9  ;;  %v14557_v34 = vadd.f32 %v10862_v26, %v6120_v37  ;;  %6677 = vmatprep.mubr.bf16.mxu1 %v2454_v33  ;;  %v295_v37 = vld [vmem:[%s13675_s16 + $0x70] sm:$0xff]  ;;  %v341_v22 = vld [vmem:[%s13675_s16 + $0x1e0] sm:$0xff] }
 0x1a0   : > { %v10754_v39 = vpop.f32.mrf.mxu0  ;;  %v10864_v53 = vpop.f32.mrf.mxu1  ;;  %v387_v23 = vld [vmem:[%s13675_s16 + $0x350] sm:$0xff] }
 0x1a1   : > { %v6125_v45 = vadd.f32 %v10753_v31, %v14227_v14  ;;  %v10865_v20 = vadd.f32 %v10864_v53, %v10863_v32  ;;  %v1768_v14 = vpack.c.bf16 %v342_v54, %v296_v50  ;;  %v1765_v32 = vpack.c.bf16 %v339_v6, %v293_v5  ;;  %v13285_v50 = vld [vmem:[%s17572_s2 + $0x470] sm:$0xff]   ;;  %v478_v6 = vld [vmem:[%s13675_s16 + $0x628] sm:$0xff] }
 0x1a2   : > { %v10755_v19 = vpop.f32.mrf.mxu0  ;;  %v10866_v59 = vpop.f32.mrf.mxu1 }
 0x1a3   : > { %v10756_v42 = vadd.f32 %v10755_v19, %v10754_v39  ;;  %v14564_v1 = vadd.f32 %v10865_v20, %v6125_v45  ;;  %v434_v45 = vld [vmem:[%s13675_s16 + $0x4c8] sm:$0xff]  ;;  %v1767_v19 = vpack.c.bf16 %v341_v22, %v295_v37 }
 0x1a4   : > { %v10757_v48 = vpop.f32.mrf.mxu0  ;;  %6517 = vmatmul.mubr.bf16.gmra.mxu0 %v2451_v25  ;;  %v10867_v9 = vpop.f32.mrf.mxu1  ;;  %v13284_v25 = vld [vmem:[%s17572_s2 + $0x438] sm:$0xff]   ;;  %v1814_v5 = vpack.c.bf16 %v434_v45, %v388_v56 }
 0x1a5   : > { %v6128_v7 = vadd.f32 %v10756_v42, %v14236_v36  ;;  %6718 = vmatprep.mubr.bf16.mxu0 %v1766_v38  ;;  %v10868_v16 = vadd.f32 %v10867_v9, %v10866_v59  ;;  %v431_v42 = vld [vmem:[%s13675_s16 + $0x4b0] sm:$0xff]  ;;  %v13298_v9 = vld [vmem:[%s17572_s2 + $0x4b8] sm:$0xff]  }
 0x1a6   : > { %v10758_v33 = vpop.f32.mrf.mxu0  ;;  %v10869_v61 = vpop.f32.mrf.mxu1  ;;  %6678 = vmatmul.mubr.bf16.gmra.mxu1 %v2453_v60  ;;  %v13286_v59 = vld [vmem:[%s17572_s2 + $0x430] sm:$0xff]   ;;  %v480_v56 = vld [vmem:[%s13675_s16 + $0x638] sm:$0xff] }
 0x1a7   : > { %v10759_v26 = vadd.f32 %v10758_v33, %v10757_v48  ;;  %v14573_v0 = vadd.f32 %v10868_v16, %v6128_v7  ;;  %6879 = vmatprep.mubr.bf16.mxu1 %v1768_v14  ;;  %v524_v14 = vld [vmem:[%s13675_s16 + $0x798] sm:$0xff]  ;;  %v13287_v7 = vld [vmem:[%s17572_s2 + $0x468] sm:$0xff]  }
 0x1a8   : > { %v10760_v31 = vpop.f32.mrf.mxu0  ;;  %v10870_v39 = vpop.f32.mrf.mxu1  ;;  %v1858_v45 = vpack.c.bf16 %v524_v14, %v478_v6 }
 0x1a9   : > { %v6133_v36 = vadd.f32 %v10759_v26, %v14252_v62  ;;  %v10871_v53 = vadd.f32 %v10870_v39, %v10869_v61  ;;  %v385_v62 = vld [vmem:[%s13675_s16 + $0x340] sm:$0xff] }
 0x1aa   : > { %v10761_v38 = vpop.f32.mrf.mxu0  ;;  %v10872_v20 = vpop.f32.mrf.mxu1  ;;  %v433_v26 = vld [vmem:[%s13675_s16 + $0x4c0] sm:$0xff]  ;;  %v1811_v39 = vpack.c.bf16 %v431_v42, %v385_v62 }
 0x1ab   : > { %v10762_v54 = vadd.f32 %v10761_v38, %v10760_v31  ;;  %v14589_v60 = vadd.f32 %v10871_v53, %v6133_v36  ;;  %v526_v53 = vld [vmem:[%s13675_s16 + $0x7a8] sm:$0xff]  ;;  %v1813_v42 = vpack.c.bf16 %v433_v26, %v387_v23 }
 0x1ac   : > { %v10763_v48 = vpop.f32.mrf.mxu0  ;;  %6719 = vmatmul.mubr.bf16.vlgmr.msra.gmra.mxu0 %v1765_v32  ;;  %v10873_v33 = vpop.f32.mrf.mxu1  ;;  %v13288_v38 = vld [vmem:[%s17572_s2 + $0x428] sm:$0xff]  }
 0x1ad   : > { %v6136_v16 = vadd.f32 %v10762_v54, %v14270_v24  ;;  %11372 = vmatpush3.bf16.msra.mxu0 %v13284_v25  ;;  %6726 = vmatprep.mubr.bf16.mxu0 %v1812_v40  ;;  %v10874_v37 = vadd.f32 %v10873_v33, %v10872_v20  ;;  %v13300_v24 = vld [vmem:[%s17572_s2 + $0x4b0] sm:$0xff]   ;;  %v13289_v20 = vld [vmem:[%s17572_s2 + $0x460] sm:$0xff]   ;;  %v13302_v33 = vld [vmem:[%s17572_s2 + $0x4a8] sm:$0xff]  }
 0x1ae   : > { %v10764_v22 = vpop.f32.mrf.mxu0  ;;  %11373 = vmatprep.subr.bf16.mxu0 %v13285_v50  ;;  %v10875_v31 = vpop.f32.mrf.mxu1  ;;  %6880 = vmatmul.mubr.bf16.vlgmr.msra.gmra.mxu1 %v1767_v19 }
 0x1af   : > { %v10765_v61 = vadd.f32 %v10764_v22, %v10763_v48  ;;  %v14605_v32 = vadd.f32 %v10874_v37, %v6136_v16  ;;  %6887 = vmatprep.mubr.bf16.mxu1 %v1814_v5  ;;  %11484 = vmatpush3.bf16.msra.mxu1 %v13298_v9  ;;  %v523_v48 = vld [vmem:[%s13675_s16 + $0x790] sm:$0xff]  ;;  %v13290_v5 = vld [vmem:[%s17572_s2 + $0x420] sm:$0xff]   ;;  %v570_v9 = vld [vmem:[%s13675_s16 + $0x908] sm:$0xff] }
 0x1b0   : > { %v10766_v36 = vpop.f32.mrf.mxu0  ;;  %v10876_v40 = vpop.f32.mrf.mxu1  ;;  %11485 = vmatprep.subr.bf16.mxu1 %v13299_v15  ;;  %v616_v15 = vld [vmem:[%s13675_s16 + $0xa78] sm:$0xff]  ;;  %v13303_v37 = vld [vmem:[%s17572_s2 + $0x4e0] sm:$0xff]  }
 0x1b1   : > { %v6141_v25 = vadd.f32 %v10765_v61, %v14293_v52  ;;  %11374 = vmatpush3.bf16.msra.mxu0 %v13286_v59  ;;  %v10877_v50 = vadd.f32 %v10876_v40, %v10875_v31  ;;  %v13301_v52 = vld [vmem:[%s17572_s2 + $0x4e8] sm:$0xff]   ;;  %v477_v59 = vld [vmem:[%s13675_s16 + $0x620] sm:$0xff]  ;;  %v13291_v16 = vld [vmem:[%s17572_s2 + $0x458] sm:$0xff]  }
 0x1b2   : > { %v10767_v54 = vpop.f32.mrf.mxu0  ;;  %11375 = vmatprep.subr.bf16.mxu0 %v13287_v7  ;;  %v10878_v62 = vpop.f32.mrf.mxu1  ;;  %v1860_v7 = vpack.c.bf16 %v526_v53, %v480_v56  ;;  %v479_v31 = vld [vmem:[%s13675_s16 + $0x630] sm:$0xff] }
 0x1b3   : > { %v10768_v19 = vadd.f32 %v10767_v54, %v10766_v36  ;;  %v14627_v6 = vadd.f32 %v10877_v50, %v6141_v25  ;;  %11486 = vmatpush3.bf16.msra.mxu1 %v13300_v24  ;;  %v525_v36 = vld [vmem:[%s13675_s16 + $0x7a0] sm:$0xff]  ;;  %v572_v25 = vld [vmem:[%s13675_s16 + $0x918] sm:$0xff]  ;;  %v1904_v50 = vpack.c.bf16 %v616_v15, %v570_v9  ;;  %v618_v54 = vld [vmem:[%s13675_s16 + $0xa88] sm:$0xff] }
 0x1b4   : > { %v10769_v14 = vpop.f32.mrf.mxu0  ;;  %6727 = vmatmul.mubr.bf16.gmra.mxu0 %v1811_v39  ;;  %v10879_v23 = vpop.f32.mrf.mxu1  ;;  %11487 = vmatprep.subr.bf16.mxu1 %v13301_v52  ;;  %v13304_v39 = vld [vmem:[%s17572_s2 + $0x4a0] sm:$0xff]  }
 0x1b5   : > { %v6144_v22 = vadd.f32 %v10768_v19, %v14318_v18  ;;  %6734 = vmatprep.mubr.bf16.mxu0 %v1858_v45  ;;  %11376 = vmatpush3.bf16.msra.mxu0 %v13288_v38  ;;  %v10880_v26 = vadd.f32 %v10879_v23, %v10878_v62  ;;  %v1857_v45 = vpack.c.bf16 %v523_v48, %v477_v59  ;;  %v13293_v62 = vld [vmem:[%s17572_s2 + $0x450] sm:$0xff]   ;;  %v13308_v23 = vld [vmem:[%s17572_s2 + $0x498] sm:$0xff]  }
 0x1b6   : > { %v10770_v61 = vpop.f32.mrf.mxu0  ;;  %11377 = vmatprep.subr.bf16.mxu0 %v13289_v20  ;;  %v10881_v24 = vpop.f32.mrf.mxu1  ;;  %6888 = vmatmul.mubr.bf16.gmra.mxu1 %v1813_v42  ;;  %v13292_v20 = vld [vmem:[%s17572_s2 + $0x418] sm:$0xff]   ;;  %v1859_v48 = vpack.c.bf16 %v525_v36, %v479_v31 }
 0x1b7   : > { %v10771_v56 = vadd.f32 %v10770_v61, %v10769_v14  ;;  %v14647_v40 = vadd.f32 %v10880_v26, %v6144_v22  ;;  %6895 = vmatprep.mubr.bf16.mxu1 %v1860_v7  ;;  %11488 = vmatpush3.bf16.msra.mxu1 %v13302_v33  ;;  %v615_v14 = vld [vmem:[%s13675_s16 + $0xa70] sm:$0xff]  ;;  %v662_v33 = vld [vmem:[%s13675_s16 + $0xbe8] sm:$0xff] }
 0x1b8   : > { %v10772_v18 = vpop.f32.mrf.mxu0  ;;  %v10882_v38 = vpop.f32.mrf.mxu1  ;;  %11489 = vmatprep.subr.bf16.mxu1 %v13303_v37  ;;  %v13294_v7 = vld [vmem:[%s17572_s2 + $0x410] sm:$0xff]   ;;  %v708_v37 = vld [vmem:[%s13675_s16 + $0xd58] sm:$0xff]  ;;  %v13295_v22 = vld [vmem:[%s17572_s2 + $0x448] sm:$0xff]  }
 0x1b9   : > { %v6149_v53 = vadd.f32 %v10771_v56, %v14338_v46  ;;  %11378 = vmatpush3.bf16.msra.mxu0 %v13290_v5  ;;  %v10883_v52 = vadd.f32 %v10882_v38, %v10881_v24  ;;  %v13307_v46 = vld [vmem:[%s17572_s2 + $0x4d8] sm:$0xff]   ;;  %v569_v5 = vld [vmem:[%s13675_s16 + $0x900] sm:$0xff]  ;;  %v13309_v26 = vld [vmem:[%s17572_s2 + $0x4d0] sm:$0xff]  }
 0x1ba   : > { %v10773_v19 = vpop.f32.mrf.mxu0  ;;  %11379 = vmatprep.subr.bf16.mxu0 %v13291_v16  ;;  %v10884_v59 = vpop.f32.mrf.mxu1  ;;  %v1906_v16 = vpack.c.bf16 %v618_v54, %v572_v25  ;;  %v571_v24 = vld [vmem:[%s13675_s16 + $0x910] sm:$0xff]  ;;  %v617_v25 = vld [vmem:[%s13675_s16 + $0xa80] sm:$0xff]  ;;  %v1903_v38 = vpack.c.bf16 %v615_v14, %v569_v5 }
 0x1bb   : > { %v10774_v42 = vadd.f32 %v10773_v19, %v10772_v18  ;;  %v14665_v9 = vadd.f32 %v10883_v52, %v6149_v53  ;;  %11490 = vmatpush3.bf16.msra.mxu1 %v13304_v39  ;;  %v1950_v52 = vpack.c.bf16 %v708_v37, %v662_v33  ;;  %v710_v19 = vld [vmem:[%s13675_s16 + $0xd68] sm:$0xff]  ;;  %v1905_v14 = vpack.c.bf16 %v617_v25, %v571_v24 }
 0x1bc   : > { %v10775_v15 = vpop.f32.mrf.mxu0  ;;  %6735 = vmatmul.mubr.bf16.gmra.mxu0 %v1857_v45  ;;  %v10885_v31 = vpop.f32.mrf.mxu1  ;;  %11491 = vmatprep.subr.bf16.mxu1 %v13307_v46  ;;  %v13312_v33 = vld [vmem:[%s17572_s2 + $0x488] sm:$0xff]  }
 0x1bd   : > { %v6152_v61 = vadd.f32 %v10774_v42, %v14359_v11  ;;  %6742 = vmatprep.mubr.bf16.mxu0 %v1904_v50  ;;  %11380 = vmatpush3.bf16.msra.mxu0 %v13292_v20  ;;  %v10886_v36 = vadd.f32 %v10885_v31, %v10884_v59  ;;  %v664_v11 = vld [vmem:[%s13675_s16 + $0xbf8] sm:$0xff]  ;;  %v13310_v50 = vld [vmem:[%s17572_s2 + $0x490] sm:$0xff]   ;;  %v13305_v59 = vld [vmem:[%s17572_s2 + $0x440] sm:$0xff]  }
 0x1be   : > { %v10776_v56 = vpop.f32.mrf.mxu0  ;;  %11381 = vmatprep.subr.bf16.mxu0 %v13293_v62  ;;  %v10887_v18 = vpop.f32.mrf.mxu1  ;;  %6896 = vmatmul.mubr.bf16.gmra.mxu1 %v1859_v48  ;;  %v13296_v62 = vld [vmem:[%s17572_s2 + $0x408] sm:$0xff]   ;;  %v13313_v31 = vld [vmem:[%s17572_s2 + $0x4c0] sm:$0xff]  }
 0x1bf   : > { %v10777_v39 = vadd.f32 %v10776_v56, %v10775_v15  ;;  %v14681_v45 = vadd.f32 %v10886_v36, %v6152_v61  ;;  %6903 = vmatprep.mubr.bf16.mxu1 %v1906_v16  ;;  %11492 = vmatpush3.bf16.msra.mxu1 %v13308_v23  ;;  %v707_v15 = vld [vmem:[%s13675_s16 + $0xd50] sm:$0xff]  ;;  %v13306_v16 = vld [vmem:[%s17572_s2 + $0x400] sm:$0xff]   ;;  %v1952_v23 = vpack.c.bf16 %v710_v19, %v664_v11  ;;  %v800_v61 = vld [vmem:[%s13675_s16 + $0x1038] sm:$0xff] }
 0x1c0   : > { %v10778_v53 = vpop.f32.mrf.mxu0  ;;  %v10888_v20 = vpop.f32.mrf.mxu1  ;;  %11493 = vmatprep.subr.bf16.mxu1 %v13309_v26  ;;  %v754_v26 = vld [vmem:[%s13675_s16 + $0xec8] sm:$0xff]  ;;  %v13315_v36 = vld [vmem:[%s17572_s2 + $0x578] sm:$0xff]  }
 0x1c1   : > { %v6157_v54 = vadd.f32 %v10777_v39, %v14386_v44  ;;  %11382 = vmatpush3.bf16.msra.mxu0 %v13294_v7  ;;  %v10889_v46 = vadd.f32 %v10888_v20, %v10887_v18  ;;  %v13311_v44 = vld [vmem:[%s17572_s2 + $0x4c8] sm:$0xff]   ;;  %v661_v7 = vld [vmem:[%s13675_s16 + $0xbe0] sm:$0xff]  ;;  %v663_v18 = vld [vmem:[%s13675_s16 + $0xbf0] sm:$0xff] }
 0x1c2   : > { %v10779_v42 = vpop.f32.mrf.mxu0  ;;  %11383 = vmatprep.subr.bf16.mxu0 %v13295_v22  ;;  %v10890_v5 = vpop.f32.mrf.mxu1  ;;  %v1949_v20 = vpack.c.bf16 %v707_v15, %v661_v7  ;;  %v753_v7 = vld [vmem:[%s13675_s16 + $0xec0] sm:$0xff]  ;;  %v799_v15 = vld [vmem:[%s13675_s16 + $0x1030] sm:$0xff] }
 0x1c3   : > { %v10780_v48 = vadd.f32 %v10779_v42, %v10778_v53  ;;  %v14706_v37 = vadd.f32 %v10889_v46, %v6157_v54  ;;  %11494 = vmatpush3.bf16.msra.mxu1 %v13310_v50  ;;  %v709_v53 = vld [vmem:[%s13675_s16 + $0xd60] sm:$0xff]  ;;  %v756_v46 = vld [vmem:[%s13675_s16 + $0xed8] sm:$0xff]  ;;  %v802_v42 = vld [vmem:[%s13675_s16 + $0x1048] sm:$0xff] }
 0x1c4   : > { %v10781_v22 = vpop.f32.mrf.mxu0  ;;  %6743 = vmatmul.mubr.bf16.gmra.mxu0 %v1903_v38  ;;  %v10891_v24 = vpop.f32.mrf.mxu1  ;;  %11495 = vmatprep.subr.bf16.mxu1 %v13311_v44  ;;  %v13314_v38 = vld [vmem:[%s17572_s2 + $0x480] sm:$0xff]  }
 0x1c5   : > { %v6160_v56 = vadd.f32 %v10780_v48, %v14403_v10  ;;  %6750 = vmatprep.mubr.bf16.mxu0 %v1950_v52  ;;  %11384 = vmatpush3.bf16.msra.mxu0 %v13296_v62  ;;  %v10892_v25 = vadd.f32 %v10891_v24, %v10890_v5  ;;  %v1996_v62 = vpack.c.bf16 %v800_v61, %v754_v26  ;;  %v892_v26 = vld [vmem:[%s13675_s16 + $0x1318] sm:$0xff] }
 0x1c6   : > { %v10782_v39 = vpop.f32.mrf.mxu0  ;;  %11385 = vmatprep.subr.bf16.mxu0 %v13305_v59  ;;  %v10893_v50 = vpop.f32.mrf.mxu1  ;;  %6904 = vmatmul.mubr.bf16.gmra.mxu1 %v1905_v14  ;;  %v1951_v14 = vpack.c.bf16 %v709_v53, %v663_v18  ;;  %v1995_v18 = vpack.c.bf16 %v799_v15, %v753_v7  ;;  %v755_v53 = vld [vmem:[%s13675_s16 + $0xed0] sm:$0xff]  ;;  %v984_v7 = vld [vmem:[%s13675_s16 + $0x15f8] sm:$0xff] }
 0x1c7   : > { %v10783_v11 = vadd.f32 %v10782_v39, %v10781_v22  ;;  %v14722_v54 = vadd.f32 %v10892_v25, %v6160_v56  ;;  %6911 = vmatprep.mubr.bf16.mxu1 %v1952_v23  ;;  %11496 = vmatpush3.bf16.msra.mxu1 %v13312_v33  ;;  %v846_v23 = vld [vmem:[%s13675_s16 + $0x11a8] sm:$0xff] }
 0x1c8   : > { %v10784_v10 = vpop.f32.mrf.mxu0  ;;  %v10894_v19 = vpop.f32.mrf.mxu1  ;;  %11497 = vmatprep.subr.bf16.mxu1 %v13313_v31 }
 0x1c9   : > { %v6165_v52 = vadd.f32 %v10783_v11, %v14410_v35  ;;  %11386 = vmatpush3.bf16.msra.mxu0 %v13306_v16  ;;  %v10895_v59 = vadd.f32 %v10894_v19, %v10893_v50  ;;  %v1998_v35 = vpack.c.bf16 %v802_v42, %v756_v46  ;;  %v2042_v50 = vpack.c.bf16 %v892_v26, %v846_v23  ;;  %v847_v26 = vld [vmem:[%s13675_s16 + $0x11b0] sm:$0xff] }
 0x1ca   : > { %v10785_v44 = vpop.f32.mrf.mxu0  ;;  %11595 = vmatprep.subr.bf16.mxu0 %v13315_v36  ;;  %v10896_v5 = vpop.f32.mrf.mxu1 }
 0x1cb   : > { %v10786_v48 = vadd.f32 %v10785_v44, %v10784_v10  ;;  %v14729_v22 = vadd.f32 %v10895_v59, %v6165_v52  ;;  %11498 = vmatpush3.bf16.msra.mxu1 %v13314_v38  ;;  %v801_v38 = vld [vmem:[%s13675_s16 + $0x1040] sm:$0xff]  ;;  %v848_v10 = vld [vmem:[%s13675_s16 + $0x11b8] sm:$0xff]  ;;  %v891_v44 = vld [vmem:[%s13675_s16 + $0x1310] sm:$0xff] }
 0x1cc   : > { %v10787_v33 = vpop.f32.mrf.mxu0  ;;  %6751 = vmatmul.mubr.bf16.gmra.mxu0 %v1949_v20  ;;  %v10897_v61 = vpop.f32.mrf.mxu1  ;;  %v894_v20 = vld [vmem:[%s13675_s16 + $0x1328] sm:$0xff]  ;;  %v1997_v42 = vpack.c.bf16 %v801_v38, %v755_v53  ;;  %v845_v59 = vld [vmem:[%s13675_s16 + $0x11a0] sm:$0xff]  ;;  %v940_v53 = vld [vmem:[%s13675_s16 + $0x1498] sm:$0xff] }
 0x1cd   : > { %v6168_v16 = vadd.f32 %v10786_v48, %v14415_v58  ;;  %6758 = vmatprep.mubr.bf16.mxu0 %v1996_v62  ;;  %v10898_v31 = vadd.f32 %v10897_v61, %v10896_v5  ;;  %v986_v38 = vld [vmem:[%s13675_s16 + $0x1608] sm:$0xff] }
 0x1ce   : > { %v10788_v36 = vpop.f32.mrf.mxu0  ;;  %v10899_v24 = vpop.f32.mrf.mxu1  ;;  %6912 = vmatmul.mubr.bf16.gmra.mxu1 %v1951_v14  ;;  %v938_v14 = vld [vmem:[%s13675_s16 + $0x1488] sm:$0xff] }
 0x1cf   : > { %v10789_v56 = vadd.f32 %v10788_v36, %v10787_v33  ;;  %v14734_v25 = vadd.f32 %v10898_v31, %v6168_v16  ;;  %6919 = vmatprep.mubr.bf16.mxu1 %v1998_v35  ;;  %v893_v16 = vld [vmem:[%s13675_s16 + $0x1320] sm:$0xff] }
 0x1d0   : > { %v10790_v39 = vpop.f32.mrf.mxu0  ;;  %v10900_v11 = vpop.f32.mrf.mxu1 }
 0x1d1   : > { %v6173_v58 = vadd.f32 %v10789_v56, %v14424_v27  ;;  %v10901_v52 = vadd.f32 %v10900_v11, %v10899_v24  ;;  %v2044_v27 = vpack.c.bf16 %v894_v20, %v848_v10  ;;  %v2041_v24 = vpack.c.bf16 %v891_v44, %v845_v59  ;;  %v1076_v59 = vld [vmem:[%s13675_s16 + $0x18d8] sm:$0xff] }
 0x1d2   : > { %v10791_v19 = vpop.f32.mrf.mxu0  ;;  %v10902_v46 = vpop.f32.mrf.mxu1  ;;  %v2043_v20 = vpack.c.bf16 %v893_v16, %v847_v26  ;;  %v939_v26 = vld [vmem:[%s13675_s16 + $0x1490] sm:$0xff]  ;;  %v985_v16 = vld [vmem:[%s13675_s16 + $0x1600] sm:$0xff] }
 0x1d3   : > { %v10792_v62 = vadd.f32 %v10791_v19, %v10790_v39  ;;  %v14743_v48 = vadd.f32 %v10901_v52, %v6173_v58  ;;  %v937_v52 = vld [vmem:[%s13675_s16 + $0x1480] sm:$0xff]  ;;  %v983_v19 = vld [vmem:[%s13675_s16 + $0x15f0] sm:$0xff] }
 0x1d4   : > { %v10793_v5 = vpop.f32.mrf.mxu0  ;;  %6759 = vmatmul.mubr.bf16.gmra.mxu0 %v1995_v18  ;;  %v10903_v33 = vpop.f32.mrf.mxu1  ;;  %v2088_v18 = vpack.c.bf16 %v984_v7, %v938_v14 }
 0x1d5   : > { %v6176_v15 = vadd.f32 %v10792_v62, %v14431_v51  ;;  %6766 = vmatprep.mubr.bf16.mxu0 %v2042_v50  ;;  %v10904_v35 = vadd.f32 %v10903_v33, %v10902_v46 }
 0x1d6   : > { %v10794_v23 = vpop.f32.mrf.mxu0  ;;  %v10905_v31 = vpop.f32.mrf.mxu1  ;;  %6920 = vmatmul.mubr.bf16.gmra.mxu1 %v1997_v42  ;;  %v2090_v42 = vpack.c.bf16 %v986_v38, %v940_v53  ;;  %v2089_v38 = vpack.c.bf16 %v985_v16, %v939_v26  ;;  %v1124_v26 = vld [vmem:[%s13675_s16 + $0x1a58] sm:$0xff]  ;;  %v1170_v16 = vld [vmem:[%s13675_s16 + $0x1bc8] sm:$0xff] }
 0x1d7   : > { %v10795_v61 = vadd.f32 %v10794_v23, %v10793_v5  ;;  %v14750_v36 = vadd.f32 %v10904_v35, %v6176_v15  ;;  %6927 = vmatprep.mubr.bf16.mxu1 %v2044_v27  ;;  %v2087_v23 = vpack.c.bf16 %v983_v19, %v937_v52  ;;  %v1168_v52 = vld [vmem:[%s13675_s16 + $0x1bb8] sm:$0xff] }
 0x1d8   : > { %v10796_v56 = vpop.f32.mrf.mxu0  ;;  %v10906_v39 = vpop.f32.mrf.mxu1 }
 0x1d9   : > { %v6181_v51 = vadd.f32 %v10795_v61, %v14438_v17  ;;  %v10907_v58 = vadd.f32 %v10906_v39, %v10905_v31  ;;  %v1030_v17 = vld [vmem:[%s13675_s16 + $0x1768] sm:$0xff] }
 0x1da   : > { %v10797_v11 = vpop.f32.mrf.mxu0  ;;  %v10908_v10 = vpop.f32.mrf.mxu1  ;;  %v2134_v31 = vpack.c.bf16 %v1076_v59, %v1030_v17  ;;  %v1031_v59 = vld [vmem:[%s13675_s16 + $0x1770] sm:$0xff] }
 0x1db   : > { %v10798_v50 = vadd.f32 %v10797_v11, %v10796_v56  ;;  %v14757_v62 = vadd.f32 %v10907_v58, %v6181_v51  ;;  %v1032_v56 = vld [vmem:[%s13675_s16 + $0x1778] sm:$0xff]  ;;  %v1029_v58 = vld [vmem:[%s13675_s16 + $0x1760] sm:$0xff]  ;;  %v1075_v11 = vld [vmem:[%s13675_s16 + $0x18d0] sm:$0xff] }
 0x1dc   : > { %v10799_v46 = vpop.f32.mrf.mxu0  ;;  %6767 = vmatmul.mubr.bf16.gmra.mxu0 %v2041_v24  ;;  %v10909_v5 = vpop.f32.mrf.mxu1  ;;  %v1078_v24 = vld [vmem:[%s13675_s16 + $0x18e8] sm:$0xff] }
 0x1dd   : > { %v6184_v44 = vadd.f32 %v10798_v50, %v14443_v43  ;;  %6774 = vmatprep.mubr.bf16.mxu0 %v2088_v18  ;;  %v10910_v27 = vadd.f32 %v10909_v5, %v10908_v10 }
 0x1de   : > { %v10800_v14 = vpop.f32.mrf.mxu0  ;;  %v10911_v15 = vpop.f32.mrf.mxu1  ;;  %6928 = vmatmul.mubr.bf16.gmra.mxu1 %v2043_v20  ;;  %v1122_v20 = vld [vmem:[%s13675_s16 + $0x1a48] sm:$0xff] }
 0x1df   : > { %v10801_v7 = vadd.f32 %v10800_v14, %v10799_v46  ;;  %v14762_v33 = vadd.f32 %v10910_v27, %v6184_v44  ;;  %6935 = vmatprep.mubr.bf16.mxu1 %v2090_v42  ;;  %v1077_v44 = vld [vmem:[%s13675_s16 + $0x18e0] sm:$0xff] }
 0x1e0   : > { %v10802_v35 = vpop.f32.mrf.mxu0  ;;  %v10912_v61 = vpop.f32.mrf.mxu1 }
 0x1e1   : > { %v6189_v43 = vadd.f32 %v10801_v7, %v14452_v13  ;;  %v10913_v51 = vadd.f32 %v10912_v61, %v10911_v15  ;;  %v2136_v13 = vpack.c.bf16 %v1078_v24, %v1032_v56  ;;  %v2133_v15 = vpack.c.bf16 %v1075_v11, %v1029_v58  ;;  %v1260_v58 = vld [vmem:[%s13675_s16 + $0x1e98] sm:$0xff] }
 0x1e2   : > { %v10803_v39 = vpop.f32.mrf.mxu0  ;;  %v10914_v53 = vpop.f32.mrf.mxu1  ;;  %v2135_v24 = vpack.c.bf16 %v1077_v44, %v1031_v59  ;;  %v1123_v59 = vld [vmem:[%s13675_s16 + $0x1a50] sm:$0xff]  ;;  %v1169_v44 = vld [vmem:[%s13675_s16 + $0x1bc0] sm:$0xff] }
 0x1e3   : > { %v10804_v18 = vadd.f32 %v10803_v39, %v10802_v35  ;;  %v14771_v50 = vadd.f32 %v10913_v51, %v6189_v43  ;;  %v1121_v51 = vld [vmem:[%s13675_s16 + $0x1a40] sm:$0xff]  ;;  %v1167_v39 = vld [vmem:[%s13675_s16 + $0x1bb0] sm:$0xff] }
 0x1e4   : > { %v10805_v10 = vpop.f32.mrf.mxu0  ;;  %6775 = vmatmul.mubr.bf16.gmra.mxu0 %v2087_v23  ;;  %v10915_v46 = vpop.f32.mrf.mxu1  ;;  %v2180_v23 = vpack.c.bf16 %v1168_v52, %v1122_v20 }
 0x1e5   : > { %v6192_v19 = vadd.f32 %v10804_v18, %v14459_v41  ;;  %6782 = vmatprep.mubr.bf16.mxu0 %v2134_v31  ;;  %v10916_v42 = vadd.f32 %v10915_v46, %v10914_v53 }
 0x1e6   : > { %v10806_v17 = vpop.f32.mrf.mxu0  ;;  %v10917_v27 = vpop.f32.mrf.mxu1  ;;  %6936 = vmatmul.mubr.bf16.gmra.mxu1 %v2089_v38  ;;  %v2182_v38 = vpack.c.bf16 %v1170_v16, %v1124_v26  ;;  %v2181_v16 = vpack.c.bf16 %v1169_v44, %v1123_v59  ;;  %v1308_v59 = vld [vmem:[%s13675_s16 + $0x2018] sm:$0xff]  ;;  %v1354_v44 = vld [vmem:[%s13675_s16 + $0x2188] sm:$0xff] }
 0x1e7   : > { %v10807_v5 = vadd.f32 %v10806_v17, %v10805_v10  ;;  %v14778_v14 = vadd.f32 %v10916_v42, %v6192_v19  ;;  %6943 = vmatprep.mubr.bf16.mxu1 %v2136_v13  ;;  %v2179_v17 = vpack.c.bf16 %v1167_v39, %v1121_v51  ;;  %v1352_v51 = vld [vmem:[%s13675_s16 + $0x2178] sm:$0xff] }
 0x1e8   : > { %v10808_v7 = vpop.f32.mrf.mxu0  ;;  %v10918_v35 = vpop.f32.mrf.mxu1 }
 0x1e9   : > { %v6197_v41 = vadd.f32 %v10807_v5, %v14466_v8  ;;  %v10919_v43 = vadd.f32 %v10918_v35, %v10917_v27  ;;  %v1214_v8 = vld [vmem:[%s13675_s16 + $0x1d28] sm:$0xff] }
 0x1ea   : > { %v10809_v61 = vpop.f32.mrf.mxu0  ;;  %v10920_v56 = vpop.f32.mrf.mxu1  ;;  %v2226_v27 = vpack.c.bf16 %v1260_v58, %v1214_v8  ;;  %v1215_v58 = vld [vmem:[%s13675_s16 + $0x1d30] sm:$0xff] }
 0x1eb   : > { %v10810_v31 = vadd.f32 %v10809_v61, %v10808_v7  ;;  %v14785_v18 = vadd.f32 %v10919_v43, %v6197_v41  ;;  %v1216_v7 = vld [vmem:[%s13675_s16 + $0x1d38] sm:$0xff]  ;;  %v1213_v43 = vld [vmem:[%s13675_s16 + $0x1d20] sm:$0xff]  ;;  %v1259_v61 = vld [vmem:[%s13675_s16 + $0x1e90] sm:$0xff] }
 0x1ec   : > { %v10939_v53 = vpop.f32.mrf.mxu0  ;;  %6783 = vmatmul.mubr.bf16.gmra.mxu0 %v2133_v15  ;;  %v10921_v10 = vpop.f32.mrf.mxu1  ;;  %v1262_v15 = vld [vmem:[%s13675_s16 + $0x1ea8] sm:$0xff] }
 0x1ed   : > { %v6200_v11 = vadd.f32 %v10810_v31, %v14470_v29  ;;  %6790 = vmatprep.mubr.bf16.mxu0 %v2180_v23  ;;  %v10922_v13 = vadd.f32 %v10921_v10, %v10920_v56 }
 0x1ee   : > { %v10940_v20 = vpop.f32.mrf.mxu0  ;;  %v11051_v19 = vpop.f32.mrf.mxu1  ;;  %6944 = vmatmul.mubr.bf16.gmra.mxu1 %v2135_v24  ;;  %v1306_v24 = vld [vmem:[%s13675_s16 + $0x2008] sm:$0xff] }
 0x1ef   : > { %v10941_v52 = vadd.f32 %v10940_v20, %v10939_v53  ;;  %v14790_v46 = vadd.f32 %v10922_v13, %v6200_v11  ;;  %6951 = vmatprep.mubr.bf16.mxu1 %v2182_v38  ;;  %v1261_v11 = vld [vmem:[%s13675_s16 + $0x1ea0] sm:$0xff] }
 0x1f0   : > { %v10942_v42 = vpop.f32.mrf.mxu0  ;;  %v11052_v5 = vpop.f32.mrf.mxu1 }
 0x1f1   : > { %v6399_v29 = vadd.f32 %v10941_v52, %v14479_v63  ;;  %v11053_v41 = vadd.f32 %v11052_v5, %v11051_v19  ;;  %v2228_v63 = vpack.c.bf16 %v1262_v15, %v1216_v7  ;;  %v2225_v19 = vpack.c.bf16 %v1259_v61, %v1213_v43  ;;  %v1444_v43 = vld [vmem:[%s13675_s16 + $0x2458] sm:$0xff] }
 0x1f2   : > { %v10943_v35 = vpop.f32.mrf.mxu0  ;;  %v11054_v26 = vpop.f32.mrf.mxu1  ;;  %v2227_v15 = vpack.c.bf16 %v1261_v11, %v1215_v58  ;;  %v1307_v58 = vld [vmem:[%s13675_s16 + $0x2010] sm:$0xff]  ;;  %v1353_v11 = vld [vmem:[%s13675_s16 + $0x2180] sm:$0xff] }
 0x1f3   : > { %v10944_v23 = vadd.f32 %v10943_v35, %v10942_v42  ;;  %v14799_v31 = vadd.f32 %v11053_v41, %v6399_v29  ;;  %v1305_v41 = vld [vmem:[%s13675_s16 + $0x2000] sm:$0xff]  ;;  %v1351_v35 = vld [vmem:[%s13675_s16 + $0x2170] sm:$0xff] }
 0x1f4   : > { %v10945_v56 = vpop.f32.mrf.mxu0  ;;  %6791 = vmatmul.mubr.bf16.gmra.mxu0 %v2179_v17  ;;  %v11055_v53 = vpop.f32.mrf.mxu1  ;;  %v2272_v17 = vpack.c.bf16 %v1352_v51, %v1306_v24 }
 0x1f5   : > { %v6402_v39 = vadd.f32 %v10944_v23, %v14486_v28  ;;  %6798 = vmatprep.mubr.bf16.mxu0 %v2226_v27  ;;  %v11056_v38 = vadd.f32 %v11055_v53, %v11054_v26 }
 0x1f6   : > { %v10946_v8 = vpop.f32.mrf.mxu0  ;;  %v11057_v13 = vpop.f32.mrf.mxu1  ;;  %6952 = vmatmul.mubr.bf16.gmra.mxu1 %v2181_v16  ;;  %v2274_v16 = vpack.c.bf16 %v1354_v44, %v1308_v59  ;;  %v2273_v44 = vpack.c.bf16 %v1353_v11, %v1307_v58  ;;  %v1492_v58 = vld [vmem:[%s13675_s16 + $0x25d8] sm:$0xff]  ;;  %v1538_v11 = vld [vmem:[%s13675_s16 + $0x2748] sm:$0xff] }
 0x1f7   : > { %v10947_v10 = vadd.f32 %v10946_v8, %v10945_v56  ;;  %v14806_v20 = vadd.f32 %v11056_v38, %v6402_v39  ;;  %6959 = vmatprep.mubr.bf16.mxu1 %v2228_v63  ;;  %v2271_v8 = vpack.c.bf16 %v1351_v35, %v1305_v41  ;;  %v1536_v41 = vld [vmem:[%s13675_s16 + $0x2738] sm:$0xff] }
 0x1f8   : > { %v10948_v52 = vpop.f32.mrf.mxu0  ;;  %v11058_v42 = vpop.f32.mrf.mxu1 }
 0x1f9   : > { %v6407_v28 = vadd.f32 %v10947_v10, %v14493_v55  ;;  %v11059_v29 = vadd.f32 %v11058_v42, %v11057_v13  ;;  %v1398_v55 = vld [vmem:[%s13675_s16 + $0x22e8] sm:$0xff] }
 0x1fa   : > { %v10949_v5 = vpop.f32.mrf.mxu0  ;;  %v11060_v7 = vpop.f32.mrf.mxu1  ;;  %v2318_v13 = vpack.c.bf16 %v1444_v43, %v1398_v55  ;;  %v1399_v43 = vld [vmem:[%s13675_s16 + $0x22f0] sm:$0xff] }
 0x1fb   : > { %v10950_v27 = vadd.f32 %v10949_v5, %v10948_v52  ;;  %v14813_v23 = vadd.f32 %v11059_v29, %v6407_v28  ;;  %v1400_v52 = vld [vmem:[%s13675_s16 + $0x22f8] sm:$0xff]  ;;  %v1397_v29 = vld [vmem:[%s13675_s16 + $0x22e0] sm:$0xff]  ;;  %v1443_v5 = vld [vmem:[%s13675_s16 + $0x2450] sm:$0xff] }
 0x1fc   : > { %v10951_v26 = vpop.f32.mrf.mxu0  ;;  %6799 = vmatmul.mubr.bf16.gmra.mxu0 %v2225_v19  ;;  %v11061_v56 = vpop.f32.mrf.mxu1  ;;  %v1446_v19 = vld [vmem:[%s13675_s16 + $0x2468] sm:$0xff] }
 0x1fd   : > { %v6410_v61 = vadd.f32 %v10950_v27, %v14498_v3  ;;  %6806 = vmatprep.mubr.bf16.mxu0 %v2272_v17  ;;  %v11062_v63 = vadd.f32 %v11061_v56, %v11060_v7 }
 0x1fe   : > { %v10952_v24 = vpop.f32.mrf.mxu0  ;;  %v11063_v39 = vpop.f32.mrf.mxu1  ;;  %6960 = vmatmul.mubr.bf16.gmra.mxu1 %v2227_v15  ;;  %v1490_v15 = vld [vmem:[%s13675_s16 + $0x25c8] sm:$0xff] }
 0x1ff   : > { %v10953_v51 = vadd.f32 %v10952_v24, %v10951_v26  ;;  %v14818_v53 = vadd.f32 %v11062_v63, %v6410_v61  ;;  %6967 = vmatprep.mubr.bf16.mxu1 %v2274_v16  ;;  %v1445_v61 = vld [vmem:[%s13675_s16 + $0x2460] sm:$0xff] }
 0x200   : > { %v10954_v38 = vpop.f32.mrf.mxu0  ;;  %v11064_v10 = vpop.f32.mrf.mxu1 }
 0x201   : > { %v6415_v3 = vadd.f32 %v10953_v51, %v14507_v47  ;;  %v11065_v28 = vadd.f32 %v11064_v10, %v11063_v39  ;;  %v2320_v47 = vpack.c.bf16 %v1446_v19, %v1400_v52  ;;  %v2317_v39 = vpack.c.bf16 %v1443_v5, %v1397_v29  ;;  %v1582_v29 = vld [vmem:[%s13675_s16 + $0x28a8] sm:$0xff] }
 0x202   : > { %v10955_v42 = vpop.f32.mrf.mxu0  ;;  %v11066_v59 = vpop.f32.mrf.mxu1  ;;  %v2319_v19 = vpack.c.bf16 %v1445_v61, %v1399_v43  ;;  %v1491_v43 = vld [vmem:[%s13675_s16 + $0x25d0] sm:$0xff]  ;;  %v1537_v61 = vld [vmem:[%s13675_s16 + $0x2740] sm:$0xff] }
 0x203   : > { %v10956_v17 = vadd.f32 %v10955_v42, %v10954_v38  ;;  %v14827_v27 = vadd.f32 %v11065_v28, %v6415_v3  ;;  %v1489_v28 = vld [vmem:[%s13675_s16 + $0x25c0] sm:$0xff] }
 0x204   : > { %v10957_v7 = vpop.f32.mrf.mxu0  ;;  %6807 = vmatmul.mubr.bf16.gmra.mxu0 %v2271_v8  ;;  %v11067_v26 = vpop.f32.mrf.mxu1  ;;  %v2364_v8 = vpack.c.bf16 %v1536_v41, %v1490_v15  ;;  %v1628_v41 = vld [vmem:[%s13675_s16 + $0x2a18] sm:$0xff] }
 0x205   : > { %v6418_v35 = vadd.f32 %v10956_v17, %v14514_v2  ;;  %6814 = vmatprep.mubr.bf16.mxu0 %v2318_v13  ;;  %v11068_v16 = vadd.f32 %v11067_v26, %v11066_v59  ;;  %v1535_v59 = vld [vmem:[%s13675_s16 + $0x2730] sm:$0xff] }
 0x206   : > { %v10958_v55 = vpop.f32.mrf.mxu0  ;;  %v11069_v63 = vpop.f32.mrf.mxu1  ;;  %6968 = vmatmul.mubr.bf16.gmra.mxu1 %v2273_v44  ;;  %v2366_v44 = vpack.c.bf16 %v1538_v11, %v1492_v58 }
 0x207   : > { %v10959_v56 = vadd.f32 %v10958_v55, %v10957_v7  ;;  %v14834_v24 = vadd.f32 %v11068_v16, %v6418_v35  ;;  %6975 = vmatprep.mubr.bf16.mxu1 %v2320_v47  ;;  %v13329_v7 = vld [vmem:[%s17572_s2 + $0x5f8] sm:$0xff]  }
 0x208   : > { %v10960_v51 = vpop.f32.mrf.mxu0  ;;  %v11070_v38 = vpop.f32.mrf.mxu1  ;;  %11707 = vmatprep.subr.bf16.mxu1 %v13329_v7 }
 0x209   : > { %v6423_v2 = vadd.f32 %v10959_v56, %v14520_v30  ;;  %v11071_v3 = vadd.f32 %v11070_v38, %v11069_v63 }
 0x20a   : > { %v10961_v10 = vpop.f32.mrf.mxu0  ;;  %v11072_v52 = vpop.f32.mrf.mxu1 }
 0x20b   : > { %v10962_v13 = vadd.f32 %v10961_v10, %v10960_v51  ;;  %v14840_v42 = vadd.f32 %v11071_v3, %v6423_v2  ;;  %v2410_v51 = vpack.c.bf16 %v1628_v41, %v1582_v29  ;;  %v1630_v2 = vld [vmem:[%s13675_s16 + $0x2a28] sm:$0xff]  ;;  %v2365_v3 = vpack.c.bf16 %v1537_v61, %v1491_v43  ;;  %v1676_v43 = vld [vmem:[%s13675_s16 + $0x2b98] sm:$0xff] }
 0x20c   : > { %v10963_v17 = vpop.f32.mrf.mxu0  ;;  %6815 = vmatmul.mubr.bf16.gmra.mxu0 %v2317_v39  ;;  %v11073_v5 = vpop.f32.mrf.mxu1  ;;  %v1584_v39 = vld [vmem:[%s13675_s16 + $0x28b8] sm:$0xff]  ;;  %v1674_v29 = vld [vmem:[%s13675_s16 + $0x2b88] sm:$0xff] }
 0x20d   : > { %v6426_v30 = vadd.f32 %v10962_v13, %v14529_v57  ;;  %6822 = vmatprep.mubr.bf16.mxu0 %v2364_v8  ;;  %v11074_v47 = vadd.f32 %v11073_v5, %v11072_v52  ;;  %v2363_v57 = vpack.c.bf16 %v1535_v59, %v1489_v28  ;;  %v1581_v52 = vld [vmem:[%s13675_s16 + $0x28a0] sm:$0xff]  ;;  %v1722_v61 = vld [vmem:[%s13675_s16 + $0x2d08] sm:$0xff] }
 0x20e   : > { %v10964_v15 = vpop.f32.mrf.mxu0  ;;  %v11075_v26 = vpop.f32.mrf.mxu1  ;;  %6976 = vmatmul.mubr.bf16.gmra.mxu1 %v2319_v19  ;;  %v2412_v19 = vpack.c.bf16 %v1630_v2, %v1584_v39 }
 0x20f   : > { %v10965_v35 = vadd.f32 %v10964_v15, %v10963_v17  ;;  %v14849_v16 = vadd.f32 %v11074_v47, %v6426_v30  ;;  %6983 = vmatprep.mubr.bf16.mxu1 %v2366_v44  ;;  %v1627_v17 = vld [vmem:[%s13675_s16 + $0x2a10] sm:$0xff]  ;;  %v1720_v30 = vld [vmem:[%s13675_s16 + $0x2cf8] sm:$0xff] }
 0x210   : > { %v10966_v55 = vpop.f32.mrf.mxu0  ;;  %v11076_v63 = vpop.f32.mrf.mxu1  ;;  %v2409_v41 = vpack.c.bf16 %v1627_v17, %v1581_v52 }
 0x211   : > { %v6431_v56 = vadd.f32 %v10965_v35, %v14536_v21  ;;  %v11077_v38 = vadd.f32 %v11076_v63, %v11075_v26  ;;  %v1583_v35 = vld [vmem:[%s13675_s16 + $0x28b0] sm:$0xff] }
 0x212   : > { %v10967_v8 = vpop.f32.mrf.mxu0  ;;  %v11078_v11 = vpop.f32.mrf.mxu1 }
 0x213   : > { %v10968_v58 = vadd.f32 %v10967_v8, %v10966_v55  ;;  %v14856_v10 = vadd.f32 %v11077_v38, %v6431_v56 }
 0x214   : > { %v10969_v13 = vpop.f32.mrf.mxu0  ;;  %6823 = vmatmul.mubr.bf16.gmra.mxu0 %v2363_v57  ;;  %v11079_v28 = vpop.f32.mrf.mxu1  ;;  %v2456_v57 = vpack.c.bf16 %v1720_v30, %v1674_v29 }
 0x215   : > { %v6434_v21 = vadd.f32 %v10968_v58, %v14545_v49  ;;  %6830 = vmatprep.mubr.bf16.mxu0 %v2410_v51  ;;  %v11080_v59 = vadd.f32 %v11079_v28, %v11078_v11  ;;  %v1629_v49 = vld [vmem:[%s13675_s16 + $0x2a20] sm:$0xff]  ;;  %v2458_v58 = vpack.c.bf16 %v1722_v61, %v1676_v43  ;;  %v344_v28 = vld [vmem:[%s13675_s16 + $0x1f8] sm:$0xff] }
 0x216   : > { %v10970_v44 = vpop.f32.mrf.mxu0  ;;  %v11081_v7 = vpop.f32.mrf.mxu1  ;;  %6984 = vmatmul.mubr.bf16.gmra.mxu1 %v2365_v3  ;;  %v2411_v2 = vpack.c.bf16 %v1629_v49, %v1583_v35  ;;  %v1673_v3 = vld [vmem:[%s13675_s16 + $0x2b80] sm:$0xff]  ;;  %v300_v35 = vld [vmem:[%s13675_s16 + $0x98] sm:$0xff]  ;;  %v346_v49 = vld [vmem:[%s13675_s16 + $0x208] sm:$0xff] }
 0x217   : > { %v10971_v5 = vadd.f32 %v10970_v44, %v10969_v13  ;;  %v14863_v47 = vadd.f32 %v11080_v59, %v6434_v21  ;;  %6991 = vmatprep.mubr.bf16.mxu1 %v2412_v19  ;;  %v1719_v13 = vld [vmem:[%s13675_s16 + $0x2cf0] sm:$0xff]  ;;  %v298_v21 = vld [vmem:[%s13675_s16 + $0x88] sm:$0xff] }
 0x218   : > { %v10972_v15 = vpop.f32.mrf.mxu0  ;;  %v11082_v55 = vpop.f32.mrf.mxu1  ;;  %v2455_v30 = vpack.c.bf16 %v1719_v13, %v1673_v3  ;;  %v436_v3 = vld [vmem:[%s13675_s16 + $0x4d8] sm:$0xff] }
 0x219   : > { %v6439_v26 = vadd.f32 %v10971_v5, %v14550_v12  ;;  %v11083_v56 = vadd.f32 %v11082_v55, %v11081_v7  ;;  %v1721_v5 = vld [vmem:[%s13675_s16 + $0x2d00] sm:$0xff] }
 0x21a   : > { %v10973_v63 = vpop.f32.mrf.mxu0  ;;  %v11084_v39 = vpop.f32.mrf.mxu1 }
 0x21b   : > { %v10974_v51 = vadd.f32 %v10973_v63, %v10972_v15  ;;  %v14870_v38 = vadd.f32 %v11083_v56, %v6439_v26 }
 0x21c   : > { %v10975_v8 = vpop.f32.mrf.mxu0  ;;  %6831 = vmatmul.mubr.bf16.gmra.mxu0 %v2409_v41  ;;  %v11085_v11 = vpop.f32.mrf.mxu1  ;;  %v1770_v41 = vpack.c.bf16 %v344_v28, %v298_v21 }
 0x21d   : > { %v6442_v12 = vadd.f32 %v10974_v51, %v14557_v34  ;;  %6838 = vmatprep.mubr.bf16.mxu0 %v2456_v57  ;;  %v11086_v52 = vadd.f32 %v11085_v11, %v11084_v39  ;;  %v1675_v34 = vld [vmem:[%s13675_s16 + $0x2b90] sm:$0xff]  ;;  %v1772_v51 = vpack.c.bf16 %v346_v49, %v300_v35  ;;  %v390_v11 = vld [vmem:[%s13675_s16 + $0x368] sm:$0xff] }
 0x21e   : > { %v10976_v19 = vpop.f32.mrf.mxu0  ;;  %v11087_v59 = vpop.f32.mrf.mxu1  ;;  %6992 = vmatmul.mubr.bf16.gmra.mxu1 %v2411_v2  ;;  %v2457_v61 = vpack.c.bf16 %v1721_v5, %v1675_v34  ;;  %v297_v2 = vld [vmem:[%s13675_s16 + $0x80] sm:$0xff]  ;;  %v1816_v34 = vpack.c.bf16 %v436_v3, %v390_v11  ;;  %v392_v5 = vld [vmem:[%s13675_s16 + $0x378] sm:$0xff]  ;;  %v13317_v35 = vld [vmem:[%s17572_s2 + $0x570] sm:$0xff]  }
 0x21f   : > { %v10977_v17 = vadd.f32 %v10976_v19, %v10975_v8  ;;  %v14877_v44 = vadd.f32 %v11086_v52, %v6442_v12  ;;  %6999 = vmatprep.mubr.bf16.mxu1 %v2458_v58  ;;  %v343_v8 = vld [vmem:[%s13675_s16 + $0x1f0] sm:$0xff]  ;;  %v482_v11 = vld [vmem:[%s13675_s16 + $0x648] sm:$0xff]  ;;  %v528_v3 = vld [vmem:[%s13675_s16 + $0x7b8] sm:$0xff] }
 0x220   : > { %v10978_v29 = vpop.f32.mrf.mxu0  ;;  %v11088_v15 = vpop.f32.mrf.mxu1  ;;  %v1769_v28 = vpack.c.bf16 %v343_v8, %v297_v2  ;;  %v13318_v2 = vld [vmem:[%s17572_s2 + $0x530] sm:$0xff]  }
 0x221   : > { %v6447_v7 = vadd.f32 %v10977_v17, %v14564_v1  ;;  %v11089_v26 = vadd.f32 %v11088_v15, %v11087_v59  ;;  %v345_v17 = vld [vmem:[%s13675_s16 + $0x200] sm:$0xff]  ;;  %v13331_v8 = vld [vmem:[%s17572_s2 + $0x5f0] sm:$0xff]  }
 0x222   : > { %v10979_v55 = vpop.f32.mrf.mxu0  ;;  %v11090_v43 = vpop.f32.mrf.mxu1 }
 0x223   : > { %v10980_v57 = vadd.f32 %v10979_v55, %v10978_v29  ;;  %v14884_v56 = vadd.f32 %v11089_v26, %v6447_v7  ;;  %v438_v7 = vld [vmem:[%s13675_s16 + $0x4e8] sm:$0xff] }
 0x224   : > { %v10981_v63 = vpop.f32.mrf.mxu0  ;;  %6839 = vmatmul.mubr.bf16.gmra.mxu0 %v2455_v30  ;;  %v11091_v39 = vpop.f32.mrf.mxu1  ;;  %v13316_v30 = vld [vmem:[%s17572_s2 + $0x538] sm:$0xff]  }
 0x225   : > { %v6450_v1 = vadd.f32 %v10980_v57, %v14573_v0  ;;  %7040 = vmatprep.mubr.bf16.mxu0 %v1770_v41  ;;  %v11092_v58 = vadd.f32 %v11091_v39, %v11090_v43  ;;  %v299_v0 = vld [vmem:[%s13675_s16 + $0x90] sm:$0xff]  ;;  %v389_v43 = vld [vmem:[%s13675_s16 + $0x360] sm:$0xff] }
 0x226   : > { %v10982_v12 = vpop.f32.mrf.mxu0  ;;  %v11093_v52 = vpop.f32.mrf.mxu1  ;;  %7000 = vmatmul.mubr.bf16.gmra.mxu1 %v2457_v61  ;;  %v1771_v55 = vpack.c.bf16 %v345_v17, %v299_v0  ;;  %v1818_v61 = vpack.c.bf16 %v438_v7, %v392_v5  ;;  %v435_v39 = vld [vmem:[%s13675_s16 + $0x4d0] sm:$0xff]  ;;  %v1862_v5 = vpack.c.bf16 %v528_v3, %v482_v11  ;;  %v484_v7 = vld [vmem:[%s13675_s16 + $0x658] sm:$0xff]  ;;  %v13335_v11 = vld [vmem:[%s17572_s2 + $0x5e0] sm:$0xff]  }
 0x227   : > { %v10983_v13 = vadd.f32 %v10982_v12, %v10981_v63  ;;  %v14891_v19 = vadd.f32 %v11092_v58, %v6450_v1  ;;  %7201 = vmatprep.mubr.bf16.mxu1 %v1772_v51  ;;  %v13330_v63 = vld [vmem:[%s17572_s2 + $0x5b8] sm:$0xff]   ;;  %v1815_v0 = vpack.c.bf16 %v435_v39, %v389_v43  ;;  %v391_v17 = vld [vmem:[%s13675_s16 + $0x370] sm:$0xff]  ;;  %v13334_v39 = vld [vmem:[%s17572_s2 + $0x5a8] sm:$0xff]  }
 0x228   : > { %v10984_v21 = vpop.f32.mrf.mxu0  ;;  %v11094_v29 = vpop.f32.mrf.mxu1 }
 0x229   : > { %v6455_v59 = vadd.f32 %v10983_v13, %v14589_v60  ;;  %v11095_v15 = vadd.f32 %v11094_v29, %v11093_v52  ;;  %v13332_v29 = vld [vmem:[%s17572_s2 + $0x5b0] sm:$0xff]  }
 0x22a   : > { %v10985_v41 = vpop.f32.mrf.mxu0  ;;  %v11096_v26 = vpop.f32.mrf.mxu1 }
 0x22b   : > { %v10986_v49 = vadd.f32 %v10985_v41, %v10984_v21  ;;  %v14904_v60 = vadd.f32 %v11095_v15, %v6455_v59  ;;  %v437_v59 = vld [vmem:[%s13675_s16 + $0x4e0] sm:$0xff]  ;;  %v530_v15 = vld [vmem:[%s13675_s16 + $0x7c8] sm:$0xff] }
 0x22c   : > { %v10987_v57 = vpop.f32.mrf.mxu0  ;;  %7041 = vmatmul.mubr.bf16.vlgmr.msra.gmra.mxu0 %v1769_v28  ;;  %v11097_v1 = vpop.f32.mrf.mxu1  ;;  %v13320_v41 = vld [vmem:[%s17572_s2 + $0x528] sm:$0xff]   ;;  %v1817_v43 = vpack.c.bf16 %v437_v59, %v391_v17 }
 0x22d   : > { %v6458_v51 = vadd.f32 %v10986_v49, %v14605_v32  ;;  %11596 = vmatpush3.bf16.msra.mxu0 %v13316_v30  ;;  %7048 = vmatprep.mubr.bf16.mxu0 %v1816_v34  ;;  %v11098_v58 = vadd.f32 %v11097_v1, %v11096_v26  ;;  %v13319_v32 = vld [vmem:[%s17572_s2 + $0x568] sm:$0xff]   ;;  %v13321_v26 = vld [vmem:[%s17572_s2 + $0x560] sm:$0xff]   ;;  %v1864_v1 = vpack.c.bf16 %v530_v15, %v484_v7 }
 0x22e   : > { %v10988_v12 = vpop.f32.mrf.mxu0  ;;  %11597 = vmatprep.subr.bf16.mxu0 %v13317_v35  ;;  %v11099_v52 = vpop.f32.mrf.mxu1  ;;  %7202 = vmatmul.mubr.bf16.vlgmr.msra.gmra.mxu1 %v1771_v55 }
 0x22f   : > { %v10989_v13 = vadd.f32 %v10988_v12, %v10987_v57  ;;  %v14923_v21 = vadd.f32 %v11098_v58, %v6458_v51  ;;  %7209 = vmatprep.mubr.bf16.mxu1 %v1818_v61  ;;  %11708 = vmatpush3.bf16.msra.mxu1 %v13330_v63  ;;  %v481_v51 = vld [vmem:[%s13675_s16 + $0x640] sm:$0xff]  ;;  %v527_v58 = vld [vmem:[%s13675_s16 + $0x7b0] sm:$0xff] }
 0x230   : > { %v10990_v28 = vpop.f32.mrf.mxu0  ;;  %v11100_v34 = vpop.f32.mrf.mxu1  ;;  %11709 = vmatprep.subr.bf16.mxu1 %v13331_v8  ;;  %v13322_v12 = vld [vmem:[%s17572_s2 + $0x520] sm:$0xff]  }
 0x231   : > { %v6463_v30 = vadd.f32 %v10989_v13, %v14627_v6  ;;  %11598 = vmatpush3.bf16.msra.mxu0 %v13318_v2  ;;  %v11101_v35 = vadd.f32 %v11100_v34, %v11099_v52  ;;  %v13333_v6 = vld [vmem:[%s17572_s2 + $0x5e8] sm:$0xff]   ;;  %v620_v52 = vld [vmem:[%s13675_s16 + $0xa98] sm:$0xff]  ;;  %v529_v34 = vld [vmem:[%s13675_s16 + $0x7c0] sm:$0xff] }
 0x232   : > { %v10991_v49 = vpop.f32.mrf.mxu0  ;;  %11599 = vmatprep.subr.bf16.mxu0 %v13319_v32  ;;  %v11102_v57 = vpop.f32.mrf.mxu1  ;;  %v574_v13 = vld [vmem:[%s13675_s16 + $0x928] sm:$0xff] }
 0x233   : > { %v10992_v55 = vadd.f32 %v10991_v49, %v10990_v28  ;;  %v14942_v61 = vadd.f32 %v11101_v35, %v6463_v30  ;;  %11710 = vmatpush3.bf16.msra.mxu1 %v13332_v29  ;;  %v1861_v29 = vpack.c.bf16 %v527_v58, %v481_v51  ;;  %v483_v30 = vld [vmem:[%s13675_s16 + $0x650] sm:$0xff]  ;;  %v576_v35 = vld [vmem:[%s13675_s16 + $0x938] sm:$0xff]  ;;  %v622_v49 = vld [vmem:[%s13675_s16 + $0xaa8] sm:$0xff] }
 0x234   : > { %v10993_v63 = vpop.f32.mrf.mxu0  ;;  %7049 = vmatmul.mubr.bf16.gmra.mxu0 %v1815_v0  ;;  %v11103_v8 = vpop.f32.mrf.mxu1  ;;  %11711 = vmatprep.subr.bf16.mxu1 %v13333_v6  ;;  %v1863_v51 = vpack.c.bf16 %v529_v34, %v483_v30  ;;  %v13340_v58 = vld [vmem:[%s17572_s2 + $0x598] sm:$0xff]  }
 0x235   : > { %v6466_v2 = vadd.f32 %v10992_v55, %v14647_v40  ;;  %7056 = vmatprep.mubr.bf16.mxu0 %v1862_v5  ;;  %11600 = vmatpush3.bf16.msra.mxu0 %v13320_v41  ;;  %v11104_v3 = vadd.f32 %v11103_v8, %v11102_v57  ;;  %v13323_v40 = vld [vmem:[%s17572_s2 + $0x558] sm:$0xff]   ;;  %v13336_v5 = vld [vmem:[%s17572_s2 + $0x5a0] sm:$0xff]   ;;  %v1908_v41 = vpack.c.bf16 %v620_v52, %v574_v13  ;;  %v13325_v57 = vld [vmem:[%s17572_s2 + $0x550] sm:$0xff]  }
 0x236   : > { %v10994_v32 = vpop.f32.mrf.mxu0  ;;  %11601 = vmatprep.subr.bf16.mxu0 %v13321_v26  ;;  %v11105_v0 = vpop.f32.mrf.mxu1  ;;  %7210 = vmatmul.mubr.bf16.gmra.mxu1 %v1817_v43  ;;  %v13324_v26 = vld [vmem:[%s17572_s2 + $0x518] sm:$0xff]   ;;  %v1910_v8 = vpack.c.bf16 %v622_v49, %v576_v35  ;;  %v13341_v13 = vld [vmem:[%s17572_s2 + $0x5d0] sm:$0xff]  }
 0x237   : > { %v10995_v28 = vadd.f32 %v10994_v32, %v10993_v63  ;;  %v14961_v17 = vadd.f32 %v11104_v3, %v6466_v2  ;;  %7217 = vmatprep.mubr.bf16.mxu1 %v1864_v1  ;;  %11712 = vmatpush3.bf16.msra.mxu1 %v13334_v39  ;;  %v573_v2 = vld [vmem:[%s13675_s16 + $0x920] sm:$0xff]  ;;  %v619_v3 = vld [vmem:[%s13675_s16 + $0xa90] sm:$0xff] }
 0x238   : > { %v10996_v59 = vpop.f32.mrf.mxu0  ;;  %v11106_v15 = vpop.f32.mrf.mxu1  ;;  %11713 = vmatprep.subr.bf16.mxu1 %v13335_v11  ;;  %v13326_v32 = vld [vmem:[%s17572_s2 + $0x510] sm:$0xff]  }
 0x239   : > { %v6471_v7 = vadd.f32 %v10995_v28, %v14665_v9  ;;  %11602 = vmatpush3.bf16.msra.mxu0 %v13322_v12  ;;  %v11107_v6 = vadd.f32 %v11106_v15, %v11105_v0  ;;  %v13339_v9 = vld [vmem:[%s17572_s2 + $0x5d8] sm:$0xff]   ;;  %v666_v28 = vld [vmem:[%s13675_s16 + $0xc08] sm:$0xff]  ;;  %v621_v15 = vld [vmem:[%s13675_s16 + $0xaa0] sm:$0xff] }
 0x23a   : > { %v10997_v55 = vpop.f32.mrf.mxu0  ;;  %11603 = vmatprep.subr.bf16.mxu0 %v13323_v40  ;;  %v11108_v63 = vpop.f32.mrf.mxu1  ;;  %v712_v0 = vld [vmem:[%s13675_s16 + $0xd78] sm:$0xff] }
 0x23b   : > { %v10998_v43 = vadd.f32 %v10997_v55, %v10996_v59  ;;  %v14980_v1 = vadd.f32 %v11107_v6, %v6471_v7  ;;  %11714 = vmatpush3.bf16.msra.mxu1 %v13336_v5  ;;  %v1907_v5 = vpack.c.bf16 %v619_v3, %v573_v2  ;;  %v575_v7 = vld [vmem:[%s13675_s16 + $0x930] sm:$0xff]  ;;  %v668_v6 = vld [vmem:[%s13675_s16 + $0xc18] sm:$0xff]  ;;  %v714_v55 = vld [vmem:[%s13675_s16 + $0xd88] sm:$0xff] }
 0x23c   : > { %v10999_v39 = vpop.f32.mrf.mxu0  ;;  %7057 = vmatmul.mubr.bf16.gmra.mxu0 %v1861_v29  ;;  %v11109_v11 = vpop.f32.mrf.mxu1  ;;  %11715 = vmatprep.subr.bf16.mxu1 %v13339_v9  ;;  %v1909_v2 = vpack.c.bf16 %v621_v15, %v575_v7  ;;  %v13344_v3 = vld [vmem:[%s17572_s2 + $0x588] sm:$0xff]  }
 0x23d   : > { %v6474_v12 = vadd.f32 %v10998_v43, %v14681_v45  ;;  %7064 = vmatprep.mubr.bf16.mxu0 %v1908_v41  ;;  %11604 = vmatpush3.bf16.msra.mxu0 %v13324_v26  ;;  %v11110_v52 = vadd.f32 %v11109_v11, %v11108_v63  ;;  %v13327_v45 = vld [vmem:[%s17572_s2 + $0x548] sm:$0xff]   ;;  %v13342_v41 = vld [vmem:[%s17572_s2 + $0x590] sm:$0xff]   ;;  %v1954_v26 = vpack.c.bf16 %v712_v0, %v666_v28  ;;  %v13337_v63 = vld [vmem:[%s17572_s2 + $0x540] sm:$0xff]  }
 0x23e   : > { %v11000_v40 = vpop.f32.mrf.mxu0  ;;  %11605 = vmatprep.subr.bf16.mxu0 %v13325_v57  ;;  %v11111_v29 = vpop.f32.mrf.mxu1  ;;  %7218 = vmatmul.mubr.bf16.gmra.mxu1 %v1863_v51  ;;  %v13328_v57 = vld [vmem:[%s17572_s2 + $0x508] sm:$0xff]   ;;  %v1956_v11 = vpack.c.bf16 %v714_v55, %v668_v6  ;;  %v13345_v28 = vld [vmem:[%s17572_s2 + $0x5c0] sm:$0xff]  }
 0x23f   : > { %v11001_v59 = vadd.f32 %v11000_v40, %v10999_v39  ;;  %v14999_v30 = vadd.f32 %v11110_v52, %v6474_v12  ;;  %7225 = vmatprep.mubr.bf16.mxu1 %v1910_v8  ;;  %11716 = vmatpush3.bf16.msra.mxu1 %v13340_v58  ;;  %v665_v12 = vld [vmem:[%s13675_s16 + $0xc00] sm:$0xff]  ;;  %v711_v52 = vld [vmem:[%s13675_s16 + $0xd70] sm:$0xff] }
 0x240   : > { %v11002_v34 = vpop.f32.mrf.mxu0  ;;  %v11112_v49 = vpop.f32.mrf.mxu1  ;;  %11717 = vmatprep.subr.bf16.mxu1 %v13341_v13  ;;  %v13338_v40 = vld [vmem:[%s17572_s2 + $0x500] sm:$0xff]  }
 0x241   : > { %v6479_v35 = vadd.f32 %v11001_v59, %v14706_v37  ;;  %11606 = vmatpush3.bf16.msra.mxu0 %v13326_v32  ;;  %v11113_v9 = vadd.f32 %v11112_v49, %v11111_v29  ;;  %v13343_v37 = vld [vmem:[%s17572_s2 + $0x5c8] sm:$0xff]   ;;  %v804_v29 = vld [vmem:[%s13675_s16 + $0x1058] sm:$0xff]  ;;  %v713_v49 = vld [vmem:[%s13675_s16 + $0xd80] sm:$0xff] }
 0x242   : > { %v11003_v43 = vpop.f32.mrf.mxu0  ;;  %11607 = vmatprep.subr.bf16.mxu0 %v13327_v45  ;;  %v11114_v39 = vpop.f32.mrf.mxu1  ;;  %v758_v59 = vld [vmem:[%s13675_s16 + $0xee8] sm:$0xff] }
 0x243   : > { %v11004_v51 = vadd.f32 %v11003_v43, %v11002_v34  ;;  %v15018_v8 = vadd.f32 %v11113_v9, %v6479_v35  ;;  %11718 = vmatpush3.bf16.msra.mxu1 %v13342_v41  ;;  %v1953_v41 = vpack.c.bf16 %v711_v52, %v665_v12  ;;  %v667_v35 = vld [vmem:[%s13675_s16 + $0xc10] sm:$0xff]  ;;  %v760_v9 = vld [vmem:[%s13675_s16 + $0xef8] sm:$0xff]  ;;  %v806_v43 = vld [vmem:[%s13675_s16 + $0x1068] sm:$0xff] }
 0x244   : > { %v11005_v58 = vpop.f32.mrf.mxu0  ;;  %7065 = vmatmul.mubr.bf16.gmra.mxu0 %v1907_v5  ;;  %v11115_v13 = vpop.f32.mrf.mxu1  ;;  %11719 = vmatprep.subr.bf16.mxu1 %v13343_v37 }
 0x245   : > { %v6482_v32 = vadd.f32 %v11004_v51, %v14722_v54  ;;  %7072 = vmatprep.mubr.bf16.mxu0 %v1954_v26  ;;  %11608 = vmatpush3.bf16.msra.mxu0 %v13328_v57  ;;  %v11116_v0 = vadd.f32 %v11115_v13, %v11114_v39  ;;  %v13347_v54 = vld [vmem:[%s17572_s2 + $0x678] sm:$0xff]   ;;  %v13346_v26 = vld [vmem:[%s17572_s2 + $0x580] sm:$0xff]   ;;  %v2000_v57 = vpack.c.bf16 %v804_v29, %v758_v59  ;;  %v803_v13 = vld [vmem:[%s13675_s16 + $0x1050] sm:$0xff] }
 0x246   : > { %v11006_v45 = vpop.f32.mrf.mxu0  ;;  %11609 = vmatprep.subr.bf16.mxu0 %v13337_v63  ;;  %v11117_v5 = vpop.f32.mrf.mxu1  ;;  %7226 = vmatmul.mubr.bf16.gmra.mxu1 %v1909_v2  ;;  %v1955_v2 = vpack.c.bf16 %v713_v49, %v667_v35  ;;  %v852_v49 = vld [vmem:[%s13675_s16 + $0x11d8] sm:$0xff] }
 0x247   : > { %v11007_v34 = vadd.f32 %v11006_v45, %v11005_v58  ;;  %v15037_v7 = vadd.f32 %v11116_v0, %v6482_v32  ;;  %7233 = vmatprep.mubr.bf16.mxu1 %v1956_v11  ;;  %11720 = vmatpush3.bf16.msra.mxu1 %v13344_v3  ;;  %v757_v32 = vld [vmem:[%s13675_s16 + $0xee0] sm:$0xff]  ;;  %v896_v0 = vld [vmem:[%s13675_s16 + $0x1338] sm:$0xff] }
 0x248   : > { %v11008_v15 = vpop.f32.mrf.mxu0  ;;  %v11118_v55 = vpop.f32.mrf.mxu1  ;;  %11721 = vmatprep.subr.bf16.mxu1 %v13345_v28  ;;  %v850_v28 = vld [vmem:[%s13675_s16 + $0x11c8] sm:$0xff] }
 0x249   : > { %v6487_v6 = vadd.f32 %v11007_v34, %v14729_v22  ;;  %11610 = vmatpush3.bf16.msra.mxu0 %v13338_v40  ;;  %v11119_v63 = vadd.f32 %v11118_v55, %v11117_v5  ;;  %v2002_v22 = vpack.c.bf16 %v806_v43, %v760_v9  ;;  %v1999_v34 = vpack.c.bf16 %v803_v13, %v757_v32  ;;  %v805_v5 = vld [vmem:[%s13675_s16 + $0x1060] sm:$0xff]  ;;  %v988_v32 = vld [vmem:[%s13675_s16 + $0x1618] sm:$0xff] }
 0x24a   : > { %v11009_v37 = vpop.f32.mrf.mxu0  ;;  %11819 = vmatprep.subr.bf16.mxu0 %v13347_v54  ;;  %v11120_v39 = vpop.f32.mrf.mxu1  ;;  %v2046_v35 = vpack.c.bf16 %v896_v0, %v850_v28 }
 0x24b   : > { %v11010_v51 = vadd.f32 %v11009_v37, %v11008_v15  ;;  %v15047_v58 = vadd.f32 %v11119_v63, %v6487_v6  ;;  %11722 = vmatpush3.bf16.msra.mxu1 %v13346_v26  ;;  %v898_v26 = vld [vmem:[%s13675_s16 + $0x1348] sm:$0xff] }
 0x24c   : > { %v11011_v12 = vpop.f32.mrf.mxu0  ;;  %7073 = vmatmul.mubr.bf16.gmra.mxu0 %v1953_v41  ;;  %v11121_v3 = vpop.f32.mrf.mxu1 }
 0x24d   : > { %v6490_v11 = vadd.f32 %v11010_v51, %v14734_v25  ;;  %7080 = vmatprep.mubr.bf16.mxu0 %v2000_v57  ;;  %v11122_v52 = vadd.f32 %v11121_v3, %v11120_v39  ;;  %v759_v25 = vld [vmem:[%s13675_s16 + $0xef0] sm:$0xff]  ;;  %v2048_v51 = vpack.c.bf16 %v898_v26, %v852_v49  ;;  %v942_v3 = vld [vmem:[%s13675_s16 + $0x14a8] sm:$0xff] }
 0x24e   : > { %v11012_v40 = vpop.f32.mrf.mxu0  ;;  %v11123_v59 = vpop.f32.mrf.mxu1  ;;  %7234 = vmatmul.mubr.bf16.gmra.mxu1 %v1955_v2  ;;  %v2001_v43 = vpack.c.bf16 %v805_v5, %v759_v25  ;;  %v849_v2 = vld [vmem:[%s13675_s16 + $0x11c0] sm:$0xff]  ;;  %v944_v25 = vld [vmem:[%s13675_s16 + $0x14b8] sm:$0xff]  ;;  %v990_v5 = vld [vmem:[%s13675_s16 + $0x1628] sm:$0xff] }
 0x24f   : > { %v11013_v45 = vadd.f32 %v11012_v40, %v11011_v12  ;;  %v15054_v29 = vadd.f32 %v11122_v52, %v6490_v11  ;;  %7241 = vmatprep.mubr.bf16.mxu1 %v2002_v22  ;;  %v895_v12 = vld [vmem:[%s13675_s16 + $0x1330] sm:$0xff] }
 0x250   : > { %v11014_v54 = vpop.f32.mrf.mxu0  ;;  %v11124_v41 = vpop.f32.mrf.mxu1  ;;  %v2045_v0 = vpack.c.bf16 %v895_v12, %v849_v2  ;;  %v1080_v2 = vld [vmem:[%s13675_s16 + $0x18f8] sm:$0xff] }
 0x251   : > { %v6495_v15 = vadd.f32 %v11013_v45, %v14743_v48  ;;  %v11125_v6 = vadd.f32 %v11124_v41, %v11123_v59  ;;  %v897_v45 = vld [vmem:[%s13675_s16 + $0x1340] sm:$0xff] }
 0x252   : > { %v11015_v55 = vpop.f32.mrf.mxu0  ;;  %v11126_v9 = vpop.f32.mrf.mxu1 }
 0x253   : > { %v11016_v57 = vadd.f32 %v11015_v55, %v11014_v54  ;;  %v15061_v63 = vadd.f32 %v11125_v6, %v6495_v15 }
 0x254   : > { %v11017_v37 = vpop.f32.mrf.mxu0  ;;  %7081 = vmatmul.mubr.bf16.gmra.mxu0 %v1999_v34  ;;  %v11127_v39 = vpop.f32.mrf.mxu1  ;;  %v2092_v34 = vpack.c.bf16 %v988_v32, %v942_v3 }
 0x255   : > { %v6498_v48 = vadd.f32 %v11016_v57, %v14750_v36  ;;  %7088 = vmatprep.mubr.bf16.mxu0 %v2046_v35  ;;  %v11128_v22 = vadd.f32 %v11127_v39, %v11126_v9  ;;  %v851_v36 = vld [vmem:[%s13675_s16 + $0x11d0] sm:$0xff]  ;;  %v2094_v57 = vpack.c.bf16 %v990_v5, %v944_v25  ;;  %v1034_v39 = vld [vmem:[%s13675_s16 + $0x1788] sm:$0xff] }
 0x256   : > { %v11018_v11 = vpop.f32.mrf.mxu0  ;;  %v11129_v52 = vpop.f32.mrf.mxu1  ;;  %7242 = vmatmul.mubr.bf16.gmra.mxu1 %v2001_v43  ;;  %v2047_v26 = vpack.c.bf16 %v897_v45, %v851_v36  ;;  %v941_v43 = vld [vmem:[%s13675_s16 + $0x14a0] sm:$0xff]  ;;  %v1036_v36 = vld [vmem:[%s13675_s16 + $0x1798] sm:$0xff]  ;;  %v1082_v45 = vld [vmem:[%s13675_s16 + $0x1908] sm:$0xff] }
 0x257   : > { %v11019_v13 = vadd.f32 %v11018_v11, %v11017_v37  ;;  %v15068_v40 = vadd.f32 %v11128_v22, %v6498_v48  ;;  %7249 = vmatprep.mubr.bf16.mxu1 %v2048_v51  ;;  %v987_v37 = vld [vmem:[%s13675_s16 + $0x1610] sm:$0xff] }
 0x258   : > { %v11020_v28 = vpop.f32.mrf.mxu0  ;;  %v11130_v54 = vpop.f32.mrf.mxu1  ;;  %v2091_v32 = vpack.c.bf16 %v987_v37, %v941_v43  ;;  %v1172_v43 = vld [vmem:[%s13675_s16 + $0x1bd8] sm:$0xff] }
 0x259   : > { %v6503_v59 = vadd.f32 %v11019_v13, %v14757_v62  ;;  %v11131_v15 = vadd.f32 %v11130_v54, %v11129_v52  ;;  %v989_v13 = vld [vmem:[%s13675_s16 + $0x1620] sm:$0xff] }
 0x25a   : > { %v11021_v41 = vpop.f32.mrf.mxu0  ;;  %v11132_v49 = vpop.f32.mrf.mxu1 }
 0x25b   : > { %v11022_v35 = vadd.f32 %v11021_v41, %v11020_v28  ;;  %v15075_v6 = vadd.f32 %v11131_v15, %v6503_v59 }
 0x25c   : > { %v11023_v55 = vpop.f32.mrf.mxu0  ;;  %7089 = vmatmul.mubr.bf16.gmra.mxu0 %v2045_v0  ;;  %v11133_v9 = vpop.f32.mrf.mxu1  ;;  %v2138_v0 = vpack.c.bf16 %v1080_v2, %v1034_v39 }
 0x25d   : > { %v6506_v62 = vadd.f32 %v11022_v35, %v14762_v33  ;;  %7096 = vmatprep.mubr.bf16.mxu0 %v2092_v34  ;;  %v11134_v51 = vadd.f32 %v11133_v9, %v11132_v49  ;;  %v943_v33 = vld [vmem:[%s13675_s16 + $0x14b0] sm:$0xff]  ;;  %v2140_v35 = vpack.c.bf16 %v1082_v45, %v1036_v36  ;;  %v1126_v9 = vld [vmem:[%s13675_s16 + $0x1a68] sm:$0xff] }
 0x25e   : > { %v11024_v48 = vpop.f32.mrf.mxu0  ;;  %v11135_v22 = vpop.f32.mrf.mxu1  ;;  %7250 = vmatmul.mubr.bf16.gmra.mxu1 %v2047_v26  ;;  %v2093_v5 = vpack.c.bf16 %v989_v13, %v943_v33  ;;  %v1033_v26 = vld [vmem:[%s13675_s16 + $0x1780] sm:$0xff]  ;;  %v1128_v33 = vld [vmem:[%s13675_s16 + $0x1a78] sm:$0xff]  ;;  %v1174_v13 = vld [vmem:[%s13675_s16 + $0x1be8] sm:$0xff] }
 0x25f   : > { %v11025_v12 = vadd.f32 %v11024_v48, %v11023_v55  ;;  %v15082_v11 = vadd.f32 %v11134_v51, %v6506_v62  ;;  %7257 = vmatprep.mubr.bf16.mxu1 %v2094_v57  ;;  %v1079_v55 = vld [vmem:[%s13675_s16 + $0x18f0] sm:$0xff] }
 0x260   : > { %v11026_v3 = vpop.f32.mrf.mxu0  ;;  %v11136_v28 = vpop.f32.mrf.mxu1  ;;  %v2137_v2 = vpack.c.bf16 %v1079_v55, %v1033_v26  ;;  %v1264_v26 = vld [vmem:[%s13675_s16 + $0x1eb8] sm:$0xff] }
 0x261   : > { %v6511_v52 = vadd.f32 %v11025_v12, %v14771_v50  ;;  %v11137_v59 = vadd.f32 %v11136_v28, %v11135_v22  ;;  %v1081_v12 = vld [vmem:[%s13675_s16 + $0x1900] sm:$0xff] }
 0x262   : > { %v11027_v54 = vpop.f32.mrf.mxu0  ;;  %v11138_v25 = vpop.f32.mrf.mxu1 }
 0x263   : > { %v11028_v34 = vadd.f32 %v11027_v54, %v11026_v3  ;;  %v15089_v15 = vadd.f32 %v11137_v59, %v6511_v52 }
 0x264   : > { %v11029_v41 = vpop.f32.mrf.mxu0  ;;  %7097 = vmatmul.mubr.bf16.gmra.mxu0 %v2091_v32  ;;  %v11139_v49 = vpop.f32.mrf.mxu1  ;;  %v2184_v32 = vpack.c.bf16 %v1172_v43, %v1126_v9 }
 0x265   : > { %v6514_v50 = vadd.f32 %v11028_v34, %v14778_v14  ;;  %7104 = vmatprep.mubr.bf16.mxu0 %v2138_v0  ;;  %v11140_v57 = vadd.f32 %v11139_v49, %v11138_v25  ;;  %v1035_v14 = vld [vmem:[%s13675_s16 + $0x1790] sm:$0xff]  ;;  %v2186_v34 = vpack.c.bf16 %v1174_v13, %v1128_v33  ;;  %v1218_v49 = vld [vmem:[%s13675_s16 + $0x1d48] sm:$0xff] }
 0x266   : > { %v11030_v62 = vpop.f32.mrf.mxu0  ;;  %v11141_v51 = vpop.f32.mrf.mxu1  ;;  %7258 = vmatmul.mubr.bf16.gmra.mxu1 %v2093_v5  ;;  %v2139_v45 = vpack.c.bf16 %v1081_v12, %v1035_v14  ;;  %v1125_v5 = vld [vmem:[%s13675_s16 + $0x1a60] sm:$0xff]  ;;  %v1220_v14 = vld [vmem:[%s13675_s16 + $0x1d58] sm:$0xff]  ;;  %v1266_v12 = vld [vmem:[%s13675_s16 + $0x1ec8] sm:$0xff] }
 0x267   : > { %v11031_v37 = vadd.f32 %v11030_v62, %v11029_v41  ;;  %v15096_v48 = vadd.f32 %v11140_v57, %v6514_v50  ;;  %7265 = vmatprep.mubr.bf16.mxu1 %v2140_v35  ;;  %v1171_v41 = vld [vmem:[%s13675_s16 + $0x1bd0] sm:$0xff] }
 0x268   : > { %v11032_v39 = vpop.f32.mrf.mxu0  ;;  %v11142_v3 = vpop.f32.mrf.mxu1  ;;  %v2183_v43 = vpack.c.bf16 %v1171_v41, %v1125_v5  ;;  %v1356_v5 = vld [vmem:[%s13675_s16 + $0x2198] sm:$0xff] }
 0x269   : > { %v6519_v22 = vadd.f32 %v11031_v37, %v14785_v18  ;;  %v11143_v52 = vadd.f32 %v11142_v3, %v11141_v51  ;;  %v1173_v37 = vld [vmem:[%s13675_s16 + $0x1be0] sm:$0xff] }
 0x26a   : > { %v11033_v28 = vpop.f32.mrf.mxu0  ;;  %v11144_v36 = vpop.f32.mrf.mxu1 }
 0x26b   : > { %v11034_v0 = vadd.f32 %v11033_v28, %v11032_v39  ;;  %v15103_v59 = vadd.f32 %v11143_v52, %v6519_v22 }
 0x26c   : > { %v11163_v54 = vpop.f32.mrf.mxu0  ;;  %7105 = vmatmul.mubr.bf16.gmra.mxu0 %v2137_v2  ;;  %v11145_v25 = vpop.f32.mrf.mxu1  ;;  %v2230_v2 = vpack.c.bf16 %v1264_v26, %v1218_v49 }
 0x26d   : > { %v6522_v18 = vadd.f32 %v11034_v0, %v14790_v46  ;;  %7112 = vmatprep.mubr.bf16.mxu0 %v2184_v32  ;;  %v11146_v35 = vadd.f32 %v11145_v25, %v11144_v36  ;;  %v1127_v46 = vld [vmem:[%s13675_s16 + $0x1a70] sm:$0xff]  ;;  %v2232_v0 = vpack.c.bf16 %v1266_v12, %v1220_v14  ;;  %v1310_v25 = vld [vmem:[%s13675_s16 + $0x2028] sm:$0xff] }
 0x26e   : > { %v11164_v50 = vpop.f32.mrf.mxu0  ;;  %v11275_v57 = vpop.f32.mrf.mxu1  ;;  %7266 = vmatmul.mubr.bf16.gmra.mxu1 %v2139_v45  ;;  %v2185_v13 = vpack.c.bf16 %v1173_v37, %v1127_v46  ;;  %v1217_v45 = vld [vmem:[%s13675_s16 + $0x1d40] sm:$0xff]  ;;  %v1312_v46 = vld [vmem:[%s13675_s16 + $0x2038] sm:$0xff]  ;;  %v1358_v37 = vld [vmem:[%s13675_s16 + $0x21a8] sm:$0xff] }
 0x26f   : > { %v11165_v55 = vadd.f32 %v11164_v50, %v11163_v54  ;;  %v15110_v62 = vadd.f32 %v11146_v35, %v6522_v18  ;;  %7273 = vmatprep.mubr.bf16.mxu1 %v2186_v34  ;;  %v1263_v54 = vld [vmem:[%s13675_s16 + $0x1eb0] sm:$0xff] }
 0x270   : > { %v11166_v9 = vpop.f32.mrf.mxu0  ;;  %v11276_v39 = vpop.f32.mrf.mxu1  ;;  %v2229_v26 = vpack.c.bf16 %v1263_v54, %v1217_v45  ;;  %v1448_v45 = vld [vmem:[%s13675_s16 + $0x2478] sm:$0xff] }
 0x271   : > { %v6721_v51 = vadd.f32 %v11165_v55, %v14799_v31  ;;  %v11277_v22 = vadd.f32 %v11276_v39, %v11275_v57  ;;  %v1265_v55 = vld [vmem:[%s13675_s16 + $0x1ec0] sm:$0xff] }
 0x272   : > { %v11167_v3 = vpop.f32.mrf.mxu0  ;;  %v11278_v33 = vpop.f32.mrf.mxu1 }
 0x273   : > { %v11168_v32 = vadd.f32 %v11167_v3, %v11166_v9  ;;  %v15117_v52 = vadd.f32 %v11277_v22, %v6721_v51 }
 0x274   : > { %v11169_v28 = vpop.f32.mrf.mxu0  ;;  %7113 = vmatmul.mubr.bf16.gmra.mxu0 %v2183_v43  ;;  %v11279_v36 = vpop.f32.mrf.mxu1  ;;  %v2276_v43 = vpack.c.bf16 %v1356_v5, %v1310_v25 }
 0x275   : > { %v6724_v31 = vadd.f32 %v11168_v32, %v14806_v20  ;;  %7120 = vmatprep.mubr.bf16.mxu0 %v2230_v2  ;;  %v11280_v34 = vadd.f32 %v11279_v36, %v11278_v33  ;;  %v1219_v20 = vld [vmem:[%s13675_s16 + $0x1d50] sm:$0xff]  ;;  %v2278_v32 = vpack.c.bf16 %v1358_v37, %v1312_v46  ;;  %v1402_v36 = vld [vmem:[%s13675_s16 + $0x2308] sm:$0xff] }
 0x276   : > { %v11170_v18 = vpop.f32.mrf.mxu0  ;;  %v11281_v35 = vpop.f32.mrf.mxu1  ;;  %7274 = vmatmul.mubr.bf16.gmra.mxu1 %v2185_v13  ;;  %v2231_v12 = vpack.c.bf16 %v1265_v55, %v1219_v20  ;;  %v1309_v13 = vld [vmem:[%s13675_s16 + $0x2020] sm:$0xff]  ;;  %v1404_v20 = vld [vmem:[%s13675_s16 + $0x2318] sm:$0xff]  ;;  %v1450_v55 = vld [vmem:[%s13675_s16 + $0x2488] sm:$0xff] }
 0x277   : > { %v11171_v41 = vadd.f32 %v11170_v18, %v11169_v28  ;;  %v15124_v50 = vadd.f32 %v11280_v34, %v6724_v31  ;;  %7281 = vmatprep.mubr.bf16.mxu1 %v2232_v0  ;;  %v1355_v28 = vld [vmem:[%s13675_s16 + $0x2190] sm:$0xff] }
 0x278   : > { %v11172_v49 = vpop.f32.mrf.mxu0  ;;  %v11282_v9 = vpop.f32.mrf.mxu1  ;;  %v2275_v5 = vpack.c.bf16 %v1355_v28, %v1309_v13  ;;  %v1540_v13 = vld [vmem:[%s13675_s16 + $0x2758] sm:$0xff] }
 0x279   : > { %v6729_v57 = vadd.f32 %v11171_v41, %v14813_v23  ;;  %v11283_v51 = vadd.f32 %v11282_v9, %v11281_v35  ;;  %v1357_v41 = vld [vmem:[%s13675_s16 + $0x21a0] sm:$0xff] }
 0x27a   : > { %v11173_v39 = vpop.f32.mrf.mxu0  ;;  %v11284_v14 = vpop.f32.mrf.mxu1 }
 0x27b   : > { %v11174_v2 = vadd.f32 %v11173_v39, %v11172_v49  ;;  %v15131_v22 = vadd.f32 %v11283_v51, %v6729_v57 }
 0x27c   : > { %v11175_v3 = vpop.f32.mrf.mxu0  ;;  %7121 = vmatmul.mubr.bf16.gmra.mxu0 %v2229_v26  ;;  %v11285_v33 = vpop.f32.mrf.mxu1  ;;  %v2322_v26 = vpack.c.bf16 %v1448_v45, %v1402_v36 }
 0x27d   : > { %v6732_v23 = vadd.f32 %v11174_v2, %v14818_v53  ;;  %7128 = vmatprep.mubr.bf16.mxu0 %v2276_v43  ;;  %v11286_v0 = vadd.f32 %v11285_v33, %v11284_v14  ;;  %v1311_v53 = vld [vmem:[%s13675_s16 + $0x2030] sm:$0xff]  ;;  %v2324_v2 = vpack.c.bf16 %v1450_v55, %v1404_v20  ;;  %v1494_v33 = vld [vmem:[%s13675_s16 + $0x25e8] sm:$0xff] }
 0x27e   : > { %v11176_v31 = vpop.f32.mrf.mxu0  ;;  %v11287_v34 = vpop.f32.mrf.mxu1  ;;  %7282 = vmatmul.mubr.bf16.gmra.mxu1 %v2231_v12  ;;  %v2277_v37 = vpack.c.bf16 %v1357_v41, %v1311_v53  ;;  %v1401_v12 = vld [vmem:[%s13675_s16 + $0x2300] sm:$0xff]  ;;  %v1496_v53 = vld [vmem:[%s13675_s16 + $0x25f8] sm:$0xff]  ;;  %v1542_v41 = vld [vmem:[%s13675_s16 + $0x2768] sm:$0xff] }
 0x27f   : > { %v11177_v54 = vadd.f32 %v11176_v31, %v11175_v3  ;;  %v15138_v18 = vadd.f32 %v11286_v0, %v6732_v23  ;;  %7289 = vmatprep.mubr.bf16.mxu1 %v2278_v32  ;;  %v1447_v3 = vld [vmem:[%s13675_s16 + $0x2470] sm:$0xff] }
 0x280   : > { %v11178_v25 = vpop.f32.mrf.mxu0  ;;  %v11288_v49 = vpop.f32.mrf.mxu1  ;;  %v2321_v45 = vpack.c.bf16 %v1447_v3, %v1401_v12  ;;  %v1586_v12 = vld [vmem:[%s13675_s16 + $0x28c8] sm:$0xff]  ;;  %v1632_v3 = vld [vmem:[%s13675_s16 + $0x2a38] sm:$0xff] }
 0x281   : > { %v6737_v35 = vadd.f32 %v11177_v54, %v14827_v27  ;;  %v11289_v57 = vadd.f32 %v11288_v49, %v11287_v34  ;;  %v1449_v54 = vld [vmem:[%s13675_s16 + $0x2480] sm:$0xff] }
 0x282   : > { %v11179_v9 = vpop.f32.mrf.mxu0  ;;  %v11290_v46 = vpop.f32.mrf.mxu1 }
 0x283   : > { %v11180_v43 = vadd.f32 %v11179_v9, %v11178_v25  ;;  %v15145_v51 = vadd.f32 %v11289_v57, %v6737_v35 }
 0x284   : > { %v11181_v39 = vpop.f32.mrf.mxu0  ;;  %7129 = vmatmul.mubr.bf16.gmra.mxu0 %v2275_v5  ;;  %v11291_v14 = vpop.f32.mrf.mxu1  ;;  %v2368_v5 = vpack.c.bf16 %v1540_v13, %v1494_v33 }
 0x285   : > { %v6740_v27 = vadd.f32 %v11180_v43, %v14834_v24  ;;  %7136 = vmatprep.mubr.bf16.mxu0 %v2322_v26  ;;  %v11292_v32 = vadd.f32 %v11291_v14, %v11290_v46  ;;  %v1403_v24 = vld [vmem:[%s13675_s16 + $0x2310] sm:$0xff]  ;;  %v2370_v43 = vpack.c.bf16 %v1542_v41, %v1496_v53 }
 0x286   : > { %v11182_v23 = vpop.f32.mrf.mxu0  ;;  %v11293_v0 = vpop.f32.mrf.mxu1  ;;  %7290 = vmatmul.mubr.bf16.gmra.mxu1 %v2277_v37  ;;  %v2323_v55 = vpack.c.bf16 %v1449_v54, %v1403_v24  ;;  %v1493_v37 = vld [vmem:[%s13675_s16 + $0x25e0] sm:$0xff]  ;;  %v2414_v24 = vpack.c.bf16 %v1632_v3, %v1586_v12  ;;  %v1588_v54 = vld [vmem:[%s13675_s16 + $0x28d8] sm:$0xff] }
 0x287   : > { %v11183_v28 = vadd.f32 %v11182_v23, %v11181_v39  ;;  %v15152_v31 = vadd.f32 %v11292_v32, %v6740_v27  ;;  %7297 = vmatprep.mubr.bf16.mxu1 %v2324_v2  ;;  %v1539_v39 = vld [vmem:[%s13675_s16 + $0x2750] sm:$0xff]  ;;  %v13361_v2 = vld [vmem:[%s17572_s2 + $0x6f8] sm:$0xff]  }
 0x288   : > { %v11184_v36 = vpop.f32.mrf.mxu0  ;;  %v11294_v25 = vpop.f32.mrf.mxu1  ;;  %11931 = vmatprep.subr.bf16.mxu1 %v13361_v2  ;;  %v2367_v13 = vpack.c.bf16 %v1539_v39, %v1493_v37  ;;  %v1678_v37 = vld [vmem:[%s13675_s16 + $0x2ba8] sm:$0xff]  ;;  %v1724_v39 = vld [vmem:[%s13675_s16 + $0x2d18] sm:$0xff] }
 0x289   : > { %v6745_v34 = vadd.f32 %v11183_v28, %v14840_v42  ;;  %v11295_v35 = vadd.f32 %v11294_v25, %v11293_v0  ;;  %v1495_v28 = vld [vmem:[%s13675_s16 + $0x25f0] sm:$0xff]  ;;  %v1541_v0 = vld [vmem:[%s13675_s16 + $0x2760] sm:$0xff] }
 0x28a   : > { %v11185_v49 = vpop.f32.mrf.mxu0  ;;  %v11296_v20 = vpop.f32.mrf.mxu1 }
 0x28b   : > { %v11186_v26 = vadd.f32 %v11185_v49, %v11184_v36  ;;  %v15159_v57 = vadd.f32 %v11295_v35, %v6745_v34  ;;  %v1634_v34 = vld [vmem:[%s13675_s16 + $0x2a48] sm:$0xff]  ;;  %v2369_v35 = vpack.c.bf16 %v1541_v0, %v1495_v28  ;;  %v1680_v28 = vld [vmem:[%s13675_s16 + $0x2bb8] sm:$0xff] }
 0x28c   : > { %v11187_v9 = vpop.f32.mrf.mxu0  ;;  %7137 = vmatmul.mubr.bf16.gmra.mxu0 %v2321_v45  ;;  %v11297_v46 = vpop.f32.mrf.mxu1  ;;  %v1726_v0 = vld [vmem:[%s13675_s16 + $0x2d28] sm:$0xff] }
 0x28d   : > { %v6748_v42 = vadd.f32 %v11186_v26, %v14849_v16  ;;  %7144 = vmatprep.mubr.bf16.mxu0 %v2368_v5  ;;  %v11298_v27 = vadd.f32 %v11297_v46, %v11296_v20  ;;  %v2416_v20 = vpack.c.bf16 %v1634_v34, %v1588_v54 }
 0x28e   : > { %v11188_v14 = vpop.f32.mrf.mxu0  ;;  %v11299_v23 = vpop.f32.mrf.mxu1  ;;  %7298 = vmatmul.mubr.bf16.gmra.mxu1 %v2323_v55 }
 0x28f   : > { %v11189_v32 = vadd.f32 %v11188_v14, %v11187_v9  ;;  %v15169_v16 = vadd.f32 %v11298_v27, %v6748_v42  ;;  %7305 = vmatprep.mubr.bf16.mxu1 %v2370_v43  ;;  %v1585_v9 = vld [vmem:[%s13675_s16 + $0x28c0] sm:$0xff]  ;;  %v1631_v43 = vld [vmem:[%s13675_s16 + $0x2a30] sm:$0xff] }
 0x290   : > { %v11190_v33 = vpop.f32.mrf.mxu0  ;;  %v11300_v45 = vpop.f32.mrf.mxu1  ;;  %v2413_v3 = vpack.c.bf16 %v1631_v43, %v1585_v9  ;;  %v348_v9 = vld [vmem:[%s13675_s16 + $0x218] sm:$0xff] }
 0x291   : > { %v6753_v36 = vadd.f32 %v11189_v32, %v14856_v10  ;;  %v11301_v25 = vadd.f32 %v11300_v45, %v11299_v23  ;;  %v1633_v32 = vld [vmem:[%s13675_s16 + $0x2a40] sm:$0xff] }
 0x292   : > { %v11191_v5 = vpop.f32.mrf.mxu0  ;;  %v11302_v41 = vpop.f32.mrf.mxu1 }
 0x293   : > { %v11192_v53 = vadd.f32 %v11191_v5, %v11190_v33  ;;  %v15176_v49 = vadd.f32 %v11301_v25, %v6753_v36 }
 0x294   : > { %v11193_v26 = vpop.f32.mrf.mxu0  ;;  %7145 = vmatmul.mubr.bf16.gmra.mxu0 %v2367_v13  ;;  %v11303_v55 = vpop.f32.mrf.mxu1  ;;  %v2460_v13 = vpack.c.bf16 %v1724_v39, %v1678_v37 }
 0x295   : > { %v6756_v10 = vadd.f32 %v11192_v53, %v14863_v47  ;;  %7152 = vmatprep.mubr.bf16.mxu0 %v2414_v24  ;;  %v11304_v42 = vadd.f32 %v11303_v55, %v11302_v41  ;;  %v1587_v47 = vld [vmem:[%s13675_s16 + $0x28d0] sm:$0xff]  ;;  %v2462_v53 = vpack.c.bf16 %v1726_v0, %v1680_v28  ;;  %v302_v55 = vld [vmem:[%s13675_s16 + $0xa8] sm:$0xff] }
 0x296   : > { %v11194_v46 = vpop.f32.mrf.mxu0  ;;  %v11305_v27 = vpop.f32.mrf.mxu1  ;;  %7306 = vmatmul.mubr.bf16.gmra.mxu1 %v2369_v35  ;;  %v2415_v34 = vpack.c.bf16 %v1633_v32, %v1587_v47  ;;  %v1677_v35 = vld [vmem:[%s13675_s16 + $0x2ba0] sm:$0xff]  ;;  %v304_v47 = vld [vmem:[%s13675_s16 + $0xb8] sm:$0xff]  ;;  %v350_v32 = vld [vmem:[%s13675_s16 + $0x228] sm:$0xff] }
 0x297   : > { %v11195_v2 = vadd.f32 %v11194_v46, %v11193_v26  ;;  %v15183_v14 = vadd.f32 %v11304_v42, %v6756_v10  ;;  %7313 = vmatprep.mubr.bf16.mxu1 %v2416_v20  ;;  %v1723_v26 = vld [vmem:[%s13675_s16 + $0x2d10] sm:$0xff] }
 0x298   : > { %v11196_v12 = vpop.f32.mrf.mxu0  ;;  %v11306_v33 = vpop.f32.mrf.mxu1  ;;  %v2459_v39 = vpack.c.bf16 %v1723_v26, %v1677_v35  ;;  %v440_v35 = vld [vmem:[%s13675_s16 + $0x4f8] sm:$0xff] }
 0x299   : > { %v6761_v23 = vadd.f32 %v11195_v2, %v14870_v38  ;;  %v11307_v36 = vadd.f32 %v11306_v33, %v11305_v27  ;;  %v1725_v2 = vld [vmem:[%s13675_s16 + $0x2d20] sm:$0xff] }
 0x29a   : > { %v11197_v45 = vpop.f32.mrf.mxu0  ;;  %v11308_v54 = vpop.f32.mrf.mxu1 }
 0x29b   : > { %v11198_v24 = vadd.f32 %v11197_v45, %v11196_v12  ;;  %v15190_v25 = vadd.f32 %v11307_v36, %v6761_v23 }
 0x29c   : > { %v11199_v5 = vpop.f32.mrf.mxu0  ;;  %7153 = vmatmul.mubr.bf16.gmra.mxu0 %v2413_v3  ;;  %v11309_v41 = vpop.f32.mrf.mxu1  ;;  %v1774_v3 = vpack.c.bf16 %v348_v9, %v302_v55 }
 0x29d   : > { %v6764_v38 = vadd.f32 %v11198_v24, %v14877_v44  ;;  %7160 = vmatprep.mubr.bf16.mxu0 %v2460_v13  ;;  %v11310_v20 = vadd.f32 %v11309_v41, %v11308_v54  ;;  %v1679_v44 = vld [vmem:[%s13675_s16 + $0x2bb0] sm:$0xff]  ;;  %v1776_v24 = vpack.c.bf16 %v350_v32, %v304_v47  ;;  %v394_v41 = vld [vmem:[%s13675_s16 + $0x388] sm:$0xff] }
 0x29e   : > { %v11200_v10 = vpop.f32.mrf.mxu0  ;;  %v11311_v42 = vpop.f32.mrf.mxu1  ;;  %7314 = vmatmul.mubr.bf16.gmra.mxu1 %v2415_v34  ;;  %v2461_v0 = vpack.c.bf16 %v1725_v2, %v1679_v44  ;;  %v301_v34 = vld [vmem:[%s13675_s16 + $0xa0] sm:$0xff]  ;;  %v1820_v44 = vpack.c.bf16 %v440_v35, %v394_v41  ;;  %v396_v2 = vld [vmem:[%s13675_s16 + $0x398] sm:$0xff]  ;;  %v13349_v47 = vld [vmem:[%s17572_s2 + $0x670] sm:$0xff]  }
 0x29f   : > { %v11201_v43 = vadd.f32 %v11200_v10, %v11199_v5  ;;  %v15197_v46 = vadd.f32 %v11310_v20, %v6764_v38  ;;  %7321 = vmatprep.mubr.bf16.mxu1 %v2462_v53  ;;  %v347_v5 = vld [vmem:[%s13675_s16 + $0x210] sm:$0xff]  ;;  %v486_v41 = vld [vmem:[%s13675_s16 + $0x668] sm:$0xff]  ;;  %v532_v35 = vld [vmem:[%s13675_s16 + $0x7d8] sm:$0xff] }
 0x2a0   : > { %v11202_v37 = vpop.f32.mrf.mxu0  ;;  %v11312_v12 = vpop.f32.mrf.mxu1  ;;  %v1773_v9 = vpack.c.bf16 %v347_v5, %v301_v34  ;;  %v13350_v34 = vld [vmem:[%s17572_s2 + $0x630] sm:$0xff]  }
 0x2a1   : > { %v6769_v27 = vadd.f32 %v11201_v43, %v14884_v56  ;;  %v11313_v23 = vadd.f32 %v11312_v12, %v11311_v42  ;;  %v349_v43 = vld [vmem:[%s13675_s16 + $0x220] sm:$0xff]  ;;  %v13363_v5 = vld [vmem:[%s17572_s2 + $0x6f0] sm:$0xff]  }
 0x2a2   : > { %v11203_v33 = vpop.f32.mrf.mxu0  ;;  %v11314_v28 = vpop.f32.mrf.mxu1 }
 0x2a3   : > { %v11204_v13 = vadd.f32 %v11203_v33, %v11202_v37  ;;  %v15204_v36 = vadd.f32 %v11313_v23, %v6769_v27  ;;  %v442_v27 = vld [vmem:[%s13675_s16 + $0x508] sm:$0xff] }
 0x2a4   : > { %v11205_v45 = vpop.f32.mrf.mxu0  ;;  %7161 = vmatmul.mubr.bf16.gmra.mxu0 %v2459_v39  ;;  %v11315_v54 = vpop.f32.mrf.mxu1  ;;  %v13348_v39 = vld [vmem:[%s17572_s2 + $0x638] sm:$0xff]  }
 0x2a5   : > { %v6772_v56 = vadd.f32 %v11204_v13, %v14891_v19  ;;  %7362 = vmatprep.mubr.bf16.mxu0 %v1774_v3  ;;  %v11316_v53 = vadd.f32 %v11315_v54, %v11314_v28  ;;  %v303_v19 = vld [vmem:[%s13675_s16 + $0xb0] sm:$0xff]  ;;  %v393_v28 = vld [vmem:[%s13675_s16 + $0x380] sm:$0xff] }
 0x2a6   : > { %v11206_v38 = vpop.f32.mrf.mxu0  ;;  %v11317_v20 = vpop.f32.mrf.mxu1  ;;  %7322 = vmatmul.mubr.bf16.gmra.mxu1 %v2461_v0  ;;  %v1775_v33 = vpack.c.bf16 %v349_v43, %v303_v19  ;;  %v1822_v0 = vpack.c.bf16 %v442_v27, %v396_v2  ;;  %v439_v54 = vld [vmem:[%s13675_s16 + $0x4f0] sm:$0xff]  ;;  %v1866_v2 = vpack.c.bf16 %v532_v35, %v486_v41  ;;  %v488_v27 = vld [vmem:[%s13675_s16 + $0x678] sm:$0xff]  ;;  %v13367_v41 = vld [vmem:[%s17572_s2 + $0x6e0] sm:$0xff]  }
 0x2a7   : > { %v11207_v26 = vadd.f32 %v11206_v38, %v11205_v45  ;;  %v15211_v10 = vadd.f32 %v11316_v53, %v6772_v56  ;;  %7523 = vmatprep.mubr.bf16.mxu1 %v1776_v24  ;;  %v13362_v45 = vld [vmem:[%s17572_s2 + $0x6b8] sm:$0xff]   ;;  %v1819_v19 = vpack.c.bf16 %v439_v54, %v393_v28  ;;  %v395_v43 = vld [vmem:[%s13675_s16 + $0x390] sm:$0xff]  ;;  %v13366_v54 = vld [vmem:[%s17572_s2 + $0x6a8] sm:$0xff]  }
 0x2a8   : > { %v11208_v55 = vpop.f32.mrf.mxu0  ;;  %v11318_v37 = vpop.f32.mrf.mxu1 }
 0x2a9   : > { %v6777_v42 = vadd.f32 %v11207_v26, %v14904_v60  ;;  %v11319_v12 = vadd.f32 %v11318_v37, %v11317_v20  ;;  %v13364_v37 = vld [vmem:[%s17572_s2 + $0x6b0] sm:$0xff]  }
 0x2aa   : > { %v11209_v3 = vpop.f32.mrf.mxu0  ;;  %v11320_v23 = vpop.f32.mrf.mxu1 }
 0x2ab   : > { %v11210_v32 = vadd.f32 %v11209_v3, %v11208_v55  ;;  %v15224_v60 = vadd.f32 %v11319_v12, %v6777_v42  ;;  %v441_v42 = vld [vmem:[%s13675_s16 + $0x500] sm:$0xff]  ;;  %v534_v12 = vld [vmem:[%s13675_s16 + $0x7e8] sm:$0xff] }
 0x2ac   : > { %v11211_v13 = vpop.f32.mrf.mxu0  ;;  %7363 = vmatmul.mubr.bf16.vlgmr.msra.gmra.mxu0 %v1773_v9  ;;  %v11321_v56 = vpop.f32.mrf.mxu1  ;;  %v13352_v3 = vld [vmem:[%s17572_s2 + $0x628] sm:$0xff]   ;;  %v1821_v28 = vpack.c.bf16 %v441_v42, %v395_v43 }
 0x2ad   : > { %v6780_v24 = vadd.f32 %v11210_v32, %v14923_v21  ;;  %11820 = vmatpush3.bf16.msra.mxu0 %v13348_v39  ;;  %7370 = vmatprep.mubr.bf16.mxu0 %v1820_v44  ;;  %v11322_v53 = vadd.f32 %v11321_v56, %v11320_v23  ;;  %v13351_v21 = vld [vmem:[%s17572_s2 + $0x668] sm:$0xff]   ;;  %v13353_v23 = vld [vmem:[%s17572_s2 + $0x660] sm:$0xff]   ;;  %v1868_v56 = vpack.c.bf16 %v534_v12, %v488_v27 }
 0x2ae   : > { %v11212_v38 = vpop.f32.mrf.mxu0  ;;  %11821 = vmatprep.subr.bf16.mxu0 %v13349_v47  ;;  %v11323_v20 = vpop.f32.mrf.mxu1  ;;  %7524 = vmatmul.mubr.bf16.vlgmr.msra.gmra.mxu1 %v1775_v33 }
 0x2af   : > { %v11213_v26 = vadd.f32 %v11212_v38, %v11211_v13  ;;  %v15243_v55 = vadd.f32 %v11322_v53, %v6780_v24  ;;  %7531 = vmatprep.mubr.bf16.mxu1 %v1822_v0  ;;  %11932 = vmatpush3.bf16.msra.mxu1 %v13362_v45  ;;  %v485_v24 = vld [vmem:[%s13675_s16 + $0x660] sm:$0xff]  ;;  %v531_v53 = vld [vmem:[%s13675_s16 + $0x7d0] sm:$0xff] }
 0x2b0   : > { %v11214_v9 = vpop.f32.mrf.mxu0  ;;  %v11324_v44 = vpop.f32.mrf.mxu1  ;;  %11933 = vmatprep.subr.bf16.mxu1 %v13363_v5  ;;  %v13354_v38 = vld [vmem:[%s17572_s2 + $0x620] sm:$0xff]  }
 0x2b1   : > { %v6785_v39 = vadd.f32 %v11213_v26, %v14942_v61  ;;  %11822 = vmatpush3.bf16.msra.mxu0 %v13350_v34  ;;  %v11325_v47 = vadd.f32 %v11324_v44, %v11323_v20  ;;  %v13365_v61 = vld [vmem:[%s17572_s2 + $0x6e8] sm:$0xff]   ;;  %v624_v20 = vld [vmem:[%s13675_s16 + $0xab8] sm:$0xff]  ;;  %v533_v44 = vld [vmem:[%s13675_s16 + $0x7e0] sm:$0xff] }
 0x2b2   : > { %v11215_v32 = vpop.f32.mrf.mxu0  ;;  %11823 = vmatprep.subr.bf16.mxu0 %v13351_v21  ;;  %v11326_v13 = vpop.f32.mrf.mxu1  ;;  %v578_v26 = vld [vmem:[%s13675_s16 + $0x948] sm:$0xff] }
 0x2b3   : > { %v11216_v33 = vadd.f32 %v11215_v32, %v11214_v9  ;;  %v15262_v0 = vadd.f32 %v11325_v47, %v6785_v39  ;;  %11934 = vmatpush3.bf16.msra.mxu1 %v13364_v37  ;;  %v1865_v37 = vpack.c.bf16 %v531_v53, %v485_v24  ;;  %v487_v39 = vld [vmem:[%s13675_s16 + $0x670] sm:$0xff]  ;;  %v580_v47 = vld [vmem:[%s13675_s16 + $0x958] sm:$0xff]  ;;  %v626_v32 = vld [vmem:[%s13675_s16 + $0xac8] sm:$0xff] }
 0x2b4   : > { %v11217_v45 = vpop.f32.mrf.mxu0  ;;  %7371 = vmatmul.mubr.bf16.gmra.mxu0 %v1819_v19  ;;  %v11327_v5 = vpop.f32.mrf.mxu1  ;;  %11935 = vmatprep.subr.bf16.mxu1 %v13365_v61  ;;  %v1867_v24 = vpack.c.bf16 %v533_v44, %v487_v39  ;;  %v13372_v53 = vld [vmem:[%s17572_s2 + $0x698] sm:$0xff]  }
 0x2b5   : > { %v6788_v34 = vadd.f32 %v11216_v33, %v14961_v17  ;;  %7378 = vmatprep.mubr.bf16.mxu0 %v1866_v2  ;;  %11824 = vmatpush3.bf16.msra.mxu0 %v13352_v3  ;;  %v11328_v35 = vadd.f32 %v11327_v5, %v11326_v13  ;;  %v13355_v17 = vld [vmem:[%s17572_s2 + $0x658] sm:$0xff]   ;;  %v13368_v2 = vld [vmem:[%s17572_s2 + $0x6a0] sm:$0xff]   ;;  %v1912_v3 = vpack.c.bf16 %v624_v20, %v578_v26  ;;  %v13357_v13 = vld [vmem:[%s17572_s2 + $0x650] sm:$0xff]  }
 0x2b6   : > { %v11218_v21 = vpop.f32.mrf.mxu0  ;;  %11825 = vmatprep.subr.bf16.mxu0 %v13353_v23  ;;  %v11329_v19 = vpop.f32.mrf.mxu1  ;;  %7532 = vmatmul.mubr.bf16.gmra.mxu1 %v1821_v28  ;;  %v13356_v23 = vld [vmem:[%s17572_s2 + $0x618] sm:$0xff]   ;;  %v1914_v5 = vpack.c.bf16 %v626_v32, %v580_v47  ;;  %v13373_v26 = vld [vmem:[%s17572_s2 + $0x6d0] sm:$0xff]  }
 0x2b7   : > { %v11219_v9 = vadd.f32 %v11218_v21, %v11217_v45  ;;  %v15281_v43 = vadd.f32 %v11328_v35, %v6788_v34  ;;  %7539 = vmatprep.mubr.bf16.mxu1 %v1868_v56  ;;  %11936 = vmatpush3.bf16.msra.mxu1 %v13366_v54  ;;  %v577_v34 = vld [vmem:[%s13675_s16 + $0x940] sm:$0xff]  ;;  %v623_v35 = vld [vmem:[%s13675_s16 + $0xab0] sm:$0xff] }
 0x2b8   : > { %v11220_v42 = vpop.f32.mrf.mxu0  ;;  %v11330_v12 = vpop.f32.mrf.mxu1  ;;  %11937 = vmatprep.subr.bf16.mxu1 %v13367_v41  ;;  %v13358_v21 = vld [vmem:[%s17572_s2 + $0x610] sm:$0xff]  }
 0x2b9   : > { %v6793_v27 = vadd.f32 %v11219_v9, %v14980_v1  ;;  %11826 = vmatpush3.bf16.msra.mxu0 %v13354_v38  ;;  %v11331_v61 = vadd.f32 %v11330_v12, %v11329_v19  ;;  %v13371_v1 = vld [vmem:[%s17572_s2 + $0x6d8] sm:$0xff]   ;;  %v670_v9 = vld [vmem:[%s13675_s16 + $0xc28] sm:$0xff]  ;;  %v625_v12 = vld [vmem:[%s13675_s16 + $0xac0] sm:$0xff] }
 0x2ba   : > { %v11221_v33 = vpop.f32.mrf.mxu0  ;;  %11827 = vmatprep.subr.bf16.mxu0 %v13355_v17  ;;  %v11332_v45 = vpop.f32.mrf.mxu1  ;;  %v716_v19 = vld [vmem:[%s13675_s16 + $0xd98] sm:$0xff] }
 0x2bb   : > { %v11222_v28 = vadd.f32 %v11221_v33, %v11220_v42  ;;  %v15300_v56 = vadd.f32 %v11331_v61, %v6793_v27  ;;  %11938 = vmatpush3.bf16.msra.mxu1 %v13368_v2  ;;  %v1911_v2 = vpack.c.bf16 %v623_v35, %v577_v34  ;;  %v579_v27 = vld [vmem:[%s13675_s16 + $0x950] sm:$0xff]  ;;  %v672_v61 = vld [vmem:[%s13675_s16 + $0xc38] sm:$0xff]  ;;  %v718_v33 = vld [vmem:[%s13675_s16 + $0xda8] sm:$0xff] }
 0x2bc   : > { %v11223_v54 = vpop.f32.mrf.mxu0  ;;  %7379 = vmatmul.mubr.bf16.gmra.mxu0 %v1865_v37  ;;  %v11333_v41 = vpop.f32.mrf.mxu1  ;;  %11939 = vmatprep.subr.bf16.mxu1 %v13371_v1  ;;  %v1913_v34 = vpack.c.bf16 %v625_v12, %v579_v27  ;;  %v13376_v35 = vld [vmem:[%s17572_s2 + $0x688] sm:$0xff]  }
 0x2bd   : > { %v6796_v38 = vadd.f32 %v11222_v28, %v14999_v30  ;;  %7386 = vmatprep.mubr.bf16.mxu0 %v1912_v3  ;;  %11828 = vmatpush3.bf16.msra.mxu0 %v13356_v23  ;;  %v11334_v20 = vadd.f32 %v11333_v41, %v11332_v45  ;;  %v13359_v30 = vld [vmem:[%s17572_s2 + $0x648] sm:$0xff]   ;;  %v13374_v3 = vld [vmem:[%s17572_s2 + $0x690] sm:$0xff]   ;;  %v1958_v23 = vpack.c.bf16 %v716_v19, %v670_v9  ;;  %v13369_v45 = vld [vmem:[%s17572_s2 + $0x640] sm:$0xff]  }
 0x2be   : > { %v11224_v17 = vpop.f32.mrf.mxu0  ;;  %11829 = vmatprep.subr.bf16.mxu0 %v13357_v13  ;;  %v11335_v37 = vpop.f32.mrf.mxu1  ;;  %7540 = vmatmul.mubr.bf16.gmra.mxu1 %v1867_v24  ;;  %v13360_v13 = vld [vmem:[%s17572_s2 + $0x608] sm:$0xff]   ;;  %v1960_v41 = vpack.c.bf16 %v718_v33, %v672_v61  ;;  %v13377_v9 = vld [vmem:[%s17572_s2 + $0x6c0] sm:$0xff]  }
 0x2bf   : > { %v11225_v42 = vadd.f32 %v11224_v17, %v11223_v54  ;;  %v15319_v39 = vadd.f32 %v11334_v20, %v6796_v38  ;;  %7547 = vmatprep.mubr.bf16.mxu1 %v1914_v5  ;;  %11940 = vmatpush3.bf16.msra.mxu1 %v13372_v53  ;;  %v669_v38 = vld [vmem:[%s13675_s16 + $0xc20] sm:$0xff]  ;;  %v715_v20 = vld [vmem:[%s13675_s16 + $0xd90] sm:$0xff] }
 0x2c0   : > { %v11226_v44 = vpop.f32.mrf.mxu0  ;;  %v11336_v32 = vpop.f32.mrf.mxu1  ;;  %11941 = vmatprep.subr.bf16.mxu1 %v13373_v26  ;;  %v13370_v17 = vld [vmem:[%s17572_s2 + $0x600] sm:$0xff]  }
 0x2c1   : > { %v6801_v47 = vadd.f32 %v11225_v42, %v15018_v8  ;;  %11830 = vmatpush3.bf16.msra.mxu0 %v13358_v21  ;;  %v11337_v1 = vadd.f32 %v11336_v32, %v11335_v37  ;;  %v13375_v8 = vld [vmem:[%s17572_s2 + $0x6c8] sm:$0xff]   ;;  %v808_v37 = vld [vmem:[%s13675_s16 + $0x1078] sm:$0xff]  ;;  %v717_v32 = vld [vmem:[%s13675_s16 + $0xda0] sm:$0xff] }
 0x2c2   : > { %v11227_v28 = vpop.f32.mrf.mxu0  ;;  %11831 = vmatprep.subr.bf16.mxu0 %v13359_v30  ;;  %v11338_v54 = vpop.f32.mrf.mxu1  ;;  %v762_v42 = vld [vmem:[%s13675_s16 + $0xf08] sm:$0xff] }
 0x2c3   : > { %v11228_v24 = vadd.f32 %v11227_v28, %v11226_v44  ;;  %v15338_v5 = vadd.f32 %v11337_v1, %v6801_v47  ;;  %11942 = vmatpush3.bf16.msra.mxu1 %v13374_v3  ;;  %v1957_v3 = vpack.c.bf16 %v715_v20, %v669_v38  ;;  %v671_v47 = vld [vmem:[%s13675_s16 + $0xc30] sm:$0xff]  ;;  %v764_v1 = vld [vmem:[%s13675_s16 + $0xf18] sm:$0xff]  ;;  %v810_v28 = vld [vmem:[%s13675_s16 + $0x1088] sm:$0xff] }
 0x2c4   : > { %v11229_v53 = vpop.f32.mrf.mxu0  ;;  %7387 = vmatmul.mubr.bf16.gmra.mxu0 %v1911_v2  ;;  %v11339_v26 = vpop.f32.mrf.mxu1  ;;  %11943 = vmatprep.subr.bf16.mxu1 %v13375_v8 }
 0x2c5   : > { %v6804_v21 = vadd.f32 %v11228_v24, %v15037_v7  ;;  %7394 = vmatprep.mubr.bf16.mxu0 %v1958_v23  ;;  %11832 = vmatpush3.bf16.msra.mxu0 %v13360_v13  ;;  %v11340_v19 = vadd.f32 %v11339_v26, %v11338_v54  ;;  %v13379_v7 = vld [vmem:[%s17572_s2 + $0x778] sm:$0xff]   ;;  %v13378_v23 = vld [vmem:[%s17572_s2 + $0x680] sm:$0xff]   ;;  %v2004_v13 = vpack.c.bf16 %v808_v37, %v762_v42  ;;  %v807_v26 = vld [vmem:[%s13675_s16 + $0x1070] sm:$0xff] }
 0x2c6   : > { %v11230_v30 = vpop.f32.mrf.mxu0  ;;  %11833 = vmatprep.subr.bf16.mxu0 %v13369_v45  ;;  %v11341_v2 = vpop.f32.mrf.mxu1  ;;  %7548 = vmatmul.mubr.bf16.gmra.mxu1 %v1913_v34  ;;  %v1959_v34 = vpack.c.bf16 %v717_v32, %v671_v47  ;;  %v856_v32 = vld [vmem:[%s13675_s16 + $0x11f8] sm:$0xff] }
 0x2c7   : > { %v11231_v44 = vadd.f32 %v11230_v30, %v11229_v53  ;;  %v15357_v27 = vadd.f32 %v11340_v19, %v6804_v21  ;;  %7555 = vmatprep.mubr.bf16.mxu1 %v1960_v41  ;;  %11944 = vmatpush3.bf16.msra.mxu1 %v13376_v35  ;;  %v761_v21 = vld [vmem:[%s13675_s16 + $0xf00] sm:$0xff]  ;;  %v900_v19 = vld [vmem:[%s13675_s16 + $0x1358] sm:$0xff] }
 0x2c8   : > { %v11232_v12 = vpop.f32.mrf.mxu0  ;;  %v11342_v33 = vpop.f32.mrf.mxu1  ;;  %11945 = vmatprep.subr.bf16.mxu1 %v13377_v9  ;;  %v854_v9 = vld [vmem:[%s13675_s16 + $0x11e8] sm:$0xff] }
 0x2c9   : > { %v6809_v61 = vadd.f32 %v11231_v44, %v15047_v58  ;;  %11834 = vmatpush3.bf16.msra.mxu0 %v13370_v17  ;;  %v11343_v45 = vadd.f32 %v11342_v33, %v11341_v2  ;;  %v2006_v58 = vpack.c.bf16 %v810_v28, %v764_v1  ;;  %v2003_v44 = vpack.c.bf16 %v807_v26, %v761_v21  ;;  %v809_v2 = vld [vmem:[%s13675_s16 + $0x1080] sm:$0xff]  ;;  %v992_v21 = vld [vmem:[%s13675_s16 + $0x1638] sm:$0xff] }
 0x2ca   : > { %v11233_v8 = vpop.f32.mrf.mxu0  ;;  %12043 = vmatprep.subr.bf16.mxu0 %v13379_v7  ;;  %v11344_v54 = vpop.f32.mrf.mxu1  ;;  %v2050_v47 = vpack.c.bf16 %v900_v19, %v854_v9 }
 0x2cb   : > { %v11234_v24 = vadd.f32 %v11233_v8, %v11232_v12  ;;  %v15367_v53 = vadd.f32 %v11343_v45, %v6809_v61  ;;  %11946 = vmatpush3.bf16.msra.mxu1 %v13378_v23  ;;  %v902_v23 = vld [vmem:[%s13675_s16 + $0x1368] sm:$0xff] }
 0x2cc   : > { %v11235_v38 = vpop.f32.mrf.mxu0  ;;  %7395 = vmatmul.mubr.bf16.gmra.mxu0 %v1957_v3  ;;  %v11345_v35 = vpop.f32.mrf.mxu1 }
 0x2cd   : > { %v6812_v41 = vadd.f32 %v11234_v24, %v15054_v29  ;;  %7402 = vmatprep.mubr.bf16.mxu0 %v2004_v13  ;;  %v11346_v20 = vadd.f32 %v11345_v35, %v11344_v54  ;;  %v763_v29 = vld [vmem:[%s13675_s16 + $0xf10] sm:$0xff]  ;;  %v2052_v24 = vpack.c.bf16 %v902_v23, %v856_v32  ;;  %v946_v35 = vld [vmem:[%s13675_s16 + $0x14c8] sm:$0xff] }
 0x2ce   : > { %v11236_v17 = vpop.f32.mrf.mxu0  ;;  %v11347_v42 = vpop.f32.mrf.mxu1  ;;  %7556 = vmatmul.mubr.bf16.gmra.mxu1 %v1959_v34  ;;  %v2005_v28 = vpack.c.bf16 %v809_v2, %v763_v29  ;;  %v853_v34 = vld [vmem:[%s13675_s16 + $0x11e0] sm:$0xff]  ;;  %v948_v29 = vld [vmem:[%s13675_s16 + $0x14d8] sm:$0xff]  ;;  %v994_v2 = vld [vmem:[%s13675_s16 + $0x1648] sm:$0xff] }
 0x2cf   : > { %v11237_v30 = vadd.f32 %v11236_v17, %v11235_v38  ;;  %v15374_v37 = vadd.f32 %v11346_v20, %v6812_v41  ;;  %7563 = vmatprep.mubr.bf16.mxu1 %v2006_v58  ;;  %v899_v38 = vld [vmem:[%s13675_s16 + $0x1350] sm:$0xff] }
 0x2d0   : > { %v11238_v7 = vpop.f32.mrf.mxu0  ;;  %v11348_v3 = vpop.f32.mrf.mxu1  ;;  %v2049_v19 = vpack.c.bf16 %v899_v38, %v853_v34  ;;  %v1084_v34 = vld [vmem:[%s13675_s16 + $0x1918] sm:$0xff] }
 0x2d1   : > { %v6817_v12 = vadd.f32 %v11237_v30, %v15061_v63  ;;  %v11349_v61 = vadd.f32 %v11348_v3, %v11347_v42  ;;  %v901_v30 = vld [vmem:[%s13675_s16 + $0x1360] sm:$0xff] }
 0x2d2   : > { %v11239_v33 = vpop.f32.mrf.mxu0  ;;  %v11350_v1 = vpop.f32.mrf.mxu1 }
 0x2d3   : > { %v11240_v13 = vadd.f32 %v11239_v33, %v11238_v7  ;;  %v15381_v45 = vadd.f32 %v11349_v61, %v6817_v12 }
 0x2d4   : > { %v11241_v8 = vpop.f32.mrf.mxu0  ;;  %7403 = vmatmul.mubr.bf16.gmra.mxu0 %v2003_v44  ;;  %v11351_v54 = vpop.f32.mrf.mxu1  ;;  %v2096_v44 = vpack.c.bf16 %v992_v21, %v946_v35 }
 0x2d5   : > { %v6820_v63 = vadd.f32 %v11240_v13, %v15068_v40  ;;  %7410 = vmatprep.mubr.bf16.mxu0 %v2050_v47  ;;  %v11352_v58 = vadd.f32 %v11351_v54, %v11350_v1  ;;  %v855_v40 = vld [vmem:[%s13675_s16 + $0x11f0] sm:$0xff]  ;;  %v2098_v13 = vpack.c.bf16 %v994_v2, %v948_v29  ;;  %v1038_v54 = vld [vmem:[%s13675_s16 + $0x17a8] sm:$0xff] }
 0x2d6   : > { %v11242_v41 = vpop.f32.mrf.mxu0  ;;  %v11353_v20 = vpop.f32.mrf.mxu1  ;;  %7564 = vmatmul.mubr.bf16.gmra.mxu1 %v2005_v28  ;;  %v2051_v23 = vpack.c.bf16 %v901_v30, %v855_v40  ;;  %v945_v28 = vld [vmem:[%s13675_s16 + $0x14c0] sm:$0xff]  ;;  %v1040_v40 = vld [vmem:[%s13675_s16 + $0x17b8] sm:$0xff]  ;;  %v1086_v30 = vld [vmem:[%s13675_s16 + $0x1928] sm:$0xff] }
 0x2d7   : > { %v11243_v26 = vadd.f32 %v11242_v41, %v11241_v8  ;;  %v15388_v17 = vadd.f32 %v11352_v58, %v6820_v63  ;;  %7571 = vmatprep.mubr.bf16.mxu1 %v2052_v24  ;;  %v991_v8 = vld [vmem:[%s13675_s16 + $0x1630] sm:$0xff] }
 0x2d8   : > { %v11244_v9 = vpop.f32.mrf.mxu0  ;;  %v11354_v7 = vpop.f32.mrf.mxu1  ;;  %v2095_v21 = vpack.c.bf16 %v991_v8, %v945_v28  ;;  %v1176_v28 = vld [vmem:[%s13675_s16 + $0x1bf8] sm:$0xff] }
 0x2d9   : > { %v6825_v42 = vadd.f32 %v11243_v26, %v15075_v6  ;;  %v11355_v12 = vadd.f32 %v11354_v7, %v11353_v20  ;;  %v993_v26 = vld [vmem:[%s13675_s16 + $0x1640] sm:$0xff] }
 0x2da   : > { %v11245_v3 = vpop.f32.mrf.mxu0  ;;  %v11356_v32 = vpop.f32.mrf.mxu1 }
 0x2db   : > { %v11246_v47 = vadd.f32 %v11245_v3, %v11244_v9  ;;  %v15395_v61 = vadd.f32 %v11355_v12, %v6825_v42 }
 0x2dc   : > { %v11247_v33 = vpop.f32.mrf.mxu0  ;;  %7411 = vmatmul.mubr.bf16.gmra.mxu0 %v2049_v19  ;;  %v11357_v1 = vpop.f32.mrf.mxu1  ;;  %v2142_v19 = vpack.c.bf16 %v1084_v34, %v1038_v54 }
 0x2dd   : > { %v6828_v6 = vadd.f32 %v11246_v47, %v15082_v11  ;;  %7418 = vmatprep.mubr.bf16.mxu0 %v2096_v44  ;;  %v11358_v24 = vadd.f32 %v11357_v1, %v11356_v32  ;;  %v947_v11 = vld [vmem:[%s13675_s16 + $0x14d0] sm:$0xff]  ;;  %v2144_v47 = vpack.c.bf16 %v1086_v30, %v1040_v40  ;;  %v1130_v1 = vld [vmem:[%s13675_s16 + $0x1a88] sm:$0xff] }
 0x2de   : > { %v11248_v63 = vpop.f32.mrf.mxu0  ;;  %v11359_v58 = vpop.f32.mrf.mxu1  ;;  %7572 = vmatmul.mubr.bf16.gmra.mxu1 %v2051_v23  ;;  %v2097_v2 = vpack.c.bf16 %v993_v26, %v947_v11  ;;  %v1037_v23 = vld [vmem:[%s13675_s16 + $0x17a0] sm:$0xff]  ;;  %v1132_v11 = vld [vmem:[%s13675_s16 + $0x1a98] sm:$0xff]  ;;  %v1178_v26 = vld [vmem:[%s13675_s16 + $0x1c08] sm:$0xff] }
 0x2df   : > { %v11249_v38 = vadd.f32 %v11248_v63, %v11247_v33  ;;  %v15402_v41 = vadd.f32 %v11358_v24, %v6828_v6  ;;  %7579 = vmatprep.mubr.bf16.mxu1 %v2098_v13  ;;  %v1083_v33 = vld [vmem:[%s13675_s16 + $0x1910] sm:$0xff] }
 0x2e0   : > { %v11250_v35 = vpop.f32.mrf.mxu0  ;;  %v11360_v9 = vpop.f32.mrf.mxu1  ;;  %v2141_v34 = vpack.c.bf16 %v1083_v33, %v1037_v23  ;;  %v1268_v23 = vld [vmem:[%s13675_s16 + $0x1ed8] sm:$0xff] }
 0x2e1   : > { %v6833_v20 = vadd.f32 %v11249_v38, %v15089_v15  ;;  %v11361_v42 = vadd.f32 %v11360_v9, %v11359_v58  ;;  %v1085_v38 = vld [vmem:[%s13675_s16 + $0x1920] sm:$0xff] }
 0x2e2   : > { %v11251_v7 = vpop.f32.mrf.mxu0  ;;  %v11362_v29 = vpop.f32.mrf.mxu1 }
 0x2e3   : > { %v11252_v44 = vadd.f32 %v11251_v7, %v11250_v35  ;;  %v15409_v12 = vadd.f32 %v11361_v42, %v6833_v20 }
 0x2e4   : > { %v11253_v3 = vpop.f32.mrf.mxu0  ;;  %7419 = vmatmul.mubr.bf16.gmra.mxu0 %v2095_v21  ;;  %v11363_v32 = vpop.f32.mrf.mxu1  ;;  %v2188_v21 = vpack.c.bf16 %v1176_v28, %v1130_v1 }
 0x2e5   : > { %v6836_v15 = vadd.f32 %v11252_v44, %v15096_v48  ;;  %7426 = vmatprep.mubr.bf16.mxu0 %v2142_v19  ;;  %v11364_v13 = vadd.f32 %v11363_v32, %v11362_v29  ;;  %v1039_v48 = vld [vmem:[%s13675_s16 + $0x17b0] sm:$0xff]  ;;  %v2190_v44 = vpack.c.bf16 %v1178_v26, %v1132_v11  ;;  %v1222_v32 = vld [vmem:[%s13675_s16 + $0x1d68] sm:$0xff] }
 0x2e6   : > { %v11254_v6 = vpop.f32.mrf.mxu0  ;;  %v11365_v24 = vpop.f32.mrf.mxu1  ;;  %7580 = vmatmul.mubr.bf16.gmra.mxu1 %v2097_v2  ;;  %v2143_v30 = vpack.c.bf16 %v1085_v38, %v1039_v48  ;;  %v1129_v2 = vld [vmem:[%s13675_s16 + $0x1a80] sm:$0xff]  ;;  %v1224_v48 = vld [vmem:[%s13675_s16 + $0x1d78] sm:$0xff]  ;;  %v1270_v38 = vld [vmem:[%s13675_s16 + $0x1ee8] sm:$0xff] }
 0x2e7   : > { %v11255_v8 = vadd.f32 %v11254_v6, %v11253_v3  ;;  %v15416_v63 = vadd.f32 %v11364_v13, %v6836_v15  ;;  %7587 = vmatprep.mubr.bf16.mxu1 %v2144_v47  ;;  %v1175_v3 = vld [vmem:[%s13675_s16 + $0x1bf0] sm:$0xff] }
 0x2e8   : > { %v11256_v54 = vpop.f32.mrf.mxu0  ;;  %v11366_v35 = vpop.f32.mrf.mxu1  ;;  %v2187_v28 = vpack.c.bf16 %v1175_v3, %v1129_v2  ;;  %v1360_v2 = vld [vmem:[%s13675_s16 + $0x21b8] sm:$0xff] }
 0x2e9   : > { %v6841_v58 = vadd.f32 %v11255_v8, %v15103_v59  ;;  %v11367_v20 = vadd.f32 %v11366_v35, %v11365_v24  ;;  %v1177_v8 = vld [vmem:[%s13675_s16 + $0x1c00] sm:$0xff] }
 0x2ea   : > { %v11257_v9 = vpop.f32.mrf.mxu0  ;;  %v11368_v40 = vpop.f32.mrf.mxu1 }
 0x2eb   : > { %v11258_v19 = vadd.f32 %v11257_v9, %v11256_v54  ;;  %v15423_v42 = vadd.f32 %v11367_v20, %v6841_v58 }
 0x2ec   : > { %v11387_v7 = vpop.f32.mrf.mxu0  ;;  %7427 = vmatmul.mubr.bf16.gmra.mxu0 %v2141_v34  ;;  %v11369_v29 = vpop.f32.mrf.mxu1  ;;  %v2234_v34 = vpack.c.bf16 %v1268_v23, %v1222_v32 }
 0x2ed   : > { %v6844_v59 = vadd.f32 %v11258_v19, %v15110_v62  ;;  %7434 = vmatprep.mubr.bf16.mxu0 %v2188_v21  ;;  %v11370_v47 = vadd.f32 %v11369_v29, %v11368_v40  ;;  %v1131_v62 = vld [vmem:[%s13675_s16 + $0x1a90] sm:$0xff]  ;;  %v2236_v19 = vpack.c.bf16 %v1270_v38, %v1224_v48  ;;  %v1314_v29 = vld [vmem:[%s13675_s16 + $0x2048] sm:$0xff] }
 0x2ee   : > { %v11388_v15 = vpop.f32.mrf.mxu0  ;;  %v11499_v13 = vpop.f32.mrf.mxu1  ;;  %7588 = vmatmul.mubr.bf16.gmra.mxu1 %v2143_v30  ;;  %v2189_v26 = vpack.c.bf16 %v1177_v8, %v1131_v62  ;;  %v1221_v30 = vld [vmem:[%s13675_s16 + $0x1d60] sm:$0xff]  ;;  %v1316_v62 = vld [vmem:[%s13675_s16 + $0x2058] sm:$0xff]  ;;  %v1362_v8 = vld [vmem:[%s13675_s16 + $0x21c8] sm:$0xff] }
 0x2ef   : > { %v11389_v33 = vadd.f32 %v11388_v15, %v11387_v7  ;;  %v15430_v6 = vadd.f32 %v11370_v47, %v6844_v59  ;;  %7595 = vmatprep.mubr.bf16.mxu1 %v2190_v44  ;;  %v1267_v7 = vld [vmem:[%s13675_s16 + $0x1ed0] sm:$0xff] }
 0x2f0   : > { %v11390_v1 = vpop.f32.mrf.mxu0  ;;  %v11500_v54 = vpop.f32.mrf.mxu1  ;;  %v2233_v23 = vpack.c.bf16 %v1267_v7, %v1221_v30  ;;  %v1452_v30 = vld [vmem:[%s13675_s16 + $0x2498] sm:$0xff] }
 0x2f1   : > { %v7043_v24 = vadd.f32 %v11389_v33, %v15117_v52  ;;  %v11501_v58 = vadd.f32 %v11500_v54, %v11499_v13  ;;  %v1269_v33 = vld [vmem:[%s13675_s16 + $0x1ee0] sm:$0xff] }
 0x2f2   : > { %v11391_v35 = vpop.f32.mrf.mxu0  ;;  %v11502_v11 = vpop.f32.mrf.mxu1 }
 0x2f3   : > { %v11392_v21 = vadd.f32 %v11391_v35, %v11390_v1  ;;  %v15437_v20 = vadd.f32 %v11501_v58, %v7043_v24 }
 0x2f4   : > { %v11393_v9 = vpop.f32.mrf.mxu0  ;;  %7435 = vmatmul.mubr.bf16.gmra.mxu0 %v2187_v28  ;;  %v11503_v40 = vpop.f32.mrf.mxu1  ;;  %v2280_v28 = vpack.c.bf16 %v1360_v2, %v1314_v29 }
 0x2f5   : > { %v7046_v52 = vadd.f32 %v11392_v21, %v15124_v50  ;;  %7442 = vmatprep.mubr.bf16.mxu0 %v2234_v34  ;;  %v11504_v44 = vadd.f32 %v11503_v40, %v11502_v11  ;;  %v1223_v50 = vld [vmem:[%s13675_s16 + $0x1d70] sm:$0xff]  ;;  %v2282_v21 = vpack.c.bf16 %v1362_v8, %v1316_v62  ;;  %v1406_v40 = vld [vmem:[%s13675_s16 + $0x2328] sm:$0xff] }
 0x2f6   : > { %v11394_v59 = vpop.f32.mrf.mxu0  ;;  %v11505_v47 = vpop.f32.mrf.mxu1  ;;  %7596 = vmatmul.mubr.bf16.gmra.mxu1 %v2189_v26  ;;  %v2235_v38 = vpack.c.bf16 %v1269_v33, %v1223_v50  ;;  %v1313_v26 = vld [vmem:[%s13675_s16 + $0x2040] sm:$0xff]  ;;  %v1408_v50 = vld [vmem:[%s13675_s16 + $0x2338] sm:$0xff]  ;;  %v1454_v33 = vld [vmem:[%s13675_s16 + $0x24a8] sm:$0xff] }
 0x2f7   : > { %v11395_v3 = vadd.f32 %v11394_v59, %v11393_v9  ;;  %v15444_v15 = vadd.f32 %v11504_v44, %v7046_v52  ;;  %7603 = vmatprep.mubr.bf16.mxu1 %v2236_v19  ;;  %v1359_v9 = vld [vmem:[%s13675_s16 + $0x21b0] sm:$0xff] }
 0x2f8   : > { %v11396_v32 = vpop.f32.mrf.mxu0  ;;  %v11506_v1 = vpop.f32.mrf.mxu1  ;;  %v2279_v2 = vpack.c.bf16 %v1359_v9, %v1313_v26  ;;  %v1544_v26 = vld [vmem:[%s13675_s16 + $0x2778] sm:$0xff] }
 0x2f9   : > { %v7051_v13 = vadd.f32 %v11395_v3, %v15131_v22  ;;  %v11507_v24 = vadd.f32 %v11506_v1, %v11505_v47  ;;  %v1361_v3 = vld [vmem:[%s13675_s16 + $0x21c0] sm:$0xff] }
 0x2fa   : > { %v11397_v54 = vpop.f32.mrf.mxu0  ;;  %v11508_v48 = vpop.f32.mrf.mxu1 }
 0x2fb   : > { %v11398_v34 = vadd.f32 %v11397_v54, %v11396_v32  ;;  %v15451_v58 = vadd.f32 %v11507_v24, %v7051_v13 }
 0x2fc   : > { %v11399_v35 = vpop.f32.mrf.mxu0  ;;  %7443 = vmatmul.mubr.bf16.gmra.mxu0 %v2233_v23  ;;  %v11509_v11 = vpop.f32.mrf.mxu1  ;;  %v2326_v23 = vpack.c.bf16 %v1452_v30, %v1406_v40 }
 0x2fd   : > { %v7054_v22 = vadd.f32 %v11398_v34, %v15138_v18  ;;  %7450 = vmatprep.mubr.bf16.mxu0 %v2280_v28  ;;  %v11510_v19 = vadd.f32 %v11509_v11, %v11508_v48  ;;  %v1315_v18 = vld [vmem:[%s13675_s16 + $0x2050] sm:$0xff]  ;;  %v2328_v34 = vpack.c.bf16 %v1454_v33, %v1408_v50  ;;  %v1498_v11 = vld [vmem:[%s13675_s16 + $0x2608] sm:$0xff] }
 0x2fe   : > { %v11400_v52 = vpop.f32.mrf.mxu0  ;;  %v11511_v44 = vpop.f32.mrf.mxu1  ;;  %7604 = vmatmul.mubr.bf16.gmra.mxu1 %v2235_v38  ;;  %v2281_v8 = vpack.c.bf16 %v1361_v3, %v1315_v18  ;;  %v1405_v38 = vld [vmem:[%s13675_s16 + $0x2320] sm:$0xff]  ;;  %v1500_v18 = vld [vmem:[%s13675_s16 + $0x2618] sm:$0xff]  ;;  %v1546_v3 = vld [vmem:[%s13675_s16 + $0x2788] sm:$0xff] }
 0x2ff   : > { %v11401_v7 = vadd.f32 %v11400_v52, %v11399_v35  ;;  %v15458_v59 = vadd.f32 %v11510_v19, %v7054_v22  ;;  %7611 = vmatprep.mubr.bf16.mxu1 %v2282_v21  ;;  %v1451_v35 = vld [vmem:[%s13675_s16 + $0x2490] sm:$0xff] }
 0x300   : > { %v11402_v29 = vpop.f32.mrf.mxu0  ;;  %v11512_v32 = vpop.f32.mrf.mxu1  ;;  %v2325_v30 = vpack.c.bf16 %v1451_v35, %v1405_v38  ;;  %v1590_v38 = vld [vmem:[%s13675_s16 + $0x28e8] sm:$0xff]  ;;  %v1636_v35 = vld [vmem:[%s13675_s16 + $0x2a58] sm:$0xff] }
 0x301   : > { %v7059_v47 = vadd.f32 %v11401_v7, %v15145_v51  ;;  %v11513_v13 = vadd.f32 %v11512_v32, %v11511_v44  ;;  %v1453_v7 = vld [vmem:[%s13675_s16 + $0x24a0] sm:$0xff] }
 0x302   : > { %v11403_v1 = vpop.f32.mrf.mxu0  ;;  %v11514_v62 = vpop.f32.mrf.mxu1 }
 0x303   : > { %v11404_v28 = vadd.f32 %v11403_v1, %v11402_v29  ;;  %v15465_v24 = vadd.f32 %v11513_v13, %v7059_v47 }
 0x304   : > { %v11405_v54 = vpop.f32.mrf.mxu0  ;;  %7451 = vmatmul.mubr.bf16.gmra.mxu0 %v2279_v2  ;;  %v11515_v48 = vpop.f32.mrf.mxu1  ;;  %v2372_v2 = vpack.c.bf16 %v1544_v26, %v1498_v11 }
 0x305   : > { %v7062_v51 = vadd.f32 %v11404_v28, %v15152_v31  ;;  %7458 = vmatprep.mubr.bf16.mxu0 %v2326_v23  ;;  %v11516_v21 = vadd.f32 %v11515_v48, %v11514_v62  ;;  %v1407_v31 = vld [vmem:[%s13675_s16 + $0x2330] sm:$0xff]  ;;  %v2374_v28 = vpack.c.bf16 %v1546_v3, %v1500_v18 }
 0x306   : > { %v11406_v22 = vpop.f32.mrf.mxu0  ;;  %v11517_v19 = vpop.f32.mrf.mxu1  ;;  %7612 = vmatmul.mubr.bf16.gmra.mxu1 %v2281_v8  ;;  %v2327_v33 = vpack.c.bf16 %v1453_v7, %v1407_v31  ;;  %v1497_v8 = vld [vmem:[%s13675_s16 + $0x2600] sm:$0xff]  ;;  %v2418_v31 = vpack.c.bf16 %v1636_v35, %v1590_v38  ;;  %v1592_v7 = vld [vmem:[%s13675_s16 + $0x28f8] sm:$0xff] }
 0x307   : > { %v11407_v9 = vadd.f32 %v11406_v22, %v11405_v54  ;;  %v15472_v52 = vadd.f32 %v11516_v21, %v7062_v51  ;;  %7619 = vmatprep.mubr.bf16.mxu1 %v2328_v34  ;;  %v1543_v54 = vld [vmem:[%s13675_s16 + $0x2770] sm:$0xff]  ;;  %v13393_v34 = vld [vmem:[%s17572_s2 + $0x7f8] sm:$0xff]  }
 0x308   : > { %v11408_v40 = vpop.f32.mrf.mxu0  ;;  %v11518_v29 = vpop.f32.mrf.mxu1  ;;  %12155 = vmatprep.subr.bf16.mxu1 %v13393_v34  ;;  %v2371_v26 = vpack.c.bf16 %v1543_v54, %v1497_v8  ;;  %v1682_v8 = vld [vmem:[%s13675_s16 + $0x2bc8] sm:$0xff]  ;;  %v1728_v54 = vld [vmem:[%s13675_s16 + $0x2d38] sm:$0xff] }
 0x309   : > { %v7067_v44 = vadd.f32 %v11407_v9, %v15159_v57  ;;  %v11519_v47 = vadd.f32 %v11518_v29, %v11517_v19  ;;  %v1499_v9 = vld [vmem:[%s13675_s16 + $0x2610] sm:$0xff]  ;;  %v1545_v19 = vld [vmem:[%s13675_s16 + $0x2780] sm:$0xff] }
 0x30a   : > { %v11409_v32 = vpop.f32.mrf.mxu0  ;;  %v11520_v50 = vpop.f32.mrf.mxu1 }
 0x30b   : > { %v11410_v23 = vadd.f32 %v11409_v32, %v11408_v40  ;;  %v15479_v13 = vadd.f32 %v11519_v47, %v7067_v44  ;;  %v1638_v44 = vld [vmem:[%s13675_s16 + $0x2a68] sm:$0xff]  ;;  %v2373_v47 = vpack.c.bf16 %v1545_v19, %v1499_v9  ;;  %v1684_v9 = vld [vmem:[%s13675_s16 + $0x2bd8] sm:$0xff] }
 0x30c   : > { %v11411_v1 = vpop.f32.mrf.mxu0  ;;  %7459 = vmatmul.mubr.bf16.gmra.mxu0 %v2325_v30  ;;  %v11521_v62 = vpop.f32.mrf.mxu1  ;;  %v1730_v19 = vld [vmem:[%s13675_s16 + $0x2d48] sm:$0xff] }
 0x30d   : > { %v7070_v57 = vadd.f32 %v11410_v23, %v15169_v16  ;;  %7466 = vmatprep.mubr.bf16.mxu0 %v2372_v2  ;;  %v11522_v51 = vadd.f32 %v11521_v62, %v11520_v50  ;;  %v2420_v50 = vpack.c.bf16 %v1638_v44, %v1592_v7 }
 0x30e   : > { %v11412_v48 = vpop.f32.mrf.mxu0  ;;  %v11523_v22 = vpop.f32.mrf.mxu1  ;;  %7620 = vmatmul.mubr.bf16.gmra.mxu1 %v2327_v33 }
 0x30f   : > { %v11413_v21 = vadd.f32 %v11412_v48, %v11411_v1  ;;  %v15489_v16 = vadd.f32 %v11522_v51, %v7070_v57  ;;  %7627 = vmatprep.mubr.bf16.mxu1 %v2374_v28  ;;  %v1589_v1 = vld [vmem:[%s13675_s16 + $0x28e0] sm:$0xff]  ;;  %v1635_v28 = vld [vmem:[%s13675_s16 + $0x2a50] sm:$0xff] }
 0x310   : > { %v11414_v11 = vpop.f32.mrf.mxu0  ;;  %v11524_v30 = vpop.f32.mrf.mxu1  ;;  %v2417_v35 = vpack.c.bf16 %v1635_v28, %v1589_v1  ;;  %v352_v1 = vld [vmem:[%s13675_s16 + $0x238] sm:$0xff] }
 0x311   : > { %v7075_v40 = vadd.f32 %v11413_v21, %v15176_v49  ;;  %v11525_v29 = vadd.f32 %v11524_v30, %v11523_v22  ;;  %v1637_v21 = vld [vmem:[%s13675_s16 + $0x2a60] sm:$0xff] }
 0x312   : > { %v11415_v2 = vpop.f32.mrf.mxu0  ;;  %v11526_v3 = vpop.f32.mrf.mxu1 }
 0x313   : > { %v11416_v18 = vadd.f32 %v11415_v2, %v11414_v11  ;;  %v15496_v32 = vadd.f32 %v11525_v29, %v7075_v40 }
 0x314   : > { %v11417_v23 = vpop.f32.mrf.mxu0  ;;  %7467 = vmatmul.mubr.bf16.gmra.mxu0 %v2371_v26  ;;  %v11527_v33 = vpop.f32.mrf.mxu1  ;;  %v2464_v26 = vpack.c.bf16 %v1728_v54, %v1682_v8 }
 0x315   : > { %v7078_v49 = vadd.f32 %v11416_v18, %v15183_v14  ;;  %7474 = vmatprep.mubr.bf16.mxu0 %v2418_v31  ;;  %v11528_v57 = vadd.f32 %v11527_v33, %v11526_v3  ;;  %v1591_v14 = vld [vmem:[%s13675_s16 + $0x28f0] sm:$0xff]  ;;  %v2466_v18 = vpack.c.bf16 %v1730_v19, %v1684_v9  ;;  %v306_v33 = vld [vmem:[%s13675_s16 + $0xc8] sm:$0xff] }
 0x316   : > { %v11418_v62 = vpop.f32.mrf.mxu0  ;;  %v11529_v51 = vpop.f32.mrf.mxu1  ;;  %7628 = vmatmul.mubr.bf16.gmra.mxu1 %v2373_v47  ;;  %v2419_v44 = vpack.c.bf16 %v1637_v21, %v1591_v14  ;;  %v1681_v47 = vld [vmem:[%s13675_s16 + $0x2bc0] sm:$0xff]  ;;  %v308_v14 = vld [vmem:[%s13675_s16 + $0xd8] sm:$0xff]  ;;  %v354_v21 = vld [vmem:[%s13675_s16 + $0x248] sm:$0xff] }
 0x317   : > { %v11419_v34 = vadd.f32 %v11418_v62, %v11417_v23  ;;  %v15503_v48 = vadd.f32 %v11528_v57, %v7078_v49  ;;  %7635 = vmatprep.mubr.bf16.mxu1 %v2420_v50  ;;  %v1727_v23 = vld [vmem:[%s13675_s16 + $0x2d30] sm:$0xff] }
 0x318   : > { %v11420_v38 = vpop.f32.mrf.mxu0  ;;  %v11530_v11 = vpop.f32.mrf.mxu1  ;;  %v2463_v54 = vpack.c.bf16 %v1727_v23, %v1681_v47  ;;  %v444_v47 = vld [vmem:[%s13675_s16 + $0x518] sm:$0xff] }
 0x319   : > { %v7083_v22 = vadd.f32 %v11419_v34, %v15190_v25  ;;  %v11531_v40 = vadd.f32 %v11530_v11, %v11529_v51  ;;  %v1729_v34 = vld [vmem:[%s13675_s16 + $0x2d40] sm:$0xff] }
 0x31a   : > { %v11421_v30 = vpop.f32.mrf.mxu0  ;;  %v11532_v7 = vpop.f32.mrf.mxu1 }
 0x31b   : > { %v11422_v31 = vadd.f32 %v11421_v30, %v11420_v38  ;;  %v15510_v29 = vadd.f32 %v11531_v40, %v7083_v22 }
 0x31c   : > { %v11423_v2 = vpop.f32.mrf.mxu0  ;;  %7475 = vmatmul.mubr.bf16.gmra.mxu0 %v2417_v35  ;;  %v11533_v3 = vpop.f32.mrf.mxu1  ;;  %v1778_v35 = vpack.c.bf16 %v352_v1, %v306_v33 }
 0x31d   : > { %v7086_v25 = vadd.f32 %v11422_v31, %v15197_v46  ;;  %7482 = vmatprep.mubr.bf16.mxu0 %v2464_v26  ;;  %v11534_v50 = vadd.f32 %v11533_v3, %v11532_v7  ;;  %v1683_v46 = vld [vmem:[%s13675_s16 + $0x2bd0] sm:$0xff]  ;;  %v1780_v31 = vpack.c.bf16 %v354_v21, %v308_v14  ;;  %v398_v3 = vld [vmem:[%s13675_s16 + $0x3a8] sm:$0xff] }
 0x31e   : > { %v11424_v49 = vpop.f32.mrf.mxu0  ;;  %v11535_v57 = vpop.f32.mrf.mxu1  ;;  %7636 = vmatmul.mubr.bf16.gmra.mxu1 %v2419_v44  ;;  %v2465_v19 = vpack.c.bf16 %v1729_v34, %v1683_v46  ;;  %v305_v44 = vld [vmem:[%s13675_s16 + $0xc0] sm:$0xff]  ;;  %v1824_v46 = vpack.c.bf16 %v444_v47, %v398_v3  ;;  %v400_v34 = vld [vmem:[%s13675_s16 + $0x3b8] sm:$0xff]  ;;  %v13381_v14 = vld [vmem:[%s17572_s2 + $0x770] sm:$0xff]  }
 0x31f   : > { %v11425_v28 = vadd.f32 %v11424_v49, %v11423_v2  ;;  %v15517_v62 = vadd.f32 %v11534_v50, %v7086_v25  ;;  %7643 = vmatprep.mubr.bf16.mxu1 %v2466_v18  ;;  %v351_v2 = vld [vmem:[%s13675_s16 + $0x230] sm:$0xff]  ;;  %v490_v3 = vld [vmem:[%s13675_s16 + $0x688] sm:$0xff]  ;;  %v536_v47 = vld [vmem:[%s13675_s16 + $0x7f8] sm:$0xff] }
 0x320   : > { %v11426_v8 = vpop.f32.mrf.mxu0  ;;  %v11536_v38 = vpop.f32.mrf.mxu1  ;;  %v1777_v1 = vpack.c.bf16 %v351_v2, %v305_v44  ;;  %v13382_v44 = vld [vmem:[%s17572_s2 + $0x730] sm:$0xff]  }
 0x321   : > { %v7091_v51 = vadd.f32 %v11425_v28, %v15204_v36  ;;  %v11537_v22 = vadd.f32 %v11536_v38, %v11535_v57  ;;  %v353_v28 = vld [vmem:[%s13675_s16 + $0x240] sm:$0xff]  ;;  %v13395_v2 = vld [vmem:[%s17572_s2 + $0x7f0] sm:$0xff]  }
 0x322   : > { %v11427_v11 = vpop.f32.mrf.mxu0  ;;  %v11538_v9 = vpop.f32.mrf.mxu1 }
 0x323   : > { %v11428_v26 = vadd.f32 %v11427_v11, %v11426_v8  ;;  %v15524_v40 = vadd.f32 %v11537_v22, %v7091_v51  ;;  %v446_v51 = vld [vmem:[%s13675_s16 + $0x528] sm:$0xff] }
 0x324   : > { %v11429_v30 = vpop.f32.mrf.mxu0  ;;  %7483 = vmatmul.mubr.bf16.gmra.mxu0 %v2463_v54  ;;  %v11539_v7 = vpop.f32.mrf.mxu1  ;;  %v13380_v54 = vld [vmem:[%s17572_s2 + $0x738] sm:$0xff]  }
 0x325   : > { %v7094_v36 = vadd.f32 %v11428_v26, %v15211_v10  ;;  %7684 = vmatprep.mubr.bf16.mxu0 %v1778_v35  ;;  %v11540_v18 = vadd.f32 %v11539_v7, %v11538_v9  ;;  %v307_v10 = vld [vmem:[%s13675_s16 + $0xd0] sm:$0xff]  ;;  %v397_v9 = vld [vmem:[%s13675_s16 + $0x3a0] sm:$0xff] }
 0x326   : > { %v11430_v25 = vpop.f32.mrf.mxu0  ;;  %v11541_v50 = vpop.f32.mrf.mxu1  ;;  %7644 = vmatmul.mubr.bf16.gmra.mxu1 %v2465_v19  ;;  %v1779_v11 = vpack.c.bf16 %v353_v28, %v307_v10  ;;  %v1826_v19 = vpack.c.bf16 %v446_v51, %v400_v34  ;;  %v443_v7 = vld [vmem:[%s13675_s16 + $0x510] sm:$0xff]  ;;  %v1870_v34 = vpack.c.bf16 %v536_v47, %v490_v3  ;;  %v492_v51 = vld [vmem:[%s13675_s16 + $0x698] sm:$0xff]  ;;  %v13399_v3 = vld [vmem:[%s17572_s2 + $0x7e0] sm:$0xff]  }
 0x327   : > { %v11431_v23 = vadd.f32 %v11430_v25, %v11429_v30  ;;  %v15531_v49 = vadd.f32 %v11540_v18, %v7094_v36  ;;  %7845 = vmatprep.mubr.bf16.mxu1 %v1780_v31  ;;  %v13394_v30 = vld [vmem:[%s17572_s2 + $0x7b8] sm:$0xff]   ;;  %v1823_v10 = vpack.c.bf16 %v443_v7, %v397_v9  ;;  %v399_v28 = vld [vmem:[%s13675_s16 + $0x3b0] sm:$0xff]  ;;  %v13398_v7 = vld [vmem:[%s17572_s2 + $0x7a8] sm:$0xff]  }
 0x328   : > { %v11432_v33 = vpop.f32.mrf.mxu0  ;;  %v11542_v8 = vpop.f32.mrf.mxu1 }
 0x329   : > { %v7099_v57 = vadd.f32 %v11431_v23, %v15224_v60  ;;  %v11543_v38 = vadd.f32 %v11542_v8, %v11541_v50  ;;  %v13396_v8 = vld [vmem:[%s17572_s2 + $0x7b0] sm:$0xff]  }
 0x32a   : > { %v11433_v35 = vpop.f32.mrf.mxu0  ;;  %v11544_v22 = vpop.f32.mrf.mxu1 }
 0x32b   : > { %v11434_v21 = vadd.f32 %v11433_v35, %v11432_v33  ;;  %v15544_v60 = vadd.f32 %v11543_v38, %v7099_v57  ;;  %v445_v57 = vld [vmem:[%s13675_s16 + $0x520] sm:$0xff]  ;;  %v538_v38 = vld [vmem:[%s13675_s16 + $0x808] sm:$0xff] }
 0x32c   : > { %v11435_v26 = vpop.f32.mrf.mxu0  ;;  %7685 = vmatmul.mubr.bf16.vlgmr.msra.gmra.mxu0 %v1777_v1  ;;  %v11545_v36 = vpop.f32.mrf.mxu1  ;;  %v13384_v35 = vld [vmem:[%s17572_s2 + $0x728] sm:$0xff]   ;;  %v1825_v9 = vpack.c.bf16 %v445_v57, %v399_v28 }
 0x32d   : > { %v7102_v31 = vadd.f32 %v11434_v21, %v15243_v55  ;;  %12044 = vmatpush3.bf16.msra.mxu0 %v13380_v54  ;;  %7692 = vmatprep.mubr.bf16.mxu0 %v1824_v46  ;;  %v11546_v18 = vadd.f32 %v11545_v36, %v11544_v22  ;;  %v13383_v55 = vld [vmem:[%s17572_s2 + $0x768] sm:$0xff]   ;;  %v13385_v22 = vld [vmem:[%s17572_s2 + $0x760] sm:$0xff]   ;;  %v1872_v36 = vpack.c.bf16 %v538_v38, %v492_v51 }
 0x32e   : > { %v11436_v25 = vpop.f32.mrf.mxu0  ;;  %12045 = vmatprep.subr.bf16.mxu0 %v13381_v14  ;;  %v11547_v50 = vpop.f32.mrf.mxu1  ;;  %7846 = vmatmul.mubr.bf16.vlgmr.msra.gmra.mxu1 %v1779_v11 }
 0x32f   : > { %v11437_v23 = vadd.f32 %v11436_v25, %v11435_v26  ;;  %v15563_v33 = vadd.f32 %v11546_v18, %v7102_v31  ;;  %7853 = vmatprep.mubr.bf16.mxu1 %v1826_v19  ;;  %12156 = vmatpush3.bf16.msra.mxu1 %v13394_v30  ;;  %v489_v31 = vld [vmem:[%s13675_s16 + $0x680] sm:$0xff]  ;;  %v535_v18 = vld [vmem:[%s13675_s16 + $0x7f0] sm:$0xff] }
 0x330   : > { %v11438_v1 = vpop.f32.mrf.mxu0  ;;  %v11548_v46 = vpop.f32.mrf.mxu1  ;;  %12157 = vmatprep.subr.bf16.mxu1 %v13395_v2  ;;  %v13386_v25 = vld [vmem:[%s17572_s2 + $0x720] sm:$0xff]  }
 0x331   : > { %v7107_v54 = vadd.f32 %v11437_v23, %v15262_v0  ;;  %12046 = vmatpush3.bf16.msra.mxu0 %v13382_v44  ;;  %v11549_v14 = vadd.f32 %v11548_v46, %v11547_v50  ;;  %v13397_v0 = vld [vmem:[%s17572_s2 + $0x7e8] sm:$0xff]   ;;  %v628_v50 = vld [vmem:[%s13675_s16 + $0xad8] sm:$0xff]  ;;  %v537_v46 = vld [vmem:[%s13675_s16 + $0x800] sm:$0xff] }
 0x332   : > { %v11439_v21 = vpop.f32.mrf.mxu0  ;;  %12047 = vmatprep.subr.bf16.mxu0 %v13383_v55  ;;  %v11550_v26 = vpop.f32.mrf.mxu1  ;;  %v582_v23 = vld [vmem:[%s13675_s16 + $0x968] sm:$0xff] }
 0x333   : > { %v11440_v11 = vadd.f32 %v11439_v21, %v11438_v1  ;;  %v15582_v19 = vadd.f32 %v11549_v14, %v7107_v54  ;;  %12158 = vmatpush3.bf16.msra.mxu1 %v13396_v8  ;;  %v1869_v8 = vpack.c.bf16 %v535_v18, %v489_v31  ;;  %v491_v54 = vld [vmem:[%s13675_s16 + $0x690] sm:$0xff]  ;;  %v584_v14 = vld [vmem:[%s13675_s16 + $0x978] sm:$0xff]  ;;  %v630_v21 = vld [vmem:[%s13675_s16 + $0xae8] sm:$0xff] }
 0x334   : > { %v11441_v30 = vpop.f32.mrf.mxu0  ;;  %7693 = vmatmul.mubr.bf16.gmra.mxu0 %v1823_v10  ;;  %v11551_v2 = vpop.f32.mrf.mxu1  ;;  %12159 = vmatprep.subr.bf16.mxu1 %v13397_v0  ;;  %v1871_v31 = vpack.c.bf16 %v537_v46, %v491_v54  ;;  %v13404_v18 = vld [vmem:[%s17572_s2 + $0x798] sm:$0xff]  }
 0x335   : > { %v7110_v44 = vadd.f32 %v11440_v11, %v15281_v43  ;;  %7700 = vmatprep.mubr.bf16.mxu0 %v1870_v34  ;;  %12048 = vmatpush3.bf16.msra.mxu0 %v13384_v35  ;;  %v11552_v47 = vadd.f32 %v11551_v2, %v11550_v26  ;;  %v13387_v43 = vld [vmem:[%s17572_s2 + $0x758] sm:$0xff]   ;;  %v13400_v34 = vld [vmem:[%s17572_s2 + $0x7a0] sm:$0xff]   ;;  %v1916_v35 = vpack.c.bf16 %v628_v50, %v582_v23  ;;  %v13389_v26 = vld [vmem:[%s17572_s2 + $0x750] sm:$0xff]  }
 0x336   : > { %v11442_v55 = vpop.f32.mrf.mxu0  ;;  %12049 = vmatprep.subr.bf16.mxu0 %v13385_v22  ;;  %v11553_v10 = vpop.f32.mrf.mxu1  ;;  %7854 = vmatmul.mubr.bf16.gmra.mxu1 %v1825_v9  ;;  %v13388_v22 = vld [vmem:[%s17572_s2 + $0x718] sm:$0xff]   ;;  %v1918_v2 = vpack.c.bf16 %v630_v21, %v584_v14  ;;  %v13405_v23 = vld [vmem:[%s17572_s2 + $0x7d0] sm:$0xff]  }
 0x337   : > { %v11443_v1 = vadd.f32 %v11442_v55, %v11441_v30  ;;  %v15601_v28 = vadd.f32 %v11552_v47, %v7110_v44  ;;  %7861 = vmatprep.mubr.bf16.mxu1 %v1872_v36  ;;  %12160 = vmatpush3.bf16.msra.mxu1 %v13398_v7  ;;  %v581_v44 = vld [vmem:[%s13675_s16 + $0x960] sm:$0xff]  ;;  %v627_v47 = vld [vmem:[%s13675_s16 + $0xad0] sm:$0xff] }
 0x338   : > { %v11444_v57 = vpop.f32.mrf.mxu0  ;;  %v11554_v38 = vpop.f32.mrf.mxu1  ;;  %12161 = vmatprep.subr.bf16.mxu1 %v13399_v3  ;;  %v13390_v55 = vld [vmem:[%s17572_s2 + $0x710] sm:$0xff]  }
 0x339   : > { %v7115_v51 = vadd.f32 %v11443_v1, %v15300_v56  ;;  %12050 = vmatpush3.bf16.msra.mxu0 %v13386_v25  ;;  %v11555_v0 = vadd.f32 %v11554_v38, %v11553_v10  ;;  %v13403_v56 = vld [vmem:[%s17572_s2 + $0x7d8] sm:$0xff]   ;;  %v674_v1 = vld [vmem:[%s13675_s16 + $0xc48] sm:$0xff]  ;;  %v629_v38 = vld [vmem:[%s13675_s16 + $0xae0] sm:$0xff] }
 0x33a   : > { %v11445_v11 = vpop.f32.mrf.mxu0  ;;  %12051 = vmatprep.subr.bf16.mxu0 %v13387_v43  ;;  %v11556_v30 = vpop.f32.mrf.mxu1  ;;  %v720_v10 = vld [vmem:[%s13675_s16 + $0xdb8] sm:$0xff] }
 0x33b   : > { %v11446_v9 = vadd.f32 %v11445_v11, %v11444_v57  ;;  %v15620_v36 = vadd.f32 %v11555_v0, %v7115_v51  ;;  %12162 = vmatpush3.bf16.msra.mxu1 %v13400_v34  ;;  %v1915_v34 = vpack.c.bf16 %v627_v47, %v581_v44  ;;  %v583_v51 = vld [vmem:[%s13675_s16 + $0x970] sm:$0xff]  ;;  %v676_v0 = vld [vmem:[%s13675_s16 + $0xc58] sm:$0xff]  ;;  %v722_v11 = vld [vmem:[%s13675_s16 + $0xdc8] sm:$0xff] }
 0x33c   : > { %v11447_v7 = vpop.f32.mrf.mxu0  ;;  %7701 = vmatmul.mubr.bf16.gmra.mxu0 %v1869_v8  ;;  %v11557_v3 = vpop.f32.mrf.mxu1  ;;  %12163 = vmatprep.subr.bf16.mxu1 %v13403_v56  ;;  %v1917_v44 = vpack.c.bf16 %v629_v38, %v583_v51  ;;  %v13408_v47 = vld [vmem:[%s17572_s2 + $0x788] sm:$0xff]  }
 0x33d   : > { %v7118_v25 = vadd.f32 %v11446_v9, %v15319_v39  ;;  %7708 = vmatprep.mubr.bf16.mxu0 %v1916_v35  ;;  %12052 = vmatpush3.bf16.msra.mxu0 %v13388_v22  ;;  %v11558_v50 = vadd.f32 %v11557_v3, %v11556_v30  ;;  %v13391_v39 = vld [vmem:[%s17572_s2 + $0x748] sm:$0xff]   ;;  %v13406_v35 = vld [vmem:[%s17572_s2 + $0x790] sm:$0xff]   ;;  %v1962_v22 = vpack.c.bf16 %v720_v10, %v674_v1  ;;  %v13401_v30 = vld [vmem:[%s17572_s2 + $0x740] sm:$0xff]  }
 0x33e   : > { %v11448_v43 = vpop.f32.mrf.mxu0  ;;  %12053 = vmatprep.subr.bf16.mxu0 %v13389_v26  ;;  %v11559_v8 = vpop.f32.mrf.mxu1  ;;  %7862 = vmatmul.mubr.bf16.gmra.mxu1 %v1871_v31  ;;  %v13392_v26 = vld [vmem:[%s17572_s2 + $0x708] sm:$0xff]   ;;  %v1964_v3 = vpack.c.bf16 %v722_v11, %v676_v0  ;;  %v13409_v1 = vld [vmem:[%s17572_s2 + $0x7c0] sm:$0xff]  }
 0x33f   : > { %v11449_v57 = vadd.f32 %v11448_v43, %v11447_v7  ;;  %v15639_v54 = vadd.f32 %v11558_v50, %v7118_v25  ;;  %7869 = vmatprep.mubr.bf16.mxu1 %v1918_v2  ;;  %12164 = vmatpush3.bf16.msra.mxu1 %v13404_v18  ;;  %v673_v25 = vld [vmem:[%s13675_s16 + $0xc40] sm:$0xff]  ;;  %v719_v50 = vld [vmem:[%s13675_s16 + $0xdb0] sm:$0xff] }
 0x340   : > { %v11450_v46 = vpop.f32.mrf.mxu0  ;;  %v11560_v21 = vpop.f32.mrf.mxu1  ;;  %12165 = vmatprep.subr.bf16.mxu1 %v13405_v23  ;;  %v13402_v43 = vld [vmem:[%s17572_s2 + $0x700] sm:$0xff]  }
 0x341   : > { %v7123_v14 = vadd.f32 %v11449_v57, %v15338_v5  ;;  %12054 = vmatpush3.bf16.msra.mxu0 %v13390_v55  ;;  %v11561_v56 = vadd.f32 %v11560_v21, %v11559_v8  ;;  %v13407_v5 = vld [vmem:[%s17572_s2 + $0x7c8] sm:$0xff]   ;;  %v812_v8 = vld [vmem:[%s13675_s16 + $0x1098] sm:$0xff]  ;;  %v721_v21 = vld [vmem:[%s13675_s16 + $0xdc0] sm:$0xff] }
 0x342   : > { %v11451_v9 = vpop.f32.mrf.mxu0  ;;  %12055 = vmatprep.subr.bf16.mxu0 %v13391_v39  ;;  %v11562_v7 = vpop.f32.mrf.mxu1  ;;  %v766_v57 = vld [vmem:[%s13675_s16 + $0xf28] sm:$0xff] }
 0x343   : > { %v11452_v31 = vadd.f32 %v11451_v9, %v11450_v46  ;;  %v15658_v2 = vadd.f32 %v11561_v56, %v7123_v14  ;;  %12166 = vmatpush3.bf16.msra.mxu1 %v13406_v35  ;;  %v1961_v35 = vpack.c.bf16 %v719_v50, %v673_v25  ;;  %v675_v14 = vld [vmem:[%s13675_s16 + $0xc50] sm:$0xff]  ;;  %v768_v56 = vld [vmem:[%s13675_s16 + $0xf38] sm:$0xff]  ;;  %v814_v9 = vld [vmem:[%s13675_s16 + $0x10a8] sm:$0xff] }
 0x344   : > { %v11453_v18 = vpop.f32.mrf.mxu0  ;;  %7709 = vmatmul.mubr.bf16.gmra.mxu0 %v1915_v34  ;;  %v11563_v23 = vpop.f32.mrf.mxu1  ;;  %12167 = vmatprep.subr.bf16.mxu1 %v13407_v5 }
 0x345   : > { %v7126_v55 = vadd.f32 %v11452_v31, %v15357_v27  ;;  %7716 = vmatprep.mubr.bf16.mxu0 %v1962_v22  ;;  %12056 = vmatpush3.bf16.msra.mxu0 %v13392_v26  ;;  %v11564_v10 = vadd.f32 %v11563_v23, %v11562_v7  ;;  %v13411_v27 = vld [vmem:[%s17572_s2 + $0x878] sm:$0xff]   ;;  %v13410_v22 = vld [vmem:[%s17572_s2 + $0x780] sm:$0xff]   ;;  %v2008_v26 = vpack.c.bf16 %v812_v8, %v766_v57  ;;  %v811_v23 = vld [vmem:[%s13675_s16 + $0x1090] sm:$0xff] }
 0x346   : > { %v11454_v39 = vpop.f32.mrf.mxu0  ;;  %12057 = vmatprep.subr.bf16.mxu0 %v13401_v30  ;;  %v11565_v34 = vpop.f32.mrf.mxu1  ;;  %7870 = vmatmul.mubr.bf16.gmra.mxu1 %v1917_v44  ;;  %v1963_v44 = vpack.c.bf16 %v721_v21, %v675_v14  ;;  %v860_v21 = vld [vmem:[%s13675_s16 + $0x1218] sm:$0xff] }
 0x347   : > { %v11455_v46 = vadd.f32 %v11454_v39, %v11453_v18  ;;  %v15677_v51 = vadd.f32 %v11564_v10, %v7126_v55  ;;  %7877 = vmatprep.mubr.bf16.mxu1 %v1964_v3  ;;  %12168 = vmatpush3.bf16.msra.mxu1 %v13408_v47  ;;  %v765_v55 = vld [vmem:[%s13675_s16 + $0xf20] sm:$0xff]  ;;  %v904_v10 = vld [vmem:[%s13675_s16 + $0x1378] sm:$0xff] }
 0x348   : > { %v11456_v38 = vpop.f32.mrf.mxu0  ;;  %v11566_v11 = vpop.f32.mrf.mxu1  ;;  %12169 = vmatprep.subr.bf16.mxu1 %v13409_v1  ;;  %v858_v1 = vld [vmem:[%s13675_s16 + $0x1208] sm:$0xff] }
 0x349   : > { %v7131_v0 = vadd.f32 %v11455_v46, %v15367_v53  ;;  %12058 = vmatpush3.bf16.msra.mxu0 %v13402_v43  ;;  %v11567_v30 = vadd.f32 %v11566_v11, %v11565_v34  ;;  %v2010_v53 = vpack.c.bf16 %v814_v9, %v768_v56  ;;  %v2007_v46 = vpack.c.bf16 %v811_v23, %v765_v55  ;;  %v813_v34 = vld [vmem:[%s13675_s16 + $0x10a0] sm:$0xff]  ;;  %v996_v55 = vld [vmem:[%s13675_s16 + $0x1658] sm:$0xff] }
 0x34a   : > { %v11457_v5 = vpop.f32.mrf.mxu0  ;;  %12267 = vmatprep.subr.bf16.mxu0 %v13411_v27  ;;  %v11568_v7 = vpop.f32.mrf.mxu1  ;;  %v2054_v14 = vpack.c.bf16 %v904_v10, %v858_v1 }
 0x34b   : > { %v11458_v31 = vadd.f32 %v11457_v5, %v11456_v38  ;;  %v15687_v18 = vadd.f32 %v11567_v30, %v7131_v0  ;;  %12170 = vmatpush3.bf16.msra.mxu1 %v13410_v22  ;;  %v906_v22 = vld [vmem:[%s13675_s16 + $0x1388] sm:$0xff] }
 0x34c   : > { %v11459_v25 = vpop.f32.mrf.mxu0  ;;  %7717 = vmatmul.mubr.bf16.gmra.mxu0 %v1961_v35  ;;  %v11569_v47 = vpop.f32.mrf.mxu1 }
 0x34d   : > { %v7134_v3 = vadd.f32 %v11458_v31, %v15374_v37  ;;  %7724 = vmatprep.mubr.bf16.mxu0 %v2008_v26  ;;  %v11570_v50 = vadd.f32 %v11569_v47, %v11568_v7  ;;  %v767_v37 = vld [vmem:[%s13675_s16 + $0xf30] sm:$0xff]  ;;  %v2056_v31 = vpack.c.bf16 %v906_v22, %v860_v21  ;;  %v950_v47 = vld [vmem:[%s13675_s16 + $0x14e8] sm:$0xff] }
 0x34e   : > { %v11460_v43 = vpop.f32.mrf.mxu0  ;;  %v11571_v57 = vpop.f32.mrf.mxu1  ;;  %7878 = vmatmul.mubr.bf16.gmra.mxu1 %v1963_v44  ;;  %v2009_v9 = vpack.c.bf16 %v813_v34, %v767_v37  ;;  %v857_v44 = vld [vmem:[%s13675_s16 + $0x1200] sm:$0xff]  ;;  %v952_v37 = vld [vmem:[%s13675_s16 + $0x14f8] sm:$0xff]  ;;  %v998_v34 = vld [vmem:[%s13675_s16 + $0x1668] sm:$0xff] }
 0x34f   : > { %v11461_v39 = vadd.f32 %v11460_v43, %v11459_v25  ;;  %v15694_v8 = vadd.f32 %v11570_v50, %v7134_v3  ;;  %7885 = vmatprep.mubr.bf16.mxu1 %v2010_v53  ;;  %v903_v25 = vld [vmem:[%s13675_s16 + $0x1370] sm:$0xff] }
 0x350   : > { %v11462_v27 = vpop.f32.mrf.mxu0  ;;  %v11572_v35 = vpop.f32.mrf.mxu1  ;;  %v2053_v10 = vpack.c.bf16 %v903_v25, %v857_v44  ;;  %v1088_v44 = vld [vmem:[%s13675_s16 + $0x1938] sm:$0xff] }
 0x351   : > { %v7139_v38 = vadd.f32 %v11461_v39, %v15381_v45  ;;  %v11573_v0 = vadd.f32 %v11572_v35, %v11571_v57  ;;  %v905_v39 = vld [vmem:[%s13675_s16 + $0x1380] sm:$0xff] }
 0x352   : > { %v11463_v11 = vpop.f32.mrf.mxu0  ;;  %v11574_v56 = vpop.f32.mrf.mxu1 }
 0x353   : > { %v11464_v26 = vadd.f32 %v11463_v11, %v11462_v27  ;;  %v15701_v30 = vadd.f32 %v11573_v0, %v7139_v38 }
 0x354   : > { %v11465_v5 = vpop.f32.mrf.mxu0  ;;  %7725 = vmatmul.mubr.bf16.gmra.mxu0 %v2007_v46  ;;  %v11575_v7 = vpop.f32.mrf.mxu1  ;;  %v2100_v46 = vpack.c.bf16 %v996_v55, %v950_v47 }
 0x355   : > { %v7142_v45 = vadd.f32 %v11464_v26, %v15388_v17  ;;  %7732 = vmatprep.mubr.bf16.mxu0 %v2054_v14  ;;  %v11576_v53 = vadd.f32 %v11575_v7, %v11574_v56  ;;  %v859_v17 = vld [vmem:[%s13675_s16 + $0x1210] sm:$0xff]  ;;  %v2102_v26 = vpack.c.bf16 %v998_v34, %v952_v37  ;;  %v1042_v7 = vld [vmem:[%s13675_s16 + $0x17c8] sm:$0xff] }
 0x356   : > { %v11466_v3 = vpop.f32.mrf.mxu0  ;;  %v11577_v50 = vpop.f32.mrf.mxu1  ;;  %7886 = vmatmul.mubr.bf16.gmra.mxu1 %v2009_v9  ;;  %v2055_v22 = vpack.c.bf16 %v905_v39, %v859_v17  ;;  %v949_v9 = vld [vmem:[%s13675_s16 + $0x14e0] sm:$0xff]  ;;  %v1044_v17 = vld [vmem:[%s13675_s16 + $0x17d8] sm:$0xff]  ;;  %v1090_v39 = vld [vmem:[%s13675_s16 + $0x1948] sm:$0xff] }
 0x357   : > { %v11467_v23 = vadd.f32 %v11466_v3, %v11465_v5  ;;  %v15708_v43 = vadd.f32 %v11576_v53, %v7142_v45  ;;  %7893 = vmatprep.mubr.bf16.mxu1 %v2056_v31  ;;  %v995_v5 = vld [vmem:[%s13675_s16 + $0x1650] sm:$0xff] }
 0x358   : > { %v11468_v1 = vpop.f32.mrf.mxu0  ;;  %v11578_v27 = vpop.f32.mrf.mxu1  ;;  %v2099_v55 = vpack.c.bf16 %v995_v5, %v949_v9  ;;  %v1180_v9 = vld [vmem:[%s13675_s16 + $0x1c18] sm:$0xff] }
 0x359   : > { %v7147_v57 = vadd.f32 %v11467_v23, %v15395_v61  ;;  %v11579_v38 = vadd.f32 %v11578_v27, %v11577_v50  ;;  %v997_v23 = vld [vmem:[%s13675_s16 + $0x1660] sm:$0xff] }
 0x35a   : > { %v11469_v35 = vpop.f32.mrf.mxu0  ;;  %v11580_v21 = vpop.f32.mrf.mxu1 }
 0x35b   : > { %v11470_v14 = vadd.f32 %v11469_v35, %v11468_v1  ;;  %v15715_v0 = vadd.f32 %v11579_v38, %v7147_v57 }
 0x35c   : > { %v11471_v11 = vpop.f32.mrf.mxu0  ;;  %7733 = vmatmul.mubr.bf16.gmra.mxu0 %v2053_v10  ;;  %v11581_v56 = vpop.f32.mrf.mxu1  ;;  %v2146_v10 = vpack.c.bf16 %v1088_v44, %v1042_v7 }
 0x35d   : > { %v7150_v61 = vadd.f32 %v11470_v14, %v15402_v41  ;;  %7740 = vmatprep.mubr.bf16.mxu0 %v2100_v46  ;;  %v11582_v31 = vadd.f32 %v11581_v56, %v11580_v21  ;;  %v951_v41 = vld [vmem:[%s13675_s16 + $0x14f0] sm:$0xff]  ;;  %v2148_v14 = vpack.c.bf16 %v1090_v39, %v1044_v17  ;;  %v1134_v56 = vld [vmem:[%s13675_s16 + $0x1aa8] sm:$0xff] }
 0x35e   : > { %v11472_v45 = vpop.f32.mrf.mxu0  ;;  %v11583_v53 = vpop.f32.mrf.mxu1  ;;  %7894 = vmatmul.mubr.bf16.gmra.mxu1 %v2055_v22  ;;  %v2101_v34 = vpack.c.bf16 %v997_v23, %v951_v41  ;;  %v1041_v22 = vld [vmem:[%s13675_s16 + $0x17c0] sm:$0xff]  ;;  %v1136_v41 = vld [vmem:[%s13675_s16 + $0x1ab8] sm:$0xff]  ;;  %v1182_v23 = vld [vmem:[%s13675_s16 + $0x1c28] sm:$0xff] }
 0x35f   : > { %v11473_v25 = vadd.f32 %v11472_v45, %v11471_v11  ;;  %v15722_v3 = vadd.f32 %v11582_v31, %v7150_v61  ;;  %7901 = vmatprep.mubr.bf16.mxu1 %v2102_v26  ;;  %v1087_v11 = vld [vmem:[%s13675_s16 + $0x1930] sm:$0xff] }
 0x360   : > { %v11474_v47 = vpop.f32.mrf.mxu0  ;;  %v11584_v1 = vpop.f32.mrf.mxu1  ;;  %v2145_v44 = vpack.c.bf16 %v1087_v11, %v1041_v22  ;;  %v1272_v22 = vld [vmem:[%s13675_s16 + $0x1ef8] sm:$0xff] }
 0x361   : > { %v7155_v50 = vadd.f32 %v11473_v25, %v15409_v12  ;;  %v11585_v57 = vadd.f32 %v11584_v1, %v11583_v53  ;;  %v1089_v25 = vld [vmem:[%s13675_s16 + $0x1940] sm:$0xff] }
 0x362   : > { %v11475_v27 = vpop.f32.mrf.mxu0  ;;  %v11586_v37 = vpop.f32.mrf.mxu1 }
 0x363   : > { %v11476_v46 = vadd.f32 %v11475_v27, %v11474_v47  ;;  %v15729_v38 = vadd.f32 %v11585_v57, %v7155_v50 }
 0x364   : > { %v11477_v35 = vpop.f32.mrf.mxu0  ;;  %7741 = vmatmul.mubr.bf16.gmra.mxu0 %v2099_v55  ;;  %v11587_v21 = vpop.f32.mrf.mxu1  ;;  %v2192_v55 = vpack.c.bf16 %v1180_v9, %v1134_v56 }
 0x365   : > { %v7158_v12 = vadd.f32 %v11476_v46, %v15416_v63  ;;  %7748 = vmatprep.mubr.bf16.mxu0 %v2146_v10  ;;  %v11588_v26 = vadd.f32 %v11587_v21, %v11586_v37  ;;  %v1043_v63 = vld [vmem:[%s13675_s16 + $0x17d0] sm:$0xff]  ;;  %v2194_v46 = vpack.c.bf16 %v1182_v23, %v1136_v41  ;;  %v1226_v21 = vld [vmem:[%s13675_s16 + $0x1d88] sm:$0xff] }
 0x366   : > { %v11478_v61 = vpop.f32.mrf.mxu0  ;;  %v11589_v31 = vpop.f32.mrf.mxu1  ;;  %7902 = vmatmul.mubr.bf16.gmra.mxu1 %v2101_v34  ;;  %v2147_v39 = vpack.c.bf16 %v1089_v25, %v1043_v63  ;;  %v1133_v34 = vld [vmem:[%s13675_s16 + $0x1aa0] sm:$0xff]  ;;  %v1228_v63 = vld [vmem:[%s13675_s16 + $0x1d98] sm:$0xff]  ;;  %v1274_v25 = vld [vmem:[%s13675_s16 + $0x1f08] sm:$0xff] }
 0x367   : > { %v11479_v5 = vadd.f32 %v11478_v61, %v11477_v35  ;;  %v15736_v45 = vadd.f32 %v11588_v26, %v7158_v12  ;;  %7909 = vmatprep.mubr.bf16.mxu1 %v2148_v14  ;;  %v1179_v35 = vld [vmem:[%s13675_s16 + $0x1c10] sm:$0xff] }
 0x368   : > { %v11480_v7 = vpop.f32.mrf.mxu0  ;;  %v11590_v47 = vpop.f32.mrf.mxu1  ;;  %v2191_v9 = vpack.c.bf16 %v1179_v35, %v1133_v34  ;;  %v1364_v34 = vld [vmem:[%s13675_s16 + $0x21d8] sm:$0xff] }
 0x369   : > { %v7163_v53 = vadd.f32 %v11479_v5, %v15423_v42  ;;  %v11591_v50 = vadd.f32 %v11590_v47, %v11589_v31  ;;  %v1181_v5 = vld [vmem:[%s13675_s16 + $0x1c20] sm:$0xff] }
 0x36a   : > { %v11481_v1 = vpop.f32.mrf.mxu0  ;;  %v11592_v17 = vpop.f32.mrf.mxu1 }
 0x36b   : > { %v11482_v10 = vadd.f32 %v11481_v1, %v11480_v7  ;;  %v15743_v57 = vadd.f32 %v11591_v50, %v7163_v53 }
 0x36c   : > { %v11611_v27 = vpop.f32.mrf.mxu0  ;;  %7749 = vmatmul.mubr.bf16.gmra.mxu0 %v2145_v44  ;;  %v11593_v37 = vpop.f32.mrf.mxu1  ;;  %v2238_v44 = vpack.c.bf16 %v1272_v22, %v1226_v21 }
 0x36d   : > { %v7166_v42 = vadd.f32 %v11482_v10, %v15430_v6  ;;  %7756 = vmatprep.mubr.bf16.mxu0 %v2192_v55  ;;  %v11594_v14 = vadd.f32 %v11593_v37, %v11592_v17  ;;  %v1135_v6 = vld [vmem:[%s13675_s16 + $0x1ab0] sm:$0xff]  ;;  %v2240_v10 = vpack.c.bf16 %v1274_v25, %v1228_v63  ;;  %v1318_v37 = vld [vmem:[%s13675_s16 + $0x2068] sm:$0xff] }
 0x36e   : > { %v11612_v12 = vpop.f32.mrf.mxu0  ;;  %v11723_v26 = vpop.f32.mrf.mxu1  ;;  %7910 = vmatmul.mubr.bf16.gmra.mxu1 %v2147_v39  ;;  %v2193_v23 = vpack.c.bf16 %v1181_v5, %v1135_v6  ;;  %v1225_v39 = vld [vmem:[%s13675_s16 + $0x1d80] sm:$0xff]  ;;  %v1320_v6 = vld [vmem:[%s13675_s16 + $0x2078] sm:$0xff]  ;;  %v1366_v5 = vld [vmem:[%s13675_s16 + $0x21e8] sm:$0xff] }
 0x36f   : > { %v11613_v11 = vadd.f32 %v11612_v12, %v11611_v27  ;;  %v15750_v61 = vadd.f32 %v11594_v14, %v7166_v42  ;;  %7917 = vmatprep.mubr.bf16.mxu1 %v2194_v46  ;;  %v1271_v27 = vld [vmem:[%s13675_s16 + $0x1ef0] sm:$0xff] }
 0x370   : > { %v11614_v56 = vpop.f32.mrf.mxu0  ;;  %v11724_v7 = vpop.f32.mrf.mxu1  ;;  %v2237_v22 = vpack.c.bf16 %v1271_v27, %v1225_v39  ;;  %v1456_v39 = vld [vmem:[%s13675_s16 + $0x24b8] sm:$0xff] }
 0x371   : > { %v7365_v31 = vadd.f32 %v11613_v11, %v15437_v20  ;;  %v11725_v53 = vadd.f32 %v11724_v7, %v11723_v26  ;;  %v1273_v11 = vld [vmem:[%s13675_s16 + $0x1f00] sm:$0xff] }
 0x372   : > { %v11615_v47 = vpop.f32.mrf.mxu0  ;;  %v11726_v41 = vpop.f32.mrf.mxu1 }
 0x373   : > { %v11616_v55 = vadd.f32 %v11615_v47, %v11614_v56  ;;  %v15757_v50 = vadd.f32 %v11725_v53, %v7365_v31 }
 0x374   : > { %v11617_v1 = vpop.f32.mrf.mxu0  ;;  %7757 = vmatmul.mubr.bf16.gmra.mxu0 %v2191_v9  ;;  %v11727_v17 = vpop.f32.mrf.mxu1  ;;  %v2284_v9 = vpack.c.bf16 %v1364_v34, %v1318_v37 }
 0x375   : > { %v7368_v20 = vadd.f32 %v11616_v55, %v15444_v15  ;;  %7764 = vmatprep.mubr.bf16.mxu0 %v2238_v44  ;;  %v11728_v46 = vadd.f32 %v11727_v17, %v11726_v41  ;;  %v1227_v15 = vld [vmem:[%s13675_s16 + $0x1d90] sm:$0xff]  ;;  %v2286_v55 = vpack.c.bf16 %v1366_v5, %v1320_v6  ;;  %v1410_v17 = vld [vmem:[%s13675_s16 + $0x2348] sm:$0xff] }
 0x376   : > { %v11618_v42 = vpop.f32.mrf.mxu0  ;;  %v11729_v14 = vpop.f32.mrf.mxu1  ;;  %7918 = vmatmul.mubr.bf16.gmra.mxu1 %v2193_v23  ;;  %v2239_v25 = vpack.c.bf16 %v1273_v11, %v1227_v15  ;;  %v1317_v23 = vld [vmem:[%s13675_s16 + $0x2060] sm:$0xff]  ;;  %v1412_v15 = vld [vmem:[%s13675_s16 + $0x2358] sm:$0xff]  ;;  %v1458_v11 = vld [vmem:[%s13675_s16 + $0x24c8] sm:$0xff] }
 0x377   : > { %v11619_v35 = vadd.f32 %v11618_v42, %v11617_v1  ;;  %v15764_v12 = vadd.f32 %v11728_v46, %v7368_v20  ;;  %7925 = vmatprep.mubr.bf16.mxu1 %v2240_v10  ;;  %v1363_v1 = vld [vmem:[%s13675_s16 + $0x21d0] sm:$0xff] }
 0x378   : > { %v11620_v21 = vpop.f32.mrf.mxu0  ;;  %v11730_v56 = vpop.f32.mrf.mxu1  ;;  %v2283_v34 = vpack.c.bf16 %v1363_v1, %v1317_v23  ;;  %v1548_v23 = vld [vmem:[%s13675_s16 + $0x2798] sm:$0xff] }
 0x379   : > { %v7373_v26 = vadd.f32 %v11619_v35, %v15451_v58  ;;  %v11731_v31 = vadd.f32 %v11730_v56, %v11729_v14  ;;  %v1365_v35 = vld [vmem:[%s13675_s16 + $0x21e0] sm:$0xff] }
 0x37a   : > { %v11621_v7 = vpop.f32.mrf.mxu0  ;;  %v11732_v63 = vpop.f32.mrf.mxu1 }
 0x37b   : > { %v11622_v44 = vadd.f32 %v11621_v7, %v11620_v21  ;;  %v15771_v53 = vadd.f32 %v11731_v31, %v7373_v26 }
 0x37c   : > { %v11623_v47 = vpop.f32.mrf.mxu0  ;;  %7765 = vmatmul.mubr.bf16.gmra.mxu0 %v2237_v22  ;;  %v11733_v41 = vpop.f32.mrf.mxu1  ;;  %v2330_v22 = vpack.c.bf16 %v1456_v39, %v1410_v17 }
 0x37d   : > { %v7376_v58 = vadd.f32 %v11622_v44, %v15458_v59  ;;  %7772 = vmatprep.mubr.bf16.mxu0 %v2284_v9  ;;  %v11734_v10 = vadd.f32 %v11733_v41, %v11732_v63  ;;  %v1319_v59 = vld [vmem:[%s13675_s16 + $0x2070] sm:$0xff]  ;;  %v2332_v44 = vpack.c.bf16 %v1458_v11, %v1412_v15  ;;  %v1502_v41 = vld [vmem:[%s13675_s16 + $0x2628] sm:$0xff] }
 0x37e   : > { %v11624_v20 = vpop.f32.mrf.mxu0  ;;  %v11735_v46 = vpop.f32.mrf.mxu1  ;;  %7926 = vmatmul.mubr.bf16.gmra.mxu1 %v2239_v25  ;;  %v2285_v5 = vpack.c.bf16 %v1365_v35, %v1319_v59  ;;  %v1409_v25 = vld [vmem:[%s13675_s16 + $0x2340] sm:$0xff]  ;;  %v1504_v59 = vld [vmem:[%s13675_s16 + $0x2638] sm:$0xff]  ;;  %v1550_v35 = vld [vmem:[%s13675_s16 + $0x27a8] sm:$0xff] }
 0x37f   : > { %v11625_v27 = vadd.f32 %v11624_v20, %v11623_v47  ;;  %v15778_v42 = vadd.f32 %v11734_v10, %v7376_v58  ;;  %7933 = vmatprep.mubr.bf16.mxu1 %v2286_v55  ;;  %v1455_v47 = vld [vmem:[%s13675_s16 + $0x24b0] sm:$0xff] }
 0x380   : > { %v11626_v37 = vpop.f32.mrf.mxu0  ;;  %v11736_v21 = vpop.f32.mrf.mxu1  ;;  %v2329_v39 = vpack.c.bf16 %v1455_v47, %v1409_v25  ;;  %v1594_v25 = vld [vmem:[%s13675_s16 + $0x2908] sm:$0xff]  ;;  %v1640_v47 = vld [vmem:[%s13675_s16 + $0x2a78] sm:$0xff] }
 0x381   : > { %v7381_v14 = vadd.f32 %v11625_v27, %v15465_v24  ;;  %v11737_v26 = vadd.f32 %v11736_v21, %v11735_v46  ;;  %v1457_v27 = vld [vmem:[%s13675_s16 + $0x24c0] sm:$0xff] }
 0x382   : > { %v11627_v56 = vpop.f32.mrf.mxu0  ;;  %v11738_v6 = vpop.f32.mrf.mxu1 }
 0x383   : > { %v11628_v9 = vadd.f32 %v11627_v56, %v11626_v37  ;;  %v15785_v31 = vadd.f32 %v11737_v26, %v7381_v14 }
 0x384   : > { %v11629_v7 = vpop.f32.mrf.mxu0  ;;  %7773 = vmatmul.mubr.bf16.gmra.mxu0 %v2283_v34  ;;  %v11739_v63 = vpop.f32.mrf.mxu1  ;;  %v2376_v34 = vpack.c.bf16 %v1548_v23, %v1502_v41 }
 0x385   : > { %v7384_v24 = vadd.f32 %v11628_v9, %v15472_v52  ;;  %7780 = vmatprep.mubr.bf16.mxu0 %v2330_v22  ;;  %v11740_v55 = vadd.f32 %v11739_v63, %v11738_v6  ;;  %v1411_v52 = vld [vmem:[%s13675_s16 + $0x2350] sm:$0xff]  ;;  %v2378_v9 = vpack.c.bf16 %v1550_v35, %v1504_v59 }
 0x386   : > { %v11630_v58 = vpop.f32.mrf.mxu0  ;;  %v11741_v10 = vpop.f32.mrf.mxu1  ;;  %7934 = vmatmul.mubr.bf16.gmra.mxu1 %v2285_v5  ;;  %v2331_v11 = vpack.c.bf16 %v1457_v27, %v1411_v52  ;;  %v1501_v5 = vld [vmem:[%s13675_s16 + $0x2620] sm:$0xff]  ;;  %v2422_v52 = vpack.c.bf16 %v1640_v47, %v1594_v25  ;;  %v1596_v27 = vld [vmem:[%s13675_s16 + $0x2918] sm:$0xff] }
 0x387   : > { %v11631_v1 = vadd.f32 %v11630_v58, %v11629_v7  ;;  %v15792_v20 = vadd.f32 %v11740_v55, %v7384_v24  ;;  %7941 = vmatprep.mubr.bf16.mxu1 %v2332_v44  ;;  %v1547_v7 = vld [vmem:[%s13675_s16 + $0x2790] sm:$0xff]  ;;  %v13425_v44 = vld [vmem:[%s17572_s2 + $0x8f8] sm:$0xff]  }
 0x388   : > { %v11632_v17 = vpop.f32.mrf.mxu0  ;;  %v11742_v37 = vpop.f32.mrf.mxu1  ;;  %12379 = vmatprep.subr.bf16.mxu1 %v13425_v44  ;;  %v2375_v23 = vpack.c.bf16 %v1547_v7, %v1501_v5  ;;  %v1686_v5 = vld [vmem:[%s13675_s16 + $0x2be8] sm:$0xff]  ;;  %v1732_v7 = vld [vmem:[%s13675_s16 + $0x2d58] sm:$0xff] }
 0x389   : > { %v7389_v46 = vadd.f32 %v11631_v1, %v15479_v13  ;;  %v11743_v14 = vadd.f32 %v11742_v37, %v11741_v10  ;;  %v1503_v1 = vld [vmem:[%s13675_s16 + $0x2630] sm:$0xff]  ;;  %v1549_v10 = vld [vmem:[%s13675_s16 + $0x27a0] sm:$0xff] }
 0x38a   : > { %v11633_v21 = vpop.f32.mrf.mxu0  ;;  %v11744_v15 = vpop.f32.mrf.mxu1 }
 0x38b   : > { %v11634_v22 = vadd.f32 %v11633_v21, %v11632_v17  ;;  %v15799_v26 = vadd.f32 %v11743_v14, %v7389_v46  ;;  %v1642_v46 = vld [vmem:[%s13675_s16 + $0x2a88] sm:$0xff]  ;;  %v2377_v14 = vpack.c.bf16 %v1549_v10, %v1503_v1  ;;  %v1688_v1 = vld [vmem:[%s13675_s16 + $0x2bf8] sm:$0xff] }
 0x38c   : > { %v11635_v56 = vpop.f32.mrf.mxu0  ;;  %7781 = vmatmul.mubr.bf16.gmra.mxu0 %v2329_v39  ;;  %v11745_v6 = vpop.f32.mrf.mxu1  ;;  %v1734_v10 = vld [vmem:[%s13675_s16 + $0x2d68] sm:$0xff] }
 0x38d   : > { %v7392_v13 = vadd.f32 %v11634_v22, %v15489_v16  ;;  %7788 = vmatprep.mubr.bf16.mxu0 %v2376_v34  ;;  %v11746_v24 = vadd.f32 %v11745_v6, %v11744_v15  ;;  %v2424_v15 = vpack.c.bf16 %v1642_v46, %v1596_v27 }
 0x38e   : > { %v11636_v63 = vpop.f32.mrf.mxu0  ;;  %v11747_v58 = vpop.f32.mrf.mxu1  ;;  %7942 = vmatmul.mubr.bf16.gmra.mxu1 %v2331_v11 }
 0x38f   : > { %v11637_v55 = vadd.f32 %v11636_v63, %v11635_v56  ;;  %v15809_v16 = vadd.f32 %v11746_v24, %v7392_v13  ;;  %7949 = vmatprep.mubr.bf16.mxu1 %v2378_v9  ;;  %v1593_v56 = vld [vmem:[%s13675_s16 + $0x2900] sm:$0xff]  ;;  %v1639_v9 = vld [vmem:[%s13675_s16 + $0x2a70] sm:$0xff] }
 0x390   : > { %v11638_v41 = vpop.f32.mrf.mxu0  ;;  %v11748_v39 = vpop.f32.mrf.mxu1  ;;  %v2421_v47 = vpack.c.bf16 %v1639_v9, %v1593_v56  ;;  %v356_v56 = vld [vmem:[%s13675_s16 + $0x258] sm:$0xff] }
 0x391   : > { %v7397_v17 = vadd.f32 %v11637_v55, %v15496_v32  ;;  %v11749_v37 = vadd.f32 %v11748_v39, %v11747_v58  ;;  %v1641_v55 = vld [vmem:[%s13675_s16 + $0x2a80] sm:$0xff] }
 0x392   : > { %v11639_v34 = vpop.f32.mrf.mxu0  ;;  %v11750_v35 = vpop.f32.mrf.mxu1 }
 0x393   : > { %v11640_v59 = vadd.f32 %v11639_v34, %v11638_v41  ;;  %v15816_v21 = vadd.f32 %v11749_v37, %v7397_v17 }
 0x394   : > { %v11641_v22 = vpop.f32.mrf.mxu0  ;;  %7789 = vmatmul.mubr.bf16.gmra.mxu0 %v2375_v23  ;;  %v11751_v11 = vpop.f32.mrf.mxu1  ;;  %v2468_v23 = vpack.c.bf16 %v1732_v7, %v1686_v5 }
 0x395   : > { %v7400_v32 = vadd.f32 %v11640_v59, %v15503_v48  ;;  %7796 = vmatprep.mubr.bf16.mxu0 %v2422_v52  ;;  %v11752_v13 = vadd.f32 %v11751_v11, %v11750_v35  ;;  %v1595_v48 = vld [vmem:[%s13675_s16 + $0x2910] sm:$0xff]  ;;  %v2470_v59 = vpack.c.bf16 %v1734_v10, %v1688_v1  ;;  %v310_v11 = vld [vmem:[%s13675_s16 + $0xe8] sm:$0xff] }
 0x396   : > { %v11642_v6 = vpop.f32.mrf.mxu0  ;;  %v11753_v24 = vpop.f32.mrf.mxu1  ;;  %7950 = vmatmul.mubr.bf16.gmra.mxu1 %v2377_v14  ;;  %v2423_v46 = vpack.c.bf16 %v1641_v55, %v1595_v48  ;;  %v1685_v14 = vld [vmem:[%s13675_s16 + $0x2be0] sm:$0xff]  ;;  %v312_v48 = vld [vmem:[%s13675_s16 + $0xf8] sm:$0xff]  ;;  %v358_v55 = vld [vmem:[%s13675_s16 + $0x268] sm:$0xff] }
 0x397   : > { %v11643_v44 = vadd.f32 %v11642_v6, %v11641_v22  ;;  %v15823_v63 = vadd.f32 %v11752_v13, %v7400_v32  ;;  %7957 = vmatprep.mubr.bf16.mxu1 %v2424_v15  ;;  %v1731_v22 = vld [vmem:[%s13675_s16 + $0x2d50] sm:$0xff] }
 0x398   : > { %v11644_v25 = vpop.f32.mrf.mxu0  ;;  %v11754_v41 = vpop.f32.mrf.mxu1  ;;  %v2467_v7 = vpack.c.bf16 %v1731_v22, %v1685_v14  ;;  %v448_v14 = vld [vmem:[%s13675_s16 + $0x538] sm:$0xff] }
 0x399   : > { %v7405_v58 = vadd.f32 %v11643_v44, %v15510_v29  ;;  %v11755_v17 = vadd.f32 %v11754_v41, %v11753_v24  ;;  %v1733_v44 = vld [vmem:[%s13675_s16 + $0x2d60] sm:$0xff] }
 0x39a   : > { %v11645_v39 = vpop.f32.mrf.mxu0  ;;  %v11756_v27 = vpop.f32.mrf.mxu1 }
 0x39b   : > { %v11646_v52 = vadd.f32 %v11645_v39, %v11644_v25  ;;  %v15830_v37 = vadd.f32 %v11755_v17, %v7405_v58 }
 0x39c   : > { %v11647_v34 = vpop.f32.mrf.mxu0  ;;  %7797 = vmatmul.mubr.bf16.gmra.mxu0 %v2421_v47  ;;  %v11757_v35 = vpop.f32.mrf.mxu1  ;;  %v1782_v47 = vpack.c.bf16 %v356_v56, %v310_v11 }
 0x39d   : > { %v7408_v29 = vadd.f32 %v11646_v52, %v15517_v62  ;;  %7804 = vmatprep.mubr.bf16.mxu0 %v2468_v23  ;;  %v11758_v15 = vadd.f32 %v11757_v35, %v11756_v27  ;;  %v1687_v62 = vld [vmem:[%s13675_s16 + $0x2bf0] sm:$0xff]  ;;  %v1784_v52 = vpack.c.bf16 %v358_v55, %v312_v48  ;;  %v402_v35 = vld [vmem:[%s13675_s16 + $0x3c8] sm:$0xff] }
 0x39e   : > { %v11648_v32 = vpop.f32.mrf.mxu0  ;;  %v11759_v13 = vpop.f32.mrf.mxu1  ;;  %7958 = vmatmul.mubr.bf16.gmra.mxu1 %v2423_v46  ;;  %v2469_v10 = vpack.c.bf16 %v1733_v44, %v1687_v62  ;;  %v309_v46 = vld [vmem:[%s13675_s16 + $0xe0] sm:$0xff]  ;;  %v1828_v62 = vpack.c.bf16 %v448_v14, %v402_v35  ;;  %v404_v44 = vld [vmem:[%s13675_s16 + $0x3d8] sm:$0xff]  ;;  %v13413_v48 = vld [vmem:[%s17572_s2 + $0x870] sm:$0xff]  }
 0x39f   : > { %v11649_v9 = vadd.f32 %v11648_v32, %v11647_v34  ;;  %v15837_v6 = vadd.f32 %v11758_v15, %v7408_v29  ;;  %7965 = vmatprep.mubr.bf16.mxu1 %v2470_v59  ;;  %v355_v34 = vld [vmem:[%s13675_s16 + $0x250] sm:$0xff]  ;;  %v494_v35 = vld [vmem:[%s13675_s16 + $0x6a8] sm:$0xff]  ;;  %v540_v14 = vld [vmem:[%s13675_s16 + $0x818] sm:$0xff] }
 0x3a0   : > { %v11650_v5 = vpop.f32.mrf.mxu0  ;;  %v11760_v25 = vpop.f32.mrf.mxu1  ;;  %v1781_v56 = vpack.c.bf16 %v355_v34, %v309_v46  ;;  %v13414_v46 = vld [vmem:[%s17572_s2 + $0x830] sm:$0xff]  }
 0x3a1   : > { %v7413_v24 = vadd.f32 %v11649_v9, %v15524_v40  ;;  %v11761_v58 = vadd.f32 %v11760_v25, %v11759_v13  ;;  %v357_v9 = vld [vmem:[%s13675_s16 + $0x260] sm:$0xff]  ;;  %v13427_v34 = vld [vmem:[%s17572_s2 + $0x8f0] sm:$0xff]  }
 0x3a2   : > { %v11651_v41 = vpop.f32.mrf.mxu0  ;;  %v11762_v1 = vpop.f32.mrf.mxu1 }
 0x3a3   : > { %v11652_v23 = vadd.f32 %v11651_v41, %v11650_v5  ;;  %v15844_v17 = vadd.f32 %v11761_v58, %v7413_v24  ;;  %v450_v24 = vld [vmem:[%s13675_s16 + $0x548] sm:$0xff] }
 0x3a4   : > { %v11653_v39 = vpop.f32.mrf.mxu0  ;;  %7805 = vmatmul.mubr.bf16.gmra.mxu0 %v2467_v7  ;;  %v11763_v27 = vpop.f32.mrf.mxu1  ;;  %v13412_v7 = vld [vmem:[%s17572_s2 + $0x838] sm:$0xff]  }
 0x3a5   : > { %v7416_v40 = vadd.f32 %v11652_v23, %v15531_v49  ;;  %8006 = vmatprep.mubr.bf16.mxu0 %v1782_v47  ;;  %v11764_v59 = vadd.f32 %v11763_v27, %v11762_v1  ;;  %v311_v49 = vld [vmem:[%s13675_s16 + $0xf0] sm:$0xff]  ;;  %v401_v1 = vld [vmem:[%s13675_s16 + $0x3c0] sm:$0xff] }
 0x3a6   : > { %v11654_v29 = vpop.f32.mrf.mxu0  ;;  %v11765_v15 = vpop.f32.mrf.mxu1  ;;  %7966 = vmatmul.mubr.bf16.gmra.mxu1 %v2469_v10  ;;  %v1783_v41 = vpack.c.bf16 %v357_v9, %v311_v49  ;;  %v1830_v10 = vpack.c.bf16 %v450_v24, %v404_v44  ;;  %v447_v27 = vld [vmem:[%s13675_s16 + $0x530] sm:$0xff]  ;;  %v1874_v44 = vpack.c.bf16 %v540_v14, %v494_v35  ;;  %v496_v24 = vld [vmem:[%s13675_s16 + $0x6b8] sm:$0xff]  ;;  %v13431_v35 = vld [vmem:[%s17572_s2 + $0x8e0] sm:$0xff]  }
 0x3a7   : > { %v11655_v22 = vadd.f32 %v11654_v29, %v11653_v39  ;;  %v15851_v32 = vadd.f32 %v11764_v59, %v7416_v40  ;;  %8167 = vmatprep.mubr.bf16.mxu1 %v1784_v52  ;;  %v13426_v39 = vld [vmem:[%s17572_s2 + $0x8b8] sm:$0xff]   ;;  %v1827_v49 = vpack.c.bf16 %v447_v27, %v401_v1  ;;  %v403_v9 = vld [vmem:[%s13675_s16 + $0x3d0] sm:$0xff]  ;;  %v13430_v27 = vld [vmem:[%s17572_s2 + $0x8a8] sm:$0xff]  }
 0x3a8   : > { %v11656_v11 = vpop.f32.mrf.mxu0  ;;  %v11766_v5 = vpop.f32.mrf.mxu1 }
 0x3a9   : > { %v7421_v13 = vadd.f32 %v11655_v22, %v15544_v60  ;;  %v11767_v25 = vadd.f32 %v11766_v5, %v11765_v15  ;;  %v13428_v5 = vld [vmem:[%s17572_s2 + $0x8b0] sm:$0xff]  }
 0x3aa   : > { %v11657_v47 = vpop.f32.mrf.mxu0  ;;  %v11768_v58 = vpop.f32.mrf.mxu1 }
 0x3ab   : > { %v11658_v55 = vadd.f32 %v11657_v47, %v11656_v11  ;;  %v15864_v60 = vadd.f32 %v11767_v25, %v7421_v13  ;;  %v449_v13 = vld [vmem:[%s13675_s16 + $0x540] sm:$0xff]  ;;  %v542_v25 = vld [vmem:[%s13675_s16 + $0x828] sm:$0xff] }
 0x3ac   : > { %v11659_v23 = vpop.f32.mrf.mxu0  ;;  %8007 = vmatmul.mubr.bf16.vlgmr.msra.gmra.mxu0 %v1781_v56  ;;  %v11769_v40 = vpop.f32.mrf.mxu1  ;;  %v13416_v47 = vld [vmem:[%s17572_s2 + $0x828] sm:$0xff]   ;;  %v1829_v1 = vpack.c.bf16 %v449_v13, %v403_v9 }
 0x3ad   : > { %v7424_v52 = vadd.f32 %v11658_v55, %v15563_v33  ;;  %12268 = vmatpush3.bf16.msra.mxu0 %v13412_v7  ;;  %8014 = vmatprep.mubr.bf16.mxu0 %v1828_v62  ;;  %v11770_v59 = vadd.f32 %v11769_v40, %v11768_v58  ;;  %v13415_v33 = vld [vmem:[%s17572_s2 + $0x868] sm:$0xff]   ;;  %v13417_v58 = vld [vmem:[%s17572_s2 + $0x860] sm:$0xff]   ;;  %v1876_v40 = vpack.c.bf16 %v542_v25, %v496_v24 }
 0x3ae   : > { %v11660_v29 = vpop.f32.mrf.mxu0  ;;  %12269 = vmatprep.subr.bf16.mxu0 %v13413_v48  ;;  %v11771_v15 = vpop.f32.mrf.mxu1  ;;  %8168 = vmatmul.mubr.bf16.vlgmr.msra.gmra.mxu1 %v1783_v41 }
 0x3af   : > { %v11661_v22 = vadd.f32 %v11660_v29, %v11659_v23  ;;  %v15883_v11 = vadd.f32 %v11770_v59, %v7424_v52  ;;  %8175 = vmatprep.mubr.bf16.mxu1 %v1830_v10  ;;  %12380 = vmatpush3.bf16.msra.mxu1 %v13426_v39  ;;  %v493_v52 = vld [vmem:[%s13675_s16 + $0x6a0] sm:$0xff]  ;;  %v539_v59 = vld [vmem:[%s13675_s16 + $0x810] sm:$0xff] }
 0x3b0   : > { %v11662_v56 = vpop.f32.mrf.mxu0  ;;  %v11772_v62 = vpop.f32.mrf.mxu1  ;;  %12381 = vmatprep.subr.bf16.mxu1 %v13427_v34  ;;  %v13418_v29 = vld [vmem:[%s17572_s2 + $0x820] sm:$0xff]  }
 0x3b1   : > { %v7429_v7 = vadd.f32 %v11661_v22, %v15582_v19  ;;  %12270 = vmatpush3.bf16.msra.mxu0 %v13414_v46  ;;  %v11773_v48 = vadd.f32 %v11772_v62, %v11771_v15  ;;  %v13429_v19 = vld [vmem:[%s17572_s2 + $0x8e8] sm:$0xff]   ;;  %v632_v15 = vld [vmem:[%s13675_s16 + $0xaf8] sm:$0xff]  ;;  %v541_v62 = vld [vmem:[%s13675_s16 + $0x820] sm:$0xff] }
 0x3b2   : > { %v11663_v55 = vpop.f32.mrf.mxu0  ;;  %12271 = vmatprep.subr.bf16.mxu0 %v13415_v33  ;;  %v11774_v23 = vpop.f32.mrf.mxu1  ;;  %v586_v22 = vld [vmem:[%s13675_s16 + $0x988] sm:$0xff] }
 0x3b3   : > { %v11664_v41 = vadd.f32 %v11663_v55, %v11662_v56  ;;  %v15902_v10 = vadd.f32 %v11773_v48, %v7429_v7  ;;  %12382 = vmatpush3.bf16.msra.mxu1 %v13428_v5  ;;  %v1873_v5 = vpack.c.bf16 %v539_v59, %v493_v52  ;;  %v495_v7 = vld [vmem:[%s13675_s16 + $0x6b0] sm:$0xff]  ;;  %v588_v48 = vld [vmem:[%s13675_s16 + $0x998] sm:$0xff]  ;;  %v634_v55 = vld [vmem:[%s13675_s16 + $0xb08] sm:$0xff] }
 0x3b4   : > { %v11665_v39 = vpop.f32.mrf.mxu0  ;;  %8015 = vmatmul.mubr.bf16.gmra.mxu0 %v1827_v49  ;;  %v11775_v34 = vpop.f32.mrf.mxu1  ;;  %12383 = vmatprep.subr.bf16.mxu1 %v13429_v19  ;;  %v1875_v52 = vpack.c.bf16 %v541_v62, %v495_v7  ;;  %v13436_v59 = vld [vmem:[%s17572_s2 + $0x898] sm:$0xff]  }
 0x3b5   : > { %v7432_v46 = vadd.f32 %v11664_v41, %v15601_v28  ;;  %8022 = vmatprep.mubr.bf16.mxu0 %v1874_v44  ;;  %12272 = vmatpush3.bf16.msra.mxu0 %v13416_v47  ;;  %v11776_v14 = vadd.f32 %v11775_v34, %v11774_v23  ;;  %v13419_v28 = vld [vmem:[%s17572_s2 + $0x858] sm:$0xff]   ;;  %v13432_v44 = vld [vmem:[%s17572_s2 + $0x8a0] sm:$0xff]   ;;  %v1920_v47 = vpack.c.bf16 %v632_v15, %v586_v22  ;;  %v13421_v23 = vld [vmem:[%s17572_s2 + $0x850] sm:$0xff]  }
 0x3b6   : > { %v11666_v33 = vpop.f32.mrf.mxu0  ;;  %12273 = vmatprep.subr.bf16.mxu0 %v13417_v58  ;;  %v11777_v49 = vpop.f32.mrf.mxu1  ;;  %8176 = vmatmul.mubr.bf16.gmra.mxu1 %v1829_v1  ;;  %v13420_v58 = vld [vmem:[%s17572_s2 + $0x818] sm:$0xff]   ;;  %v1922_v34 = vpack.c.bf16 %v634_v55, %v588_v48  ;;  %v13437_v22 = vld [vmem:[%s17572_s2 + $0x8d0] sm:$0xff]  }
 0x3b7   : > { %v11667_v56 = vadd.f32 %v11666_v33, %v11665_v39  ;;  %v15921_v9 = vadd.f32 %v11776_v14, %v7432_v46  ;;  %8183 = vmatprep.mubr.bf16.mxu1 %v1876_v40  ;;  %12384 = vmatpush3.bf16.msra.mxu1 %v13430_v27  ;;  %v585_v46 = vld [vmem:[%s13675_s16 + $0x980] sm:$0xff]  ;;  %v631_v14 = vld [vmem:[%s13675_s16 + $0xaf0] sm:$0xff] }
 0x3b8   : > { %v11668_v13 = vpop.f32.mrf.mxu0  ;;  %v11778_v25 = vpop.f32.mrf.mxu1  ;;  %12385 = vmatprep.subr.bf16.mxu1 %v13431_v35  ;;  %v13422_v33 = vld [vmem:[%s17572_s2 + $0x810] sm:$0xff]  }
 0x3b9   : > { %v7437_v24 = vadd.f32 %v11667_v56, %v15620_v36  ;;  %12274 = vmatpush3.bf16.msra.mxu0 %v13418_v29  ;;  %v11779_v19 = vadd.f32 %v11778_v25, %v11777_v49  ;;  %v13435_v36 = vld [vmem:[%s17572_s2 + $0x8d8] sm:$0xff]   ;;  %v678_v56 = vld [vmem:[%s13675_s16 + $0xc68] sm:$0xff]  ;;  %v633_v25 = vld [vmem:[%s13675_s16 + $0xb00] sm:$0xff] }
 0x3ba   : > { %v11669_v41 = vpop.f32.mrf.mxu0  ;;  %12275 = vmatprep.subr.bf16.mxu0 %v13419_v28  ;;  %v11780_v39 = vpop.f32.mrf.mxu1  ;;  %v724_v49 = vld [vmem:[%s13675_s16 + $0xdd8] sm:$0xff] }
 0x3bb   : > { %v11670_v1 = vadd.f32 %v11669_v41, %v11668_v13  ;;  %v15940_v40 = vadd.f32 %v11779_v19, %v7437_v24  ;;  %12386 = vmatpush3.bf16.msra.mxu1 %v13432_v44  ;;  %v1919_v44 = vpack.c.bf16 %v631_v14, %v585_v46  ;;  %v587_v24 = vld [vmem:[%s13675_s16 + $0x990] sm:$0xff]  ;;  %v680_v19 = vld [vmem:[%s13675_s16 + $0xc78] sm:$0xff]  ;;  %v726_v41 = vld [vmem:[%s13675_s16 + $0xde8] sm:$0xff] }
 0x3bc   : > { %v11671_v27 = vpop.f32.mrf.mxu0  ;;  %8023 = vmatmul.mubr.bf16.gmra.mxu0 %v1873_v5  ;;  %v11781_v35 = vpop.f32.mrf.mxu1  ;;  %12387 = vmatprep.subr.bf16.mxu1 %v13435_v36  ;;  %v1921_v46 = vpack.c.bf16 %v633_v25, %v587_v24  ;;  %v13440_v14 = vld [vmem:[%s17572_s2 + $0x888] sm:$0xff]  }
 0x3bd   : > { %v7440_v29 = vadd.f32 %v11670_v1, %v15639_v54  ;;  %8030 = vmatprep.mubr.bf16.mxu0 %v1920_v47  ;;  %12276 = vmatpush3.bf16.msra.mxu0 %v13420_v58  ;;  %v11782_v15 = vadd.f32 %v11781_v35, %v11780_v39  ;;  %v13423_v54 = vld [vmem:[%s17572_s2 + $0x848] sm:$0xff]   ;;  %v13438_v47 = vld [vmem:[%s17572_s2 + $0x890] sm:$0xff]   ;;  %v1966_v58 = vpack.c.bf16 %v724_v49, %v678_v56  ;;  %v13433_v39 = vld [vmem:[%s17572_s2 + $0x840] sm:$0xff]  }
 0x3be   : > { %v11672_v28 = vpop.f32.mrf.mxu0  ;;  %12277 = vmatprep.subr.bf16.mxu0 %v13421_v23  ;;  %v11783_v5 = vpop.f32.mrf.mxu1  ;;  %8184 = vmatmul.mubr.bf16.gmra.mxu1 %v1875_v52  ;;  %v13424_v23 = vld [vmem:[%s17572_s2 + $0x808] sm:$0xff]   ;;  %v1968_v35 = vpack.c.bf16 %v726_v41, %v680_v19  ;;  %v13441_v56 = vld [vmem:[%s17572_s2 + $0x8c0] sm:$0xff]  }
 0x3bf   : > { %v11673_v13 = vadd.f32 %v11672_v28, %v11671_v27  ;;  %v15959_v7 = vadd.f32 %v11782_v15, %v7440_v29  ;;  %8191 = vmatprep.mubr.bf16.mxu1 %v1922_v34  ;;  %12388 = vmatpush3.bf16.msra.mxu1 %v13436_v59  ;;  %v677_v29 = vld [vmem:[%s13675_s16 + $0xc60] sm:$0xff]  ;;  %v723_v15 = vld [vmem:[%s13675_s16 + $0xdd0] sm:$0xff] }
 0x3c0   : > { %v11674_v62 = vpop.f32.mrf.mxu0  ;;  %v11784_v55 = vpop.f32.mrf.mxu1  ;;  %12389 = vmatprep.subr.bf16.mxu1 %v13437_v22  ;;  %v13434_v28 = vld [vmem:[%s17572_s2 + $0x800] sm:$0xff]  }
 0x3c1   : > { %v7445_v48 = vadd.f32 %v11673_v13, %v15658_v2  ;;  %12278 = vmatpush3.bf16.msra.mxu0 %v13422_v33  ;;  %v11785_v36 = vadd.f32 %v11784_v55, %v11783_v5  ;;  %v13439_v2 = vld [vmem:[%s17572_s2 + $0x8c8] sm:$0xff]   ;;  %v816_v5 = vld [vmem:[%s13675_s16 + $0x10b8] sm:$0xff]  ;;  %v725_v55 = vld [vmem:[%s13675_s16 + $0xde0] sm:$0xff] }
 0x3c2   : > { %v11675_v1 = vpop.f32.mrf.mxu0  ;;  %12279 = vmatprep.subr.bf16.mxu0 %v13423_v54  ;;  %v11786_v27 = vpop.f32.mrf.mxu1  ;;  %v770_v13 = vld [vmem:[%s13675_s16 + $0xf48] sm:$0xff] }
 0x3c3   : > { %v11676_v52 = vadd.f32 %v11675_v1, %v11674_v62  ;;  %v15978_v34 = vadd.f32 %v11785_v36, %v7445_v48  ;;  %12390 = vmatpush3.bf16.msra.mxu1 %v13438_v47  ;;  %v1965_v47 = vpack.c.bf16 %v723_v15, %v677_v29  ;;  %v679_v48 = vld [vmem:[%s13675_s16 + $0xc70] sm:$0xff]  ;;  %v772_v36 = vld [vmem:[%s13675_s16 + $0xf58] sm:$0xff]  ;;  %v818_v1 = vld [vmem:[%s13675_s16 + $0x10c8] sm:$0xff] }
 0x3c4   : > { %v11677_v59 = vpop.f32.mrf.mxu0  ;;  %8031 = vmatmul.mubr.bf16.gmra.mxu0 %v1919_v44  ;;  %v11787_v22 = vpop.f32.mrf.mxu1  ;;  %12391 = vmatprep.subr.bf16.mxu1 %v13439_v2 }
 0x3c5   : > { %v7448_v33 = vadd.f32 %v11676_v52, %v15677_v51  ;;  %8038 = vmatprep.mubr.bf16.mxu0 %v1966_v58  ;;  %12280 = vmatpush3.bf16.msra.mxu0 %v13424_v23  ;;  %v11788_v49 = vadd.f32 %v11787_v22, %v11786_v27  ;;  %v13443_v51 = vld [vmem:[%s17572_s2 + $0x978] sm:$0xff]   ;;  %v13442_v58 = vld [vmem:[%s17572_s2 + $0x880] sm:$0xff]   ;;  %v2012_v23 = vpack.c.bf16 %v816_v5, %v770_v13  ;;  %v815_v22 = vld [vmem:[%s13675_s16 + $0x10b0] sm:$0xff] }
 0x3c6   : > { %v11678_v54 = vpop.f32.mrf.mxu0  ;;  %12281 = vmatprep.subr.bf16.mxu0 %v13433_v39  ;;  %v11789_v44 = vpop.f32.mrf.mxu1  ;;  %8192 = vmatmul.mubr.bf16.gmra.mxu1 %v1921_v46  ;;  %v1967_v46 = vpack.c.bf16 %v725_v55, %v679_v48  ;;  %v864_v55 = vld [vmem:[%s13675_s16 + $0x1238] sm:$0xff] }
 0x3c7   : > { %v11679_v62 = vadd.f32 %v11678_v54, %v11677_v59  ;;  %v15997_v24 = vadd.f32 %v11788_v49, %v7448_v33  ;;  %8199 = vmatprep.mubr.bf16.mxu1 %v1968_v35  ;;  %12392 = vmatpush3.bf16.msra.mxu1 %v13440_v14  ;;  %v769_v33 = vld [vmem:[%s13675_s16 + $0xf40] sm:$0xff]  ;;  %v908_v49 = vld [vmem:[%s13675_s16 + $0x1398] sm:$0xff] }
 0x3c8   : > { %v11680_v25 = vpop.f32.mrf.mxu0  ;;  %v11790_v41 = vpop.f32.mrf.mxu1  ;;  %12393 = vmatprep.subr.bf16.mxu1 %v13441_v56  ;;  %v862_v56 = vld [vmem:[%s13675_s16 + $0x1228] sm:$0xff] }
 0x3c9   : > { %v7453_v19 = vadd.f32 %v11679_v62, %v15687_v18  ;;  %12282 = vmatpush3.bf16.msra.mxu0 %v13434_v28  ;;  %v11791_v39 = vadd.f32 %v11790_v41, %v11789_v44  ;;  %v2014_v18 = vpack.c.bf16 %v818_v1, %v772_v36  ;;  %v2011_v62 = vpack.c.bf16 %v815_v22, %v769_v33  ;;  %v817_v44 = vld [vmem:[%s13675_s16 + $0x10c0] sm:$0xff]  ;;  %v1000_v33 = vld [vmem:[%s13675_s16 + $0x1678] sm:$0xff] }
 0x3ca   : > { %v11681_v2 = vpop.f32.mrf.mxu0  ;;  %12491 = vmatprep.subr.bf16.mxu0 %v13443_v51  ;;  %v11792_v27 = vpop.f32.mrf.mxu1  ;;  %v2058_v48 = vpack.c.bf16 %v908_v49, %v862_v56 }
 0x3cb   : > { %v11682_v52 = vadd.f32 %v11681_v2, %v11680_v25  ;;  %v16007_v59 = vadd.f32 %v11791_v39, %v7453_v19  ;;  %12394 = vmatpush3.bf16.msra.mxu1 %v13442_v58  ;;  %v910_v58 = vld [vmem:[%s13675_s16 + $0x13a8] sm:$0xff] }
 0x3cc   : > { %v11683_v29 = vpop.f32.mrf.mxu0  ;;  %8039 = vmatmul.mubr.bf16.gmra.mxu0 %v1965_v47  ;;  %v11793_v14 = vpop.f32.mrf.mxu1 }
 0x3cd   : > { %v7456_v35 = vadd.f32 %v11682_v52, %v15694_v8  ;;  %8046 = vmatprep.mubr.bf16.mxu0 %v2012_v23  ;;  %v11794_v15 = vadd.f32 %v11793_v14, %v11792_v27  ;;  %v771_v8 = vld [vmem:[%s13675_s16 + $0xf50] sm:$0xff]  ;;  %v2060_v52 = vpack.c.bf16 %v910_v58, %v864_v55  ;;  %v954_v14 = vld [vmem:[%s13675_s16 + $0x1508] sm:$0xff] }
 0x3ce   : > { %v11684_v28 = vpop.f32.mrf.mxu0  ;;  %v11795_v13 = vpop.f32.mrf.mxu1  ;;  %8200 = vmatmul.mubr.bf16.gmra.mxu1 %v1967_v46  ;;  %v2013_v1 = vpack.c.bf16 %v817_v44, %v771_v8  ;;  %v861_v46 = vld [vmem:[%s13675_s16 + $0x1220] sm:$0xff]  ;;  %v956_v8 = vld [vmem:[%s13675_s16 + $0x1518] sm:$0xff]  ;;  %v1002_v44 = vld [vmem:[%s13675_s16 + $0x1688] sm:$0xff] }
 0x3cf   : > { %v11685_v54 = vadd.f32 %v11684_v28, %v11683_v29  ;;  %v16014_v5 = vadd.f32 %v11794_v15, %v7456_v35  ;;  %8207 = vmatprep.mubr.bf16.mxu1 %v2014_v18  ;;  %v907_v29 = vld [vmem:[%s13675_s16 + $0x1390] sm:$0xff] }
 0x3d0   : > { %v11686_v51 = vpop.f32.mrf.mxu0  ;;  %v11796_v47 = vpop.f32.mrf.mxu1  ;;  %v2057_v49 = vpack.c.bf16 %v907_v29, %v861_v46  ;;  %v1092_v46 = vld [vmem:[%s13675_s16 + $0x1958] sm:$0xff] }
 0x3d1   : > { %v7461_v25 = vadd.f32 %v11685_v54, %v15701_v30  ;;  %v11797_v19 = vadd.f32 %v11796_v47, %v11795_v13  ;;  %v909_v54 = vld [vmem:[%s13675_s16 + $0x13a0] sm:$0xff] }
 0x3d2   : > { %v11687_v41 = vpop.f32.mrf.mxu0  ;;  %v11798_v36 = vpop.f32.mrf.mxu1 }
 0x3d3   : > { %v11688_v23 = vadd.f32 %v11687_v41, %v11686_v51  ;;  %v16021_v39 = vadd.f32 %v11797_v19, %v7461_v25 }
 0x3d4   : > { %v11689_v2 = vpop.f32.mrf.mxu0  ;;  %8047 = vmatmul.mubr.bf16.gmra.mxu0 %v2011_v62  ;;  %v11799_v27 = vpop.f32.mrf.mxu1  ;;  %v2104_v62 = vpack.c.bf16 %v1000_v33, %v954_v14 }
 0x3d5   : > { %v7464_v30 = vadd.f32 %v11688_v23, %v15708_v43  ;;  %8054 = vmatprep.mubr.bf16.mxu0 %v2058_v48  ;;  %v11800_v18 = vadd.f32 %v11799_v27, %v11798_v36  ;;  %v863_v43 = vld [vmem:[%s13675_s16 + $0x1230] sm:$0xff]  ;;  %v2106_v23 = vpack.c.bf16 %v1002_v44, %v956_v8  ;;  %v1046_v27 = vld [vmem:[%s13675_s16 + $0x17e8] sm:$0xff] }
 0x3d6   : > { %v11690_v35 = vpop.f32.mrf.mxu0  ;;  %v11801_v15 = vpop.f32.mrf.mxu1  ;;  %8208 = vmatmul.mubr.bf16.gmra.mxu1 %v2013_v1  ;;  %v2059_v58 = vpack.c.bf16 %v909_v54, %v863_v43  ;;  %v953_v1 = vld [vmem:[%s13675_s16 + $0x1500] sm:$0xff]  ;;  %v1048_v43 = vld [vmem:[%s13675_s16 + $0x17f8] sm:$0xff]  ;;  %v1094_v54 = vld [vmem:[%s13675_s16 + $0x1968] sm:$0xff] }
 0x3d7   : > { %v11691_v22 = vadd.f32 %v11690_v35, %v11689_v2  ;;  %v16028_v28 = vadd.f32 %v11800_v18, %v7464_v30  ;;  %8215 = vmatprep.mubr.bf16.mxu1 %v2060_v52  ;;  %v999_v2 = vld [vmem:[%s13675_s16 + $0x1670] sm:$0xff] }
 0x3d8   : > { %v11692_v56 = vpop.f32.mrf.mxu0  ;;  %v11802_v51 = vpop.f32.mrf.mxu1  ;;  %v2103_v33 = vpack.c.bf16 %v999_v2, %v953_v1  ;;  %v1184_v1 = vld [vmem:[%s13675_s16 + $0x1c38] sm:$0xff] }
 0x3d9   : > { %v7469_v13 = vadd.f32 %v11691_v22, %v15715_v0  ;;  %v11803_v25 = vadd.f32 %v11802_v51, %v11801_v15  ;;  %v1001_v22 = vld [vmem:[%s13675_s16 + $0x1680] sm:$0xff] }
 0x3da   : > { %v11693_v47 = vpop.f32.mrf.mxu0  ;;  %v11804_v55 = vpop.f32.mrf.mxu1 }
 0x3db   : > { %v11694_v48 = vadd.f32 %v11693_v47, %v11692_v56  ;;  %v16035_v19 = vadd.f32 %v11803_v25, %v7469_v13 }
 0x3dc   : > { %v11695_v41 = vpop.f32.mrf.mxu0  ;;  %8055 = vmatmul.mubr.bf16.gmra.mxu0 %v2057_v49  ;;  %v11805_v36 = vpop.f32.mrf.mxu1  ;;  %v2150_v49 = vpack.c.bf16 %v1092_v46, %v1046_v27 }
 0x3dd   : > { %v7472_v0 = vadd.f32 %v11694_v48, %v15722_v3  ;;  %8062 = vmatprep.mubr.bf16.mxu0 %v2104_v62  ;;  %v11806_v52 = vadd.f32 %v11805_v36, %v11804_v55  ;;  %v955_v3 = vld [vmem:[%s13675_s16 + $0x1510] sm:$0xff]  ;;  %v2152_v48 = vpack.c.bf16 %v1094_v54, %v1048_v43  ;;  %v1138_v36 = vld [vmem:[%s13675_s16 + $0x1ac8] sm:$0xff] }
 0x3de   : > { %v11696_v30 = vpop.f32.mrf.mxu0  ;;  %v11807_v18 = vpop.f32.mrf.mxu1  ;;  %8216 = vmatmul.mubr.bf16.gmra.mxu1 %v2059_v58  ;;  %v2105_v44 = vpack.c.bf16 %v1001_v22, %v955_v3  ;;  %v1045_v58 = vld [vmem:[%s13675_s16 + $0x17e0] sm:$0xff]  ;;  %v1140_v3 = vld [vmem:[%s13675_s16 + $0x1ad8] sm:$0xff]  ;;  %v1186_v22 = vld [vmem:[%s13675_s16 + $0x1c48] sm:$0xff] }
 0x3df   : > { %v11697_v29 = vadd.f32 %v11696_v30, %v11695_v41  ;;  %v16042_v35 = vadd.f32 %v11806_v52, %v7472_v0  ;;  %8223 = vmatprep.mubr.bf16.mxu1 %v2106_v23  ;;  %v1091_v41 = vld [vmem:[%s13675_s16 + $0x1950] sm:$0xff] }
 0x3e0   : > { %v11698_v14 = vpop.f32.mrf.mxu0  ;;  %v11808_v56 = vpop.f32.mrf.mxu1  ;;  %v2149_v46 = vpack.c.bf16 %v1091_v41, %v1045_v58  ;;  %v1276_v58 = vld [vmem:[%s13675_s16 + $0x1f18] sm:$0xff] }
 0x3e1   : > { %v7477_v15 = vadd.f32 %v11697_v29, %v15729_v38  ;;  %v11809_v13 = vadd.f32 %v11808_v56, %v11807_v18  ;;  %v1093_v29 = vld [vmem:[%s13675_s16 + $0x1960] sm:$0xff] }
 0x3e2   : > { %v11699_v51 = vpop.f32.mrf.mxu0  ;;  %v11810_v8 = vpop.f32.mrf.mxu1 }
 0x3e3   : > { %v11700_v62 = vadd.f32 %v11699_v51, %v11698_v14  ;;  %v16049_v25 = vadd.f32 %v11809_v13, %v7477_v15 }
 0x3e4   : > { %v11701_v47 = vpop.f32.mrf.mxu0  ;;  %8063 = vmatmul.mubr.bf16.gmra.mxu0 %v2103_v33  ;;  %v11811_v55 = vpop.f32.mrf.mxu1  ;;  %v2196_v33 = vpack.c.bf16 %v1184_v1, %v1138_v36 }
 0x3e5   : > { %v7480_v38 = vadd.f32 %v11700_v62, %v15736_v45  ;;  %8070 = vmatprep.mubr.bf16.mxu0 %v2150_v49  ;;  %v11812_v23 = vadd.f32 %v11811_v55, %v11810_v8  ;;  %v1047_v45 = vld [vmem:[%s13675_s16 + $0x17f0] sm:$0xff]  ;;  %v2198_v62 = vpack.c.bf16 %v1186_v22, %v1140_v3  ;;  %v1230_v55 = vld [vmem:[%s13675_s16 + $0x1da8] sm:$0xff] }
 0x3e6   : > { %v11702_v0 = vpop.f32.mrf.mxu0  ;;  %v11813_v52 = vpop.f32.mrf.mxu1  ;;  %8224 = vmatmul.mubr.bf16.gmra.mxu1 %v2105_v44  ;;  %v2151_v54 = vpack.c.bf16 %v1093_v29, %v1047_v45  ;;  %v1137_v44 = vld [vmem:[%s13675_s16 + $0x1ac0] sm:$0xff]  ;;  %v1232_v45 = vld [vmem:[%s13675_s16 + $0x1db8] sm:$0xff]  ;;  %v1278_v29 = vld [vmem:[%s13675_s16 + $0x1f28] sm:$0xff] }
 0x3e7   : > { %v11703_v2 = vadd.f32 %v11702_v0, %v11701_v47  ;;  %v16056_v30 = vadd.f32 %v11812_v23, %v7480_v38  ;;  %8231 = vmatprep.mubr.bf16.mxu1 %v2152_v48  ;;  %v1183_v47 = vld [vmem:[%s13675_s16 + $0x1c30] sm:$0xff] }
 0x3e8   : > { %v11704_v27 = vpop.f32.mrf.mxu0  ;;  %v11814_v14 = vpop.f32.mrf.mxu1  ;;  %v2195_v1 = vpack.c.bf16 %v1183_v47, %v1137_v44  ;;  %v1368_v44 = vld [vmem:[%s13675_s16 + $0x21f8] sm:$0xff] }
 0x3e9   : > { %v7485_v18 = vadd.f32 %v11703_v2, %v15743_v57  ;;  %v11815_v15 = vadd.f32 %v11814_v14, %v11813_v52  ;;  %v1185_v2 = vld [vmem:[%s13675_s16 + $0x1c40] sm:$0xff] }
 0x3ea   : > { %v11705_v56 = vpop.f32.mrf.mxu0  ;;  %v11816_v43 = vpop.f32.mrf.mxu1 }
 0x3eb   : > { %v11706_v49 = vadd.f32 %v11705_v56, %v11704_v27  ;;  %v16063_v13 = vadd.f32 %v11815_v15, %v7485_v18 }
 0x3ec   : > { %v11835_v51 = vpop.f32.mrf.mxu0  ;;  %8071 = vmatmul.mubr.bf16.gmra.mxu0 %v2149_v46  ;;  %v11817_v8 = vpop.f32.mrf.mxu1  ;;  %v2242_v46 = vpack.c.bf16 %v1276_v58, %v1230_v55 }
 0x3ed   : > { %v7488_v57 = vadd.f32 %v11706_v49, %v15750_v61  ;;  %8078 = vmatprep.mubr.bf16.mxu0 %v2196_v33  ;;  %v11818_v48 = vadd.f32 %v11817_v8, %v11816_v43  ;;  %v1139_v61 = vld [vmem:[%s13675_s16 + $0x1ad0] sm:$0xff]  ;;  %v2244_v49 = vpack.c.bf16 %v1278_v29, %v1232_v45  ;;  %v1322_v8 = vld [vmem:[%s13675_s16 + $0x2088] sm:$0xff] }
 0x3ee   : > { %v11836_v38 = vpop.f32.mrf.mxu0  ;;  %v11947_v23 = vpop.f32.mrf.mxu1  ;;  %8232 = vmatmul.mubr.bf16.gmra.mxu1 %v2151_v54  ;;  %v2197_v22 = vpack.c.bf16 %v1185_v2, %v1139_v61  ;;  %v1229_v54 = vld [vmem:[%s13675_s16 + $0x1da0] sm:$0xff]  ;;  %v1324_v61 = vld [vmem:[%s13675_s16 + $0x2098] sm:$0xff]  ;;  %v1370_v2 = vld [vmem:[%s13675_s16 + $0x2208] sm:$0xff] }
 0x3ef   : > { %v11837_v41 = vadd.f32 %v11836_v38, %v11835_v51  ;;  %v16070_v0 = vadd.f32 %v11818_v48, %v7488_v57  ;;  %8239 = vmatprep.mubr.bf16.mxu1 %v2198_v62  ;;  %v1275_v51 = vld [vmem:[%s13675_s16 + $0x1f10] sm:$0xff] }
 0x3f0   : > { %v11838_v36 = vpop.f32.mrf.mxu0  ;;  %v11948_v27 = vpop.f32.mrf.mxu1  ;;  %v2241_v58 = vpack.c.bf16 %v1275_v51, %v1229_v54  ;;  %v1460_v54 = vld [vmem:[%s13675_s16 + $0x24d8] sm:$0xff] }
 0x3f1   : > { %v7687_v52 = vadd.f32 %v11837_v41, %v15757_v50  ;;  %v11949_v18 = vadd.f32 %v11948_v27, %v11947_v23  ;;  %v1277_v41 = vld [vmem:[%s13675_s16 + $0x1f20] sm:$0xff] }
 0x3f2   : > { %v11839_v14 = vpop.f32.mrf.mxu0  ;;  %v11950_v3 = vpop.f32.mrf.mxu1 }
 0x3f3   : > { %v11840_v33 = vadd.f32 %v11839_v14, %v11838_v36  ;;  %v16077_v15 = vadd.f32 %v11949_v18, %v7687_v52 }
 0x3f4   : > { %v11841_v56 = vpop.f32.mrf.mxu0  ;;  %8079 = vmatmul.mubr.bf16.gmra.mxu0 %v2195_v1  ;;  %v11951_v43 = vpop.f32.mrf.mxu1  ;;  %v2288_v1 = vpack.c.bf16 %v1368_v44, %v1322_v8 }
 0x3f5   : > { %v7690_v50 = vadd.f32 %v11840_v33, %v15764_v12  ;;  %8086 = vmatprep.mubr.bf16.mxu0 %v2242_v46  ;;  %v11952_v62 = vadd.f32 %v11951_v43, %v11950_v3  ;;  %v1231_v12 = vld [vmem:[%s13675_s16 + $0x1db0] sm:$0xff]  ;;  %v2290_v33 = vpack.c.bf16 %v1370_v2, %v1324_v61  ;;  %v1414_v43 = vld [vmem:[%s13675_s16 + $0x2368] sm:$0xff] }
 0x3f6   : > { %v11842_v57 = vpop.f32.mrf.mxu0  ;;  %v11953_v48 = vpop.f32.mrf.mxu1  ;;  %8240 = vmatmul.mubr.bf16.gmra.mxu1 %v2197_v22  ;;  %v2243_v29 = vpack.c.bf16 %v1277_v41, %v1231_v12  ;;  %v1321_v22 = vld [vmem:[%s13675_s16 + $0x2080] sm:$0xff]  ;;  %v1416_v12 = vld [vmem:[%s13675_s16 + $0x2378] sm:$0xff]  ;;  %v1462_v41 = vld [vmem:[%s13675_s16 + $0x24e8] sm:$0xff] }
 0x3f7   : > { %v11843_v47 = vadd.f32 %v11842_v57, %v11841_v56  ;;  %v16084_v38 = vadd.f32 %v11952_v62, %v7690_v50  ;;  %8247 = vmatprep.mubr.bf16.mxu1 %v2244_v49  ;;  %v1367_v56 = vld [vmem:[%s13675_s16 + $0x21f0] sm:$0xff] }
 0x3f8   : > { %v11844_v55 = vpop.f32.mrf.mxu0  ;;  %v11954_v36 = vpop.f32.mrf.mxu1  ;;  %v2287_v44 = vpack.c.bf16 %v1367_v56, %v1321_v22  ;;  %v1552_v22 = vld [vmem:[%s13675_s16 + $0x27b8] sm:$0xff] }
 0x3f9   : > { %v7695_v23 = vadd.f32 %v11843_v47, %v15771_v53  ;;  %v11955_v52 = vadd.f32 %v11954_v36, %v11953_v48  ;;  %v1369_v47 = vld [vmem:[%s13675_s16 + $0x2200] sm:$0xff] }
 0x3fa   : > { %v11845_v27 = vpop.f32.mrf.mxu0  ;;  %v11956_v45 = vpop.f32.mrf.mxu1 }
 0x3fb   : > { %v11846_v46 = vadd.f32 %v11845_v27, %v11844_v55  ;;  %v16091_v18 = vadd.f32 %v11955_v52, %v7695_v23 }
 0x3fc   : > { %v11847_v14 = vpop.f32.mrf.mxu0  ;;  %8087 = vmatmul.mubr.bf16.gmra.mxu0 %v2241_v58  ;;  %v11957_v3 = vpop.f32.mrf.mxu1  ;;  %v2334_v58 = vpack.c.bf16 %v1460_v54, %v1414_v43 }
 0x3fd   : > { %v7698_v53 = vadd.f32 %v11846_v46, %v15778_v42  ;;  %8094 = vmatprep.mubr.bf16.mxu0 %v2288_v1  ;;  %v11958_v49 = vadd.f32 %v11957_v3, %v11956_v45  ;;  %v1323_v42 = vld [vmem:[%s13675_s16 + $0x2090] sm:$0xff]  ;;  %v2336_v46 = vpack.c.bf16 %v1462_v41, %v1416_v12  ;;  %v1506_v3 = vld [vmem:[%s13675_s16 + $0x2648] sm:$0xff] }
 0x3fe   : > { %v11848_v50 = vpop.f32.mrf.mxu0  ;;  %v11959_v62 = vpop.f32.mrf.mxu1  ;;  %8248 = vmatmul.mubr.bf16.gmra.mxu1 %v2243_v29  ;;  %v2289_v2 = vpack.c.bf16 %v1369_v47, %v1323_v42  ;;  %v1413_v29 = vld [vmem:[%s13675_s16 + $0x2360] sm:$0xff]  ;;  %v1508_v42 = vld [vmem:[%s13675_s16 + $0x2658] sm:$0xff]  ;;  %v1554_v47 = vld [vmem:[%s13675_s16 + $0x27c8] sm:$0xff] }
 0x3ff   : > { %v11849_v51 = vadd.f32 %v11848_v50, %v11847_v14  ;;  %v16098_v57 = vadd.f32 %v11958_v49, %v7698_v53  ;;  %8255 = vmatprep.mubr.bf16.mxu1 %v2290_v33  ;;  %v1459_v14 = vld [vmem:[%s13675_s16 + $0x24d0] sm:$0xff] }
 0x400   : > { %v11850_v8 = vpop.f32.mrf.mxu0  ;;  %v11960_v55 = vpop.f32.mrf.mxu1  ;;  %v2333_v54 = vpack.c.bf16 %v1459_v14, %v1413_v29  ;;  %v1598_v29 = vld [vmem:[%s13675_s16 + $0x2928] sm:$0xff]  ;;  %v1644_v14 = vld [vmem:[%s13675_s16 + $0x2a98] sm:$0xff] }
 0x401   : > { %v7703_v48 = vadd.f32 %v11849_v51, %v15785_v31  ;;  %v11961_v23 = vadd.f32 %v11960_v55, %v11959_v62  ;;  %v1461_v51 = vld [vmem:[%s13675_s16 + $0x24e0] sm:$0xff] }
 0x402   : > { %v11851_v36 = vpop.f32.mrf.mxu0  ;;  %v11962_v61 = vpop.f32.mrf.mxu1 }
 0x403   : > { %v11852_v1 = vadd.f32 %v11851_v36, %v11850_v8  ;;  %v16105_v52 = vadd.f32 %v11961_v23, %v7703_v48 }
 0x404   : > { %v11853_v27 = vpop.f32.mrf.mxu0  ;;  %8095 = vmatmul.mubr.bf16.gmra.mxu0 %v2287_v44  ;;  %v11963_v45 = vpop.f32.mrf.mxu1  ;;  %v2380_v44 = vpack.c.bf16 %v1552_v22, %v1506_v3 }
 0x405   : > { %v7706_v31 = vadd.f32 %v11852_v1, %v15792_v20  ;;  %8102 = vmatprep.mubr.bf16.mxu0 %v2334_v58  ;;  %v11964_v33 = vadd.f32 %v11963_v45, %v11962_v61  ;;  %v1415_v20 = vld [vmem:[%s13675_s16 + $0x2370] sm:$0xff]  ;;  %v2382_v1 = vpack.c.bf16 %v1554_v47, %v1508_v42 }
 0x406   : > { %v11854_v53 = vpop.f32.mrf.mxu0  ;;  %v11965_v49 = vpop.f32.mrf.mxu1  ;;  %8256 = vmatmul.mubr.bf16.gmra.mxu1 %v2289_v2  ;;  %v2335_v41 = vpack.c.bf16 %v1461_v51, %v1415_v20  ;;  %v1505_v2 = vld [vmem:[%s13675_s16 + $0x2640] sm:$0xff]  ;;  %v2426_v20 = vpack.c.bf16 %v1644_v14, %v1598_v29  ;;  %v1600_v51 = vld [vmem:[%s13675_s16 + $0x2938] sm:$0xff] }
 0x407   : > { %v11855_v56 = vadd.f32 %v11854_v53, %v11853_v27  ;;  %v16112_v50 = vadd.f32 %v11964_v33, %v7706_v31  ;;  %8263 = vmatprep.mubr.bf16.mxu1 %v2336_v46  ;;  %v1551_v27 = vld [vmem:[%s13675_s16 + $0x27b0] sm:$0xff]  ;;  %v13457_v46 = vld [vmem:[%s17572_s2 + $0x9f8] sm:$0xff]  }
 0x408   : > { %v11856_v43 = vpop.f32.mrf.mxu0  ;;  %v11966_v8 = vpop.f32.mrf.mxu1  ;;  %12603 = vmatprep.subr.bf16.mxu1 %v13457_v46  ;;  %v2379_v22 = vpack.c.bf16 %v1551_v27, %v1505_v2  ;;  %v1690_v2 = vld [vmem:[%s13675_s16 + $0x2c08] sm:$0xff]  ;;  %v1736_v27 = vld [vmem:[%s13675_s16 + $0x2d78] sm:$0xff] }
 0x409   : > { %v7711_v62 = vadd.f32 %v11855_v56, %v15799_v26  ;;  %v11967_v48 = vadd.f32 %v11966_v8, %v11965_v49  ;;  %v1507_v56 = vld [vmem:[%s13675_s16 + $0x2650] sm:$0xff]  ;;  %v1553_v49 = vld [vmem:[%s13675_s16 + $0x27c0] sm:$0xff] }
 0x40a   : > { %v11857_v55 = vpop.f32.mrf.mxu0  ;;  %v11968_v12 = vpop.f32.mrf.mxu1 }
 0x40b   : > { %v11858_v58 = vadd.f32 %v11857_v55, %v11856_v43  ;;  %v16119_v23 = vadd.f32 %v11967_v48, %v7711_v62  ;;  %v1646_v62 = vld [vmem:[%s13675_s16 + $0x2aa8] sm:$0xff]  ;;  %v2381_v48 = vpack.c.bf16 %v1553_v49, %v1507_v56  ;;  %v1692_v56 = vld [vmem:[%s13675_s16 + $0x2c18] sm:$0xff] }
 0x40c   : > { %v11859_v36 = vpop.f32.mrf.mxu0  ;;  %8103 = vmatmul.mubr.bf16.gmra.mxu0 %v2333_v54  ;;  %v11969_v61 = vpop.f32.mrf.mxu1  ;;  %v1738_v49 = vld [vmem:[%s13675_s16 + $0x2d88] sm:$0xff] }
 0x40d   : > { %v7714_v26 = vadd.f32 %v11858_v58, %v15809_v16  ;;  %8110 = vmatprep.mubr.bf16.mxu0 %v2380_v44  ;;  %v11970_v31 = vadd.f32 %v11969_v61, %v11968_v12  ;;  %v2428_v12 = vpack.c.bf16 %v1646_v62, %v1600_v51 }
 0x40e   : > { %v11860_v45 = vpop.f32.mrf.mxu0  ;;  %v11971_v53 = vpop.f32.mrf.mxu1  ;;  %8264 = vmatmul.mubr.bf16.gmra.mxu1 %v2335_v41 }
 0x40f   : > { %v11861_v33 = vadd.f32 %v11860_v45, %v11859_v36  ;;  %v16129_v16 = vadd.f32 %v11970_v31, %v7714_v26  ;;  %8271 = vmatprep.mubr.bf16.mxu1 %v2382_v1  ;;  %v1597_v36 = vld [vmem:[%s13675_s16 + $0x2920] sm:$0xff]  ;;  %v1643_v1 = vld [vmem:[%s13675_s16 + $0x2a90] sm:$0xff] }
 0x410   : > { %v11862_v3 = vpop.f32.mrf.mxu0  ;;  %v11972_v54 = vpop.f32.mrf.mxu1  ;;  %v2425_v14 = vpack.c.bf16 %v1643_v1, %v1597_v36  ;;  %v360_v36 = vld [vmem:[%s13675_s16 + $0x278] sm:$0xff] }
 0x411   : > { %v7719_v43 = vadd.f32 %v11861_v33, %v15816_v21  ;;  %v11973_v8 = vadd.f32 %v11972_v54, %v11971_v53  ;;  %v1645_v33 = vld [vmem:[%s13675_s16 + $0x2aa0] sm:$0xff] }
 0x412   : > { %v11863_v44 = vpop.f32.mrf.mxu0  ;;  %v11974_v47 = vpop.f32.mrf.mxu1 }
 0x413   : > { %v11864_v42 = vadd.f32 %v11863_v44, %v11862_v3  ;;  %v16136_v55 = vadd.f32 %v11973_v8, %v7719_v43 }
 0x414   : > { %v11865_v58 = vpop.f32.mrf.mxu0  ;;  %8111 = vmatmul.mubr.bf16.gmra.mxu0 %v2379_v22  ;;  %v11975_v41 = vpop.f32.mrf.mxu1  ;;  %v2472_v22 = vpack.c.bf16 %v1736_v27, %v1690_v2 }
 0x415   : > { %v7722_v21 = vadd.f32 %v11864_v42, %v15823_v63  ;;  %8118 = vmatprep.mubr.bf16.mxu0 %v2426_v20  ;;  %v11976_v26 = vadd.f32 %v11975_v41, %v11974_v47  ;;  %v1599_v63 = vld [vmem:[%s13675_s16 + $0x2930] sm:$0xff]  ;;  %v2474_v42 = vpack.c.bf16 %v1738_v49, %v1692_v56  ;;  %v314_v41 = vld [vmem:[%s13675_s16 + $0x108] sm:$0xff] }
 0x416   : > { %v11866_v61 = vpop.f32.mrf.mxu0  ;;  %v11977_v31 = vpop.f32.mrf.mxu1  ;;  %8272 = vmatmul.mubr.bf16.gmra.mxu1 %v2381_v48  ;;  %v2427_v62 = vpack.c.bf16 %v1645_v33, %v1599_v63  ;;  %v1689_v48 = vld [vmem:[%s13675_s16 + $0x2c00] sm:$0xff]  ;;  %v316_v63 = vld [vmem:[%s13675_s16 + $0x118] sm:$0xff]  ;;  %v362_v33 = vld [vmem:[%s13675_s16 + $0x288] sm:$0xff] }
 0x417   : > { %v11867_v46 = vadd.f32 %v11866_v61, %v11865_v58  ;;  %v16143_v45 = vadd.f32 %v11976_v26, %v7722_v21  ;;  %8279 = vmatprep.mubr.bf16.mxu1 %v2428_v12  ;;  %v1735_v58 = vld [vmem:[%s13675_s16 + $0x2d70] sm:$0xff] }
 0x418   : > { %v11868_v29 = vpop.f32.mrf.mxu0  ;;  %v11978_v3 = vpop.f32.mrf.mxu1  ;;  %v2471_v27 = vpack.c.bf16 %v1735_v58, %v1689_v48  ;;  %v452_v48 = vld [vmem:[%s13675_s16 + $0x558] sm:$0xff] }
 0x419   : > { %v7727_v53 = vadd.f32 %v11867_v46, %v15830_v37  ;;  %v11979_v43 = vadd.f32 %v11978_v3, %v11977_v31  ;;  %v1737_v46 = vld [vmem:[%s13675_s16 + $0x2d80] sm:$0xff] }
 0x41a   : > { %v11869_v54 = vpop.f32.mrf.mxu0  ;;  %v11980_v51 = vpop.f32.mrf.mxu1 }
 0x41b   : > { %v11870_v20 = vadd.f32 %v11869_v54, %v11868_v29  ;;  %v16150_v8 = vadd.f32 %v11979_v43, %v7727_v53 }
 0x41c   : > { %v11871_v44 = vpop.f32.mrf.mxu0  ;;  %8119 = vmatmul.mubr.bf16.gmra.mxu0 %v2425_v14  ;;  %v11981_v47 = vpop.f32.mrf.mxu1  ;;  %v1786_v14 = vpack.c.bf16 %v360_v36, %v314_v41 }
 0x41d   : > { %v7730_v37 = vadd.f32 %v11870_v20, %v15837_v6  ;;  %8126 = vmatprep.mubr.bf16.mxu0 %v2472_v22  ;;  %v11982_v12 = vadd.f32 %v11981_v47, %v11980_v51  ;;  %v1691_v6 = vld [vmem:[%s13675_s16 + $0x2c10] sm:$0xff]  ;;  %v1788_v20 = vpack.c.bf16 %v362_v33, %v316_v63  ;;  %v406_v47 = vld [vmem:[%s13675_s16 + $0x3e8] sm:$0xff] }
 0x41e   : > { %v11872_v21 = vpop.f32.mrf.mxu0  ;;  %v11983_v26 = vpop.f32.mrf.mxu1  ;;  %8280 = vmatmul.mubr.bf16.gmra.mxu1 %v2427_v62  ;;  %v2473_v49 = vpack.c.bf16 %v1737_v46, %v1691_v6  ;;  %v313_v62 = vld [vmem:[%s13675_s16 + $0x100] sm:$0xff]  ;;  %v1832_v6 = vpack.c.bf16 %v452_v48, %v406_v47  ;;  %v408_v46 = vld [vmem:[%s13675_s16 + $0x3f8] sm:$0xff]  ;;  %v13445_v63 = vld [vmem:[%s17572_s2 + $0x970] sm:$0xff]  }
 0x41f   : > { %v11873_v1 = vadd.f32 %v11872_v21, %v11871_v44  ;;  %v16157_v61 = vadd.f32 %v11982_v12, %v7730_v37  ;;  %8287 = vmatprep.mubr.bf16.mxu1 %v2474_v42  ;;  %v359_v44 = vld [vmem:[%s13675_s16 + $0x270] sm:$0xff]  ;;  %v498_v47 = vld [vmem:[%s13675_s16 + $0x6c8] sm:$0xff]  ;;  %v544_v48 = vld [vmem:[%s13675_s16 + $0x838] sm:$0xff] }
 0x420   : > { %v11874_v2 = vpop.f32.mrf.mxu0  ;;  %v11984_v29 = vpop.f32.mrf.mxu1  ;;  %v1785_v36 = vpack.c.bf16 %v359_v44, %v313_v62  ;;  %v13446_v62 = vld [vmem:[%s17572_s2 + $0x930] sm:$0xff]  }
 0x421   : > { %v7735_v31 = vadd.f32 %v11873_v1, %v15844_v17  ;;  %v11985_v53 = vadd.f32 %v11984_v29, %v11983_v26  ;;  %v361_v1 = vld [vmem:[%s13675_s16 + $0x280] sm:$0xff]  ;;  %v13459_v44 = vld [vmem:[%s17572_s2 + $0x9f0] sm:$0xff]  }
 0x422   : > { %v11875_v3 = vpop.f32.mrf.mxu0  ;;  %v11986_v56 = vpop.f32.mrf.mxu1 }
 0x423   : > { %v11876_v22 = vadd.f32 %v11875_v3, %v11874_v2  ;;  %v16164_v43 = vadd.f32 %v11985_v53, %v7735_v31  ;;  %v454_v31 = vld [vmem:[%s13675_s16 + $0x568] sm:$0xff] }
 0x424   : > { %v11877_v54 = vpop.f32.mrf.mxu0  ;;  %8127 = vmatmul.mubr.bf16.gmra.mxu0 %v2471_v27  ;;  %v11987_v51 = vpop.f32.mrf.mxu1  ;;  %v13444_v27 = vld [vmem:[%s17572_s2 + $0x938] sm:$0xff]  }
 0x425   : > { %v7738_v17 = vadd.f32 %v11876_v22, %v15851_v32  ;;  %8328 = vmatprep.mubr.bf16.mxu0 %v1786_v14  ;;  %v11988_v42 = vadd.f32 %v11987_v51, %v11986_v56  ;;  %v315_v32 = vld [vmem:[%s13675_s16 + $0x110] sm:$0xff]  ;;  %v405_v56 = vld [vmem:[%s13675_s16 + $0x3e0] sm:$0xff] }
 0x426   : > { %v11878_v37 = vpop.f32.mrf.mxu0  ;;  %v11989_v12 = vpop.f32.mrf.mxu1  ;;  %8288 = vmatmul.mubr.bf16.gmra.mxu1 %v2473_v49  ;;  %v1787_v3 = vpack.c.bf16 %v361_v1, %v315_v32  ;;  %v1834_v49 = vpack.c.bf16 %v454_v31, %v408_v46  ;;  %v451_v51 = vld [vmem:[%s13675_s16 + $0x550] sm:$0xff]  ;;  %v1878_v46 = vpack.c.bf16 %v544_v48, %v498_v47  ;;  %v500_v31 = vld [vmem:[%s13675_s16 + $0x6d8] sm:$0xff]  ;;  %v13463_v47 = vld [vmem:[%s17572_s2 + $0x9e0] sm:$0xff]  }
 0x427   : > { %v11879_v58 = vadd.f32 %v11878_v37, %v11877_v54  ;;  %v16171_v21 = vadd.f32 %v11988_v42, %v7738_v17  ;;  %8489 = vmatprep.mubr.bf16.mxu1 %v1788_v20  ;;  %v13458_v54 = vld [vmem:[%s17572_s2 + $0x9b8] sm:$0xff]   ;;  %v1831_v32 = vpack.c.bf16 %v451_v51, %v405_v56  ;;  %v407_v1 = vld [vmem:[%s13675_s16 + $0x3f0] sm:$0xff]  ;;  %v13462_v51 = vld [vmem:[%s17572_s2 + $0x9a8] sm:$0xff]  }
 0x428   : > { %v11880_v41 = vpop.f32.mrf.mxu0  ;;  %v11990_v2 = vpop.f32.mrf.mxu1 }
 0x429   : > { %v7743_v26 = vadd.f32 %v11879_v58, %v15864_v60  ;;  %v11991_v29 = vadd.f32 %v11990_v2, %v11989_v12  ;;  %v13460_v2 = vld [vmem:[%s17572_s2 + $0x9b0] sm:$0xff]  }
 0x42a   : > { %v11881_v14 = vpop.f32.mrf.mxu0  ;;  %v11992_v53 = vpop.f32.mrf.mxu1 }
 0x42b   : > { %v11882_v33 = vadd.f32 %v11881_v14, %v11880_v41  ;;  %v16184_v60 = vadd.f32 %v11991_v29, %v7743_v26  ;;  %v453_v26 = vld [vmem:[%s13675_s16 + $0x560] sm:$0xff]  ;;  %v546_v29 = vld [vmem:[%s13675_s16 + $0x848] sm:$0xff] }
 0x42c   : > { %v11883_v22 = vpop.f32.mrf.mxu0  ;;  %8329 = vmatmul.mubr.bf16.vlgmr.msra.gmra.mxu0 %v1785_v36  ;;  %v11993_v17 = vpop.f32.mrf.mxu1  ;;  %v13448_v14 = vld [vmem:[%s17572_s2 + $0x928] sm:$0xff]   ;;  %v1833_v56 = vpack.c.bf16 %v453_v26, %v407_v1 }
 0x42d   : > { %v7746_v20 = vadd.f32 %v11882_v33, %v15883_v11  ;;  %12492 = vmatpush3.bf16.msra.mxu0 %v13444_v27  ;;  %8336 = vmatprep.mubr.bf16.mxu0 %v1832_v6  ;;  %v11994_v42 = vadd.f32 %v11993_v17, %v11992_v53  ;;  %v13447_v11 = vld [vmem:[%s17572_s2 + $0x968] sm:$0xff]   ;;  %v13449_v53 = vld [vmem:[%s17572_s2 + $0x960] sm:$0xff]   ;;  %v1880_v17 = vpack.c.bf16 %v546_v29, %v500_v31 }
 0x42e   : > { %v11884_v37 = vpop.f32.mrf.mxu0  ;;  %12493 = vmatprep.subr.bf16.mxu0 %v13445_v63  ;;  %v11995_v12 = vpop.f32.mrf.mxu1  ;;  %8490 = vmatmul.mubr.bf16.vlgmr.msra.gmra.mxu1 %v1787_v3 }
 0x42f   : > { %v11885_v58 = vadd.f32 %v11884_v37, %v11883_v22  ;;  %v16203_v41 = vadd.f32 %v11994_v42, %v7746_v20  ;;  %8497 = vmatprep.mubr.bf16.mxu1 %v1834_v49  ;;  %12604 = vmatpush3.bf16.msra.mxu1 %v13458_v54  ;;  %v497_v20 = vld [vmem:[%s13675_s16 + $0x6c0] sm:$0xff]  ;;  %v543_v42 = vld [vmem:[%s13675_s16 + $0x830] sm:$0xff] }
 0x430   : > { %v11886_v36 = vpop.f32.mrf.mxu0  ;;  %v11996_v6 = vpop.f32.mrf.mxu1  ;;  %12605 = vmatprep.subr.bf16.mxu1 %v13459_v44  ;;  %v13450_v37 = vld [vmem:[%s17572_s2 + $0x920] sm:$0xff]  }
 0x431   : > { %v7751_v27 = vadd.f32 %v11885_v58, %v15902_v10  ;;  %12494 = vmatpush3.bf16.msra.mxu0 %v13446_v62  ;;  %v11997_v63 = vadd.f32 %v11996_v6, %v11995_v12  ;;  %v13461_v10 = vld [vmem:[%s17572_s2 + $0x9e8] sm:$0xff]   ;;  %v636_v12 = vld [vmem:[%s13675_s16 + $0xb18] sm:$0xff]  ;;  %v545_v6 = vld [vmem:[%s13675_s16 + $0x840] sm:$0xff] }
 0x432   : > { %v11887_v33 = vpop.f32.mrf.mxu0  ;;  %12495 = vmatprep.subr.bf16.mxu0 %v13447_v11  ;;  %v11998_v22 = vpop.f32.mrf.mxu1  ;;  %v590_v58 = vld [vmem:[%s13675_s16 + $0x9a8] sm:$0xff] }
 0x433   : > { %v11888_v3 = vadd.f32 %v11887_v33, %v11886_v36  ;;  %v16222_v49 = vadd.f32 %v11997_v63, %v7751_v27  ;;  %12606 = vmatpush3.bf16.msra.mxu1 %v13460_v2  ;;  %v1877_v2 = vpack.c.bf16 %v543_v42, %v497_v20  ;;  %v499_v27 = vld [vmem:[%s13675_s16 + $0x6d0] sm:$0xff]  ;;  %v592_v63 = vld [vmem:[%s13675_s16 + $0x9b8] sm:$0xff]  ;;  %v638_v33 = vld [vmem:[%s13675_s16 + $0xb28] sm:$0xff] }
 0x434   : > { %v11889_v54 = vpop.f32.mrf.mxu0  ;;  %8337 = vmatmul.mubr.bf16.gmra.mxu0 %v1831_v32  ;;  %v11999_v44 = vpop.f32.mrf.mxu1  ;;  %12607 = vmatprep.subr.bf16.mxu1 %v13461_v10  ;;  %v1879_v20 = vpack.c.bf16 %v545_v6, %v499_v27  ;;  %v13468_v42 = vld [vmem:[%s17572_s2 + $0x998] sm:$0xff]  }
 0x435   : > { %v7754_v62 = vadd.f32 %v11888_v3, %v15921_v9  ;;  %8344 = vmatprep.mubr.bf16.mxu0 %v1878_v46  ;;  %12496 = vmatpush3.bf16.msra.mxu0 %v13448_v14  ;;  %v12000_v48 = vadd.f32 %v11999_v44, %v11998_v22  ;;  %v13451_v9 = vld [vmem:[%s17572_s2 + $0x958] sm:$0xff]   ;;  %v13464_v46 = vld [vmem:[%s17572_s2 + $0x9a0] sm:$0xff]   ;;  %v1924_v14 = vpack.c.bf16 %v636_v12, %v590_v58  ;;  %v13453_v22 = vld [vmem:[%s17572_s2 + $0x950] sm:$0xff]  }
 0x436   : > { %v11890_v11 = vpop.f32.mrf.mxu0  ;;  %12497 = vmatprep.subr.bf16.mxu0 %v13449_v53  ;;  %v12001_v32 = vpop.f32.mrf.mxu1  ;;  %8498 = vmatmul.mubr.bf16.gmra.mxu1 %v1833_v56  ;;  %v13452_v53 = vld [vmem:[%s17572_s2 + $0x918] sm:$0xff]   ;;  %v1926_v44 = vpack.c.bf16 %v638_v33, %v592_v63  ;;  %v13469_v58 = vld [vmem:[%s17572_s2 + $0x9d0] sm:$0xff]  }
 0x437   : > { %v11891_v36 = vadd.f32 %v11890_v11, %v11889_v54  ;;  %v16241_v1 = vadd.f32 %v12000_v48, %v7754_v62  ;;  %8505 = vmatprep.mubr.bf16.mxu1 %v1880_v17  ;;  %12608 = vmatpush3.bf16.msra.mxu1 %v13462_v51  ;;  %v589_v62 = vld [vmem:[%s13675_s16 + $0x9a0] sm:$0xff]  ;;  %v635_v48 = vld [vmem:[%s13675_s16 + $0xb10] sm:$0xff] }
 0x438   : > { %v11892_v26 = vpop.f32.mrf.mxu0  ;;  %v12002_v29 = vpop.f32.mrf.mxu1  ;;  %12609 = vmatprep.subr.bf16.mxu1 %v13463_v47  ;;  %v13454_v11 = vld [vmem:[%s17572_s2 + $0x910] sm:$0xff]  }
 0x439   : > { %v7759_v31 = vadd.f32 %v11891_v36, %v15940_v40  ;;  %12498 = vmatpush3.bf16.msra.mxu0 %v13450_v37  ;;  %v12003_v10 = vadd.f32 %v12002_v29, %v12001_v32  ;;  %v13467_v40 = vld [vmem:[%s17572_s2 + $0x9d8] sm:$0xff]   ;;  %v682_v36 = vld [vmem:[%s13675_s16 + $0xc88] sm:$0xff]  ;;  %v637_v29 = vld [vmem:[%s13675_s16 + $0xb20] sm:$0xff] }
 0x43a   : > { %v11893_v3 = vpop.f32.mrf.mxu0  ;;  %12499 = vmatprep.subr.bf16.mxu0 %v13451_v9  ;;  %v12004_v54 = vpop.f32.mrf.mxu1  ;;  %v728_v32 = vld [vmem:[%s13675_s16 + $0xdf8] sm:$0xff] }
 0x43b   : > { %v11894_v56 = vadd.f32 %v11893_v3, %v11892_v26  ;;  %v16260_v17 = vadd.f32 %v12003_v10, %v7759_v31  ;;  %12610 = vmatpush3.bf16.msra.mxu1 %v13464_v46  ;;  %v1923_v46 = vpack.c.bf16 %v635_v48, %v589_v62  ;;  %v591_v31 = vld [vmem:[%s13675_s16 + $0x9b0] sm:$0xff]  ;;  %v684_v10 = vld [vmem:[%s13675_s16 + $0xc98] sm:$0xff]  ;;  %v730_v3 = vld [vmem:[%s13675_s16 + $0xe08] sm:$0xff] }
 0x43c   : > { %v11895_v51 = vpop.f32.mrf.mxu0  ;;  %8345 = vmatmul.mubr.bf16.gmra.mxu0 %v1877_v2  ;;  %v12005_v47 = vpop.f32.mrf.mxu1  ;;  %12611 = vmatprep.subr.bf16.mxu1 %v13467_v40  ;;  %v1925_v62 = vpack.c.bf16 %v637_v29, %v591_v31  ;;  %v13472_v48 = vld [vmem:[%s17572_s2 + $0x988] sm:$0xff]  }
 0x43d   : > { %v7762_v37 = vadd.f32 %v11894_v56, %v15959_v7  ;;  %8352 = vmatprep.mubr.bf16.mxu0 %v1924_v14  ;;  %12500 = vmatpush3.bf16.msra.mxu0 %v13452_v53  ;;  %v12006_v12 = vadd.f32 %v12005_v47, %v12004_v54  ;;  %v13455_v7 = vld [vmem:[%s17572_s2 + $0x948] sm:$0xff]   ;;  %v13470_v14 = vld [vmem:[%s17572_s2 + $0x990] sm:$0xff]   ;;  %v1970_v53 = vpack.c.bf16 %v728_v32, %v682_v36  ;;  %v13465_v54 = vld [vmem:[%s17572_s2 + $0x940] sm:$0xff]  }
 0x43e   : > { %v11896_v9 = vpop.f32.mrf.mxu0  ;;  %12501 = vmatprep.subr.bf16.mxu0 %v13453_v22  ;;  %v12007_v2 = vpop.f32.mrf.mxu1  ;;  %8506 = vmatmul.mubr.bf16.gmra.mxu1 %v1879_v20  ;;  %v13456_v22 = vld [vmem:[%s17572_s2 + $0x908] sm:$0xff]   ;;  %v1972_v47 = vpack.c.bf16 %v730_v3, %v684_v10  ;;  %v13473_v36 = vld [vmem:[%s17572_s2 + $0x9c0] sm:$0xff]  }
 0x43f   : > { %v11897_v26 = vadd.f32 %v11896_v9, %v11895_v51  ;;  %v16279_v27 = vadd.f32 %v12006_v12, %v7762_v37  ;;  %8513 = vmatprep.mubr.bf16.mxu1 %v1926_v44  ;;  %12612 = vmatpush3.bf16.msra.mxu1 %v13468_v42  ;;  %v681_v37 = vld [vmem:[%s13675_s16 + $0xc80] sm:$0xff]  ;;  %v727_v12 = vld [vmem:[%s13675_s16 + $0xdf0] sm:$0xff] }
 0x440   : > { %v11898_v6 = vpop.f32.mrf.mxu0  ;;  %v12008_v33 = vpop.f32.mrf.mxu1  ;;  %12613 = vmatprep.subr.bf16.mxu1 %v13469_v58  ;;  %v13466_v9 = vld [vmem:[%s17572_s2 + $0x900] sm:$0xff]  }
 0x441   : > { %v7767_v63 = vadd.f32 %v11897_v26, %v15978_v34  ;;  %12502 = vmatpush3.bf16.msra.mxu0 %v13454_v11  ;;  %v12009_v40 = vadd.f32 %v12008_v33, %v12007_v2  ;;  %v13471_v34 = vld [vmem:[%s17572_s2 + $0x9c8] sm:$0xff]   ;;  %v820_v2 = vld [vmem:[%s13675_s16 + $0x10d8] sm:$0xff]  ;;  %v729_v33 = vld [vmem:[%s13675_s16 + $0xe00] sm:$0xff] }
 0x442   : > { %v11899_v56 = vpop.f32.mrf.mxu0  ;;  %12503 = vmatprep.subr.bf16.mxu0 %v13455_v7  ;;  %v12010_v51 = vpop.f32.mrf.mxu1  ;;  %v774_v26 = vld [vmem:[%s13675_s16 + $0xf68] sm:$0xff] }
 0x443   : > { %v11900_v20 = vadd.f32 %v11899_v56, %v11898_v6  ;;  %v16298_v44 = vadd.f32 %v12009_v40, %v7767_v63  ;;  %12614 = vmatpush3.bf16.msra.mxu1 %v13470_v14  ;;  %v1969_v14 = vpack.c.bf16 %v727_v12, %v681_v37  ;;  %v683_v63 = vld [vmem:[%s13675_s16 + $0xc90] sm:$0xff]  ;;  %v776_v40 = vld [vmem:[%s13675_s16 + $0xf78] sm:$0xff]  ;;  %v822_v56 = vld [vmem:[%s13675_s16 + $0x10e8] sm:$0xff] }
 0x444   : > { %v11901_v42 = vpop.f32.mrf.mxu0  ;;  %8353 = vmatmul.mubr.bf16.gmra.mxu0 %v1923_v46  ;;  %v12011_v58 = vpop.f32.mrf.mxu1  ;;  %12615 = vmatprep.subr.bf16.mxu1 %v13471_v34 }
 0x445   : > { %v7770_v11 = vadd.f32 %v11900_v20, %v15997_v24  ;;  %8360 = vmatprep.mubr.bf16.mxu0 %v1970_v53  ;;  %12504 = vmatpush3.bf16.msra.mxu0 %v13456_v22  ;;  %v12012_v32 = vadd.f32 %v12011_v58, %v12010_v51  ;;  %v13475_v24 = vld [vmem:[%s17572_s2 + $0xa78] sm:$0xff]   ;;  %v13474_v53 = vld [vmem:[%s17572_s2 + $0x980] sm:$0xff]   ;;  %v2016_v22 = vpack.c.bf16 %v820_v2, %v774_v26  ;;  %v819_v58 = vld [vmem:[%s13675_s16 + $0x10d0] sm:$0xff] }
 0x446   : > { %v11902_v7 = vpop.f32.mrf.mxu0  ;;  %12505 = vmatprep.subr.bf16.mxu0 %v13465_v54  ;;  %v12013_v46 = vpop.f32.mrf.mxu1  ;;  %8514 = vmatmul.mubr.bf16.gmra.mxu1 %v1925_v62  ;;  %v1971_v62 = vpack.c.bf16 %v729_v33, %v683_v63  ;;  %v868_v33 = vld [vmem:[%s13675_s16 + $0x1258] sm:$0xff] }
 0x447   : > { %v11903_v6 = vadd.f32 %v11902_v7, %v11901_v42  ;;  %v16317_v31 = vadd.f32 %v12012_v32, %v7770_v11  ;;  %8521 = vmatprep.mubr.bf16.mxu1 %v1972_v47  ;;  %12616 = vmatpush3.bf16.msra.mxu1 %v13472_v48  ;;  %v773_v11 = vld [vmem:[%s13675_s16 + $0xf60] sm:$0xff]  ;;  %v912_v32 = vld [vmem:[%s13675_s16 + $0x13b8] sm:$0xff] }
 0x448   : > { %v11904_v29 = vpop.f32.mrf.mxu0  ;;  %v12014_v3 = vpop.f32.mrf.mxu1  ;;  %12617 = vmatprep.subr.bf16.mxu1 %v13473_v36  ;;  %v866_v36 = vld [vmem:[%s13675_s16 + $0x1248] sm:$0xff] }
 0x449   : > { %v7775_v10 = vadd.f32 %v11903_v6, %v16007_v59  ;;  %12506 = vmatpush3.bf16.msra.mxu0 %v13466_v9  ;;  %v12015_v54 = vadd.f32 %v12014_v3, %v12013_v46  ;;  %v2018_v59 = vpack.c.bf16 %v822_v56, %v776_v40  ;;  %v2015_v6 = vpack.c.bf16 %v819_v58, %v773_v11  ;;  %v821_v46 = vld [vmem:[%s13675_s16 + $0x10e0] sm:$0xff]  ;;  %v1004_v11 = vld [vmem:[%s13675_s16 + $0x1698] sm:$0xff] }
 0x44a   : > { %v11905_v34 = vpop.f32.mrf.mxu0  ;;  %12715 = vmatprep.subr.bf16.mxu0 %v13475_v24  ;;  %v12016_v51 = vpop.f32.mrf.mxu1  ;;  %v2062_v63 = vpack.c.bf16 %v912_v32, %v866_v36 }
 0x44b   : > { %v11906_v20 = vadd.f32 %v11905_v34, %v11904_v29  ;;  %v16327_v42 = vadd.f32 %v12015_v54, %v7775_v10  ;;  %12618 = vmatpush3.bf16.msra.mxu1 %v13474_v53  ;;  %v914_v53 = vld [vmem:[%s13675_s16 + $0x13c8] sm:$0xff] }
 0x44c   : > { %v11907_v37 = vpop.f32.mrf.mxu0  ;;  %8361 = vmatmul.mubr.bf16.gmra.mxu0 %v1969_v14  ;;  %v12017_v48 = vpop.f32.mrf.mxu1 }
 0x44d   : > { %v7778_v47 = vadd.f32 %v11906_v20, %v16014_v5  ;;  %8368 = vmatprep.mubr.bf16.mxu0 %v2016_v22  ;;  %v12018_v12 = vadd.f32 %v12017_v48, %v12016_v51  ;;  %v775_v5 = vld [vmem:[%s13675_s16 + $0xf70] sm:$0xff]  ;;  %v2064_v20 = vpack.c.bf16 %v914_v53, %v868_v33  ;;  %v958_v48 = vld [vmem:[%s13675_s16 + $0x1528] sm:$0xff] }
 0x44e   : > { %v11908_v9 = vpop.f32.mrf.mxu0  ;;  %v12019_v26 = vpop.f32.mrf.mxu1  ;;  %8522 = vmatmul.mubr.bf16.gmra.mxu1 %v1971_v62  ;;  %v2017_v56 = vpack.c.bf16 %v821_v46, %v775_v5  ;;  %v865_v62 = vld [vmem:[%s13675_s16 + $0x1240] sm:$0xff]  ;;  %v960_v5 = vld [vmem:[%s13675_s16 + $0x1538] sm:$0xff]  ;;  %v1006_v46 = vld [vmem:[%s13675_s16 + $0x16a8] sm:$0xff] }
 0x44f   : > { %v11909_v7 = vadd.f32 %v11908_v9, %v11907_v37  ;;  %v16334_v2 = vadd.f32 %v12018_v12, %v7778_v47  ;;  %8529 = vmatprep.mubr.bf16.mxu1 %v2018_v59  ;;  %v911_v37 = vld [vmem:[%s13675_s16 + $0x13b0] sm:$0xff] }
 0x450   : > { %v11910_v24 = vpop.f32.mrf.mxu0  ;;  %v12020_v14 = vpop.f32.mrf.mxu1  ;;  %v2061_v32 = vpack.c.bf16 %v911_v37, %v865_v62  ;;  %v1096_v62 = vld [vmem:[%s13675_s16 + $0x1978] sm:$0xff] }
 0x451   : > { %v7783_v29 = vadd.f32 %v11909_v7, %v16021_v39  ;;  %v12021_v10 = vadd.f32 %v12020_v14, %v12019_v26  ;;  %v913_v7 = vld [vmem:[%s13675_s16 + $0x13c0] sm:$0xff] }
 0x452   : > { %v11911_v3 = vpop.f32.mrf.mxu0  ;;  %v12022_v40 = vpop.f32.mrf.mxu1 }
 0x453   : > { %v11912_v22 = vadd.f32 %v11911_v3, %v11910_v24  ;;  %v16341_v54 = vadd.f32 %v12021_v10, %v7783_v29 }
 0x454   : > { %v11913_v34 = vpop.f32.mrf.mxu0  ;;  %8369 = vmatmul.mubr.bf16.gmra.mxu0 %v2015_v6  ;;  %v12023_v51 = vpop.f32.mrf.mxu1  ;;  %v2108_v6 = vpack.c.bf16 %v1004_v11, %v958_v48 }
 0x455   : > { %v7786_v39 = vadd.f32 %v11912_v22, %v16028_v28  ;;  %8376 = vmatprep.mubr.bf16.mxu0 %v2062_v63  ;;  %v12024_v59 = vadd.f32 %v12023_v51, %v12022_v40  ;;  %v867_v28 = vld [vmem:[%s13675_s16 + $0x1250] sm:$0xff]  ;;  %v2110_v22 = vpack.c.bf16 %v1006_v46, %v960_v5  ;;  %v1050_v51 = vld [vmem:[%s13675_s16 + $0x1808] sm:$0xff] }
 0x456   : > { %v11914_v47 = vpop.f32.mrf.mxu0  ;;  %v12025_v12 = vpop.f32.mrf.mxu1  ;;  %8530 = vmatmul.mubr.bf16.gmra.mxu1 %v2017_v56  ;;  %v2063_v53 = vpack.c.bf16 %v913_v7, %v867_v28  ;;  %v957_v56 = vld [vmem:[%s13675_s16 + $0x1520] sm:$0xff]  ;;  %v1052_v28 = vld [vmem:[%s13675_s16 + $0x1818] sm:$0xff]  ;;  %v1098_v7 = vld [vmem:[%s13675_s16 + $0x1988] sm:$0xff] }
 0x457   : > { %v11915_v58 = vadd.f32 %v11914_v47, %v11913_v34  ;;  %v16348_v9 = vadd.f32 %v12024_v59, %v7786_v39  ;;  %8537 = vmatprep.mubr.bf16.mxu1 %v2064_v20  ;;  %v1003_v34 = vld [vmem:[%s13675_s16 + $0x1690] sm:$0xff] }
 0x458   : > { %v11916_v36 = vpop.f32.mrf.mxu0  ;;  %v12026_v24 = vpop.f32.mrf.mxu1  ;;  %v2107_v11 = vpack.c.bf16 %v1003_v34, %v957_v56  ;;  %v1188_v56 = vld [vmem:[%s13675_s16 + $0x1c58] sm:$0xff] }
 0x459   : > { %v7791_v26 = vadd.f32 %v11915_v58, %v16035_v19  ;;  %v12027_v29 = vadd.f32 %v12026_v24, %v12025_v12  ;;  %v1005_v58 = vld [vmem:[%s13675_s16 + $0x16a0] sm:$0xff] }
 0x45a   : > { %v11917_v14 = vpop.f32.mrf.mxu0  ;;  %v12028_v33 = vpop.f32.mrf.mxu1 }
 0x45b   : > { %v11918_v63 = vadd.f32 %v11917_v14, %v11916_v36  ;;  %v16355_v10 = vadd.f32 %v12027_v29, %v7791_v26 }
 0x45c   : > { %v11919_v3 = vpop.f32.mrf.mxu0  ;;  %8377 = vmatmul.mubr.bf16.gmra.mxu0 %v2061_v32  ;;  %v12029_v40 = vpop.f32.mrf.mxu1  ;;  %v2154_v32 = vpack.c.bf16 %v1096_v62, %v1050_v51 }
 0x45d   : > { %v7794_v19 = vadd.f32 %v11918_v63, %v16042_v35  ;;  %8384 = vmatprep.mubr.bf16.mxu0 %v2108_v6  ;;  %v12030_v20 = vadd.f32 %v12029_v40, %v12028_v33  ;;  %v959_v35 = vld [vmem:[%s13675_s16 + $0x1530] sm:$0xff]  ;;  %v2156_v63 = vpack.c.bf16 %v1098_v7, %v1052_v28  ;;  %v1142_v40 = vld [vmem:[%s13675_s16 + $0x1ae8] sm:$0xff] }
 0x45e   : > { %v11920_v39 = vpop.f32.mrf.mxu0  ;;  %v12031_v59 = vpop.f32.mrf.mxu1  ;;  %8538 = vmatmul.mubr.bf16.gmra.mxu1 %v2063_v53  ;;  %v2109_v46 = vpack.c.bf16 %v1005_v58, %v959_v35  ;;  %v1049_v53 = vld [vmem:[%s13675_s16 + $0x1800] sm:$0xff]  ;;  %v1144_v35 = vld [vmem:[%s13675_s16 + $0x1af8] sm:$0xff]  ;;  %v1190_v58 = vld [vmem:[%s13675_s16 + $0x1c68] sm:$0xff] }
 0x45f   : > { %v11921_v37 = vadd.f32 %v11920_v39, %v11919_v3  ;;  %v16362_v47 = vadd.f32 %v12030_v20, %v7794_v19  ;;  %8545 = vmatprep.mubr.bf16.mxu1 %v2110_v22  ;;  %v1095_v3 = vld [vmem:[%s13675_s16 + $0x1970] sm:$0xff] }
 0x460   : > { %v11922_v48 = vpop.f32.mrf.mxu0  ;;  %v12032_v36 = vpop.f32.mrf.mxu1  ;;  %v2153_v62 = vpack.c.bf16 %v1095_v3, %v1049_v53  ;;  %v1280_v53 = vld [vmem:[%s13675_s16 + $0x1f38] sm:$0xff] }
 0x461   : > { %v7799_v12 = vadd.f32 %v11921_v37, %v16049_v25  ;;  %v12033_v26 = vadd.f32 %v12032_v36, %v12031_v59  ;;  %v1097_v37 = vld [vmem:[%s13675_s16 + $0x1980] sm:$0xff] }
 0x462   : > { %v11923_v24 = vpop.f32.mrf.mxu0  ;;  %v12034_v5 = vpop.f32.mrf.mxu1 }
 0x463   : > { %v11924_v6 = vadd.f32 %v11923_v24, %v11922_v48  ;;  %v16369_v29 = vadd.f32 %v12033_v26, %v7799_v12 }
 0x464   : > { %v11925_v14 = vpop.f32.mrf.mxu0  ;;  %8385 = vmatmul.mubr.bf16.gmra.mxu0 %v2107_v11  ;;  %v12035_v33 = vpop.f32.mrf.mxu1  ;;  %v2200_v11 = vpack.c.bf16 %v1188_v56, %v1142_v40 }
 0x465   : > { %v7802_v25 = vadd.f32 %v11924_v6, %v16056_v30  ;;  %8392 = vmatprep.mubr.bf16.mxu0 %v2154_v32  ;;  %v12036_v22 = vadd.f32 %v12035_v33, %v12034_v5  ;;  %v1051_v30 = vld [vmem:[%s13675_s16 + $0x1810] sm:$0xff]  ;;  %v2202_v6 = vpack.c.bf16 %v1190_v58, %v1144_v35  ;;  %v1234_v33 = vld [vmem:[%s13675_s16 + $0x1dc8] sm:$0xff] }
 0x466   : > { %v11926_v19 = vpop.f32.mrf.mxu0  ;;  %v12037_v20 = vpop.f32.mrf.mxu1  ;;  %8546 = vmatmul.mubr.bf16.gmra.mxu1 %v2109_v46  ;;  %v2155_v7 = vpack.c.bf16 %v1097_v37, %v1051_v30  ;;  %v1141_v46 = vld [vmem:[%s13675_s16 + $0x1ae0] sm:$0xff]  ;;  %v1236_v30 = vld [vmem:[%s13675_s16 + $0x1dd8] sm:$0xff]  ;;  %v1282_v37 = vld [vmem:[%s13675_s16 + $0x1f48] sm:$0xff] }
 0x467   : > { %v11927_v34 = vadd.f32 %v11926_v19, %v11925_v14  ;;  %v16376_v39 = vadd.f32 %v12036_v22, %v7802_v25  ;;  %8553 = vmatprep.mubr.bf16.mxu1 %v2156_v63  ;;  %v1187_v14 = vld [vmem:[%s13675_s16 + $0x1c50] sm:$0xff] }
 0x468   : > { %v11928_v51 = vpop.f32.mrf.mxu0  ;;  %v12038_v48 = vpop.f32.mrf.mxu1  ;;  %v2199_v56 = vpack.c.bf16 %v1187_v14, %v1141_v46  ;;  %v1372_v46 = vld [vmem:[%s13675_s16 + $0x2218] sm:$0xff] }
 0x469   : > { %v7807_v59 = vadd.f32 %v11927_v34, %v16063_v13  ;;  %v12039_v12 = vadd.f32 %v12038_v48, %v12037_v20  ;;  %v1189_v34 = vld [vmem:[%s13675_s16 + $0x1c60] sm:$0xff] }
 0x46a   : > { %v11929_v36 = vpop.f32.mrf.mxu0  ;;  %v12040_v28 = vpop.f32.mrf.mxu1 }
 0x46b   : > { %v11930_v32 = vadd.f32 %v11929_v36, %v11928_v51  ;;  %v16383_v26 = vadd.f32 %v12039_v12, %v7807_v59 }
 0x46c   : > { %v12059_v24 = vpop.f32.mrf.mxu0  ;;  %8393 = vmatmul.mubr.bf16.gmra.mxu0 %v2153_v62  ;;  %v12041_v5 = vpop.f32.mrf.mxu1  ;;  %v2246_v62 = vpack.c.bf16 %v1280_v53, %v1234_v33 }
 0x46d   : > { %v7810_v13 = vadd.f32 %v11930_v32, %v16070_v0  ;;  %8400 = vmatprep.mubr.bf16.mxu0 %v2200_v11  ;;  %v12042_v63 = vadd.f32 %v12041_v5, %v12040_v28  ;;  %v1143_v0 = vld [vmem:[%s13675_s16 + $0x1af0] sm:$0xff]  ;;  %v2248_v32 = vpack.c.bf16 %v1282_v37, %v1236_v30  ;;  %v1326_v5 = vld [vmem:[%s13675_s16 + $0x20a8] sm:$0xff] }
 0x46e   : > { %v12060_v25 = vpop.f32.mrf.mxu0  ;;  %v12171_v22 = vpop.f32.mrf.mxu1  ;;  %8554 = vmatmul.mubr.bf16.gmra.mxu1 %v2155_v7  ;;  %v2201_v58 = vpack.c.bf16 %v1189_v34, %v1143_v0  ;;  %v1233_v7 = vld [vmem:[%s13675_s16 + $0x1dc0] sm:$0xff]  ;;  %v1328_v0 = vld [vmem:[%s13675_s16 + $0x20b8] sm:$0xff]  ;;  %v1374_v34 = vld [vmem:[%s13675_s16 + $0x2228] sm:$0xff] }
 0x46f   : > { %v12061_v3 = vadd.f32 %v12060_v25, %v12059_v24  ;;  %v16390_v19 = vadd.f32 %v12042_v63, %v7810_v13  ;;  %8561 = vmatprep.mubr.bf16.mxu1 %v2202_v6  ;;  %v1279_v24 = vld [vmem:[%s13675_s16 + $0x1f30] sm:$0xff] }
 0x470   : > { %v12062_v40 = vpop.f32.mrf.mxu0  ;;  %v12172_v51 = vpop.f32.mrf.mxu1  ;;  %v2245_v53 = vpack.c.bf16 %v1279_v24, %v1233_v7  ;;  %v1464_v7 = vld [vmem:[%s13675_s16 + $0x24f8] sm:$0xff] }
 0x471   : > { %v8009_v20 = vadd.f32 %v12061_v3, %v16077_v15  ;;  %v12173_v59 = vadd.f32 %v12172_v51, %v12171_v22  ;;  %v1281_v3 = vld [vmem:[%s13675_s16 + $0x1f40] sm:$0xff] }
 0x472   : > { %v12063_v48 = vpop.f32.mrf.mxu0  ;;  %v12174_v35 = vpop.f32.mrf.mxu1 }
 0x473   : > { %v12064_v11 = vadd.f32 %v12063_v48, %v12062_v40  ;;  %v16397_v12 = vadd.f32 %v12173_v59, %v8009_v20 }
 0x474   : > { %v12065_v36 = vpop.f32.mrf.mxu0  ;;  %8401 = vmatmul.mubr.bf16.gmra.mxu0 %v2199_v56  ;;  %v12175_v28 = vpop.f32.mrf.mxu1  ;;  %v2292_v56 = vpack.c.bf16 %v1372_v46, %v1326_v5 }
 0x475   : > { %v8012_v15 = vadd.f32 %v12064_v11, %v16084_v38  ;;  %8408 = vmatprep.mubr.bf16.mxu0 %v2246_v62  ;;  %v12176_v6 = vadd.f32 %v12175_v28, %v12174_v35  ;;  %v1235_v38 = vld [vmem:[%s13675_s16 + $0x1dd0] sm:$0xff]  ;;  %v2294_v11 = vpack.c.bf16 %v1374_v34, %v1328_v0  ;;  %v1418_v28 = vld [vmem:[%s13675_s16 + $0x2388] sm:$0xff] }
 0x476   : > { %v12066_v13 = vpop.f32.mrf.mxu0  ;;  %v12177_v63 = vpop.f32.mrf.mxu1  ;;  %8562 = vmatmul.mubr.bf16.gmra.mxu1 %v2201_v58  ;;  %v2247_v37 = vpack.c.bf16 %v1281_v3, %v1235_v38  ;;  %v1325_v58 = vld [vmem:[%s13675_s16 + $0x20a0] sm:$0xff]  ;;  %v1420_v38 = vld [vmem:[%s13675_s16 + $0x2398] sm:$0xff]  ;;  %v1466_v3 = vld [vmem:[%s13675_s16 + $0x2508] sm:$0xff] }
 0x477   : > { %v12067_v14 = vadd.f32 %v12066_v13, %v12065_v36  ;;  %v16404_v25 = vadd.f32 %v12176_v6, %v8012_v15  ;;  %8569 = vmatprep.mubr.bf16.mxu1 %v2248_v32  ;;  %v1371_v36 = vld [vmem:[%s13675_s16 + $0x2210] sm:$0xff] }
 0x478   : > { %v12068_v33 = vpop.f32.mrf.mxu0  ;;  %v12178_v40 = vpop.f32.mrf.mxu1  ;;  %v2291_v46 = vpack.c.bf16 %v1371_v36, %v1325_v58  ;;  %v1556_v58 = vld [vmem:[%s13675_s16 + $0x27d8] sm:$0xff] }
 0x479   : > { %v8017_v22 = vadd.f32 %v12067_v14, %v16091_v18  ;;  %v12179_v20 = vadd.f32 %v12178_v40, %v12177_v63  ;;  %v1373_v14 = vld [vmem:[%s13675_s16 + $0x2220] sm:$0xff] }
 0x47a   : > { %v12069_v51 = vpop.f32.mrf.mxu0  ;;  %v12180_v30 = vpop.f32.mrf.mxu1 }
 0x47b   : > { %v12070_v62 = vadd.f32 %v12069_v51, %v12068_v33  ;;  %v16411_v59 = vadd.f32 %v12179_v20, %v8017_v22 }
 0x47c   : > { %v12071_v48 = vpop.f32.mrf.mxu0  ;;  %8409 = vmatmul.mubr.bf16.gmra.mxu0 %v2245_v53  ;;  %v12181_v35 = vpop.f32.mrf.mxu1  ;;  %v2338_v53 = vpack.c.bf16 %v1464_v7, %v1418_v28 }
 0x47d   : > { %v8020_v18 = vadd.f32 %v12070_v62, %v16098_v57  ;;  %8416 = vmatprep.mubr.bf16.mxu0 %v2292_v56  ;;  %v12182_v32 = vadd.f32 %v12181_v35, %v12180_v30  ;;  %v1327_v57 = vld [vmem:[%s13675_s16 + $0x20b0] sm:$0xff]  ;;  %v2340_v62 = vpack.c.bf16 %v1466_v3, %v1420_v38  ;;  %v1510_v35 = vld [vmem:[%s13675_s16 + $0x2668] sm:$0xff] }
 0x47e   : > { %v12072_v15 = vpop.f32.mrf.mxu0  ;;  %v12183_v6 = vpop.f32.mrf.mxu1  ;;  %8570 = vmatmul.mubr.bf16.gmra.mxu1 %v2247_v37  ;;  %v2293_v34 = vpack.c.bf16 %v1373_v14, %v1327_v57  ;;  %v1417_v37 = vld [vmem:[%s13675_s16 + $0x2380] sm:$0xff]  ;;  %v1512_v57 = vld [vmem:[%s13675_s16 + $0x2678] sm:$0xff]  ;;  %v1558_v14 = vld [vmem:[%s13675_s16 + $0x27e8] sm:$0xff] }
 0x47f   : > { %v12073_v24 = vadd.f32 %v12072_v15, %v12071_v48  ;;  %v16418_v13 = vadd.f32 %v12182_v32, %v8020_v18  ;;  %8577 = vmatprep.mubr.bf16.mxu1 %v2294_v11  ;;  %v1463_v48 = vld [vmem:[%s13675_s16 + $0x24f0] sm:$0xff] }
 0x480   : > { %v12074_v5 = vpop.f32.mrf.mxu0  ;;  %v12184_v33 = vpop.f32.mrf.mxu1  ;;  %v2337_v7 = vpack.c.bf16 %v1463_v48, %v1417_v37  ;;  %v1602_v37 = vld [vmem:[%s13675_s16 + $0x2948] sm:$0xff]  ;;  %v1648_v48 = vld [vmem:[%s13675_s16 + $0x2ab8] sm:$0xff] }
 0x481   : > { %v8025_v63 = vadd.f32 %v12073_v24, %v16105_v52  ;;  %v12185_v22 = vadd.f32 %v12184_v33, %v12183_v6  ;;  %v1465_v24 = vld [vmem:[%s13675_s16 + $0x2500] sm:$0xff] }
 0x482   : > { %v12075_v40 = vpop.f32.mrf.mxu0  ;;  %v12186_v0 = vpop.f32.mrf.mxu1 }
 0x483   : > { %v12076_v56 = vadd.f32 %v12075_v40, %v12074_v5  ;;  %v16425_v20 = vadd.f32 %v12185_v22, %v8025_v63 }
 0x484   : > { %v12077_v51 = vpop.f32.mrf.mxu0  ;;  %8417 = vmatmul.mubr.bf16.gmra.mxu0 %v2291_v46  ;;  %v12187_v30 = vpop.f32.mrf.mxu1  ;;  %v2384_v46 = vpack.c.bf16 %v1556_v58, %v1510_v35 }
 0x485   : > { %v8028_v52 = vadd.f32 %v12076_v56, %v16112_v50  ;;  %8424 = vmatprep.mubr.bf16.mxu0 %v2338_v53  ;;  %v12188_v11 = vadd.f32 %v12187_v30, %v12186_v0  ;;  %v1419_v50 = vld [vmem:[%s13675_s16 + $0x2390] sm:$0xff]  ;;  %v2386_v56 = vpack.c.bf16 %v1558_v14, %v1512_v57 }
 0x486   : > { %v12078_v18 = vpop.f32.mrf.mxu0  ;;  %v12189_v32 = vpop.f32.mrf.mxu1  ;;  %8578 = vmatmul.mubr.bf16.gmra.mxu1 %v2293_v34  ;;  %v2339_v3 = vpack.c.bf16 %v1465_v24, %v1419_v50  ;;  %v1509_v34 = vld [vmem:[%s13675_s16 + $0x2660] sm:$0xff]  ;;  %v2430_v50 = vpack.c.bf16 %v1648_v48, %v1602_v37  ;;  %v1604_v24 = vld [vmem:[%s13675_s16 + $0x2958] sm:$0xff] }
 0x487   : > { %v12079_v36 = vadd.f32 %v12078_v18, %v12077_v51  ;;  %v16432_v15 = vadd.f32 %v12188_v11, %v8028_v52  ;;  %8585 = vmatprep.mubr.bf16.mxu1 %v2340_v62  ;;  %v1555_v51 = vld [vmem:[%s13675_s16 + $0x27d0] sm:$0xff]  ;;  %v13489_v62 = vld [vmem:[%s17572_s2 + $0xaf8] sm:$0xff]  }
 0x488   : > { %v12080_v28 = vpop.f32.mrf.mxu0  ;;  %v12190_v5 = vpop.f32.mrf.mxu1  ;;  %12827 = vmatprep.subr.bf16.mxu1 %v13489_v62  ;;  %v2383_v58 = vpack.c.bf16 %v1555_v51, %v1509_v34  ;;  %v1694_v34 = vld [vmem:[%s13675_s16 + $0x2c28] sm:$0xff]  ;;  %v1740_v51 = vld [vmem:[%s13675_s16 + $0x2d98] sm:$0xff] }
 0x489   : > { %v8033_v6 = vadd.f32 %v12079_v36, %v16119_v23  ;;  %v12191_v63 = vadd.f32 %v12190_v5, %v12189_v32  ;;  %v1511_v36 = vld [vmem:[%s13675_s16 + $0x2670] sm:$0xff]  ;;  %v1557_v32 = vld [vmem:[%s13675_s16 + $0x27e0] sm:$0xff] }
 0x48a   : > { %v12081_v33 = vpop.f32.mrf.mxu0  ;;  %v12192_v38 = vpop.f32.mrf.mxu1 }
 0x48b   : > { %v12082_v53 = vadd.f32 %v12081_v33, %v12080_v28  ;;  %v16439_v22 = vadd.f32 %v12191_v63, %v8033_v6  ;;  %v1650_v6 = vld [vmem:[%s13675_s16 + $0x2ac8] sm:$0xff]  ;;  %v2385_v63 = vpack.c.bf16 %v1557_v32, %v1511_v36  ;;  %v1696_v36 = vld [vmem:[%s13675_s16 + $0x2c38] sm:$0xff] }
 0x48c   : > { %v12083_v40 = vpop.f32.mrf.mxu0  ;;  %8425 = vmatmul.mubr.bf16.gmra.mxu0 %v2337_v7  ;;  %v12193_v0 = vpop.f32.mrf.mxu1  ;;  %v1742_v32 = vld [vmem:[%s13675_s16 + $0x2da8] sm:$0xff] }
 0x48d   : > { %v8036_v23 = vadd.f32 %v12082_v53, %v16129_v16  ;;  %8432 = vmatprep.mubr.bf16.mxu0 %v2384_v46  ;;  %v12194_v52 = vadd.f32 %v12193_v0, %v12192_v38  ;;  %v2432_v38 = vpack.c.bf16 %v1650_v6, %v1604_v24 }
 0x48e   : > { %v12084_v30 = vpop.f32.mrf.mxu0  ;;  %v12195_v18 = vpop.f32.mrf.mxu1  ;;  %8586 = vmatmul.mubr.bf16.gmra.mxu1 %v2339_v3 }
 0x48f   : > { %v12085_v11 = vadd.f32 %v12084_v30, %v12083_v40  ;;  %v16449_v16 = vadd.f32 %v12194_v52, %v8036_v23  ;;  %8593 = vmatprep.mubr.bf16.mxu1 %v2386_v56  ;;  %v1601_v40 = vld [vmem:[%s13675_s16 + $0x2940] sm:$0xff]  ;;  %v1647_v56 = vld [vmem:[%s13675_s16 + $0x2ab0] sm:$0xff] }
 0x490   : > { %v12086_v35 = vpop.f32.mrf.mxu0  ;;  %v12196_v7 = vpop.f32.mrf.mxu1  ;;  %v2429_v48 = vpack.c.bf16 %v1647_v56, %v1601_v40  ;;  %v364_v40 = vld [vmem:[%s13675_s16 + $0x298] sm:$0xff] }
 0x491   : > { %v8041_v28 = vadd.f32 %v12085_v11, %v16136_v55  ;;  %v12197_v5 = vadd.f32 %v12196_v7, %v12195_v18  ;;  %v1649_v11 = vld [vmem:[%s13675_s16 + $0x2ac0] sm:$0xff] }
 0x492   : > { %v12087_v46 = vpop.f32.mrf.mxu0  ;;  %v12198_v14 = vpop.f32.mrf.mxu1 }
 0x493   : > { %v12088_v57 = vadd.f32 %v12087_v46, %v12086_v35  ;;  %v16456_v33 = vadd.f32 %v12197_v5, %v8041_v28 }
 0x494   : > { %v12089_v53 = vpop.f32.mrf.mxu0  ;;  %8433 = vmatmul.mubr.bf16.gmra.mxu0 %v2383_v58  ;;  %v12199_v3 = vpop.f32.mrf.mxu1  ;;  %v2476_v58 = vpack.c.bf16 %v1740_v51, %v1694_v34 }
 0x495   : > { %v8044_v55 = vadd.f32 %v12088_v57, %v16143_v45  ;;  %8440 = vmatprep.mubr.bf16.mxu0 %v2430_v50  ;;  %v12200_v23 = vadd.f32 %v12199_v3, %v12198_v14  ;;  %v1603_v45 = vld [vmem:[%s13675_s16 + $0x2950] sm:$0xff]  ;;  %v2478_v57 = vpack.c.bf16 %v1742_v32, %v1696_v36  ;;  %v318_v3 = vld [vmem:[%s13675_s16 + $0x128] sm:$0xff] }
 0x496   : > { %v12090_v0 = vpop.f32.mrf.mxu0  ;;  %v12201_v52 = vpop.f32.mrf.mxu1  ;;  %8594 = vmatmul.mubr.bf16.gmra.mxu1 %v2385_v63  ;;  %v2431_v6 = vpack.c.bf16 %v1649_v11, %v1603_v45  ;;  %v1693_v63 = vld [vmem:[%s13675_s16 + $0x2c20] sm:$0xff]  ;;  %v320_v45 = vld [vmem:[%s13675_s16 + $0x138] sm:$0xff]  ;;  %v366_v11 = vld [vmem:[%s13675_s16 + $0x2a8] sm:$0xff] }
 0x497   : > { %v12091_v62 = vadd.f32 %v12090_v0, %v12089_v53  ;;  %v16463_v30 = vadd.f32 %v12200_v23, %v8044_v55  ;;  %8601 = vmatprep.mubr.bf16.mxu1 %v2432_v38  ;;  %v1739_v53 = vld [vmem:[%s13675_s16 + $0x2d90] sm:$0xff] }
 0x498   : > { %v12092_v37 = vpop.f32.mrf.mxu0  ;;  %v12202_v35 = vpop.f32.mrf.mxu1  ;;  %v2475_v51 = vpack.c.bf16 %v1739_v53, %v1693_v63  ;;  %v456_v63 = vld [vmem:[%s13675_s16 + $0x578] sm:$0xff] }
 0x499   : > { %v8049_v18 = vadd.f32 %v12091_v62, %v16150_v8  ;;  %v12203_v28 = vadd.f32 %v12202_v35, %v12201_v52  ;;  %v1741_v62 = vld [vmem:[%s13675_s16 + $0x2da0] sm:$0xff] }
 0x49a   : > { %v12093_v7 = vpop.f32.mrf.mxu0  ;;  %v12204_v24 = vpop.f32.mrf.mxu1 }
 0x49b   : > { %v12094_v50 = vadd.f32 %v12093_v7, %v12092_v37  ;;  %v16470_v5 = vadd.f32 %v12203_v28, %v8049_v18 }
 0x49c   : > { %v12095_v46 = vpop.f32.mrf.mxu0  ;;  %8441 = vmatmul.mubr.bf16.gmra.mxu0 %v2429_v48  ;;  %v12205_v14 = vpop.f32.mrf.mxu1  ;;  %v1790_v48 = vpack.c.bf16 %v364_v40, %v318_v3 }
 0x49d   : > { %v8052_v8 = vadd.f32 %v12094_v50, %v16157_v61  ;;  %8448 = vmatprep.mubr.bf16.mxu0 %v2476_v58  ;;  %v12206_v38 = vadd.f32 %v12205_v14, %v12204_v24  ;;  %v1695_v61 = vld [vmem:[%s13675_s16 + $0x2c30] sm:$0xff]  ;;  %v1792_v50 = vpack.c.bf16 %v366_v11, %v320_v45  ;;  %v410_v14 = vld [vmem:[%s13675_s16 + $0x408] sm:$0xff] }
 0x49e   : > { %v12096_v55 = vpop.f32.mrf.mxu0  ;;  %v12207_v23 = vpop.f32.mrf.mxu1  ;;  %8602 = vmatmul.mubr.bf16.gmra.mxu1 %v2431_v6  ;;  %v2477_v32 = vpack.c.bf16 %v1741_v62, %v1695_v61  ;;  %v317_v6 = vld [vmem:[%s13675_s16 + $0x120] sm:$0xff]  ;;  %v1836_v61 = vpack.c.bf16 %v456_v63, %v410_v14  ;;  %v412_v62 = vld [vmem:[%s13675_s16 + $0x418] sm:$0xff]  ;;  %v13477_v45 = vld [vmem:[%s17572_s2 + $0xa70] sm:$0xff]  }
 0x49f   : > { %v12097_v56 = vadd.f32 %v12096_v55, %v12095_v46  ;;  %v16477_v0 = vadd.f32 %v12206_v38, %v8052_v8  ;;  %8609 = vmatprep.mubr.bf16.mxu1 %v2478_v57  ;;  %v363_v46 = vld [vmem:[%s13675_s16 + $0x290] sm:$0xff]  ;;  %v502_v14 = vld [vmem:[%s13675_s16 + $0x6e8] sm:$0xff]  ;;  %v548_v63 = vld [vmem:[%s13675_s16 + $0x858] sm:$0xff] }
 0x4a0   : > { %v12098_v34 = vpop.f32.mrf.mxu0  ;;  %v12208_v37 = vpop.f32.mrf.mxu1  ;;  %v1789_v40 = vpack.c.bf16 %v363_v46, %v317_v6  ;;  %v13478_v6 = vld [vmem:[%s17572_s2 + $0xa30] sm:$0xff]  }
 0x4a1   : > { %v8057_v52 = vadd.f32 %v12097_v56, %v16164_v43  ;;  %v12209_v18 = vadd.f32 %v12208_v37, %v12207_v23  ;;  %v365_v56 = vld [vmem:[%s13675_s16 + $0x2a0] sm:$0xff]  ;;  %v13491_v46 = vld [vmem:[%s17572_s2 + $0xaf0] sm:$0xff]  }
 0x4a2   : > { %v12099_v35 = vpop.f32.mrf.mxu0  ;;  %v12210_v36 = vpop.f32.mrf.mxu1 }
 0x4a3   : > { %v12100_v58 = vadd.f32 %v12099_v35, %v12098_v34  ;;  %v16484_v28 = vadd.f32 %v12209_v18, %v8057_v52  ;;  %v458_v52 = vld [vmem:[%s13675_s16 + $0x588] sm:$0xff] }
 0x4a4   : > { %v12101_v7 = vpop.f32.mrf.mxu0  ;;  %8449 = vmatmul.mubr.bf16.gmra.mxu0 %v2475_v51  ;;  %v12211_v24 = vpop.f32.mrf.mxu1  ;;  %v13476_v51 = vld [vmem:[%s17572_s2 + $0xa38] sm:$0xff]  }
 0x4a5   : > { %v8060_v43 = vadd.f32 %v12100_v58, %v16171_v21  ;;  %8650 = vmatprep.mubr.bf16.mxu0 %v1790_v48  ;;  %v12212_v57 = vadd.f32 %v12211_v24, %v12210_v36  ;;  %v319_v21 = vld [vmem:[%s13675_s16 + $0x130] sm:$0xff]  ;;  %v409_v36 = vld [vmem:[%s13675_s16 + $0x400] sm:$0xff] }
 0x4a6   : > { %v12102_v8 = vpop.f32.mrf.mxu0  ;;  %v12213_v38 = vpop.f32.mrf.mxu1  ;;  %8610 = vmatmul.mubr.bf16.gmra.mxu1 %v2477_v32  ;;  %v1791_v35 = vpack.c.bf16 %v365_v56, %v319_v21  ;;  %v1838_v32 = vpack.c.bf16 %v458_v52, %v412_v62  ;;  %v455_v24 = vld [vmem:[%s13675_s16 + $0x570] sm:$0xff]  ;;  %v1882_v62 = vpack.c.bf16 %v548_v63, %v502_v14  ;;  %v504_v52 = vld [vmem:[%s13675_s16 + $0x6f8] sm:$0xff]  ;;  %v13495_v14 = vld [vmem:[%s17572_s2 + $0xae0] sm:$0xff]  }
 0x4a7   : > { %v12103_v53 = vadd.f32 %v12102_v8, %v12101_v7  ;;  %v16491_v55 = vadd.f32 %v12212_v57, %v8060_v43  ;;  %8811 = vmatprep.mubr.bf16.mxu1 %v1792_v50  ;;  %v13490_v7 = vld [vmem:[%s17572_s2 + $0xab8] sm:$0xff]   ;;  %v1835_v21 = vpack.c.bf16 %v455_v24, %v409_v36  ;;  %v411_v56 = vld [vmem:[%s13675_s16 + $0x410] sm:$0xff]  ;;  %v13494_v24 = vld [vmem:[%s17572_s2 + $0xaa8] sm:$0xff]  }
 0x4a8   : > { %v12104_v3 = vpop.f32.mrf.mxu0  ;;  %v12214_v34 = vpop.f32.mrf.mxu1 }
 0x4a9   : > { %v8065_v23 = vadd.f32 %v12103_v53, %v16184_v60  ;;  %v12215_v37 = vadd.f32 %v12214_v34, %v12213_v38  ;;  %v13492_v34 = vld [vmem:[%s17572_s2 + $0xab0] sm:$0xff]  }
 0x4aa   : > { %v12105_v48 = vpop.f32.mrf.mxu0  ;;  %v12216_v18 = vpop.f32.mrf.mxu1 }
 0x4ab   : > { %v12106_v11 = vadd.f32 %v12105_v48, %v12104_v3  ;;  %v16504_v60 = vadd.f32 %v12215_v37, %v8065_v23  ;;  %v457_v23 = vld [vmem:[%s13675_s16 + $0x580] sm:$0xff]  ;;  %v550_v37 = vld [vmem:[%s13675_s16 + $0x868] sm:$0xff] }
 0x4ac   : > { %v12107_v58 = vpop.f32.mrf.mxu0  ;;  %8651 = vmatmul.mubr.bf16.vlgmr.msra.gmra.mxu0 %v1789_v40  ;;  %v12217_v43 = vpop.f32.mrf.mxu1  ;;  %v13480_v48 = vld [vmem:[%s17572_s2 + $0xa28] sm:$0xff]   ;;  %v1837_v36 = vpack.c.bf16 %v457_v23, %v411_v56 }
 0x4ad   : > { %v8068_v50 = vadd.f32 %v12106_v11, %v16203_v41  ;;  %12716 = vmatpush3.bf16.msra.mxu0 %v13476_v51  ;;  %8658 = vmatprep.mubr.bf16.mxu0 %v1836_v61  ;;  %v12218_v57 = vadd.f32 %v12217_v43, %v12216_v18  ;;  %v13479_v41 = vld [vmem:[%s17572_s2 + $0xa68] sm:$0xff]   ;;  %v13481_v18 = vld [vmem:[%s17572_s2 + $0xa60] sm:$0xff]   ;;  %v1884_v43 = vpack.c.bf16 %v550_v37, %v504_v52 }
 0x4ae   : > { %v12108_v8 = vpop.f32.mrf.mxu0  ;;  %12717 = vmatprep.subr.bf16.mxu0 %v13477_v45  ;;  %v12219_v38 = vpop.f32.mrf.mxu1  ;;  %8812 = vmatmul.mubr.bf16.vlgmr.msra.gmra.mxu1 %v1791_v35 }
 0x4af   : > { %v12109_v53 = vadd.f32 %v12108_v8, %v12107_v58  ;;  %v16523_v3 = vadd.f32 %v12218_v57, %v8068_v50  ;;  %8819 = vmatprep.mubr.bf16.mxu1 %v1838_v32  ;;  %12828 = vmatpush3.bf16.msra.mxu1 %v13490_v7  ;;  %v501_v50 = vld [vmem:[%s13675_s16 + $0x6e0] sm:$0xff]  ;;  %v547_v57 = vld [vmem:[%s13675_s16 + $0x850] sm:$0xff] }
 0x4b0   : > { %v12110_v40 = vpop.f32.mrf.mxu0  ;;  %v12220_v61 = vpop.f32.mrf.mxu1  ;;  %12829 = vmatprep.subr.bf16.mxu1 %v13491_v46  ;;  %v13482_v8 = vld [vmem:[%s17572_s2 + $0xa20] sm:$0xff]  }
 0x4b1   : > { %v8073_v51 = vadd.f32 %v12109_v53, %v16222_v49  ;;  %12718 = vmatpush3.bf16.msra.mxu0 %v13478_v6  ;;  %v12221_v45 = vadd.f32 %v12220_v61, %v12219_v38  ;;  %v13493_v49 = vld [vmem:[%s17572_s2 + $0xae8] sm:$0xff]   ;;  %v640_v38 = vld [vmem:[%s13675_s16 + $0xb38] sm:$0xff]  ;;  %v549_v61 = vld [vmem:[%s13675_s16 + $0x860] sm:$0xff] }
 0x4b2   : > { %v12111_v11 = vpop.f32.mrf.mxu0  ;;  %12719 = vmatprep.subr.bf16.mxu0 %v13479_v41  ;;  %v12222_v58 = vpop.f32.mrf.mxu1  ;;  %v594_v53 = vld [vmem:[%s13675_s16 + $0x9c8] sm:$0xff] }
 0x4b3   : > { %v12112_v35 = vadd.f32 %v12111_v11, %v12110_v40  ;;  %v16542_v32 = vadd.f32 %v12221_v45, %v8073_v51  ;;  %12830 = vmatpush3.bf16.msra.mxu1 %v13492_v34  ;;  %v1881_v34 = vpack.c.bf16 %v547_v57, %v501_v50  ;;  %v503_v51 = vld [vmem:[%s13675_s16 + $0x6f0] sm:$0xff]  ;;  %v596_v45 = vld [vmem:[%s13675_s16 + $0x9d8] sm:$0xff]  ;;  %v642_v11 = vld [vmem:[%s13675_s16 + $0xb48] sm:$0xff] }
 0x4b4   : > { %v12113_v7 = vpop.f32.mrf.mxu0  ;;  %8659 = vmatmul.mubr.bf16.gmra.mxu0 %v1835_v21  ;;  %v12223_v46 = vpop.f32.mrf.mxu1  ;;  %12831 = vmatprep.subr.bf16.mxu1 %v13493_v49  ;;  %v1883_v50 = vpack.c.bf16 %v549_v61, %v503_v51  ;;  %v13500_v57 = vld [vmem:[%s17572_s2 + $0xa98] sm:$0xff]  }
 0x4b5   : > { %v8076_v6 = vadd.f32 %v12112_v35, %v16241_v1  ;;  %8666 = vmatprep.mubr.bf16.mxu0 %v1882_v62  ;;  %12720 = vmatpush3.bf16.msra.mxu0 %v13480_v48  ;;  %v12224_v63 = vadd.f32 %v12223_v46, %v12222_v58  ;;  %v13483_v1 = vld [vmem:[%s17572_s2 + $0xa58] sm:$0xff]   ;;  %v13496_v62 = vld [vmem:[%s17572_s2 + $0xaa0] sm:$0xff]   ;;  %v1928_v48 = vpack.c.bf16 %v640_v38, %v594_v53  ;;  %v13485_v58 = vld [vmem:[%s17572_s2 + $0xa50] sm:$0xff]  }
 0x4b6   : > { %v12114_v41 = vpop.f32.mrf.mxu0  ;;  %12721 = vmatprep.subr.bf16.mxu0 %v13481_v18  ;;  %v12225_v21 = vpop.f32.mrf.mxu1  ;;  %8820 = vmatmul.mubr.bf16.gmra.mxu1 %v1837_v36  ;;  %v13484_v18 = vld [vmem:[%s17572_s2 + $0xa18] sm:$0xff]   ;;  %v1930_v46 = vpack.c.bf16 %v642_v11, %v596_v45  ;;  %v13501_v53 = vld [vmem:[%s17572_s2 + $0xad0] sm:$0xff]  }
 0x4b7   : > { %v12115_v40 = vadd.f32 %v12114_v41, %v12113_v7  ;;  %v16561_v56 = vadd.f32 %v12224_v63, %v8076_v6  ;;  %8827 = vmatprep.mubr.bf16.mxu1 %v1884_v43  ;;  %12832 = vmatpush3.bf16.msra.mxu1 %v13494_v24  ;;  %v593_v6 = vld [vmem:[%s13675_s16 + $0x9c0] sm:$0xff]  ;;  %v639_v63 = vld [vmem:[%s13675_s16 + $0xb30] sm:$0xff] }
 0x4b8   : > { %v12116_v23 = vpop.f32.mrf.mxu0  ;;  %v12226_v37 = vpop.f32.mrf.mxu1  ;;  %12833 = vmatprep.subr.bf16.mxu1 %v13495_v14  ;;  %v13486_v41 = vld [vmem:[%s17572_s2 + $0xa10] sm:$0xff]  }
 0x4b9   : > { %v8081_v52 = vadd.f32 %v12115_v40, %v16260_v17  ;;  %12722 = vmatpush3.bf16.msra.mxu0 %v13482_v8  ;;  %v12227_v49 = vadd.f32 %v12226_v37, %v12225_v21  ;;  %v13499_v17 = vld [vmem:[%s17572_s2 + $0xad8] sm:$0xff]   ;;  %v686_v40 = vld [vmem:[%s13675_s16 + $0xca8] sm:$0xff]  ;;  %v641_v37 = vld [vmem:[%s13675_s16 + $0xb40] sm:$0xff] }
 0x4ba   : > { %v12117_v35 = vpop.f32.mrf.mxu0  ;;  %12723 = vmatprep.subr.bf16.mxu0 %v13483_v1  ;;  %v12228_v7 = vpop.f32.mrf.mxu1  ;;  %v732_v21 = vld [vmem:[%s13675_s16 + $0xe18] sm:$0xff] }
 0x4bb   : > { %v12118_v36 = vadd.f32 %v12117_v35, %v12116_v23  ;;  %v16580_v43 = vadd.f32 %v12227_v49, %v8081_v52  ;;  %12834 = vmatpush3.bf16.msra.mxu1 %v13496_v62  ;;  %v1927_v62 = vpack.c.bf16 %v639_v63, %v593_v6  ;;  %v595_v52 = vld [vmem:[%s13675_s16 + $0x9d0] sm:$0xff]  ;;  %v688_v49 = vld [vmem:[%s13675_s16 + $0xcb8] sm:$0xff]  ;;  %v734_v35 = vld [vmem:[%s13675_s16 + $0xe28] sm:$0xff] }
 0x4bc   : > { %v12119_v24 = vpop.f32.mrf.mxu0  ;;  %8667 = vmatmul.mubr.bf16.gmra.mxu0 %v1881_v34  ;;  %v12229_v14 = vpop.f32.mrf.mxu1  ;;  %12835 = vmatprep.subr.bf16.mxu1 %v13499_v17  ;;  %v1929_v6 = vpack.c.bf16 %v641_v37, %v595_v52  ;;  %v13504_v63 = vld [vmem:[%s17572_s2 + $0xa88] sm:$0xff]  }
 0x4bd   : > { %v8084_v8 = vadd.f32 %v12118_v36, %v16279_v27  ;;  %8674 = vmatprep.mubr.bf16.mxu0 %v1928_v48  ;;  %12724 = vmatpush3.bf16.msra.mxu0 %v13484_v18  ;;  %v12230_v38 = vadd.f32 %v12229_v14, %v12228_v7  ;;  %v13487_v27 = vld [vmem:[%s17572_s2 + $0xa48] sm:$0xff]   ;;  %v13502_v48 = vld [vmem:[%s17572_s2 + $0xa90] sm:$0xff]   ;;  %v1974_v18 = vpack.c.bf16 %v732_v21, %v686_v40  ;;  %v13497_v7 = vld [vmem:[%s17572_s2 + $0xa40] sm:$0xff]  }
 0x4be   : > { %v12120_v1 = vpop.f32.mrf.mxu0  ;;  %12725 = vmatprep.subr.bf16.mxu0 %v13485_v58  ;;  %v12231_v34 = vpop.f32.mrf.mxu1  ;;  %8828 = vmatmul.mubr.bf16.gmra.mxu1 %v1883_v50  ;;  %v13488_v58 = vld [vmem:[%s17572_s2 + $0xa08] sm:$0xff]   ;;  %v1976_v14 = vpack.c.bf16 %v734_v35, %v688_v49  ;;  %v13505_v40 = vld [vmem:[%s17572_s2 + $0xac0] sm:$0xff]  }
 0x4bf   : > { %v12121_v23 = vadd.f32 %v12120_v1, %v12119_v24  ;;  %v16599_v51 = vadd.f32 %v12230_v38, %v8084_v8  ;;  %8835 = vmatprep.mubr.bf16.mxu1 %v1930_v46  ;;  %12836 = vmatpush3.bf16.msra.mxu1 %v13500_v57  ;;  %v685_v8 = vld [vmem:[%s13675_s16 + $0xca0] sm:$0xff]  ;;  %v731_v38 = vld [vmem:[%s13675_s16 + $0xe10] sm:$0xff] }
 0x4c0   : > { %v12122_v61 = vpop.f32.mrf.mxu0  ;;  %v12232_v11 = vpop.f32.mrf.mxu1  ;;  %12837 = vmatprep.subr.bf16.mxu1 %v13501_v53  ;;  %v13498_v1 = vld [vmem:[%s17572_s2 + $0xa00] sm:$0xff]   ;;  %v1973_v37 = vpack.c.bf16 %v731_v38, %v685_v8 }
 0x4c1   : > { %v8089_v45 = vadd.f32 %v12121_v23, %v16298_v44  ;;  %12726 = vmatpush3.bf16.msra.mxu0 %v13486_v41  ;;  %v12233_v17 = vadd.f32 %v12232_v11, %v12231_v34  ;;  %v13503_v44 = vld [vmem:[%s17572_s2 + $0xac8] sm:$0xff]   ;;  %v824_v34 = vld [vmem:[%s13675_s16 + $0x10f8] sm:$0xff]  ;;  %v13506_v11 = vld [vmem:[%s17572_s2 + $0xa80] sm:$0xff]  }
 0x4c2   : > { %v12123_v36 = vpop.f32.mrf.mxu0  ;;  %12727 = vmatprep.subr.bf16.mxu0 %v13487_v27  ;;  %v12234_v24 = vpop.f32.mrf.mxu1  ;;  %v778_v23 = vld [vmem:[%s13675_s16 + $0xf88] sm:$0xff] }
 0x4c3   : > { %v12124_v50 = vadd.f32 %v12123_v36, %v12122_v61  ;;  %v16618_v46 = vadd.f32 %v12233_v17, %v8089_v45  ;;  %12838 = vmatpush3.bf16.msra.mxu1 %v13502_v48  ;;  %v687_v48 = vld [vmem:[%s13675_s16 + $0xcb0] sm:$0xff]  ;;  %v733_v45 = vld [vmem:[%s13675_s16 + $0xe20] sm:$0xff]  ;;  %v2020_v35 = vpack.c.bf16 %v824_v34, %v778_v23  ;;  %v826_v17 = vld [vmem:[%s13675_s16 + $0x1108] sm:$0xff] }
 0x4c4   : > { %v12125_v57 = vpop.f32.mrf.mxu0  ;;  %8675 = vmatmul.mubr.bf16.gmra.mxu0 %v1927_v62  ;;  %v12235_v53 = vpop.f32.mrf.mxu1  ;;  %12839 = vmatprep.subr.bf16.mxu1 %v13503_v44 }
 0x4c5   : > { %v8092_v41 = vadd.f32 %v12124_v50, %v16317_v31  ;;  %8682 = vmatprep.mubr.bf16.mxu0 %v1974_v18  ;;  %12728 = vmatpush3.bf16.msra.mxu0 %v13488_v58  ;;  %v12236_v21 = vadd.f32 %v12235_v53, %v12234_v24  ;;  %v780_v58 = vld [vmem:[%s13675_s16 + $0xf98] sm:$0xff]  ;;  %v1975_v24 = vpack.c.bf16 %v733_v45, %v687_v48 }
 0x4c6   : > { %v12126_v27 = vpop.f32.mrf.mxu0  ;;  %12729 = vmatprep.subr.bf16.mxu0 %v13497_v7  ;;  %v12237_v61 = vpop.f32.mrf.mxu1  ;;  %8836 = vmatmul.mubr.bf16.gmra.mxu1 %v1929_v6  ;;  %v872_v45 = vld [vmem:[%s13675_s16 + $0x1278] sm:$0xff] }
 0x4c7   : > { %v12127_v31 = vadd.f32 %v12126_v27, %v12125_v57  ;;  %v16634_v62 = vadd.f32 %v12236_v21, %v8092_v41  ;;  %8843 = vmatprep.mubr.bf16.mxu1 %v1976_v14  ;;  %12840 = vmatpush3.bf16.msra.mxu1 %v13504_v63  ;;  %v2022_v57 = vpack.c.bf16 %v826_v17, %v780_v58  ;;  %v777_v63 = vld [vmem:[%s13675_s16 + $0xf80] sm:$0xff]  ;;  %v823_v41 = vld [vmem:[%s13675_s16 + $0x10f0] sm:$0xff] }
 0x4c8   : > { %v12128_v52 = vpop.f32.mrf.mxu0  ;;  %v12238_v49 = vpop.f32.mrf.mxu1  ;;  %12841 = vmatprep.subr.bf16.mxu1 %v13505_v40  ;;  %v916_v40 = vld [vmem:[%s13675_s16 + $0x13d8] sm:$0xff] }
 0x4c9   : > { %v8097_v18 = vadd.f32 %v12127_v31, %v16327_v42  ;;  %12730 = vmatpush3.bf16.msra.mxu0 %v13498_v1  ;;  %v12239_v36 = vadd.f32 %v12238_v49, %v12237_v61  ;;  %v870_v1 = vld [vmem:[%s13675_s16 + $0x1268] sm:$0xff]  ;;  %v2019_v31 = vpack.c.bf16 %v823_v41, %v777_v63  ;;  %v825_v61 = vld [vmem:[%s13675_s16 + $0x1100] sm:$0xff]  ;;  %v1008_v63 = vld [vmem:[%s13675_s16 + $0x16b8] sm:$0xff] }
 0x4ca   : > { %v12129_v7 = vpop.f32.mrf.mxu0  ;;  %9262 = vmatprep.subr.bf16.mxu0 %v13534_v4  ;;  %v12240_v50 = vpop.f32.mrf.mxu1  ;;  %v2066_v48 = vpack.c.bf16 %v916_v40, %v870_v1 }
 0x4cb   : > { %v12130_v44 = vadd.f32 %v12129_v7, %v12128_v52  ;;  %v16645_v6 = vadd.f32 %v12239_v36, %v8097_v18  ;;  %12842 = vmatpush3.bf16.msra.mxu1 %v13506_v11  ;;  %v918_v11 = vld [vmem:[%s13675_s16 + $0x13e8] sm:$0xff] }
 0x4cc   : > { %v12131_v42 = vpop.f32.mrf.mxu0  ;;  %8683 = vmatmul.mubr.bf16.gmra.mxu0 %v1973_v37  ;;  %v12241_v14 = vpop.f32.mrf.mxu1 }
 0x4cd   : > { %v8100_v8 = vadd.f32 %v12130_v44, %v16334_v2  ;;  %8690 = vmatprep.mubr.bf16.mxu0 %v2020_v35  ;;  %v12242_v53 = vadd.f32 %v12241_v14, %v12240_v50  ;;  %v779_v2 = vld [vmem:[%s13675_s16 + $0xf90] sm:$0xff]  ;;  %v2068_v44 = vpack.c.bf16 %v918_v11, %v872_v45  ;;  %v962_v14 = vld [vmem:[%s13675_s16 + $0x1548] sm:$0xff] }
 0x4ce   : > { %v12132_v38 = vpop.f32.mrf.mxu0  ;;  %v12243_v27 = vpop.f32.mrf.mxu1  ;;  %8844 = vmatmul.mubr.bf16.gmra.mxu1 %v1975_v24  ;;  %v2021_v17 = vpack.c.bf16 %v825_v61, %v779_v2  ;;  %v869_v24 = vld [vmem:[%s13675_s16 + $0x1260] sm:$0xff]  ;;  %v964_v2 = vld [vmem:[%s13675_s16 + $0x1558] sm:$0xff]  ;;  %v1010_v61 = vld [vmem:[%s13675_s16 + $0x16c8] sm:$0xff] }
 0x4cf   : > { %v12133_v21 = vadd.f32 %v12132_v38, %v12131_v42  ;;  %v16652_v23 = vadd.f32 %v12242_v53, %v8100_v8  ;;  %8851 = vmatprep.mubr.bf16.mxu1 %v2022_v57  ;;  %v915_v42 = vld [vmem:[%s13675_s16 + $0x13d0] sm:$0xff] }
 0x4d0   : > { %v12134_v34 = vpop.f32.mrf.mxu0  ;;  %v12244_v37 = vpop.f32.mrf.mxu1  ;;  %v2065_v40 = vpack.c.bf16 %v915_v42, %v869_v24  ;;  %v1100_v24 = vld [vmem:[%s13675_s16 + $0x1998] sm:$0xff] }
 0x4d1   : > { %v8105_v52 = vadd.f32 %v12133_v21, %v16341_v54  ;;  %v12245_v18 = vadd.f32 %v12244_v37, %v12243_v27  ;;  %v917_v21 = vld [vmem:[%s13675_s16 + $0x13e0] sm:$0xff] }
 0x4d2   : > { %v12135_v49 = vpop.f32.mrf.mxu0  ;;  %v12246_v58 = vpop.f32.mrf.mxu1 }
 0x4d3   : > { %v12136_v35 = vadd.f32 %v12135_v49, %v12134_v34  ;;  %v16659_v36 = vadd.f32 %v12245_v18, %v8105_v52 }
 0x4d4   : > { %v12137_v7 = vpop.f32.mrf.mxu0  ;;  %8691 = vmatmul.mubr.bf16.gmra.mxu0 %v2019_v31  ;;  %v12247_v50 = vpop.f32.mrf.mxu1  ;;  %v2112_v31 = vpack.c.bf16 %v1008_v63, %v962_v14 }
 0x4d5   : > { %v8108_v54 = vadd.f32 %v12136_v35, %v16348_v9  ;;  %8698 = vmatprep.mubr.bf16.mxu0 %v2066_v48  ;;  %v12248_v57 = vadd.f32 %v12247_v50, %v12246_v58  ;;  %v871_v9 = vld [vmem:[%s13675_s16 + $0x1270] sm:$0xff]  ;;  %v2114_v35 = vpack.c.bf16 %v1010_v61, %v964_v2  ;;  %v1054_v50 = vld [vmem:[%s13675_s16 + $0x1828] sm:$0xff] }
 0x4d6   : > { %v12138_v8 = vpop.f32.mrf.mxu0  ;;  %v12249_v53 = vpop.f32.mrf.mxu1  ;;  %8852 = vmatmul.mubr.bf16.gmra.mxu1 %v2021_v17  ;;  %v2067_v11 = vpack.c.bf16 %v917_v21, %v871_v9  ;;  %v961_v17 = vld [vmem:[%s13675_s16 + $0x1540] sm:$0xff]  ;;  %v1056_v9 = vld [vmem:[%s13675_s16 + $0x1838] sm:$0xff]  ;;  %v1102_v21 = vld [vmem:[%s13675_s16 + $0x19a8] sm:$0xff] }
 0x4d7   : > { %v12139_v41 = vadd.f32 %v12138_v8, %v12137_v7  ;;  %v16666_v38 = vadd.f32 %v12248_v57, %v8108_v54  ;;  %8859 = vmatprep.mubr.bf16.mxu1 %v2068_v44  ;;  %v1007_v7 = vld [vmem:[%s13675_s16 + $0x16b0] sm:$0xff] }
 0x4d8   : > { %v12140_v1 = vpop.f32.mrf.mxu0  ;;  %v12250_v34 = vpop.f32.mrf.mxu1  ;;  %v2111_v63 = vpack.c.bf16 %v1007_v7, %v961_v17  ;;  %v1192_v17 = vld [vmem:[%s13675_s16 + $0x1c78] sm:$0xff] }
 0x4d9   : > { %v8113_v27 = vadd.f32 %v12139_v41, %v16355_v10  ;;  %v12251_v52 = vadd.f32 %v12250_v34, %v12249_v53  ;;  %v1009_v41 = vld [vmem:[%s13675_s16 + $0x16c0] sm:$0xff] }
 0x4da   : > { %v12141_v37 = vpop.f32.mrf.mxu0  ;;  %v12252_v45 = vpop.f32.mrf.mxu1 }
 0x4db   : > { %v12142_v48 = vadd.f32 %v12141_v37, %v12140_v1  ;;  %v16673_v18 = vadd.f32 %v12251_v52, %v8113_v27 }
 0x4dc   : > { %v12143_v49 = vpop.f32.mrf.mxu0  ;;  %8699 = vmatmul.mubr.bf16.gmra.mxu0 %v2065_v40  ;;  %v12253_v58 = vpop.f32.mrf.mxu1  ;;  %v2158_v40 = vpack.c.bf16 %v1100_v24, %v1054_v50 }
 0x4dd   : > { %v8116_v10 = vadd.f32 %v12142_v48, %v16362_v47  ;;  %8706 = vmatprep.mubr.bf16.mxu0 %v2112_v31  ;;  %v12254_v44 = vadd.f32 %v12253_v58, %v12252_v45  ;;  %v963_v47 = vld [vmem:[%s13675_s16 + $0x1550] sm:$0xff]  ;;  %v2160_v48 = vpack.c.bf16 %v1102_v21, %v1056_v9  ;;  %v1146_v58 = vld [vmem:[%s13675_s16 + $0x1b08] sm:$0xff] }
 0x4de   : > { %v12144_v54 = vpop.f32.mrf.mxu0  ;;  %v12255_v57 = vpop.f32.mrf.mxu1  ;;  %8860 = vmatmul.mubr.bf16.gmra.mxu1 %v2067_v11  ;;  %v2113_v61 = vpack.c.bf16 %v1009_v41, %v963_v47  ;;  %v1053_v11 = vld [vmem:[%s13675_s16 + $0x1820] sm:$0xff]  ;;  %v1148_v47 = vld [vmem:[%s13675_s16 + $0x1b18] sm:$0xff]  ;;  %v1194_v41 = vld [vmem:[%s13675_s16 + $0x1c88] sm:$0xff] }
 0x4df   : > { %v12145_v42 = vadd.f32 %v12144_v54, %v12143_v49  ;;  %v16680_v8 = vadd.f32 %v12254_v44, %v8116_v10  ;;  %8867 = vmatprep.mubr.bf16.mxu1 %v2114_v35  ;;  %v1099_v49 = vld [vmem:[%s13675_s16 + $0x1990] sm:$0xff] }
 0x4e0   : > { %v12146_v14 = vpop.f32.mrf.mxu0  ;;  %v12256_v1 = vpop.f32.mrf.mxu1  ;;  %v2157_v24 = vpack.c.bf16 %v1099_v49, %v1053_v11  ;;  %v1284_v11 = vld [vmem:[%s13675_s16 + $0x1f58] sm:$0xff] }
 0x4e1   : > { %v8121_v53 = vadd.f32 %v12145_v42, %v16369_v29  ;;  %v12257_v27 = vadd.f32 %v12256_v1, %v12255_v57  ;;  %v1101_v42 = vld [vmem:[%s13675_s16 + $0x19a0] sm:$0xff] }
 0x4e2   : > { %v12147_v34 = vpop.f32.mrf.mxu0  ;;  %v12258_v2 = vpop.f32.mrf.mxu1 }
 0x4e3   : > { %v12148_v31 = vadd.f32 %v12147_v34, %v12146_v14  ;;  %v16687_v52 = vadd.f32 %v12257_v27, %v8121_v53 }
 0x4e4   : > { %v12149_v37 = vpop.f32.mrf.mxu0  ;;  %8707 = vmatmul.mubr.bf16.gmra.mxu0 %v2111_v63  ;;  %v12259_v45 = vpop.f32.mrf.mxu1  ;;  %v2204_v63 = vpack.c.bf16 %v1192_v17, %v1146_v58 }
 0x4e5   : > { %v8124_v29 = vadd.f32 %v12148_v31, %v16376_v39  ;;  %8714 = vmatprep.mubr.bf16.mxu0 %v2158_v40  ;;  %v12260_v35 = vadd.f32 %v12259_v45, %v12258_v2  ;;  %v1055_v39 = vld [vmem:[%s13675_s16 + $0x1830] sm:$0xff]  ;;  %v2206_v31 = vpack.c.bf16 %v1194_v41, %v1148_v47  ;;  %v1238_v45 = vld [vmem:[%s13675_s16 + $0x1de8] sm:$0xff] }
 0x4e6   : > { %v12150_v10 = vpop.f32.mrf.mxu0  ;;  %v12261_v44 = vpop.f32.mrf.mxu1  ;;  %8868 = vmatmul.mubr.bf16.gmra.mxu1 %v2113_v61  ;;  %v2159_v21 = vpack.c.bf16 %v1101_v42, %v1055_v39  ;;  %v1145_v61 = vld [vmem:[%s13675_s16 + $0x1b00] sm:$0xff]  ;;  %v1240_v39 = vld [vmem:[%s13675_s16 + $0x1df8] sm:$0xff]  ;;  %v1286_v42 = vld [vmem:[%s13675_s16 + $0x1f68] sm:$0xff] }
 0x4e7   : > { %v12151_v7 = vadd.f32 %v12150_v10, %v12149_v37  ;;  %v16694_v54 = vadd.f32 %v12260_v35, %v8124_v29  ;;  %8875 = vmatprep.mubr.bf16.mxu1 %v2160_v48  ;;  %v1191_v37 = vld [vmem:[%s13675_s16 + $0x1c70] sm:$0xff] }
 0x4e8   : > { %v12152_v50 = vpop.f32.mrf.mxu0  ;;  %v12262_v14 = vpop.f32.mrf.mxu1  ;;  %v2203_v17 = vpack.c.bf16 %v1191_v37, %v1145_v61  ;;  %v1376_v61 = vld [vmem:[%s13675_s16 + $0x2238] sm:$0xff] }
 0x4e9   : > { %v8129_v57 = vadd.f32 %v12151_v7, %v16383_v26  ;;  %v12263_v53 = vadd.f32 %v12262_v14, %v12261_v44  ;;  %v1193_v7 = vld [vmem:[%s13675_s16 + $0x1c80] sm:$0xff] }
 0x4ea   : > { %v12153_v1 = vpop.f32.mrf.mxu0  ;;  %v12264_v9 = vpop.f32.mrf.mxu1 }
 0x4eb   : > { %v12154_v40 = vadd.f32 %v12153_v1, %v12152_v50  ;;  %v16701_v27 = vadd.f32 %v12263_v53, %v8129_v57 }
 0x4ec   : > { %v12283_v34 = vpop.f32.mrf.mxu0  ;;  %8715 = vmatmul.mubr.bf16.gmra.mxu0 %v2157_v24  ;;  %v12265_v2 = vpop.f32.mrf.mxu1  ;;  %v2250_v24 = vpack.c.bf16 %v1284_v11, %v1238_v45 }
 0x4ed   : > { %v8132_v26 = vadd.f32 %v12154_v40, %v16390_v19  ;;  %8722 = vmatprep.mubr.bf16.mxu0 %v2204_v63  ;;  %v12266_v48 = vadd.f32 %v12265_v2, %v12264_v9  ;;  %v1147_v19 = vld [vmem:[%s13675_s16 + $0x1b10] sm:$0xff]  ;;  %v2252_v40 = vpack.c.bf16 %v1286_v42, %v1240_v39  ;;  %v1330_v2 = vld [vmem:[%s13675_s16 + $0x20c8] sm:$0xff] }
 0x4ee   : > { %v12284_v29 = vpop.f32.mrf.mxu0  ;;  %v12395_v35 = vpop.f32.mrf.mxu1  ;;  %8876 = vmatmul.mubr.bf16.gmra.mxu1 %v2159_v21  ;;  %v2205_v41 = vpack.c.bf16 %v1193_v7, %v1147_v19  ;;  %v1237_v21 = vld [vmem:[%s13675_s16 + $0x1de0] sm:$0xff]  ;;  %v1332_v19 = vld [vmem:[%s13675_s16 + $0x20d8] sm:$0xff]  ;;  %v1378_v7 = vld [vmem:[%s13675_s16 + $0x2248] sm:$0xff] }
 0x4ef   : > { %v12285_v49 = vadd.f32 %v12284_v29, %v12283_v34  ;;  %v16708_v10 = vadd.f32 %v12266_v48, %v8132_v26  ;;  %8883 = vmatprep.mubr.bf16.mxu1 %v2206_v31  ;;  %v1283_v34 = vld [vmem:[%s13675_s16 + $0x1f50] sm:$0xff] }
 0x4f0   : > { %v12286_v58 = vpop.f32.mrf.mxu0  ;;  %v12396_v50 = vpop.f32.mrf.mxu1  ;;  %v2249_v11 = vpack.c.bf16 %v1283_v34, %v1237_v21  ;;  %v1468_v21 = vld [vmem:[%s13675_s16 + $0x2518] sm:$0xff] }
 0x4f1   : > { %v8331_v44 = vadd.f32 %v12285_v49, %v16397_v12  ;;  %v12397_v57 = vadd.f32 %v12396_v50, %v12395_v35  ;;  %v1285_v49 = vld [vmem:[%s13675_s16 + $0x1f60] sm:$0xff] }
 0x4f2   : > { %v12287_v14 = vpop.f32.mrf.mxu0  ;;  %v12398_v47 = vpop.f32.mrf.mxu1 }
 0x4f3   : > { %v12288_v63 = vadd.f32 %v12287_v14, %v12286_v58  ;;  %v16715_v53 = vadd.f32 %v12397_v57, %v8331_v44 }
 0x4f4   : > { %v12289_v1 = vpop.f32.mrf.mxu0  ;;  %8723 = vmatmul.mubr.bf16.gmra.mxu0 %v2203_v17  ;;  %v12399_v9 = vpop.f32.mrf.mxu1  ;;  %v2296_v17 = vpack.c.bf16 %v1376_v61, %v1330_v2 }
 0x4f5   : > { %v8334_v12 = vadd.f32 %v12288_v63, %v16404_v25  ;;  %8730 = vmatprep.mubr.bf16.mxu0 %v2250_v24  ;;  %v12400_v31 = vadd.f32 %v12399_v9, %v12398_v47  ;;  %v1239_v25 = vld [vmem:[%s13675_s16 + $0x1df0] sm:$0xff]  ;;  %v2298_v63 = vpack.c.bf16 %v1378_v7, %v1332_v19  ;;  %v1422_v9 = vld [vmem:[%s13675_s16 + $0x23a8] sm:$0xff] }
 0x4f6   : > { %v12290_v26 = vpop.f32.mrf.mxu0  ;;  %v12401_v48 = vpop.f32.mrf.mxu1  ;;  %8884 = vmatmul.mubr.bf16.gmra.mxu1 %v2205_v41  ;;  %v2251_v42 = vpack.c.bf16 %v1285_v49, %v1239_v25  ;;  %v1329_v41 = vld [vmem:[%s13675_s16 + $0x20c0] sm:$0xff]  ;;  %v1424_v25 = vld [vmem:[%s13675_s16 + $0x23b8] sm:$0xff]  ;;  %v1470_v49 = vld [vmem:[%s13675_s16 + $0x2528] sm:$0xff] }
 0x4f7   : > { %v12291_v37 = vadd.f32 %v12290_v26, %v12289_v1  ;;  %v16722_v29 = vadd.f32 %v12400_v31, %v8334_v12  ;;  %8891 = vmatprep.mubr.bf16.mxu1 %v2252_v40  ;;  %v1375_v1 = vld [vmem:[%s13675_s16 + $0x2230] sm:$0xff] }
 0x4f8   : > { %v12292_v45 = vpop.f32.mrf.mxu0  ;;  %v12402_v58 = vpop.f32.mrf.mxu1  ;;  %v2295_v61 = vpack.c.bf16 %v1375_v1, %v1329_v41  ;;  %v1560_v41 = vld [vmem:[%s13675_s16 + $0x27f8] sm:$0xff] }
 0x4f9   : > { %v8339_v35 = vadd.f32 %v12291_v37, %v16411_v59  ;;  %v12403_v44 = vadd.f32 %v12402_v58, %v12401_v48  ;;  %v1377_v37 = vld [vmem:[%s13675_s16 + $0x2240] sm:$0xff] }
 0x4fa   : > { %v12293_v50 = vpop.f32.mrf.mxu0  ;;  %v12404_v39 = vpop.f32.mrf.mxu1 }
 0x4fb   : > { %v12294_v24 = vadd.f32 %v12293_v50, %v12292_v45  ;;  %v16729_v57 = vadd.f32 %v12403_v44, %v8339_v35 }
 0x4fc   : > { %v12295_v14 = vpop.f32.mrf.mxu0  ;;  %8731 = vmatmul.mubr.bf16.gmra.mxu0 %v2249_v11  ;;  %v12405_v47 = vpop.f32.mrf.mxu1  ;;  %v2342_v11 = vpack.c.bf16 %v1468_v21, %v1422_v9 }
 0x4fd   : > { %v8342_v59 = vadd.f32 %v12294_v24, %v16418_v13  ;;  %8738 = vmatprep.mubr.bf16.mxu0 %v2296_v17  ;;  %v12406_v40 = vadd.f32 %v12405_v47, %v12404_v39  ;;  %v1331_v13 = vld [vmem:[%s13675_s16 + $0x20d0] sm:$0xff]  ;;  %v2344_v24 = vpack.c.bf16 %v1470_v49, %v1424_v25  ;;  %v1514_v47 = vld [vmem:[%s13675_s16 + $0x2688] sm:$0xff] }
 0x4fe   : > { %v12296_v12 = vpop.f32.mrf.mxu0  ;;  %v12407_v31 = vpop.f32.mrf.mxu1  ;;  %8892 = vmatmul.mubr.bf16.gmra.mxu1 %v2251_v42  ;;  %v2297_v7 = vpack.c.bf16 %v1377_v37, %v1331_v13  ;;  %v1421_v42 = vld [vmem:[%s13675_s16 + $0x23a0] sm:$0xff]  ;;  %v1516_v13 = vld [vmem:[%s13675_s16 + $0x2698] sm:$0xff]  ;;  %v1562_v37 = vld [vmem:[%s13675_s16 + $0x2808] sm:$0xff] }
 0x4ff   : > { %v12297_v34 = vadd.f32 %v12296_v12, %v12295_v14  ;;  %v16736_v26 = vadd.f32 %v12406_v40, %v8342_v59  ;;  %8899 = vmatprep.mubr.bf16.mxu1 %v2298_v63  ;;  %v1467_v14 = vld [vmem:[%s13675_s16 + $0x2510] sm:$0xff] }
 0x500   : > { %v12298_v2 = vpop.f32.mrf.mxu0  ;;  %v12408_v45 = vpop.f32.mrf.mxu1  ;;  %v2341_v21 = vpack.c.bf16 %v1467_v14, %v1421_v42  ;;  %v1652_v42 = vld [vmem:[%s13675_s16 + $0x2ad8] sm:$0xff] }
 0x501   : > { %v8347_v48 = vadd.f32 %v12297_v34, %v16425_v20  ;;  %v12409_v35 = vadd.f32 %v12408_v45, %v12407_v31  ;;  %v1469_v34 = vld [vmem:[%s13675_s16 + $0x2520] sm:$0xff] }
 0x502   : > { %v12299_v58 = vpop.f32.mrf.mxu0  ;;  %v12410_v19 = vpop.f32.mrf.mxu1 }
 0x503   : > { %v12300_v17 = vadd.f32 %v12299_v58, %v12298_v2  ;;  %v16743_v44 = vadd.f32 %v12409_v35, %v8347_v48 }
 0x504   : > { %v12301_v50 = vpop.f32.mrf.mxu0  ;;  %8739 = vmatmul.mubr.bf16.gmra.mxu0 %v2295_v61  ;;  %v12411_v39 = vpop.f32.mrf.mxu1  ;;  %v2388_v61 = vpack.c.bf16 %v1560_v41, %v1514_v47 }
 0x505   : > { %v8350_v20 = vadd.f32 %v12300_v17, %v16432_v15  ;;  %8746 = vmatprep.mubr.bf16.mxu0 %v2342_v11  ;;  %v12412_v63 = vadd.f32 %v12411_v39, %v12410_v19  ;;  %v1423_v15 = vld [vmem:[%s13675_s16 + $0x23b0] sm:$0xff]  ;;  %v2390_v17 = vpack.c.bf16 %v1562_v37, %v1516_v13  ;;  %v1606_v39 = vld [vmem:[%s13675_s16 + $0x2968] sm:$0xff] }
 0x506   : > { %v12302_v59 = vpop.f32.mrf.mxu0  ;;  %v12413_v40 = vpop.f32.mrf.mxu1  ;;  %8900 = vmatmul.mubr.bf16.gmra.mxu1 %v2297_v7  ;;  %v2343_v49 = vpack.c.bf16 %v1469_v34, %v1423_v15  ;;  %v1513_v7 = vld [vmem:[%s13675_s16 + $0x2680] sm:$0xff]  ;;  %v1608_v15 = vld [vmem:[%s13675_s16 + $0x2978] sm:$0xff]  ;;  %v1654_v34 = vld [vmem:[%s13675_s16 + $0x2ae8] sm:$0xff] }
 0x507   : > { %v12303_v1 = vadd.f32 %v12302_v59, %v12301_v50  ;;  %v16750_v12 = vadd.f32 %v12412_v63, %v8350_v20  ;;  %8907 = vmatprep.mubr.bf16.mxu1 %v2344_v24  ;;  %v1559_v50 = vld [vmem:[%s13675_s16 + $0x27f0] sm:$0xff] }
 0x508   : > { %v12304_v9 = vpop.f32.mrf.mxu0  ;;  %v12414_v2 = vpop.f32.mrf.mxu1  ;;  %v2387_v41 = vpack.c.bf16 %v1559_v50, %v1513_v7  ;;  %v1744_v7 = vld [vmem:[%s13675_s16 + $0x2db8] sm:$0xff] }
 0x509   : > { %v8355_v31 = vadd.f32 %v12303_v1, %v16439_v22  ;;  %v12415_v48 = vadd.f32 %v12414_v2, %v12413_v40  ;;  %v1561_v1 = vld [vmem:[%s13675_s16 + $0x2800] sm:$0xff] }
 0x50a   : > { %v12305_v45 = vpop.f32.mrf.mxu0  ;;  %v12416_v25 = vpop.f32.mrf.mxu1 }
 0x50b   : > { %v12306_v11 = vadd.f32 %v12305_v45, %v12304_v9  ;;  %v16757_v35 = vadd.f32 %v12415_v48, %v8355_v31 }
 0x50c   : > { %v12307_v58 = vpop.f32.mrf.mxu0  ;;  %8747 = vmatmul.mubr.bf16.gmra.mxu0 %v2341_v21  ;;  %v12417_v19 = vpop.f32.mrf.mxu1  ;;  %v2434_v21 = vpack.c.bf16 %v1652_v42, %v1606_v39 }
 0x50d   : > { %v8358_v22 = vadd.f32 %v12306_v11, %v16449_v16  ;;  %8754 = vmatprep.mubr.bf16.mxu0 %v2388_v61  ;;  %v12418_v24 = vadd.f32 %v12417_v19, %v12416_v25  ;;  %v1515_v16 = vld [vmem:[%s13675_s16 + $0x2690] sm:$0xff]  ;;  %v2436_v11 = vpack.c.bf16 %v1654_v34, %v1608_v15  ;;  %v1698_v19 = vld [vmem:[%s13675_s16 + $0x2c48] sm:$0xff] }
 0x50e   : > { %v12308_v20 = vpop.f32.mrf.mxu0  ;;  %v12419_v63 = vpop.f32.mrf.mxu1  ;;  %8908 = vmatmul.mubr.bf16.gmra.mxu1 %v2343_v49  ;;  %v2389_v37 = vpack.c.bf16 %v1561_v1, %v1515_v16  ;;  %v1605_v49 = vld [vmem:[%s13675_s16 + $0x2960] sm:$0xff]  ;;  %v1700_v16 = vld [vmem:[%s13675_s16 + $0x2c58] sm:$0xff]  ;;  %v1746_v1 = vld [vmem:[%s13675_s16 + $0x2dc8] sm:$0xff] }
 0x50f   : > { %v12309_v14 = vadd.f32 %v12308_v20, %v12307_v58  ;;  %v16764_v59 = vadd.f32 %v12418_v24, %v8358_v22  ;;  %8915 = vmatprep.mubr.bf16.mxu1 %v2390_v17  ;;  %v1651_v58 = vld [vmem:[%s13675_s16 + $0x2ad0] sm:$0xff] }
 0x510   : > { %v12310_v47 = vpop.f32.mrf.mxu0  ;;  %v12420_v9 = vpop.f32.mrf.mxu1  ;;  %v2433_v42 = vpack.c.bf16 %v1651_v58, %v1605_v49  ;;  %v368_v49 = vld [vmem:[%s13675_s16 + $0x2b8] sm:$0xff] }
 0x511   : > { %v8363_v40 = vadd.f32 %v12309_v14, %v16456_v33  ;;  %v12421_v31 = vadd.f32 %v12420_v9, %v12419_v63  ;;  %v1653_v14 = vld [vmem:[%s13675_s16 + $0x2ae0] sm:$0xff] }
 0x512   : > { %v12311_v2 = vpop.f32.mrf.mxu0  ;;  %v12422_v13 = vpop.f32.mrf.mxu1 }
 0x513   : > { %v12312_v61 = vadd.f32 %v12311_v2, %v12310_v47  ;;  %v16771_v48 = vadd.f32 %v12421_v31, %v8363_v40 }
 0x514   : > { %v12313_v45 = vpop.f32.mrf.mxu0  ;;  %8755 = vmatmul.mubr.bf16.gmra.mxu0 %v2387_v41  ;;  %v12423_v25 = vpop.f32.mrf.mxu1  ;;  %v2480_v41 = vpack.c.bf16 %v1744_v7, %v1698_v19 }
 0x515   : > { %v8366_v33 = vadd.f32 %v12312_v61, %v16463_v30  ;;  %8762 = vmatprep.mubr.bf16.mxu0 %v2434_v21  ;;  %v12424_v17 = vadd.f32 %v12423_v25, %v12422_v13  ;;  %v1607_v30 = vld [vmem:[%s13675_s16 + $0x2970] sm:$0xff]  ;;  %v2482_v61 = vpack.c.bf16 %v1746_v1, %v1700_v16  ;;  %v322_v25 = vld [vmem:[%s13675_s16 + $0x148] sm:$0xff] }
 0x516   : > { %v12314_v22 = vpop.f32.mrf.mxu0  ;;  %v12425_v24 = vpop.f32.mrf.mxu1  ;;  %8916 = vmatmul.mubr.bf16.gmra.mxu1 %v2389_v37  ;;  %v2435_v34 = vpack.c.bf16 %v1653_v14, %v1607_v30  ;;  %v1697_v37 = vld [vmem:[%s13675_s16 + $0x2c40] sm:$0xff]  ;;  %v324_v30 = vld [vmem:[%s13675_s16 + $0x158] sm:$0xff]  ;;  %v370_v14 = vld [vmem:[%s13675_s16 + $0x2c8] sm:$0xff] }
 0x517   : > { %v12315_v50 = vadd.f32 %v12314_v22, %v12313_v45  ;;  %v16778_v20 = vadd.f32 %v12424_v17, %v8366_v33  ;;  %8923 = vmatprep.mubr.bf16.mxu1 %v2436_v11  ;;  %v1743_v45 = vld [vmem:[%s13675_s16 + $0x2db0] sm:$0xff] }
 0x518   : > { %v12316_v39 = vpop.f32.mrf.mxu0  ;;  %v12426_v47 = vpop.f32.mrf.mxu1  ;;  %v2479_v7 = vpack.c.bf16 %v1743_v45, %v1697_v37  ;;  %v460_v37 = vld [vmem:[%s13675_s16 + $0x598] sm:$0xff] }
 0x519   : > { %v8371_v63 = vadd.f32 %v12315_v50, %v16470_v5  ;;  %v12427_v40 = vadd.f32 %v12426_v47, %v12425_v24  ;;  %v1745_v50 = vld [vmem:[%s13675_s16 + $0x2dc0] sm:$0xff] }
 0x51a   : > { %v12317_v9 = vpop.f32.mrf.mxu0  ;;  %v12428_v15 = vpop.f32.mrf.mxu1 }
 0x51b   : > { %v12318_v21 = vadd.f32 %v12317_v9, %v12316_v39  ;;  %v16785_v31 = vadd.f32 %v12427_v40, %v8371_v63 }
 0x51c   : > { %v12319_v2 = vpop.f32.mrf.mxu0  ;;  %8763 = vmatmul.mubr.bf16.gmra.mxu0 %v2433_v42  ;;  %v12429_v13 = vpop.f32.mrf.mxu1  ;;  %v1794_v42 = vpack.c.bf16 %v368_v49, %v322_v25 }
 0x51d   : > { %v8374_v5 = vadd.f32 %v12318_v21, %v16477_v0  ;;  %8770 = vmatprep.mubr.bf16.mxu0 %v2480_v41  ;;  %v12430_v11 = vadd.f32 %v12429_v13, %v12428_v15  ;;  %v1699_v0 = vld [vmem:[%s13675_s16 + $0x2c50] sm:$0xff]  ;;  %v1796_v21 = vpack.c.bf16 %v370_v14, %v324_v30  ;;  %v414_v13 = vld [vmem:[%s13675_s16 + $0x428] sm:$0xff] }
 0x51e   : > { %v12320_v33 = vpop.f32.mrf.mxu0  ;;  %v12431_v17 = vpop.f32.mrf.mxu1  ;;  %8924 = vmatmul.mubr.bf16.gmra.mxu1 %v2435_v34  ;;  %v2481_v1 = vpack.c.bf16 %v1745_v50, %v1699_v0  ;;  %v321_v34 = vld [vmem:[%s13675_s16 + $0x140] sm:$0xff]  ;;  %v1840_v0 = vpack.c.bf16 %v460_v37, %v414_v13  ;;  %v416_v50 = vld [vmem:[%s13675_s16 + $0x438] sm:$0xff] }
 0x51f   : > { %v12321_v58 = vadd.f32 %v12320_v33, %v12319_v2  ;;  %v16792_v22 = vadd.f32 %v12430_v11, %v8374_v5  ;;  %8931 = vmatprep.mubr.bf16.mxu1 %v2482_v61  ;;  %v367_v2 = vld [vmem:[%s13675_s16 + $0x2b0] sm:$0xff] }
 0x520   : > { %v12322_v19 = vpop.f32.mrf.mxu0  ;;  %v12432_v39 = vpop.f32.mrf.mxu1  ;;  %v1793_v49 = vpack.c.bf16 %v367_v2, %v321_v34  ;;  %v506_v2 = vld [vmem:[%s13675_s16 + $0x708] sm:$0xff] }
 0x521   : > { %v8379_v24 = vadd.f32 %v12321_v58, %v16484_v28  ;;  %v12433_v63 = vadd.f32 %v12432_v39, %v12431_v17  ;;  %v369_v58 = vld [vmem:[%s13675_s16 + $0x2c0] sm:$0xff] }
 0x522   : > { %v12323_v47 = vpop.f32.mrf.mxu0  ;;  %v12434_v16 = vpop.f32.mrf.mxu1 }
 0x523   : > { %v12324_v41 = vadd.f32 %v12323_v47, %v12322_v19  ;;  %v16799_v40 = vadd.f32 %v12433_v63, %v8379_v24  ;;  %v462_v24 = vld [vmem:[%s13675_s16 + $0x5a8] sm:$0xff] }
 0x524   : > { %v12325_v9 = vpop.f32.mrf.mxu0  ;;  %8771 = vmatmul.mubr.bf16.gmra.mxu0 %v2479_v7  ;;  %v12435_v15 = vpop.f32.mrf.mxu1  ;;  %v13507_v7 = vld [vmem:[%s17572_s2 + $0xb38] sm:$0xff]  }
 0x525   : > { %v8382_v28 = vadd.f32 %v12324_v41, %v16491_v55  ;;  %8972 = vmatprep.mubr.bf16.mxu0 %v1794_v42  ;;  %v12436_v61 = vadd.f32 %v12435_v15, %v12434_v16  ;;  %v323_v55 = vld [vmem:[%s13675_s16 + $0x150] sm:$0xff]  ;;  %v1842_v41 = vpack.c.bf16 %v462_v24, %v416_v50 }
 0x526   : > { %v12326_v5 = vpop.f32.mrf.mxu0  ;;  %v12437_v11 = vpop.f32.mrf.mxu1  ;;  %8932 = vmatmul.mubr.bf16.gmra.mxu1 %v2481_v1  ;;  %v1795_v63 = vpack.c.bf16 %v369_v58, %v323_v55 }
 0x527   : > { %v12327_v45 = vadd.f32 %v12326_v5, %v12325_v9  ;;  %v16806_v33 = vadd.f32 %v12436_v61, %v8382_v28  ;;  %9133 = vmatprep.mubr.bf16.mxu1 %v1796_v21  ;;  %v413_v9 = vld [vmem:[%s13675_s16 + $0x420] sm:$0xff]  ;;  %v459_v21 = vld [vmem:[%s13675_s16 + $0x590] sm:$0xff]  ;;  %v552_v61 = vld [vmem:[%s13675_s16 + $0x878] sm:$0xff] }
 0x528   : > { %v12328_v25 = vpop.f32.mrf.mxu0  ;;  %v12438_v19 = vpop.f32.mrf.mxu1  ;;  %v13508_v28 = vld [vmem:[%s17572_s2 + $0xb30] sm:$0xff]   ;;  %v1886_v58 = vpack.c.bf16 %v552_v61, %v506_v2 }
 0x529   : > { %v8387_v17 = vadd.f32 %v12327_v45, %v16504_v60  ;;  %v12439_v39 = vadd.f32 %v12438_v19, %v12437_v11  ;;  %v1839_v45 = vpack.c.bf16 %v459_v21, %v413_v9  ;;  %v415_v11 = vld [vmem:[%s13675_s16 + $0x430] sm:$0xff]  ;;  %v554_v19 = vld [vmem:[%s13675_s16 + $0x888] sm:$0xff] }
 0x52a   : > { %v12329_v42 = vpop.f32.mrf.mxu0  ;;  %v12440_v14 = vpop.f32.mrf.mxu1 }
 0x52b   : > { %v12330_v30 = vadd.f32 %v12329_v42, %v12328_v25  ;;  %v16816_v47 = vadd.f32 %v12439_v39, %v8387_v17  ;;  %v461_v25 = vld [vmem:[%s13675_s16 + $0x5a0] sm:$0xff]  ;;  %v508_v17 = vld [vmem:[%s13675_s16 + $0x718] sm:$0xff] }
 0x52c   : > { %v12331_v60 = vpop.f32.mrf.mxu0  ;;  %8973 = vmatmul.mubr.bf16.vlgmr.msra.gmra.mxu0 %v1793_v49  ;;  %v12441_v1 = vpop.f32.mrf.mxu1 }
 0x52d   : > { %v8390_v16 = vadd.f32 %v12330_v30, %v16523_v3  ;;  %9263 = vmatpush1.bf16.msra.mxu0 %v13507_v7  ;;  %8980 = vmatprep.mubr.bf16.mxu0 %v1840_v0  ;;  %v12442_v15 = vadd.f32 %v12441_v1, %v12440_v14  ;;  %v13509_v7 = vld [vmem:[%s17572_s2 + $0xb28] sm:$0xff]   ;;  %v1888_v14 = vpack.c.bf16 %v554_v19, %v508_v17  ;;  %v13510_v1 = vld [vmem:[%s17572_s2 + $0xb20] sm:$0xff]  }
 0x52e   : > { %v12332_v34 = vpop.f32.mrf.mxu0  ;;  %9264 = vmatprep.subr.bf16.mxu0 %v13534_v4  ;;  %v12443_v5 = vpop.f32.mrf.mxu1  ;;  %9134 = vmatmul.mubr.bf16.vlgmr.msra.gmra.mxu1 %v1795_v63 }
 0x52f   : > { %v12333_v3 = vadd.f32 %v12332_v34, %v12331_v60  ;;  %v16827_v13 = vadd.f32 %v12442_v15, %v8390_v16  ;;  %9141 = vmatprep.mubr.bf16.mxu1 %v1842_v41  ;;  %v505_v41 = vld [vmem:[%s13675_s16 + $0x700] sm:$0xff]  ;;  %v551_v16 = vld [vmem:[%s13675_s16 + $0x870] sm:$0xff]  ;;  %v644_v15 = vld [vmem:[%s13675_s16 + $0xb58] sm:$0xff] }
 0x530   : > { %v12334_v37 = vpop.f32.mrf.mxu0  ;;  %v12444_v55 = vpop.f32.mrf.mxu1 }
 0x531   : > { %v8395_v49 = vadd.f32 %v12333_v3, %v16542_v32  ;;  %9265 = vmatpush1.bf16.msra.mxu0 %v13508_v28  ;;  %v12445_v0 = vadd.f32 %v12444_v55, %v12443_v5  ;;  %v1841_v32 = vpack.c.bf16 %v461_v25, %v415_v11  ;;  %v598_v28 = vld [vmem:[%s13675_s16 + $0x9e8] sm:$0xff]  ;;  %v1885_v3 = vpack.c.bf16 %v551_v16, %v505_v41  ;;  %v507_v5 = vld [vmem:[%s13675_s16 + $0x710] sm:$0xff] }
 0x532   : > { %v12335_v50 = vpop.f32.mrf.mxu0  ;;  %9266 = vmatprep.subr.bf16.mxu0 %v13534_v4  ;;  %v12446_v39 = vpop.f32.mrf.mxu1  ;;  %v1932_v25 = vpack.c.bf16 %v644_v15, %v598_v28  ;;  %v646_v55 = vld [vmem:[%s13675_s16 + $0xb68] sm:$0xff] }
 0x533   : > { %v12336_v24 = vadd.f32 %v12335_v50, %v12334_v37  ;;  %v16838_v42 = vadd.f32 %v12445_v0, %v8395_v49  ;;  %v553_v37 = vld [vmem:[%s13675_s16 + $0x880] sm:$0xff]  ;;  %v600_v49 = vld [vmem:[%s13675_s16 + $0x9f8] sm:$0xff] }
 0x534   : > { %v12337_v30 = vpop.f32.mrf.mxu0  ;;  %8981 = vmatmul.mubr.bf16.gmra.mxu0 %v1839_v45  ;;  %v12447_v60 = vpop.f32.mrf.mxu1 }
 0x535   : > { %v8398_v63 = vadd.f32 %v12336_v24, %v16561_v56  ;;  %8988 = vmatprep.mubr.bf16.mxu0 %v1886_v58  ;;  %9267 = vmatpush1.bf16.msra.mxu0 %v13509_v7  ;;  %v12448_v9 = vadd.f32 %v12447_v60, %v12446_v39  ;;  %v13511_v58 = vld [vmem:[%s17572_s2 + $0xb18] sm:$0xff]   ;;  %v1934_v39 = vpack.c.bf16 %v646_v55, %v600_v49  ;;  %v13512_v60 = vld [vmem:[%s17572_s2 + $0xb10] sm:$0xff]  }
 0x536   : > { %v12338_v21 = vpop.f32.mrf.mxu0  ;;  %9268 = vmatprep.subr.bf16.mxu0 %v13534_v4  ;;  %v12449_v34 = vpop.f32.mrf.mxu1  ;;  %9142 = vmatmul.mubr.bf16.gmra.mxu1 %v1841_v32 }
 0x537   : > { %v12339_v56 = vadd.f32 %v12338_v21, %v12337_v30  ;;  %v16849_v2 = vadd.f32 %v12448_v9, %v8398_v63  ;;  %9149 = vmatprep.mubr.bf16.mxu1 %v1888_v14  ;;  %v597_v14 = vld [vmem:[%s13675_s16 + $0x9e0] sm:$0xff]  ;;  %v643_v63 = vld [vmem:[%s13675_s16 + $0xb50] sm:$0xff]  ;;  %v736_v9 = vld [vmem:[%s13675_s16 + $0xe38] sm:$0xff] }
 0x538   : > { %v12340_v61 = vpop.f32.mrf.mxu0  ;;  %v12450_v11 = vpop.f32.mrf.mxu1 }
 0x539   : > { %v8403_v45 = vadd.f32 %v12339_v56, %v16580_v43  ;;  %9269 = vmatpush1.bf16.msra.mxu0 %v13510_v1  ;;  %v12451_v17 = vadd.f32 %v12450_v11, %v12449_v34  ;;  %v1887_v43 = vpack.c.bf16 %v553_v37, %v507_v5  ;;  %v690_v1 = vld [vmem:[%s13675_s16 + $0xcc8] sm:$0xff]  ;;  %v1931_v56 = vpack.c.bf16 %v643_v63, %v597_v14  ;;  %v599_v34 = vld [vmem:[%s13675_s16 + $0x9f0] sm:$0xff] }
 0x53a   : > { %v12341_v19 = vpop.f32.mrf.mxu0  ;;  %9270 = vmatprep.subr.bf16.mxu0 %v13534_v4  ;;  %v12452_v0 = vpop.f32.mrf.mxu1  ;;  %v1978_v37 = vpack.c.bf16 %v736_v9, %v690_v1  ;;  %v738_v11 = vld [vmem:[%s13675_s16 + $0xe48] sm:$0xff] }
 0x53b   : > { %v12342_v7 = vadd.f32 %v12341_v19, %v12340_v61  ;;  %v16860_v50 = vadd.f32 %v12451_v17, %v8403_v45  ;;  %v645_v61 = vld [vmem:[%s13675_s16 + $0xb60] sm:$0xff]  ;;  %v692_v45 = vld [vmem:[%s13675_s16 + $0xcd8] sm:$0xff] }
 0x53c   : > { %v12343_v24 = vpop.f32.mrf.mxu0  ;;  %8989 = vmatmul.mubr.bf16.gmra.mxu0 %v1885_v3  ;;  %v12453_v30 = vpop.f32.mrf.mxu1 }
 0x53d   : > { %v8406_v32 = vadd.f32 %v12342_v7, %v16599_v51  ;;  %8996 = vmatprep.mubr.bf16.mxu0 %v1932_v25  ;;  %9271 = vmatpush1.bf16.msra.mxu0 %v13511_v58  ;;  %v12454_v41 = vadd.f32 %v12453_v30, %v12452_v0  ;;  %v13513_v25 = vld [vmem:[%s17572_s2 + $0xb08] sm:$0xff]   ;;  %v1980_v0 = vpack.c.bf16 %v738_v11, %v692_v45  ;;  %v13514_v30 = vld [vmem:[%s17572_s2 + $0xb00] sm:$0xff]  }
 0x53e   : > { %v12344_v16 = vpop.f32.mrf.mxu0  ;;  %9272 = vmatprep.subr.bf16.mxu0 %v13534_v4  ;;  %v12455_v21 = vpop.f32.mrf.mxu1  ;;  %9150 = vmatmul.mubr.bf16.gmra.mxu1 %v1887_v43 }
 0x53f   : > { %v12345_v51 = vadd.f32 %v12344_v16, %v12343_v24  ;;  %v16871_v28 = vadd.f32 %v12454_v41, %v8406_v32  ;;  %9157 = vmatprep.mubr.bf16.mxu1 %v1934_v39  ;;  %v689_v39 = vld [vmem:[%s13675_s16 + $0xcc0] sm:$0xff]  ;;  %v735_v32 = vld [vmem:[%s13675_s16 + $0xe30] sm:$0xff]  ;;  %v828_v41 = vld [vmem:[%s13675_s16 + $0x1118] sm:$0xff] }
 0x540   : > { %v12346_v15 = vpop.f32.mrf.mxu0  ;;  %v12456_v5 = vpop.f32.mrf.mxu1 }
 0x541   : > { %v8411_v3 = vadd.f32 %v12345_v51, %v16618_v46  ;;  %9273 = vmatpush1.bf16.msra.mxu0 %v13512_v60  ;;  %v12457_v49 = vadd.f32 %v12456_v5, %v12455_v21  ;;  %v1933_v46 = vpack.c.bf16 %v645_v61, %v599_v34  ;;  %v782_v60 = vld [vmem:[%s13675_s16 + $0xfa8] sm:$0xff]  ;;  %v1977_v51 = vpack.c.bf16 %v735_v32, %v689_v39  ;;  %v691_v21 = vld [vmem:[%s13675_s16 + $0xcd0] sm:$0xff] }
 0x542   : > { %v12347_v55 = vpop.f32.mrf.mxu0  ;;  %9274 = vmatprep.subr.bf16.mxu0 %v13534_v4  ;;  %v12458_v17 = vpop.f32.mrf.mxu1  ;;  %v2024_v61 = vpack.c.bf16 %v828_v41, %v782_v60  ;;  %v830_v5 = vld [vmem:[%s13675_s16 + $0x1128] sm:$0xff] }
 0x543   : > { %v12348_v58 = vadd.f32 %v12347_v55, %v12346_v15  ;;  %v16882_v19 = vadd.f32 %v12457_v49, %v8411_v3  ;;  %v737_v15 = vld [vmem:[%s13675_s16 + $0xe40] sm:$0xff]  ;;  %v784_v3 = vld [vmem:[%s13675_s16 + $0xfb8] sm:$0xff] }
 0x544   : > { %v12349_v7 = vpop.f32.mrf.mxu0  ;;  %8997 = vmatmul.mubr.bf16.gmra.mxu0 %v1931_v56  ;;  %v12459_v24 = vpop.f32.mrf.mxu1 }
 0x545   : > { %v8414_v43 = vadd.f32 %v12348_v58, %v16634_v62  ;;  %9004 = vmatprep.mubr.bf16.mxu0 %v1978_v37  ;;  %9275 = vmatpush1.bf16.msra.mxu0 %v13513_v25  ;;  %v12460_v14 = vadd.f32 %v12459_v24, %v12458_v17  ;;  %v13515_v37 = vld [vmem:[%s17572_s2 + $0xb50] sm:$0xff]   ;;  %v2026_v17 = vpack.c.bf16 %v830_v5, %v784_v3  ;;  %v13516_v24 = vld [vmem:[%s17572_s2 + $0xb48] sm:$0xff]  }
 0x546   : > { %v12350_v63 = vpop.f32.mrf.mxu0  ;;  %9276 = vmatprep.subr.bf16.mxu0 %v13534_v4  ;;  %v12461_v16 = vpop.f32.mrf.mxu1  ;;  %9158 = vmatmul.mubr.bf16.gmra.mxu1 %v1933_v46 }
 0x547   : > { %v12351_v62 = vadd.f32 %v12350_v63, %v12349_v7  ;;  %v16893_v1 = vadd.f32 %v12460_v14, %v8414_v43  ;;  %9165 = vmatprep.mubr.bf16.mxu1 %v1980_v0  ;;  %v781_v0 = vld [vmem:[%s13675_s16 + $0xfa0] sm:$0xff]  ;;  %v827_v43 = vld [vmem:[%s13675_s16 + $0x1110] sm:$0xff]  ;;  %v920_v14 = vld [vmem:[%s13675_s16 + $0x13f8] sm:$0xff] }
 0x548   : > { %v12352_v9 = vpop.f32.mrf.mxu0  ;;  %v12462_v34 = vpop.f32.mrf.mxu1 }
 0x549   : > { %v8419_v56 = vadd.f32 %v12351_v62, %v16645_v6  ;;  %9277 = vmatpush1.bf16.msra.mxu0 %v13514_v30  ;;  %v12463_v45 = vadd.f32 %v12462_v34, %v12461_v16  ;;  %v1979_v6 = vpack.c.bf16 %v737_v15, %v691_v21  ;;  %v874_v30 = vld [vmem:[%s13675_s16 + $0x1288] sm:$0xff]  ;;  %v2023_v62 = vpack.c.bf16 %v827_v43, %v781_v0  ;;  %v783_v16 = vld [vmem:[%s13675_s16 + $0xfb0] sm:$0xff]  ;;  %v1012_v43 = vld [vmem:[%s13675_s16 + $0x16d8] sm:$0xff] }
 0x54a   : > { %v12353_v11 = vpop.f32.mrf.mxu0  ;;  %9288 = vmatprep.subr.bf16.mxu0 %v13534_v4  ;;  %v12464_v49 = vpop.f32.mrf.mxu1  ;;  %v2070_v15 = vpack.c.bf16 %v920_v14, %v874_v30  ;;  %v922_v34 = vld [vmem:[%s13675_s16 + $0x1408] sm:$0xff]  ;;  %v875_v14 = vld [vmem:[%s13675_s16 + $0x1290] sm:$0xff] }
 0x54b   : > { %v12354_v25 = vadd.f32 %v12353_v11, %v12352_v9  ;;  %v16904_v55 = vadd.f32 %v12463_v45, %v8419_v56  ;;  %v829_v9 = vld [vmem:[%s13675_s16 + $0x1120] sm:$0xff]  ;;  %v876_v56 = vld [vmem:[%s13675_s16 + $0x1298] sm:$0xff]  ;;  %v966_v0 = vld [vmem:[%s13675_s16 + $0x1568] sm:$0xff] }
 0x54c   : > { %v12355_v58 = vpop.f32.mrf.mxu0  ;;  %9005 = vmatmul.mubr.bf16.gmra.mxu0 %v1977_v51  ;;  %v12465_v7 = vpop.f32.mrf.mxu1 }
 0x54d   : > { %v8422_v46 = vadd.f32 %v12354_v25, %v16652_v23  ;;  %9012 = vmatprep.mubr.bf16.mxu0 %v2024_v61  ;;  %9289 = vmatpush2.bf16.msra.mxu0 %v13515_v37  ;;  %v12466_v39 = vadd.f32 %v12465_v7, %v12464_v49  ;;  %v13517_v61 = vld [vmem:[%s17572_s2 + $0xb40] sm:$0xff]   ;;  %v2072_v49 = vpack.c.bf16 %v922_v34, %v876_v56 }
 0x54e   : > { %v12356_v32 = vpop.f32.mrf.mxu0  ;;  %9290 = vmatprep.subr.bf16.mxu0 %v13534_v4  ;;  %v12467_v63 = vpop.f32.mrf.mxu1  ;;  %9166 = vmatmul.mubr.bf16.gmra.mxu1 %v1979_v6 }
 0x54f   : > { %v12357_v23 = vadd.f32 %v12356_v32, %v12355_v58  ;;  %v16915_v60 = vadd.f32 %v12466_v39, %v8422_v46  ;;  %9173 = vmatprep.mubr.bf16.mxu1 %v2026_v17  ;;  %v873_v17 = vld [vmem:[%s13675_s16 + $0x1280] sm:$0xff]  ;;  %v919_v46 = vld [vmem:[%s13675_s16 + $0x13f0] sm:$0xff] }
 0x550   : > { %v12358_v41 = vpop.f32.mrf.mxu0  ;;  %v12468_v21 = vpop.f32.mrf.mxu1 }
 0x551   : > { %v8427_v51 = vadd.f32 %v12357_v23, %v16659_v36  ;;  %9291 = vmatpush2.bf16.msra.mxu0 %v13516_v24  ;;  %v12469_v3 = vadd.f32 %v12468_v21, %v12467_v63  ;;  %v2025_v36 = vpack.c.bf16 %v829_v9, %v783_v16  ;;  %v921_v23 = vld [vmem:[%s13675_s16 + $0x1400] sm:$0xff]  ;;  %v968_v16 = vld [vmem:[%s13675_s16 + $0x1578] sm:$0xff]  ;;  %v1014_v9 = vld [vmem:[%s13675_s16 + $0x16e8] sm:$0xff] }
 0x552   : > { %v12359_v5 = vpop.f32.mrf.mxu0  ;;  %9292 = vmatprep.subr.bf16.mxu0 %v13534_v4  ;;  %v12470_v45 = vpop.f32.mrf.mxu1  ;;  %v2071_v34 = vpack.c.bf16 %v921_v23, %v875_v14  ;;  %v1106_v14 = vld [vmem:[%s13675_s16 + $0x19c8] sm:$0xff] }
 0x553   : > { %v12360_v37 = vadd.f32 %v12359_v5, %v12358_v41  ;;  %v16926_v11 = vadd.f32 %v12469_v3, %v8427_v51  ;;  %v2118_v5 = vpack.c.bf16 %v1014_v9, %v968_v16 }
 0x554   : > { %v12361_v25 = vpop.f32.mrf.mxu0  ;;  %9013 = vmatmul.mubr.bf16.gmra.mxu0 %v2023_v62  ;;  %v12471_v58 = vpop.f32.mrf.mxu1  ;;  %v2116_v62 = vpack.c.bf16 %v1012_v43, %v966_v0  ;;  %v1013_v43 = vld [vmem:[%s13675_s16 + $0x16e0] sm:$0xff] }
 0x555   : > { %v8430_v6 = vadd.f32 %v12360_v37, %v16666_v38  ;;  %9020 = vmatprep.mubr.bf16.mxu0 %v2070_v15  ;;  %9293 = vmatpush2.bf16.msra.mxu0 %v13517_v61  ;;  %v12472_v4 = vadd.f32 %v12471_v58, %v12470_v45  ;;  %v2069_v38 = vpack.c.bf16 %v919_v46, %v873_v17  ;;  %v965_v45 = vld [vmem:[%s13675_s16 + $0x1560] sm:$0xff]  ;;  %v1104_v58 = vld [vmem:[%s13675_s16 + $0x19b8] sm:$0xff] }
 0x556   : > { %v12362_v7 = vpop.f32.mrf.mxu0  ;;  %v12473_v39 = vpop.f32.mrf.mxu1  ;;  %9174 = vmatmul.mubr.bf16.gmra.mxu1 %v2025_v36  ;;  %v1011_v36 = vld [vmem:[%s13675_s16 + $0x16d0] sm:$0xff] }
 0x557   : > { %v12363_v24 = vadd.f32 %v12362_v7, %v12361_v25  ;;  %v16933_v32 = vadd.f32 %v12472_v4, %v8430_v6  ;;  %9181 = vmatprep.mubr.bf16.mxu1 %v2072_v49  ;;  %v1058_v6 = vld [vmem:[%s13675_s16 + $0x1848] sm:$0xff]  ;;  %v2115_v0 = vpack.c.bf16 %v1011_v36, %v965_v45 }
 0x558   : > { %v12364_v30 = vpop.f32.mrf.mxu0  ;;  %v12474_v41 = vpop.f32.mrf.mxu1 }
 0x559   : > { %v8435_v63 = vadd.f32 %v12363_v24, %v16673_v18  ;;  %v12475_v51 = vadd.f32 %v12474_v41, %v12473_v39 }
 0x55a   : > { %v12365_v21 = vpop.f32.mrf.mxu0  ;;  %v12476_v56 = vpop.f32.mrf.mxu1 }
 0x55b   : > { %v12366_v15 = vadd.f32 %v12365_v21, %v12364_v30  ;;  %v16940_v61 = vadd.f32 %v12475_v51, %v8435_v63  ;;  %v2162_v30 = vpack.c.bf16 %v1104_v58, %v1058_v6  ;;  %v1105_v58 = vld [vmem:[%s13675_s16 + $0x19c0] sm:$0xff] }
 0x55c   : > { %v12367_v3 = vpop.f32.mrf.mxu0  ;;  %9021 = vmatmul.mubr.bf16.gmra.mxu0 %v2069_v38  ;;  %v12477_v37 = vpop.f32.mrf.mxu1  ;;  %v1060_v38 = vld [vmem:[%s13675_s16 + $0x1858] sm:$0xff] }
 0x55d   : > { %v8438_v18 = vadd.f32 %v12366_v15, %v16680_v8  ;;  %9028 = vmatprep.mubr.bf16.mxu0 %v2116_v62  ;;  %v12478_v25 = vadd.f32 %v12477_v37, %v12476_v56  ;;  %v967_v8 = vld [vmem:[%s13675_s16 + $0x1570] sm:$0xff]  ;;  %v2164_v21 = vpack.c.bf16 %v1106_v14, %v1060_v38  ;;  %v1057_v56 = vld [vmem:[%s13675_s16 + $0x1840] sm:$0xff]  ;;  %v1196_v37 = vld [vmem:[%s13675_s16 + $0x1c98] sm:$0xff] }
 0x55e   : > { %v12368_v49 = vpop.f32.mrf.mxu0  ;;  %v12479_v46 = vpop.f32.mrf.mxu1  ;;  %9182 = vmatmul.mubr.bf16.gmra.mxu1 %v2071_v34  ;;  %v2117_v16 = vpack.c.bf16 %v1013_v43, %v967_v8  ;;  %v1103_v34 = vld [vmem:[%s13675_s16 + $0x19b0] sm:$0xff]  ;;  %v1198_v8 = vld [vmem:[%s13675_s16 + $0x1ca8] sm:$0xff] }
 0x55f   : > { %v12369_v17 = vadd.f32 %v12368_v49, %v12367_v3  ;;  %v16947_v4 = vadd.f32 %v12478_v25, %v8438_v18  ;;  %9189 = vmatprep.mubr.bf16.mxu1 %v2118_v5  ;;  %v1150_v18 = vld [vmem:[%s13675_s16 + $0x1b28] sm:$0xff]  ;;  %v2161_v6 = vpack.c.bf16 %v1103_v34, %v1057_v56 }
 0x560   : > { %v12370_v7 = vpop.f32.mrf.mxu0  ;;  %v12480_v39 = vpop.f32.mrf.mxu1 }
 0x561   : > { %v8443_v24 = vadd.f32 %v12369_v17, %v16687_v52  ;;  %v12481_v23 = vadd.f32 %v12480_v39, %v12479_v46 }
 0x562   : > { %v12371_v63 = vpop.f32.mrf.mxu0  ;;  %v12482_v62 = vpop.f32.mrf.mxu1 }
 0x563   : > { %v12372_v41 = vadd.f32 %v12371_v63, %v12370_v7  ;;  %v16954_v9 = vadd.f32 %v12481_v23, %v8443_v24  ;;  %v2208_v7 = vpack.c.bf16 %v1196_v37, %v1150_v18  ;;  %v1197_v37 = vld [vmem:[%s13675_s16 + $0x1ca0] sm:$0xff] }
 0x564   : > { %v12373_v51 = vpop.f32.mrf.mxu0  ;;  %9029 = vmatmul.mubr.bf16.gmra.mxu0 %v2115_v0  ;;  %v12483_v15 = vpop.f32.mrf.mxu1  ;;  %v1152_v0 = vld [vmem:[%s13675_s16 + $0x1b38] sm:$0xff] }
 0x565   : > { %v8446_v52 = vadd.f32 %v12372_v41, %v16694_v54  ;;  %9036 = vmatprep.mubr.bf16.mxu0 %v2162_v30  ;;  %v12484_v3 = vadd.f32 %v12483_v15, %v12482_v62  ;;  %v1059_v54 = vld [vmem:[%s13675_s16 + $0x1850] sm:$0xff]  ;;  %v2210_v63 = vpack.c.bf16 %v1198_v8, %v1152_v0  ;;  %v1149_v62 = vld [vmem:[%s13675_s16 + $0x1b20] sm:$0xff]  ;;  %v1288_v15 = vld [vmem:[%s13675_s16 + $0x1f78] sm:$0xff] }
 0x566   : > { %v12374_v5 = vpop.f32.mrf.mxu0  ;;  %v12485_v36 = vpop.f32.mrf.mxu1  ;;  %9190 = vmatmul.mubr.bf16.gmra.mxu1 %v2117_v16  ;;  %v2163_v38 = vpack.c.bf16 %v1105_v58, %v1059_v54  ;;  %v1195_v16 = vld [vmem:[%s13675_s16 + $0x1c90] sm:$0xff]  ;;  %v1290_v54 = vld [vmem:[%s13675_s16 + $0x1f88] sm:$0xff] }
 0x567   : > { %v12375_v45 = vadd.f32 %v12374_v5, %v12373_v51  ;;  %v16961_v25 = vadd.f32 %v12484_v3, %v8446_v52  ;;  %9197 = vmatprep.mubr.bf16.mxu1 %v2164_v21  ;;  %v1242_v52 = vld [vmem:[%s13675_s16 + $0x1e08] sm:$0xff]  ;;  %v2207_v18 = vpack.c.bf16 %v1195_v16, %v1149_v62 }
 0x568   : > { %v12376_v49 = vpop.f32.mrf.mxu0  ;;  %v12486_v46 = vpop.f32.mrf.mxu1 }
 0x569   : > { %v8451_v17 = vadd.f32 %v12375_v45, %v16701_v27  ;;  %v12487_v43 = vadd.f32 %v12486_v46, %v12485_v36 }
 0x56a   : > { %v12377_v24 = vpop.f32.mrf.mxu0  ;;  %v12488_v30 = vpop.f32.mrf.mxu1 }
 0x56b   : > { %v12378_v39 = vadd.f32 %v12377_v24, %v12376_v49  ;;  %v16968_v14 = vadd.f32 %v12487_v43, %v8451_v17  ;;  %v2254_v49 = vpack.c.bf16 %v1288_v15, %v1242_v52  ;;  %v1289_v15 = vld [vmem:[%s13675_s16 + $0x1f80] sm:$0xff] }
 0x56c   : > { %v12507_v23 = vpop.f32.mrf.mxu0  ;;  %9037 = vmatmul.mubr.bf16.gmra.mxu0 %v2161_v6  ;;  %v12489_v41 = vpop.f32.mrf.mxu1  ;;  %v1244_v6 = vld [vmem:[%s13675_s16 + $0x1e18] sm:$0xff] }
 0x56d   : > { %v8454_v27 = vadd.f32 %v12378_v39, %v16708_v10  ;;  %9044 = vmatprep.mubr.bf16.mxu0 %v2208_v7  ;;  %v12490_v51 = vadd.f32 %v12489_v41, %v12488_v30  ;;  %v1151_v10 = vld [vmem:[%s13675_s16 + $0x1b30] sm:$0xff]  ;;  %v2256_v24 = vpack.c.bf16 %v1290_v54, %v1244_v6  ;;  %v1241_v30 = vld [vmem:[%s13675_s16 + $0x1e00] sm:$0xff]  ;;  %v1380_v41 = vld [vmem:[%s13675_s16 + $0x2258] sm:$0xff] }
 0x56e   : > { %v12508_v21 = vpop.f32.mrf.mxu0  ;;  %v12619_v34 = vpop.f32.mrf.mxu1  ;;  %9198 = vmatmul.mubr.bf16.gmra.mxu1 %v2163_v38  ;;  %v2209_v0 = vpack.c.bf16 %v1197_v37, %v1151_v10  ;;  %v1287_v38 = vld [vmem:[%s13675_s16 + $0x1f70] sm:$0xff]  ;;  %v1382_v10 = vld [vmem:[%s13675_s16 + $0x2268] sm:$0xff] }
 0x56f   : > { %v12509_v56 = vadd.f32 %v12508_v21, %v12507_v23  ;;  %v16975_v3 = vadd.f32 %v12490_v51, %v8454_v27  ;;  %9205 = vmatprep.mubr.bf16.mxu1 %v2210_v63  ;;  %v1334_v27 = vld [vmem:[%s13675_s16 + $0x20e8] sm:$0xff]  ;;  %v2253_v52 = vpack.c.bf16 %v1287_v38, %v1241_v30 }
 0x570   : > { %v12510_v5 = vpop.f32.mrf.mxu0  ;;  %v12620_v36 = vpop.f32.mrf.mxu1 }
 0x571   : > { %v8653_v45 = vadd.f32 %v12509_v56, %v16715_v53  ;;  %v12621_v58 = vadd.f32 %v12620_v36, %v12619_v34 }
 0x572   : > { %v12511_v17 = vpop.f32.mrf.mxu0  ;;  %v12622_v7 = vpop.f32.mrf.mxu1 }
 0x573   : > { %v12512_v46 = vadd.f32 %v12511_v17, %v12510_v5  ;;  %v16982_v8 = vadd.f32 %v12621_v58, %v8653_v45  ;;  %v2300_v5 = vpack.c.bf16 %v1380_v41, %v1334_v27  ;;  %v1381_v41 = vld [vmem:[%s13675_s16 + $0x2260] sm:$0xff] }
 0x574   : > { %v12513_v43 = vpop.f32.mrf.mxu0  ;;  %9045 = vmatmul.mubr.bf16.gmra.mxu0 %v2207_v18  ;;  %v12623_v39 = vpop.f32.mrf.mxu1  ;;  %v1336_v18 = vld [vmem:[%s13675_s16 + $0x20f8] sm:$0xff] }
 0x575   : > { %v8656_v53 = vadd.f32 %v12512_v46, %v16722_v29  ;;  %9052 = vmatprep.mubr.bf16.mxu0 %v2254_v49  ;;  %v12624_v23 = vadd.f32 %v12623_v39, %v12622_v7  ;;  %v1243_v29 = vld [vmem:[%s13675_s16 + $0x1e10] sm:$0xff]  ;;  %v2302_v17 = vpack.c.bf16 %v1382_v10, %v1336_v18  ;;  %v1333_v7 = vld [vmem:[%s13675_s16 + $0x20e0] sm:$0xff]  ;;  %v1472_v39 = vld [vmem:[%s13675_s16 + $0x2538] sm:$0xff] }
 0x576   : > { %v12514_v63 = vpop.f32.mrf.mxu0  ;;  %v12625_v16 = vpop.f32.mrf.mxu1  ;;  %9206 = vmatmul.mubr.bf16.gmra.mxu1 %v2209_v0  ;;  %v2255_v6 = vpack.c.bf16 %v1289_v15, %v1243_v29  ;;  %v1379_v0 = vld [vmem:[%s13675_s16 + $0x2250] sm:$0xff]  ;;  %v1474_v29 = vld [vmem:[%s13675_s16 + $0x2548] sm:$0xff] }
 0x577   : > { %v12515_v62 = vadd.f32 %v12514_v63, %v12513_v43  ;;  %v16989_v51 = vadd.f32 %v12624_v23, %v8656_v53  ;;  %9213 = vmatprep.mubr.bf16.mxu1 %v2256_v24  ;;  %v1426_v53 = vld [vmem:[%s13675_s16 + $0x23c8] sm:$0xff]  ;;  %v2299_v27 = vpack.c.bf16 %v1379_v0, %v1333_v7 }
 0x578   : > { %v12516_v21 = vpop.f32.mrf.mxu0  ;;  %v12626_v34 = vpop.f32.mrf.mxu1 }
 0x579   : > { %v8661_v56 = vadd.f32 %v12515_v62, %v16729_v57  ;;  %v12627_v37 = vadd.f32 %v12626_v34, %v12625_v16 }
 0x57a   : > { %v12517_v45 = vpop.f32.mrf.mxu0  ;;  %v12628_v49 = vpop.f32.mrf.mxu1 }
 0x57b   : > { %v12518_v36 = vadd.f32 %v12517_v45, %v12516_v21  ;;  %v16996_v54 = vadd.f32 %v12627_v37, %v8661_v56  ;;  %v2346_v21 = vpack.c.bf16 %v1472_v39, %v1426_v53  ;;  %v1473_v39 = vld [vmem:[%s13675_s16 + $0x2540] sm:$0xff] }
 0x57c   : > { %v12519_v58 = vpop.f32.mrf.mxu0  ;;  %9053 = vmatmul.mubr.bf16.gmra.mxu0 %v2253_v52  ;;  %v12629_v46 = vpop.f32.mrf.mxu1  ;;  %v1428_v52 = vld [vmem:[%s13675_s16 + $0x23d8] sm:$0xff] }
 0x57d   : > { %v8664_v57 = vadd.f32 %v12518_v36, %v16736_v26  ;;  %9060 = vmatprep.mubr.bf16.mxu0 %v2300_v5  ;;  %v12630_v43 = vadd.f32 %v12629_v46, %v12628_v49  ;;  %v1335_v26 = vld [vmem:[%s13675_s16 + $0x20f0] sm:$0xff]  ;;  %v2348_v45 = vpack.c.bf16 %v1474_v29, %v1428_v52  ;;  %v1425_v49 = vld [vmem:[%s13675_s16 + $0x23c0] sm:$0xff]  ;;  %v1564_v46 = vld [vmem:[%s13675_s16 + $0x2818] sm:$0xff] }
 0x57e   : > { %v12520_v24 = vpop.f32.mrf.mxu0  ;;  %v12631_v38 = vpop.f32.mrf.mxu1  ;;  %9214 = vmatmul.mubr.bf16.gmra.mxu1 %v2255_v6  ;;  %v2301_v18 = vpack.c.bf16 %v1381_v41, %v1335_v26  ;;  %v1471_v6 = vld [vmem:[%s13675_s16 + $0x2530] sm:$0xff]  ;;  %v1566_v26 = vld [vmem:[%s13675_s16 + $0x2828] sm:$0xff] }
 0x57f   : > { %v12521_v30 = vadd.f32 %v12520_v24, %v12519_v58  ;;  %v17003_v23 = vadd.f32 %v12630_v43, %v8664_v57  ;;  %9221 = vmatprep.mubr.bf16.mxu1 %v2302_v17  ;;  %v1518_v57 = vld [vmem:[%s13675_s16 + $0x26a8] sm:$0xff]  ;;  %v2345_v53 = vpack.c.bf16 %v1471_v6, %v1425_v49 }
 0x580   : > { %v12522_v63 = vpop.f32.mrf.mxu0  ;;  %v12632_v16 = vpop.f32.mrf.mxu1 }
 0x581   : > { %v8669_v62 = vadd.f32 %v12521_v30, %v16743_v44  ;;  %v12633_v15 = vadd.f32 %v12632_v16, %v12631_v38 }
 0x582   : > { %v12523_v56 = vpop.f32.mrf.mxu0  ;;  %v12634_v5 = vpop.f32.mrf.mxu1 }
 0x583   : > { %v12524_v34 = vadd.f32 %v12523_v56, %v12522_v63  ;;  %v17010_v10 = vadd.f32 %v12633_v15, %v8669_v62  ;;  %v2392_v63 = vpack.c.bf16 %v1564_v46, %v1518_v57  ;;  %v1565_v46 = vld [vmem:[%s13675_s16 + $0x2820] sm:$0xff] }
 0x584   : > { %v12525_v37 = vpop.f32.mrf.mxu0  ;;  %9061 = vmatmul.mubr.bf16.gmra.mxu0 %v2299_v27  ;;  %v12635_v36 = vpop.f32.mrf.mxu1  ;;  %v1520_v27 = vld [vmem:[%s13675_s16 + $0x26b8] sm:$0xff] }
 0x585   : > { %v8672_v44 = vadd.f32 %v12524_v34, %v16750_v12  ;;  %9068 = vmatprep.mubr.bf16.mxu0 %v2346_v21  ;;  %v12636_v58 = vadd.f32 %v12635_v36, %v12634_v5  ;;  %v1427_v12 = vld [vmem:[%s13675_s16 + $0x23d0] sm:$0xff]  ;;  %v2394_v56 = vpack.c.bf16 %v1566_v26, %v1520_v27  ;;  %v1517_v5 = vld [vmem:[%s13675_s16 + $0x26a0] sm:$0xff]  ;;  %v1656_v36 = vld [vmem:[%s13675_s16 + $0x2af8] sm:$0xff] }
 0x586   : > { %v12526_v17 = vpop.f32.mrf.mxu0  ;;  %v12637_v0 = vpop.f32.mrf.mxu1  ;;  %9222 = vmatmul.mubr.bf16.gmra.mxu1 %v2301_v18  ;;  %v2347_v52 = vpack.c.bf16 %v1473_v39, %v1427_v12  ;;  %v1563_v18 = vld [vmem:[%s13675_s16 + $0x2810] sm:$0xff]  ;;  %v1658_v12 = vld [vmem:[%s13675_s16 + $0x2b08] sm:$0xff] }
 0x587   : > { %v12527_v7 = vadd.f32 %v12526_v17, %v12525_v37  ;;  %v17017_v43 = vadd.f32 %v12636_v58, %v8672_v44  ;;  %9229 = vmatprep.mubr.bf16.mxu1 %v2348_v45  ;;  %v1610_v44 = vld [vmem:[%s13675_s16 + $0x2988] sm:$0xff]  ;;  %v2391_v57 = vpack.c.bf16 %v1563_v18, %v1517_v5 }
 0x588   : > { %v12528_v24 = vpop.f32.mrf.mxu0  ;;  %v12638_v38 = vpop.f32.mrf.mxu1 }
 0x589   : > { %v8677_v30 = vadd.f32 %v12527_v7, %v16757_v35  ;;  %v12639_v41 = vadd.f32 %v12638_v38, %v12637_v0 }
 0x58a   : > { %v12529_v62 = vpop.f32.mrf.mxu0  ;;  %v12640_v21 = vpop.f32.mrf.mxu1 }
 0x58b   : > { %v12530_v16 = vadd.f32 %v12529_v62, %v12528_v24  ;;  %v17024_v29 = vadd.f32 %v12639_v41, %v8677_v30  ;;  %v2438_v24 = vpack.c.bf16 %v1656_v36, %v1610_v44  ;;  %v1657_v36 = vld [vmem:[%s13675_s16 + $0x2b00] sm:$0xff] }
 0x58c   : > { %v12531_v15 = vpop.f32.mrf.mxu0  ;;  %9069 = vmatmul.mubr.bf16.gmra.mxu0 %v2345_v53  ;;  %v12641_v34 = vpop.f32.mrf.mxu1  ;;  %v1612_v53 = vld [vmem:[%s13675_s16 + $0x2998] sm:$0xff] }
 0x58d   : > { %v8680_v35 = vadd.f32 %v12530_v16, %v16764_v59  ;;  %9076 = vmatprep.mubr.bf16.mxu0 %v2392_v63  ;;  %v12642_v37 = vadd.f32 %v12641_v34, %v12640_v21  ;;  %v1519_v59 = vld [vmem:[%s13675_s16 + $0x26b0] sm:$0xff]  ;;  %v2440_v62 = vpack.c.bf16 %v1658_v12, %v1612_v53  ;;  %v1609_v21 = vld [vmem:[%s13675_s16 + $0x2980] sm:$0xff]  ;;  %v1748_v34 = vld [vmem:[%s13675_s16 + $0x2dd8] sm:$0xff] }
 0x58e   : > { %v12532_v45 = vpop.f32.mrf.mxu0  ;;  %v12643_v6 = vpop.f32.mrf.mxu1  ;;  %9230 = vmatmul.mubr.bf16.gmra.mxu1 %v2347_v52  ;;  %v2393_v27 = vpack.c.bf16 %v1565_v46, %v1519_v59  ;;  %v1655_v52 = vld [vmem:[%s13675_s16 + $0x2af0] sm:$0xff]  ;;  %v1750_v59 = vld [vmem:[%s13675_s16 + $0x2de8] sm:$0xff] }
 0x58f   : > { %v12533_v49 = vadd.f32 %v12532_v45, %v12531_v15  ;;  %v17031_v58 = vadd.f32 %v12642_v37, %v8680_v35  ;;  %9237 = vmatprep.mubr.bf16.mxu1 %v2394_v56  ;;  %v1702_v35 = vld [vmem:[%s13675_s16 + $0x2c68] sm:$0xff]  ;;  %v2437_v44 = vpack.c.bf16 %v1655_v52, %v1609_v21 }
 0x590   : > { %v12534_v17 = vpop.f32.mrf.mxu0  ;;  %v12644_v0 = vpop.f32.mrf.mxu1 }
 0x591   : > { %v8685_v7 = vadd.f32 %v12533_v49, %v16771_v48  ;;  %v12645_v39 = vadd.f32 %v12644_v0, %v12643_v6 }
 0x592   : > { %v12535_v30 = vpop.f32.mrf.mxu0  ;;  %v12646_v63 = vpop.f32.mrf.mxu1 }
 0x593   : > { %v12536_v38 = vadd.f32 %v12535_v30, %v12534_v17  ;;  %v17038_v26 = vadd.f32 %v12645_v39, %v8685_v7  ;;  %v2484_v17 = vpack.c.bf16 %v1748_v34, %v1702_v35  ;;  %v1703_v34 = vld [vmem:[%s13675_s16 + $0x2c70] sm:$0xff] }
 0x594   : > { %v12537_v41 = vpop.f32.mrf.mxu0  ;;  %9077 = vmatmul.mubr.bf16.gmra.mxu0 %v2391_v57  ;;  %v12647_v16 = vpop.f32.mrf.mxu1  ;;  %v1704_v57 = vld [vmem:[%s13675_s16 + $0x2c78] sm:$0xff] }
 0x595   : > { %v8688_v48 = vadd.f32 %v12536_v38, %v16778_v20  ;;  %9084 = vmatprep.mubr.bf16.mxu0 %v2438_v24  ;;  %v12648_v15 = vadd.f32 %v12647_v16, %v12646_v63  ;;  %v1611_v20 = vld [vmem:[%s13675_s16 + $0x2990] sm:$0xff]  ;;  %v2486_v30 = vpack.c.bf16 %v1750_v59, %v1704_v57  ;;  %v1701_v63 = vld [vmem:[%s13675_s16 + $0x2c60] sm:$0xff]  ;;  %v372_v16 = vld [vmem:[%s13675_s16 + $0x2d8] sm:$0xff] }
 0x596   : > { %v12538_v56 = vpop.f32.mrf.mxu0  ;;  %v12649_v18 = vpop.f32.mrf.mxu1  ;;  %9238 = vmatmul.mubr.bf16.gmra.mxu1 %v2393_v27  ;;  %v2439_v53 = vpack.c.bf16 %v1657_v36, %v1611_v20  ;;  %v1747_v27 = vld [vmem:[%s13675_s16 + $0x2dd0] sm:$0xff] }
 0x597   : > { %v12539_v5 = vadd.f32 %v12538_v56, %v12537_v41  ;;  %v17045_v37 = vadd.f32 %v12648_v15, %v8688_v48  ;;  %9245 = vmatprep.mubr.bf16.mxu1 %v2440_v62  ;;  %v326_v48 = vld [vmem:[%s13675_s16 + $0x168] sm:$0xff]  ;;  %v2483_v35 = vpack.c.bf16 %v1747_v27, %v1701_v63 }
 0x598   : > { %v12540_v45 = vpop.f32.mrf.mxu0  ;;  %v12650_v6 = vpop.f32.mrf.mxu1 }
 0x599   : > { %v8693_v49 = vadd.f32 %v12539_v5, %v16785_v31  ;;  %v12651_v46 = vadd.f32 %v12650_v6, %v12649_v18 }
 0x59a   : > { %v12541_v7 = vpop.f32.mrf.mxu0  ;;  %v12652_v24 = vpop.f32.mrf.mxu1 }
 0x59b   : > { %v12542_v0 = vadd.f32 %v12541_v7, %v12540_v45  ;;  %v17052_v12 = vadd.f32 %v12651_v46, %v8693_v49  ;;  %v1798_v45 = vpack.c.bf16 %v372_v16, %v326_v48  ;;  %v371_v7 = vld [vmem:[%s13675_s16 + $0x2d0] sm:$0xff] }
 0x59c   : > { %v12543_v39 = vpop.f32.mrf.mxu0  ;;  %9085 = vmatmul.mubr.bf16.gmra.mxu0 %v2437_v44  ;;  %v12653_v38 = vpop.f32.mrf.mxu1 }
 0x59d   : > { %v8696_v31 = vadd.f32 %v12542_v0, %v16792_v22  ;;  %9092 = vmatprep.mubr.bf16.mxu0 %v2484_v17  ;;  %v12654_v41 = vadd.f32 %v12653_v38, %v12652_v24  ;;  %v1749_v22 = vld [vmem:[%s13675_s16 + $0x2de0] sm:$0xff] }
 0x59e   : > { %v12544_v62 = vpop.f32.mrf.mxu0  ;;  %v12655_v52 = vpop.f32.mrf.mxu1  ;;  %9246 = vmatmul.mubr.bf16.gmra.mxu1 %v2439_v53  ;;  %v2485_v6 = vpack.c.bf16 %v1749_v22, %v1703_v34  ;;  %v418_v53 = vld [vmem:[%s13675_s16 + $0x448] sm:$0xff] }
 0x59f   : > { %v12545_v21 = vadd.f32 %v12544_v62, %v12543_v39  ;;  %v17059_v15 = vadd.f32 %v12654_v41, %v8696_v31  ;;  %9253 = vmatprep.mubr.bf16.mxu1 %v2486_v30  ;;  %v464_v39 = vld [vmem:[%s13675_s16 + $0x5b8] sm:$0xff] }
 0x5a0   : > { %v12546_v56 = vpop.f32.mrf.mxu0  ;;  %v12656_v18 = vpop.f32.mrf.mxu1  ;;  %v1844_v62 = vpack.c.bf16 %v464_v39, %v418_v53 }
 0x5a1   : > { %v8701_v5 = vadd.f32 %v12545_v21, %v16799_v40  ;;  %v12657_v44 = vadd.f32 %v12656_v18, %v12655_v52  ;;  %v325_v40 = vld [vmem:[%s13675_s16 + $0x160] sm:$0xff]  ;;  %v463_v18 = vld [vmem:[%s13675_s16 + $0x5b0] sm:$0xff] }
 0x5a2   : > { %v12547_v20 = vpop.f32.mrf.mxu0  ;;  %v12658_v49 = vpop.f32.mrf.mxu1  ;;  %v1797_v27 = vpack.c.bf16 %v371_v7, %v325_v40 }
 0x5a3   : > { %v12548_v36 = vadd.f32 %v12547_v20, %v12546_v56  ;;  %v17064_v17 = vadd.f32 %v12657_v44, %v8701_v5  ;;  %v417_v5 = vld [vmem:[%s13675_s16 + $0x440] sm:$0xff]  ;;  %v510_v44 = vld [vmem:[%s13675_s16 + $0x728] sm:$0xff]  ;;  %v556_v20 = vld [vmem:[%s13675_s16 + $0x898] sm:$0xff] }
 0x5a4   : > { %v12549_v57 = vpop.f32.mrf.mxu0  ;;  %9093 = vmatmul.mubr.bf16.gmra.mxu0 %v2483_v35  ;;  %v12659_v46 = vpop.f32.mrf.mxu1  ;;  %v1890_v40 = vpack.c.bf16 %v556_v20, %v510_v44 }
 0x5a5   : > { %v8704_v59 = vadd.f32 %v12548_v36, %v16806_v33  ;;  %10433 = vmatprep.mubr.msk.bf16.mxu0 %vm5671_vm0, %v1798_v45  ;;  %v12660_v0 = vadd.f32 %v12659_v46, %v12658_v49 }
 0x5a6   : > { %v12550_v24 = vpop.f32.mrf.mxu0  ;;  %v12661_v31 = vpop.f32.mrf.mxu1  ;;  %9254 = vmatmul.mubr.bf16.gmra.mxu1 %v2485_v6 }
 0x5a7   : > { %v12551_v30 = vadd.f32 %v12550_v24, %v12549_v57  ;;  %v17072_v38 = vadd.f32 %v12660_v0, %v8704_v59  ;;  %v1843_v59 = vpack.c.bf16 %v463_v18, %v417_v5 }
 0x5a8   : > { %v12552_v63 = vpop.f32.mrf.mxu0  ;;  %v12662_v41 = vpop.f32.mrf.mxu1 }
 0x5a9   : > { %v8709_v33 = vadd.f32 %v12551_v30, %v16816_v47  ;;  %v12663_v48 = vadd.f32 %v12662_v41, %v12661_v31 }
 0x5aa   : > { %v12553_v16 = vpop.f32.mrf.mxu0  ;;  %v12664_v52 = vpop.f32.mrf.mxu1 }
 0x5ab   : > { %v12554_v21 = vadd.f32 %v12553_v16, %v12552_v63  ;;  %v17075_v56 = vadd.f32 %v12663_v48, %v8709_v33  ;;  %v555_v33 = vld [vmem:[%s13675_s16 + $0x890] sm:$0xff]  ;;  %v648_v48 = vld [vmem:[%s13675_s16 + $0xb78] sm:$0xff] }
 0x5ac   : > { %v12555_v35 = vpop.f32.mrf.mxu0  ;;  %9295 = vmatmul.mubr.bf16.vlgmr.msra.gmra.mxu0 %v1797_v27  ;;  %v12665_v22 = vpop.f32.mrf.mxu1  ;;  %v509_v27 = vld [vmem:[%s13675_s16 + $0x720] sm:$0xff] }
 0x5ad   : > { %v8712_v34 = vadd.f32 %v12554_v21, %v16827_v13  ;;  %10434 = vmatprep.mubr.msk.bf16.mxu0 %vm5671_vm0, %v1844_v62  ;;  %v12666_v47 = vadd.f32 %v12665_v22, %v12664_v52  ;;  %v602_v62 = vld [vmem:[%s13675_s16 + $0xa08] sm:$0xff] }
 0x5ae   : > { %v12556_v45 = vpop.f32.mrf.mxu0  ;;  %v12667_v49 = vpop.f32.mrf.mxu1  ;;  %v1936_v18 = vpack.c.bf16 %v648_v48, %v602_v62 }
 0x5af   : > { %v12557_v36 = vadd.f32 %v12556_v45, %v12555_v35  ;;  %v17083_v6 = vadd.f32 %v12666_v47, %v8712_v34  ;;  %v1889_v34 = vpack.c.bf16 %v555_v33, %v509_v27 }
 0x5b0   : > { %v12558_v57 = vpop.f32.mrf.mxu0  ;;  %v12668_v13 = vpop.f32.mrf.mxu1 }
 0x5b1   : > { %v8717_v46 = vadd.f32 %v12557_v36, %v16838_v42  ;;  %v12669_v7 = vadd.f32 %v12668_v13, %v12667_v49  ;;  %v647_v13 = vld [vmem:[%s13675_s16 + $0xb70] sm:$0xff] }
 0x5b2   : > { %v12559_v0 = vpop.f32.mrf.mxu0  ;;  %v12670_v53 = vpop.f32.mrf.mxu1 }
 0x5b3   : > { %v12560_v24 = vadd.f32 %v12559_v0, %v12558_v57  ;;  %v17086_v39 = vadd.f32 %v12669_v7, %v8717_v46  ;;  %v601_v46 = vld [vmem:[%s13675_s16 + $0xa00] sm:$0xff]  ;;  %v694_v0 = vld [vmem:[%s13675_s16 + $0xce8] sm:$0xff] }
 0x5b4   : > { %v12561_v30 = vpop.f32.mrf.mxu0  ;;  %9303 = vmatmul.mubr.bf16.gmra.mxu0 %v1843_v59  ;;  %v12671_v63 = vpop.f32.mrf.mxu1  ;;  %v1935_v27 = vpack.c.bf16 %v647_v13, %v601_v46 }
 0x5b5   : > { %v8720_v31 = vadd.f32 %v12560_v24, %v16849_v2  ;;  %10435 = vmatprep.mubr.msk.bf16.mxu0 %vm5671_vm0, %v1890_v40  ;;  %v12672_v42 = vadd.f32 %v12671_v63, %v12670_v53  ;;  %v9471_v2 = vld [vmem:[%s17574_s4] sm:$0xf]  ;;  %v740_v24 = vld [vmem:[%s13675_s16 + $0xe58] sm:$0xff] }
 0x5b6   : > { %v12562_v41 = vpop.f32.mrf.mxu0  ;;  %v12673_v21 = vpop.f32.mrf.mxu1  ;;  %13062 = vmatprep.subr.msk.bf16.mxu1 %vm9521_vm1, %v9471_v2  ;;  %v9523_v44 = vsel %vm9521_vm1, %v9471_v2, 0 }
 0x5b7   : > { %v12563_v16 = vadd.f32 %v12562_v41, %v12561_v30  ;;  %v17094_v52 = vadd.f32 %v12672_v42, %v8720_v31  ;;  %12981 = vmatpush3.bf16.msra.mxu1 %v9523_v44  ;;  %v1982_v42 = vpack.c.bf16 %v740_v24, %v694_v0 }
 0x5b8   : > { %v12564_v35 = vpop.f32.mrf.mxu0  ;;  %v12674_v5 = vpop.f32.mrf.mxu1 }
 0x5b9   : > { %v8725_v22 = vadd.f32 %v12563_v16, %v16860_v50  ;;  %v12675_v47 = vadd.f32 %v12674_v5, %v12673_v21  ;;  %v693_v5 = vld [vmem:[%s13675_s16 + $0xce0] sm:$0xff] }
 0x5ba   : > { %v12565_v45 = vpop.f32.mrf.mxu0  ;;  %v12676_v36 = vpop.f32.mrf.mxu1 }
 0x5bb   : > { %v12566_v20 = vadd.f32 %v12565_v45, %v12564_v35  ;;  %v17100_v49 = vadd.f32 %v12675_v47, %v8725_v22  ;;  %v786_v47 = vld [vmem:[%s13675_s16 + $0xfc8] sm:$0xff]  ;;  %v832_v45 = vld [vmem:[%s13675_s16 + $0x1138] sm:$0xff] }
 0x5bc   : > { %v12567_v50 = vpop.f32.mrf.mxu0  ;;  %9311 = vmatmul.mubr.bf16.gmra.mxu0 %v1889_v34  ;;  %v12677_v59 = vpop.f32.mrf.mxu1  ;;  %v2028_v46 = vpack.c.bf16 %v832_v45, %v786_v47 }
 0x5bd   : > { %v8728_v57 = vadd.f32 %v12566_v20, %v16871_v28  ;;  %10436 = vmatprep.mubr.msk.bf16.mxu0 %vm5671_vm0, %v1936_v18  ;;  %v12678_v40 = vadd.f32 %v12677_v59, %v12676_v36  ;;  %v739_v18 = vld [vmem:[%s13675_s16 + $0xe50] sm:$0xff] }
 0x5be   : > { %v12568_v7 = vpop.f32.mrf.mxu0  ;;  %v12679_v30 = vpop.f32.mrf.mxu1 }
 0x5bf   : > { %v12569_v53 = vadd.f32 %v12568_v7, %v12567_v50  ;;  %v17108_v31 = vadd.f32 %v12678_v40, %v8728_v57  ;;  %v1981_v57 = vpack.c.bf16 %v739_v18, %v693_v5 }
 0x5c0   : > { %v12570_v63 = vpop.f32.mrf.mxu0  ;;  %v12680_v28 = vpop.f32.mrf.mxu1 }
 0x5c1   : > { %v8733_v33 = vadd.f32 %v12569_v53, %v16882_v19  ;;  %v12681_v41 = vadd.f32 %v12680_v28, %v12679_v30 }
 0x5c2   : > { %v12571_v62 = vpop.f32.mrf.mxu0  ;;  %v12682_v16 = vpop.f32.mrf.mxu1 }
 0x5c3   : > { %v12572_v48 = vadd.f32 %v12571_v62, %v12570_v63  ;;  %v17111_v21 = vadd.f32 %v12681_v41, %v8733_v33  ;;  %v831_v33 = vld [vmem:[%s13675_s16 + $0x1130] sm:$0xff]  ;;  %v924_v41 = vld [vmem:[%s13675_s16 + $0x1418] sm:$0xff] }
 0x5c4   : > { %v12573_v35 = vpop.f32.mrf.mxu0  ;;  %9319 = vmatmul.mubr.bf16.gmra.mxu0 %v1935_v27  ;;  %v12683_v22 = vpop.f32.mrf.mxu1  ;;  %v785_v27 = vld [vmem:[%s13675_s16 + $0xfc0] sm:$0xff] }
 0x5c5   : > { %v8736_v34 = vadd.f32 %v12572_v48, %v16893_v1  ;;  %10437 = vmatprep.mubr.msk.bf16.mxu0 %vm5671_vm0, %v1982_v42  ;;  %v12684_v19 = vadd.f32 %v12683_v22, %v12682_v16  ;;  %v878_v42 = vld [vmem:[%s13675_s16 + $0x12a8] sm:$0xff] }
 0x5c6   : > { %v12574_v2 = vpop.f32.mrf.mxu0  ;;  %v12685_v20 = vpop.f32.mrf.mxu1  ;;  %v2074_v5 = vpack.c.bf16 %v924_v41, %v878_v42 }
 0x5c7   : > { %v12575_v44 = vadd.f32 %v12574_v2, %v12573_v35  ;;  %v17119_v36 = vadd.f32 %v12684_v19, %v8736_v34  ;;  %v2027_v34 = vpack.c.bf16 %v831_v33, %v785_v27 }
 0x5c8   : > { %v12576_v50 = vpop.f32.mrf.mxu0  ;;  %v12686_v1 = vpop.f32.mrf.mxu1 }
 0x5c9   : > { %v8741_v59 = vadd.f32 %v12575_v44, %v16904_v55  ;;  %v12687_v13 = vadd.f32 %v12686_v1, %v12685_v20 }
 0x5ca   : > { %v12577_v40 = vpop.f32.mrf.mxu0  ;;  %v12688_v0 = vpop.f32.mrf.mxu1 }
 0x5cb   : > { %v12578_v7 = vadd.f32 %v12577_v40, %v12576_v50  ;;  %v17122_v24 = vadd.f32 %v12687_v13, %v8741_v59  ;;  %v923_v59 = vld [vmem:[%s13675_s16 + $0x1410] sm:$0xff]  ;;  %v1016_v13 = vld [vmem:[%s13675_s16 + $0x16f8] sm:$0xff] }
 0x5cc   : > { %v12579_v53 = vpop.f32.mrf.mxu0  ;;  %9327 = vmatmul.mubr.bf16.gmra.mxu0 %v1981_v57  ;;  %v12689_v63 = vpop.f32.mrf.mxu1  ;;  %v877_v57 = vld [vmem:[%s13675_s16 + $0x12a0] sm:$0xff] }
 0x5cd   : > { %v8744_v30 = vadd.f32 %v12578_v7, %v16915_v60  ;;  %10438 = vmatprep.mubr.msk.bf16.mxu0 %vm5671_vm0, %v2028_v46  ;;  %v12690_v55 = vadd.f32 %v12689_v63, %v12688_v0  ;;  %v970_v46 = vld [vmem:[%s13675_s16 + $0x1588] sm:$0xff] }
 0x5ce   : > { %v12580_v28 = vpop.f32.mrf.mxu0  ;;  %v12691_v48 = vpop.f32.mrf.mxu1  ;;  %v2120_v27 = vpack.c.bf16 %v1016_v13, %v970_v46 }
 0x5cf   : > { %v12581_v62 = vadd.f32 %v12580_v28, %v12579_v53  ;;  %v17130_v16 = vadd.f32 %v12690_v55, %v8744_v30  ;;  %v2073_v30 = vpack.c.bf16 %v923_v59, %v877_v57 }
 0x5d0   : > { %v12582_v35 = vpop.f32.mrf.mxu0  ;;  %v12692_v60 = vpop.f32.mrf.mxu1 }
 0x5d1   : > { %v8749_v22 = vadd.f32 %v12581_v62, %v16926_v11  ;;  %v12693_v18 = vadd.f32 %v12692_v60, %v12691_v48 }
 0x5d2   : > { %v12583_v19 = vpop.f32.mrf.mxu0  ;;  %v12694_v47 = vpop.f32.mrf.mxu1 }
 0x5d3   : > { %v12584_v2 = vadd.f32 %v12583_v19, %v12582_v35  ;;  %v17133_v45 = vadd.f32 %v12693_v18, %v8749_v22  ;;  %v1015_v22 = vld [vmem:[%s13675_s16 + $0x16f0] sm:$0xff]  ;;  %v1108_v18 = vld [vmem:[%s13675_s16 + $0x19d8] sm:$0xff] }
 0x5d4   : > { %v12585_v44 = vpop.f32.mrf.mxu0  ;;  %9335 = vmatmul.mubr.bf16.gmra.mxu0 %v2027_v34  ;;  %v12695_v50 = vpop.f32.mrf.mxu1  ;;  %v969_v34 = vld [vmem:[%s13675_s16 + $0x1580] sm:$0xff] }
 0x5d5   : > { %v8752_v20 = vadd.f32 %v12584_v2, %v16933_v32  ;;  %10439 = vmatprep.mubr.msk.bf16.mxu0 %vm5671_vm0, %v2074_v5  ;;  %v12696_v11 = vadd.f32 %v12695_v50, %v12694_v47  ;;  %v1062_v5 = vld [vmem:[%s13675_s16 + $0x1868] sm:$0xff] }
 0x5d6   : > { %v12586_v1 = vpop.f32.mrf.mxu0  ;;  %v12697_v7 = vpop.f32.mrf.mxu1  ;;  %v2166_v57 = vpack.c.bf16 %v1108_v18, %v1062_v5 }
 0x5d7   : > { %v12587_v40 = vadd.f32 %v12586_v1, %v12585_v44  ;;  %v17141_v0 = vadd.f32 %v12696_v11, %v8752_v20  ;;  %v2119_v20 = vpack.c.bf16 %v1015_v22, %v969_v34 }
 0x5d8   : > { %v12588_v53 = vpop.f32.mrf.mxu0  ;;  %v12698_v32 = vpop.f32.mrf.mxu1 }
 0x5d9   : > { %v8757_v63 = vadd.f32 %v12587_v40, %v16940_v61  ;;  %v12699_v33 = vadd.f32 %v12698_v32, %v12697_v7 }
 0x5da   : > { %v12589_v55 = vpop.f32.mrf.mxu0  ;;  %v12700_v42 = vpop.f32.mrf.mxu1 }
 0x5db   : > { %v12590_v28 = vadd.f32 %v12589_v55, %v12588_v53  ;;  %v17144_v41 = vadd.f32 %v12699_v33, %v8757_v63  ;;  %v1107_v63 = vld [vmem:[%s13675_s16 + $0x19d0] sm:$0xff]  ;;  %v1200_v33 = vld [vmem:[%s13675_s16 + $0x1cb8] sm:$0xff] }
 0x5dc   : > { %v12591_v62 = vpop.f32.mrf.mxu0  ;;  %9343 = vmatmul.mubr.bf16.gmra.mxu0 %v2073_v30  ;;  %v12701_v35 = vpop.f32.mrf.mxu1  ;;  %v1061_v30 = vld [vmem:[%s13675_s16 + $0x1860] sm:$0xff] }
 0x5dd   : > { %v8760_v48 = vadd.f32 %v12590_v28, %v16947_v4  ;;  %10440 = vmatprep.mubr.msk.bf16.mxu0 %vm5671_vm0, %v2120_v27  ;;  %v12702_v61 = vadd.f32 %v12701_v35, %v12700_v42  ;;  %v1154_v27 = vld [vmem:[%s13675_s16 + $0x1b48] sm:$0xff] }
 0x5de   : > { %v12592_v60 = vpop.f32.mrf.mxu0  ;;  %v12703_v2 = vpop.f32.mrf.mxu1  ;;  %v2212_v34 = vpack.c.bf16 %v1200_v33, %v1154_v27 }
 0x5df   : > { %v12593_v19 = vadd.f32 %v12592_v60, %v12591_v62  ;;  %v17152_v47 = vadd.f32 %v12702_v61, %v8760_v48  ;;  %v2165_v48 = vpack.c.bf16 %v1107_v63, %v1061_v30 }
 0x5e0   : > { %v12594_v44 = vpop.f32.mrf.mxu0  ;;  %v12704_v4 = vpop.f32.mrf.mxu1 }
 0x5e1   : > { %v8765_v50 = vadd.f32 %v12593_v19, %v16954_v9  ;;  %v12705_v59 = vadd.f32 %v12704_v4, %v12703_v2 }
 0x5e2   : > { %v12595_v11 = vpop.f32.mrf.mxu0  ;;  %v12706_v46 = vpop.f32.mrf.mxu1 }
 0x5e3   : > { %v12596_v1 = vadd.f32 %v12595_v11, %v12594_v44  ;;  %v17155_v13 = vadd.f32 %v12705_v59, %v8765_v50  ;;  %v1199_v50 = vld [vmem:[%s13675_s16 + $0x1cb0] sm:$0xff]  ;;  %v1292_v59 = vld [vmem:[%s13675_s16 + $0x1f98] sm:$0xff] }
 0x5e4   : > { %v12597_v40 = vpop.f32.mrf.mxu0  ;;  %9351 = vmatmul.mubr.bf16.gmra.mxu0 %v2119_v20  ;;  %v12707_v53 = vpop.f32.mrf.mxu1  ;;  %v1153_v20 = vld [vmem:[%s13675_s16 + $0x1b40] sm:$0xff] }
 0x5e5   : > { %v8768_v7 = vadd.f32 %v12596_v1, %v16961_v25  ;;  %10441 = vmatprep.mubr.msk.bf16.mxu0 %vm5671_vm0, %v2166_v57  ;;  %v12708_v9 = vadd.f32 %v12707_v53, %v12706_v46  ;;  %v1246_v57 = vld [vmem:[%s13675_s16 + $0x1e28] sm:$0xff] }
 0x5e6   : > { %v12598_v32 = vpop.f32.mrf.mxu0  ;;  %v12709_v28 = vpop.f32.mrf.mxu1  ;;  %v2258_v30 = vpack.c.bf16 %v1292_v59, %v1246_v57  ;;  %v1476_v59 = vld [vmem:[%s13675_s16 + $0x2558] sm:$0xff] }
 0x5e7   : > { %v12599_v55 = vadd.f32 %v12598_v32, %v12597_v40  ;;  %v17163_v42 = vadd.f32 %v12708_v9, %v8768_v7  ;;  %v2211_v7 = vpack.c.bf16 %v1199_v50, %v1153_v20 }
 0x5e8   : > { %v12600_v62 = vpop.f32.mrf.mxu0  ;;  %v12710_v25 = vpop.f32.mrf.mxu1 }
 0x5e9   : > { %v8773_v35 = vadd.f32 %v12599_v55, %v16968_v14  ;;  %v12711_v22 = vadd.f32 %v12710_v25, %v12709_v28  ;;  %v1245_v28 = vld [vmem:[%s13675_s16 + $0x1e20] sm:$0xff] }
 0x5ea   : > { %v12601_v61 = vpop.f32.mrf.mxu0  ;;  %v12712_v5 = vpop.f32.mrf.mxu1 }
 0x5eb   : > { %v12602_v60 = vadd.f32 %v12601_v61, %v12600_v62  ;;  %v17166_v18 = vadd.f32 %v12711_v22, %v8773_v35  ;;  %v1291_v62 = vld [vmem:[%s13675_s16 + $0x1f90] sm:$0xff]  ;;  %v1384_v35 = vld [vmem:[%s13675_s16 + $0x2278] sm:$0xff] }
 0x5ec   : > { %v12731_v19 = vpop.f32.mrf.mxu0  ;;  %9359 = vmatmul.mubr.bf16.gmra.mxu0 %v2165_v48  ;;  %v12713_v44 = vpop.f32.mrf.mxu1  ;;  %v1338_v48 = vld [vmem:[%s13675_s16 + $0x2108] sm:$0xff]  ;;  %v2257_v61 = vpack.c.bf16 %v1291_v62, %v1245_v28 }
 0x5ed   : > { %v8776_v2 = vadd.f32 %v12602_v60, %v16975_v3  ;;  %10442 = vmatprep.mubr.msk.bf16.mxu0 %vm5671_vm0, %v2212_v34  ;;  %v12714_v14 = vadd.f32 %v12713_v44, %v12712_v5  ;;  %v2304_v5 = vpack.c.bf16 %v1384_v35, %v1338_v48  ;;  %v1429_v48 = vld [vmem:[%s13675_s16 + $0x23e0] sm:$0xff]  ;;  %v1475_v35 = vld [vmem:[%s13675_s16 + $0x2550] sm:$0xff] }
 0x5ee   : > { %v12732_v4 = vpop.f32.mrf.mxu0  ;;  %v17174_v1 = vpop.f32.mrf.mxu1 }
 0x5ef   : > { %v12733_v11 = vadd.f32 %v12732_v4, %v12731_v19  ;;  %v17176_v46 = vadd.f32 %v12714_v14, %v8776_v2  ;;  %v1337_v14 = vld [vmem:[%s13675_s16 + $0x2100] sm:$0xff]  ;;  %v1383_v4 = vld [vmem:[%s13675_s16 + $0x2270] sm:$0xff] }
 0x5f0   : > { %v12734_v40 = vpop.f32.mrf.mxu0  ;;  %v17181_v53 = vpop.f32.mrf.mxu1 }
 0x5f1   : > { %v17179_v3 = vadd.f32 %v12733_v11, %v16982_v8 }
 0x5f2   : > { %v12735_v63 = vpop.f32.mrf.mxu0  ;;  %v17183_v32 = vpop.f32.mrf.mxu1 }
 0x5f3   : > { %v12736_v9 = vadd.f32 %v12735_v63, %v12734_v40 }
 0x5f4   : > { %v12737_v27 = vpop.f32.mrf.mxu0  ;;  %9367 = vmatmul.mubr.bf16.gmra.mxu0 %v2211_v7  ;;  %v17188_v55 = vpop.f32.mrf.mxu1 }
 0x5f5   : > { %v17186_v33 = vadd.f32 %v12736_v9, %v16989_v51  ;;  %10443 = vmatprep.mubr.msk.bf16.mxu0 %vm5671_vm0, %v2258_v30  ;;  %v2303_v30 = vpack.c.bf16 %v1383_v4, %v1337_v14 }
 0x5f6   : > { %v12738_v8 = vpop.f32.mrf.mxu0  ;;  %v17195_v34 = vpop.f32.mrf.mxu1 }
 0x5f7   : > { %v12739_v25 = vadd.f32 %v12738_v8, %v12737_v27 }
 0x5f8   : > { %v12740_v22 = vpop.f32.mrf.mxu0  ;;  %v17200_v60 = vpop.f32.mrf.mxu1 }
 0x5f9   : > { %v17198_v51 = vadd.f32 %v12739_v25, %v16996_v54  ;;  %v1430_v54 = vld [vmem:[%s13675_s16 + $0x23e8] sm:$0xff] }
 0x5fa   : > { %v12741_v19 = vpop.f32.mrf.mxu0  ;;  %v17202_v44 = vpop.f32.mrf.mxu1 }
 0x5fb   : > { %v12742_v2 = vadd.f32 %v12741_v19, %v12740_v22  ;;  %v1522_v22 = vld [vmem:[%s13675_s16 + $0x26c8] sm:$0xff] }
 0x5fc   : > { %v12743_v20 = vpop.f32.mrf.mxu0  ;;  %9375 = vmatmul.mubr.bf16.gmra.mxu0 %v2257_v61  ;;  %v17212_v40 = vpop.f32.mrf.mxu1 }
 0x5fd   : > { %v17205_v50 = vadd.f32 %v12742_v2, %v17003_v23  ;;  %10444 = vmatprep.mubr.msk.bf16.mxu0 %vm5671_vm0, %v2304_v5  ;;  %v2350_v23 = vpack.c.bf16 %v1476_v59, %v1430_v54  ;;  %v2349_v2 = vpack.c.bf16 %v1475_v35, %v1429_v48 }
 0x5fe   : > { %v12744_v57 = vpop.f32.mrf.mxu0  ;;  %v17217_v28 = vpop.f32.mrf.mxu1 }
 0x5ff   : > { %v12745_v11 = vadd.f32 %v12744_v57, %v12743_v20 }
 0x600   : > { %v12746_v7 = vpop.f32.mrf.mxu0  ;;  %v17227_v5 = vpop.f32.mrf.mxu1 }
 0x601   : > { %v17215_v63 = vadd.f32 %v12745_v11, %v17010_v10  ;;  %v1568_v10 = vld [vmem:[%s13675_s16 + $0x2838] sm:$0xff]  ;;  %v1521_v11 = vld [vmem:[%s13675_s16 + $0x26c0] sm:$0xff] }
 0x602   : > { %v12747_v9 = vpop.f32.mrf.mxu0  ;;  %v17232_v57 = vpop.f32.mrf.mxu1 }
 0x603   : > { %v12748_v27 = vadd.f32 %v12747_v9, %v12746_v7  ;;  %v1567_v7 = vld [vmem:[%s13675_s16 + $0x2830] sm:$0xff] }
 0x604   : > { %v12749_v62 = vpop.f32.mrf.mxu0  ;;  %9383 = vmatmul.mubr.bf16.gmra.mxu0 %v2303_v30  ;;  %v2395_v48 = vpack.c.bf16 %v1567_v7, %v1521_v11 }
 0x605   : > { %v17220_v8 = vadd.f32 %v12748_v27, %v17017_v43  ;;  %10445 = vmatprep.mubr.msk.bf16.mxu0 %vm5671_vm0, %v2350_v23  ;;  %v2396_v43 = vpack.c.bf16 %v1568_v10, %v1522_v22  ;;  %v1614_v23 = vld [vmem:[%s13675_s16 + $0x29a8] sm:$0xff]  ;;  %v17242_v27 = vpop.f32.mrf.mxu1 }
 0x606   : > { %v12750_v25 = vpop.f32.mrf.mxu0 }
 0x607   : > { %v12751_v61 = vadd.f32 %v12750_v25, %v12749_v62  ;;  %v17247_v10 = vpop.f32.mrf.mxu1 }
 0x608   : > { %v12752_v19 = vpop.f32.mrf.mxu0 }
 0x609   : > { %v17230_v20 = vadd.f32 %v12751_v61, %v17024_v29  ;;  %v1660_v29 = vld [vmem:[%s13675_s16 + $0x2b18] sm:$0xff]  ;;  %v17257_v11 = vpop.f32.mrf.mxu1 }
 0x60a   : > { %v12753_v14 = vpop.f32.mrf.mxu0 }
 0x60b   : > { %v12754_v4 = vadd.f32 %v12753_v14, %v12752_v19 }
 0x60c   : > { %v12755_v54 = vpop.f32.mrf.mxu0  ;;  %9391 = vmatmul.mubr.bf16.gmra.mxu0 %v2349_v2  ;;  %v1613_v2 = vld [vmem:[%s13675_s16 + $0x29a0] sm:$0xff] }
 0x60d   : > { %v17235_v59 = vadd.f32 %v12754_v4, %v17031_v58  ;;  %10446 = vmatprep.mubr.msk.bf16.mxu0 %vm5671_vm0, %v2396_v43  ;;  %v2442_v58 = vpack.c.bf16 %v1660_v29, %v1614_v23  ;;  %v1659_v43 = vld [vmem:[%s13675_s16 + $0x2b10] sm:$0xff]  ;;  %v1706_v4 = vld [vmem:[%s13675_s16 + $0x2c88] sm:$0xff] }
 0x60e   : > { %v12756_v30 = vpop.f32.mrf.mxu0 }
 0x60f   : > { %v12757_v9 = vadd.f32 %v12756_v30, %v12755_v54  ;;  %v2441_v30 = vpack.c.bf16 %v1659_v43, %v1613_v2 }
 0x610   : > { %v12758_v62 = vpop.f32.mrf.mxu0 }
 0x611   : > { %v17245_v35 = vadd.f32 %v12757_v9, %v17038_v26  ;;  %v1752_v26 = vld [vmem:[%s13675_s16 + $0x2df8] sm:$0xff] }
 0x612   : > { %v12759_v25 = vpop.f32.mrf.mxu0  ;;  %v2488_v29 = vpack.c.bf16 %v1752_v26, %v1706_v4 }
 0x613   : > { %v12760_v22 = vadd.f32 %v12759_v25, %v12758_v62  ;;  %v17262_v62 = vpop.f32.mrf.mxu1  ;;  %v1705_v25 = vld [vmem:[%s13675_s16 + $0x2c80] sm:$0xff] }
 0x614   : > { %v12761_v61 = vpop.f32.mrf.mxu0  ;;  %9399 = vmatmul.mubr.bf16.gmra.mxu0 %v2395_v48 }
 0x615   : > { %v17250_v19 = vadd.f32 %v12760_v22, %v17045_v37  ;;  %10447 = vmatprep.mubr.msk.bf16.mxu0 %vm5671_vm0, %v2442_v58  ;;  %v1751_v22 = vld [vmem:[%s13675_s16 + $0x2df0] sm:$0xff]  ;;  %v17270_v2 = vpop.f32.mrf.mxu1 }
 0x616   : > { %v12762_v14 = vpop.f32.mrf.mxu0  ;;  %v2487_v43 = vpack.c.bf16 %v1751_v22, %v1705_v25 }
 0x617   : > { %v12763_v54 = vadd.f32 %v12762_v14, %v12761_v61 }
 0x618   : > { %v12764_v7 = vpop.f32.mrf.mxu0 }
 0x619   : > { %v17260_v23 = vadd.f32 %v12763_v54, %v17052_v12 }
 0x61a   : > { %v12765_v37 = vpop.f32.mrf.mxu0 }
 0x61b   : > { %v12766_v9 = vadd.f32 %v12765_v37, %v12764_v7  ;;  %v17275_v7 = vpop.f32.mrf.mxu1 }
 0x61c   : > { %v12767_v48 = vpop.f32.mrf.mxu0  ;;  %9407 = vmatmul.mubr.bf16.gmra.mxu0 %v2441_v30 }
 0x61d   : > { %v17265_v58 = vadd.f32 %v12766_v9, %v17059_v15  ;;  %10448 = vmatprep.mubr.msk.bf16.mxu0 %vm5671_vm0, %v2488_v29  ;;  %v17280_v9 = vpop.f32.mrf.mxu1 }
 0x61e   : > { %v12768_v61 = vpop.f32.mrf.mxu0 }
 0x61f   : > { %v12769_v14 = vadd.f32 %v12768_v61, %v12767_v48  ;;  %v17285_v22 = vpop.f32.mrf.mxu1 }
 0x620   : > { %v12770_v12 = vpop.f32.mrf.mxu0 }
 0x621   : > { %v17273_v4 = vadd.f32 %v12769_v14, %v17064_v17 }
 0x622   : > { %v12771_v26 = vpop.f32.mrf.mxu0 }
 0x623   : > { %v12772_v54 = vadd.f32 %v12771_v26, %v12770_v12 }
 0x624   : > { %v12773_v30 = vpop.f32.mrf.mxu0  ;;  %9415 = vmatmul.mubr.bf16.gmra.mxu0 %v2487_v43 }
 0x625   : > { %v17278_v15 = vadd.f32 %v12772_v54, %v17072_v38  ;;  %v17290_v38 = vpop.f32.mrf.mxu1 }
 0x626   : > { %v12774_v29 = vpop.f32.mrf.mxu0 }
 0x627   : > { %17577 = vst [vmem:[#allocation2_spill] sm:$0xff] %v17278_v15  ;;  %v12775_v37 = vadd.f32 %v12774_v29, %v12773_v30 }
 0x628   : > { %v12776_v48 = vpop.f32.mrf.mxu0 }
 0x629   : > { %v17283_v61 = vadd.f32 %v12775_v37, %v17075_v56  ;;  %v17295_v56 = vpop.f32.mrf.mxu1 }
 0x62a   : > { %v12777_v25 = vpop.f32.mrf.mxu0 }
 0x62b   : > { %17578 = vst [vmem:[#allocation3_spill] sm:$0xff] %v17283_v61  ;;  %v12778_v17 = vadd.f32 %v12777_v25, %v12776_v48 }
 0x62c   : > { %v12779_v14 = vpop.f32.mrf.mxu0 }
 0x62d   : > { %v17288_v12 = vadd.f32 %v12778_v17, %v17083_v6  ;;  %v17300_v6 = vpop.f32.mrf.mxu1 }
 0x62e   : > { %v12780_v43 = vpop.f32.mrf.mxu0 }
 0x62f   : > { %17579 = vst [vmem:[#allocation4_spill] sm:$0xff] %v17288_v12  ;;  %v12781_v26 = vadd.f32 %v12780_v43, %v12779_v14 }
 0x630   : > { %v12782_v54 = vpop.f32.mrf.mxu0 }
 0x631   : > { %v17293_v30 = vadd.f32 %v12781_v26, %v17086_v39  ;;  %v17305_v39 = vpop.f32.mrf.mxu1 }
 0x632   : > { %v12783_v29 = vpop.f32.mrf.mxu0 }
 0x633   : > { %17580 = vst [vmem:[#allocation5_spill] sm:$0xff] %v17293_v30  ;;  %v12784_v15 = vadd.f32 %v12783_v29, %v12782_v54 }
 0x634   : > { %v12785_v37 = vpop.f32.mrf.mxu0 }
 0x635   : > { %v17298_v48 = vadd.f32 %v12784_v15, %v17094_v52  ;;  %v17310_v52 = vpop.f32.mrf.mxu1 }
 0x636   : > { %v12786_v25 = vpop.f32.mrf.mxu0 }
 0x637   : > { %17581 = vst [vmem:[#allocation6_spill] sm:$0xff] %v17298_v48  ;;  %v12787_v61 = vadd.f32 %v12786_v25, %v12785_v37 }
 0x638   : > { %v12788_v17 = vpop.f32.mrf.mxu0 }
 0x639   : > { %v17303_v14 = vadd.f32 %v12787_v61, %v17100_v49  ;;  %v17315_v49 = vpop.f32.mrf.mxu1 }
 0x63a   : > { %v12789_v43 = vpop.f32.mrf.mxu0 }
 0x63b   : > { %17582 = vst [vmem:[#allocation7_spill] sm:$0xff] %v17303_v14  ;;  %v12790_v12 = vadd.f32 %v12789_v43, %v12788_v17 }
 0x63c   : > { %v12791_v26 = vpop.f32.mrf.mxu0 }
 0x63d   : > { %v17308_v54 = vadd.f32 %v12790_v12, %v17108_v31  ;;  %v17320_v31 = vpop.f32.mrf.mxu1 }
 0x63e   : > { %v12792_v29 = vpop.f32.mrf.mxu0 }
 0x63f   : > { %17583 = vst [vmem:[#allocation8_spill] sm:$0xff] %v17308_v54  ;;  %v12793_v30 = vadd.f32 %v12792_v29, %v12791_v26 }
 0x640   : > { %v12794_v15 = vpop.f32.mrf.mxu0 }
 0x641   : > { %v17313_v37 = vadd.f32 %v12793_v30, %v17111_v21  ;;  %v17325_v21 = vpop.f32.mrf.mxu1 }
 0x642   : > { %v12795_v25 = vpop.f32.mrf.mxu0 }
 0x643   : > { %17584 = vst [vmem:[#allocation9_spill] sm:$0xff] %v17313_v37  ;;  %v12796_v48 = vadd.f32 %v12795_v25, %v12794_v15 }
 0x644   : > { %v12797_v61 = vpop.f32.mrf.mxu0 }
 0x645   : > { %v17318_v17 = vadd.f32 %v12796_v48, %v17119_v36  ;;  %v17330_v36 = vpop.f32.mrf.mxu1 }
 0x646   : > { %v12798_v43 = vpop.f32.mrf.mxu0 }
 0x647   : > { %17585 = vst [vmem:[#allocation10_spill] sm:$0xff] %v17318_v17  ;;  %v12799_v14 = vadd.f32 %v12798_v43, %v12797_v61 }
 0x648   : > { %v12800_v12 = vpop.f32.mrf.mxu0 }
 0x649   : > { %v17323_v26 = vadd.f32 %v12799_v14, %v17122_v24  ;;  %v17335_v24 = vpop.f32.mrf.mxu1 }
 0x64a   : > { %v12801_v29 = vpop.f32.mrf.mxu0 }
 0x64b   : > { %17586 = vst [vmem:[#allocation11_spill] sm:$0xff] %v17323_v26  ;;  %v12802_v54 = vadd.f32 %v12801_v29, %v12800_v12 }
 0x64c   : > { %v12803_v30 = vpop.f32.mrf.mxu0 }
 0x64d   : > { %v17328_v15 = vadd.f32 %v12802_v54, %v17130_v16  ;;  %v17340_v16 = vpop.f32.mrf.mxu1 }
 0x64e   : > { %v12804_v25 = vpop.f32.mrf.mxu0 }
 0x64f   : > { %17587 = vst [vmem:[#allocation12_spill] sm:$0xff] %v17328_v15  ;;  %v12805_v37 = vadd.f32 %v12804_v25, %v12803_v30 }
 0x650   : > { %v12806_v48 = vpop.f32.mrf.mxu0 }
 0x651   : > { %v17333_v61 = vadd.f32 %v12805_v37, %v17133_v45  ;;  %v17345_v45 = vpop.f32.mrf.mxu1 }
 0x652   : > { %v12807_v43 = vpop.f32.mrf.mxu0 }
 0x653   : > { %17588 = vst [vmem:[#allocation13_spill] sm:$0xff] %v17333_v61  ;;  %v12808_v17 = vadd.f32 %v12807_v43, %v12806_v48 }
 0x654   : > { %v12809_v14 = vpop.f32.mrf.mxu0 }
 0x655   : > { %v17338_v12 = vadd.f32 %v12808_v17, %v17141_v0  ;;  %v17350_v0 = vpop.f32.mrf.mxu1 }
 0x656   : > { %v12810_v29 = vpop.f32.mrf.mxu0 }
 0x657   : > { %17589 = vst [vmem:[#allocation14_spill] sm:$0xff] %v17338_v12  ;;  %v12811_v26 = vadd.f32 %v12810_v29, %v12809_v14 }
 0x658   : > { %v12812_v54 = vpop.f32.mrf.mxu0 }
 0x659   : > { %v17343_v30 = vadd.f32 %v12811_v26, %v17144_v41  ;;  %v17355_v41 = vpop.f32.mrf.mxu1 }
 0x65a   : > { %v12813_v25 = vpop.f32.mrf.mxu0 }
 0x65b   : > { %17590 = vst [vmem:[#allocation15_spill] sm:$0xff] %v17343_v30  ;;  %v12814_v15 = vadd.f32 %v12813_v25, %v12812_v54 }
 0x65c   : > { %v12815_v37 = vpop.f32.mrf.mxu0 }
 0x65d   : > { %v17348_v48 = vadd.f32 %v12814_v15, %v17152_v47  ;;  %v17360_v47 = vpop.f32.mrf.mxu1 }
 0x65e   : > { %v12816_v43 = vpop.f32.mrf.mxu0 }
 0x65f   : > { %v12817_v61 = vadd.f32 %v12816_v43, %v12815_v37  ;;  %v12845_v37 = vadd.f32 %v17181_v53, %v17174_v1 }
 0x660   : > { %v12818_v17 = vpop.f32.mrf.mxu0 }
 0x661   : > { %v17353_v14 = vadd.f32 %v12817_v61, %v17155_v13  ;;  %v12848_v61 = vadd.f32 %v17188_v55, %v17183_v32  ;;  %v12851_v55 = vadd.f32 %v17200_v60, %v17195_v34 }
 0x662   : > { %v12819_v29 = vpop.f32.mrf.mxu0 }
 0x663   : > { %v12820_v12 = vadd.f32 %v12819_v29, %v12818_v17  ;;  %v17369_v29 = vpop.f32.mrf.mxu1  ;;  %v9139_v1 = vadd.f32 %v12848_v61, %v17186_v33 }
 0x664   : > { %v12821_v26 = vpop.f32.mrf.mxu0 }
 0x665   : > { %v17358_v54 = vadd.f32 %v12820_v12, %v17163_v42  ;;  %v17379_v53 = vpop.f32.mrf.mxu1 }
 0x666   : > { %v12822_v25 = vpop.f32.mrf.mxu0 }
 0x667   : > { %17591 = vst [vmem:[#allocation16_spill] sm:$0xff] %v17358_v54  ;;  %v12823_v30 = vadd.f32 %v12822_v25, %v12821_v26  ;;  %v9136_v26 = vadd.f32 %v12845_v37, %v17179_v3  ;;  %v12854_v3 = vadd.f32 %v17212_v40, %v17202_v44  ;;  %v12857_v44 = vadd.f32 %v17227_v5, %v17217_v28 }
 0x668   : > { %v12824_v15 = vpop.f32.mrf.mxu0 }
 0x669   : > { %v17365_v43 = vadd.f32 %v12823_v30, %v17166_v18  ;;  %v13518_v18 = vld [vmem:[%s17575_s5 + $0x38] sm:$0xff]   ;;  %v9147_v34 = vadd.f32 %v12854_v3, %v17205_v50  ;;  %v13519_v50 = vld [vmem:[%s17575_s5 + $0x30] sm:$0xff]  }
 0x66a   : > { %v12825_v13 = vpop.f32.mrf.mxu0  ;;  %13014 = vmatprep.subr.bf16.mxu1 %v13518_v18 }
 0x66b   : > { %v12826_v17 = vadd.f32 %v12825_v13, %v12824_v15  ;;  %v17385_v13 = vpop.f32.mrf.mxu1 }
 0x66c   : > { %v9296_v42 = vpop.f32.mrf.mxu0 }
 0x66d   : > { %v17372_v12 = vadd.f32 %v12826_v17, %v17176_v46  ;;  %v9297_v54 = vadd.f32 %v9296_v42, %v9136_v26  ;;  %v9144_v17 = vadd.f32 %v12851_v55, %v17198_v51  ;;  %v17390_v60 = vpop.f32.mrf.mxu1 }
 0x66e   : > { %v9298_v25 = vpop.f32.mrf.mxu0 }
 0x66f   : > { %v9423_v15 = vmax.f32 %v9297_v54, 0.0  ;;  %v17396_v51 = vpop.f32.mrf.mxu1 }
 0x670   : > { %v9299_v32 = vpop.f32.mrf.mxu0 }
 0x671   : > { %v9300_v30 = vadd.f32 %v9299_v32, %v9139_v1  ;;  %v12860_v1 = vadd.f32 %v17242_v27, %v17232_v57  ;;  %v17404_v5 = vpop.f32.mrf.mxu1  ;;  %v12863_v27 = vadd.f32 %v17257_v11, %v17247_v10  ;;  %v13521_v10 = vld [vmem:[%s17575_s5 + $0x20] sm:$0xff]  }
 0x672   : > { %v9301_v46 = vpop.f32.mrf.mxu0 }
 0x673   : > { %v9424_v37 = vmax.f32 %v9300_v30, 0.0  ;;  %v9155_v28 = vadd.f32 %v12860_v1, %v17220_v8  ;;  %v17413_v8 = vpop.f32.mrf.mxu1 }
 0x674   : > { %v9304_v33 = vpop.f32.mrf.mxu0 }
 0x675   : > { %v9455_v61 = vpack.c.bf16 %v9424_v37, %v9423_v15  ;;  %v9305_v26 = vadd.f32 %v9304_v33, %v9144_v17  ;;  %v9152_v15 = vadd.f32 %v12857_v44, %v17215_v63  ;;  %v13520_v63 = vld [vmem:[%s17575_s5 + $0x28] sm:$0xff]   ;;  %v12866_v17 = vadd.f32 %v17270_v2, %v17262_v62  ;;  %v17421_v2 = vpop.f32.mrf.mxu1 }
 0x676   : > { %v9306_v42 = vpop.f32.mrf.mxu0 }
 0x677   : > { %12982 = vmatprep.mubr.msk.bf16.mxu1 %vm9472_vm2, %v9455_v61  ;;  %v9425_v32 = vmax.f32 %v9305_v26, 0.0  ;;  %v9163_v62 = vadd.f32 %v12866_v17, %v17235_v59  ;;  %v17430_v59 = vpop.f32.mrf.mxu1 }
 0x678   : > { %v9307_v25 = vpop.f32.mrf.mxu0 }
 0x679   : > { %v9308_v40 = vadd.f32 %v9307_v25, %v9147_v34  ;;  %v9160_v25 = vadd.f32 %v12863_v27, %v17230_v20  ;;  %v13522_v20 = vld [vmem:[%s17575_s5 + $0x18] sm:$0xff]  }
 0x67a   : > { %v9309_v54 = vpop.f32.mrf.mxu0 }
 0x67b   : > { %v9426_v30 = vmax.f32 %v9308_v40, 0.0  ;;  %v12869_v54 = vadd.f32 %v17280_v9, %v17275_v7 }
 0x67c   : > { %v9312_v55 = vpop.f32.mrf.mxu0 }
 0x67d   : > { %v9456_v46 = vpack.c.bf16 %v9426_v30, %v9425_v32  ;;  %v9313_v37 = vadd.f32 %v9312_v55, %v9152_v15  ;;  %v12872_v30 = vadd.f32 %v17290_v38, %v17285_v22  ;;  %v12875_v22 = vadd.f32 %v17300_v6, %v17295_v56 }
 0x67e   : > { %v9314_v3 = vpop.f32.mrf.mxu0 }
 0x67f   : > { %12983 = vmatmul.mubr.msk.bf16.vlgmr.msra.gmra.mxu1 %vm9472_vm2, %v9456_v46  ;;  %v9427_v42 = vmax.f32 %v9313_v37, 0.0  ;;  %v9168_v3 = vadd.f32 %v12869_v54, %v17245_v35  ;;  %v9171_v37 = vadd.f32 %v12872_v30, %v17250_v19  ;;  %v9176_v19 = vadd.f32 %v12875_v22, %v17260_v23  ;;  %v17594_v22 = vld [vmem:[#allocation4_spill] sm:$0xff] }
 0x680   : > { %v9315_v57 = vpop.f32.mrf.mxu0  ;;  %13015 = vmatpush3.bf16.msra.mxu1 %v13518_v18 }
 0x681   : > { %v9316_v33 = vadd.f32 %v9315_v57, %v9155_v28  ;;  %13016 = vmatprep.subr.bf16.mxu1 %v13519_v50  ;;  %v17435_v28 = vpop.f32.mrf.mxu1 }
 0x682   : > { %v9317_v61 = vpop.f32.mrf.mxu0 }
 0x683   : > { %v9428_v26 = vmax.f32 %v9316_v33, 0.0  ;;  %v12878_v33 = vadd.f32 %v17310_v52, %v17305_v39  ;;  %v17441_v61 = vpop.f32.mrf.mxu1  ;;  %v12881_v39 = vadd.f32 %v17320_v31, %v17315_v49 }
 0x684   : > { %v9320_v34 = vpop.f32.mrf.mxu0  ;;  %13017 = vmatpush3.bf16.msra.mxu1 %v13519_v50 }
 0x685   : > { %v9457_v18 = vpack.c.bf16 %v9428_v26, %v9427_v42  ;;  %13018 = vmatprep.subr.bf16.mxu1 %v13520_v63  ;;  %v9321_v44 = vadd.f32 %v9320_v34, %v9160_v25  ;;  %v17446_v56 = vpop.f32.mrf.mxu1  ;;  %v9184_v54 = vadd.f32 %v12881_v39, %v17273_v4  ;;  %v17596_v39 = vld [vmem:[#allocation6_spill] sm:$0xff] }
 0x686   : > { %v9322_v11 = vpop.f32.mrf.mxu0 }
 0x687   : > { %12986 = vmatprep.mubr.msk.bf16.mxu1 %vm9472_vm2, %v9457_v18  ;;  %v9429_v55 = vmax.f32 %v9321_v44, 0.0  ;;  %v9179_v18 = vadd.f32 %v12878_v33, %v17265_v58  ;;  %v17452_v23 = vpop.f32.mrf.mxu1  ;;  %v12896_v33 = vadd.f32 %v17379_v53, %v17369_v29 }
 0x688   : > { %v9323_v40 = vpop.f32.mrf.mxu0  ;;  %13019 = vmatpush3.bf16.msra.mxu1 %v13520_v63 }
 0x689   : > { %v9324_v1 = vadd.f32 %v9323_v40, %v9163_v62  ;;  %13020 = vmatprep.subr.bf16.mxu1 %v13521_v10  ;;  %v17457_v49 = vpop.f32.mrf.mxu1 }
 0x68a   : > { %v9325_v32 = vpop.f32.mrf.mxu0 }
 0x68b   : > { %v9430_v46 = vmax.f32 %v9324_v1, 0.0  ;;  %v17463_v4 = vpop.f32.mrf.mxu1 }
 0x68c   : > { %v9328_v15 = vpop.f32.mrf.mxu0  ;;  %13021 = vmatpush3.bf16.msra.mxu1 %v13521_v10  ;;  %v12884_v10 = vadd.f32 %v17330_v36, %v17325_v21  ;;  %v12887_v21 = vadd.f32 %v17340_v16, %v17335_v24 }
 0x68d   : > { %v9458_v50 = vpack.c.bf16 %v9430_v46, %v9429_v55  ;;  %13022 = vmatprep.subr.bf16.mxu1 %v13522_v20  ;;  %v9329_v9 = vadd.f32 %v9328_v15, %v9168_v3  ;;  %v12890_v55 = vadd.f32 %v17350_v0, %v17345_v45  ;;  %v17468_v24 = vpop.f32.mrf.mxu1  ;;  %v12893_v45 = vadd.f32 %v17360_v47, %v17355_v41 }
 0x68e   : > { %v9330_v7 = vpop.f32.mrf.mxu0 }
 0x68f   : > { %12987 = vmatmul.mubr.msk.bf16.gmra.mxu1 %vm9472_vm2, %v9458_v50  ;;  %v9431_v35 = vmax.f32 %v9329_v9, 0.0  ;;  %v17593_v7 = vld [vmem:[#allocation3_spill] sm:$0xff] }
 0x690   : > { %v9331_v57 = vpop.f32.mrf.mxu0  ;;  %13023 = vmatpush3.bf16.msra.mxu1 %v13522_v20  ;;  %v17592_v20 = vld [vmem:[#allocation2_spill] sm:$0xff]  ;;  %v9192_v9 = vadd.f32 %v12887_v21, %v17593_v7  ;;  %v17599_v7 = vld [vmem:[#allocation9_spill] sm:$0xff] }
 0x691   : > { %v9332_v38 = vadd.f32 %v9331_v57, %v9171_v37  ;;  %v9187_v32 = vadd.f32 %v12884_v10, %v17592_v20  ;;  %v12902_v10 = vadd.f32 %v17404_v5, %v17396_v51 }
 0x692   : > { %v9333_v27 = vpop.f32.mrf.mxu0 }
 0x693   : > { %v9432_v63 = vmax.f32 %v9332_v38, 0.0  ;;  %v9195_v38 = vadd.f32 %v12890_v55, %v17594_v22 }
 0x694   : > { %v9336_v17 = vpop.f32.mrf.mxu0 }
 0x695   : > { %v9459_v42 = vpack.c.bf16 %v9432_v63, %v9431_v35  ;;  %v9337_v34 = vadd.f32 %v9336_v17, %v9176_v19  ;;  %v17474_v17 = vpop.f32.mrf.mxu1 }
 0x696   : > { %v9338_v26 = vpop.f32.mrf.mxu0 }
 0x697   : > { %12990 = vmatprep.mubr.msk.bf16.mxu1 %vm9472_vm2, %v9459_v42  ;;  %v9433_v11 = vmax.f32 %v9337_v34, 0.0  ;;  %v17595_v26 = vld [vmem:[#allocation5_spill] sm:$0xff]  ;;  %v12919_v41 = vpop.f32.mrf.mxu1 }
 0x698   : > { %v9339_v6 = vpop.f32.mrf.mxu0  ;;  %v9200_v34 = vadd.f32 %v12893_v45, %v17595_v26  ;;  %v17601_v26 = vld [vmem:[#allocation11_spill] sm:$0xff] }
 0x699   : > { %v9340_v52 = vadd.f32 %v9339_v6, %v9179_v18 }
 0x69a   : > { %v9341_v25 = vpop.f32.mrf.mxu0 }
 0x69b   : > { %v9434_v44 = vmax.f32 %v9340_v52, 0.0  ;;  %v9203_v52 = vadd.f32 %v12896_v33, %v17596_v39  ;;  %v12899_v25 = vadd.f32 %v17390_v60, %v17385_v13 }
 0x69c   : > { %v9344_v62 = vpop.f32.mrf.mxu0 }
 0x69d   : > { %v9460_v40 = vpack.c.bf16 %v9434_v44, %v9433_v11  ;;  %v9345_v1 = vadd.f32 %v9344_v62, %v9184_v54  ;;  %v17483_v62 = vpop.f32.mrf.mxu1 }
 0x69e   : > { %v9346_v58 = vpop.f32.mrf.mxu0 }
 0x69f   : > { %12991 = vmatmul.mubr.msk.bf16.gmra.mxu1 %vm9472_vm2, %v9460_v40  ;;  %v9435_v46 = vmax.f32 %v9345_v1, 0.0  ;;  %v17597_v58 = vld [vmem:[#allocation7_spill] sm:$0xff]  ;;  %v12922_v13 = vpop.f32.mrf.mxu1 }
 0x6a0   : > { %v9347_v31 = vpop.f32.mrf.mxu0  ;;  %v9208_v1 = vadd.f32 %v12899_v25, %v17597_v58 }
 0x6a1   : > { %v9348_v36 = vadd.f32 %v9347_v31, %v9187_v32  ;;  %v17598_v31 = vld [vmem:[#allocation8_spill] sm:$0xff] }
 0x6a2   : > { %v9349_v30 = vpop.f32.mrf.mxu0  ;;  %v9211_v21 = vadd.f32 %v12902_v10, %v17598_v31 }
 0x6a3   : > { %v9436_v15 = vmax.f32 %v9348_v36, 0.0  ;;  %v12905_v36 = vadd.f32 %v17421_v2, %v17413_v8  ;;  %v12908_v30 = vadd.f32 %v17435_v28, %v17430_v59  ;;  %v17600_v8 = vld [vmem:[#allocation10_spill] sm:$0xff]  ;;  %v12911_v59 = vadd.f32 %v17446_v56, %v17441_v61 }
 0x6a4   : > { %v9352_v50 = vpop.f32.mrf.mxu0  ;;  %v13525_v56 = vld [vmem:[%s17575_s5] sm:$0xff]  }
 0x6a5   : > { %v9461_v3 = vpack.c.bf16 %v9436_v15, %v9435_v46  ;;  %v9353_v57 = vadd.f32 %v9352_v50, %v9192_v9  ;;  %v12924_v15 = vpop.f32.mrf.mxu1  ;;  %v9216_v9 = vadd.f32 %v12905_v36, %v17599_v7  ;;  %v9219_v2 = vadd.f32 %v12908_v30, %v17600_v8 }
 0x6a6   : > { %v9354_v37 = vpop.f32.mrf.mxu0 }
 0x6a7   : > { %12994 = vmatprep.mubr.msk.bf16.mxu1 %vm9472_vm2, %v9461_v3  ;;  %v9437_v35 = vmax.f32 %v9353_v57, 0.0  ;;  %v13523_v57 = vld [vmem:[%s17575_s5 + $0x10] sm:$0xff]  }
 0x6a8   : > { %v9355_v16 = vpop.f32.mrf.mxu0  ;;  %13024 = vmatprep.subr.bf16.mxu1 %v13523_v57 }
 0x6a9   : > { %v9356_v0 = vadd.f32 %v9355_v16, %v9195_v38  ;;  %v12925_v38 = vpop.f32.mrf.mxu1  ;;  %13025 = vmatpush3.bf16.msra.mxu1 %v13523_v57 }
 0x6aa   : > { %v9357_v27 = vpop.f32.mrf.mxu0 }
 0x6ab   : > { %v9438_v63 = vmax.f32 %v9356_v0, 0.0  ;;  %v13524_v0 = vld [vmem:[%s17575_s5 + $0x8] sm:$0xff]   ;;  %v12914_v27 = vadd.f32 %v17457_v49, %v17452_v23 }
 0x6ac   : > { %v9360_v42 = vpop.f32.mrf.mxu0  ;;  %13026 = vmatprep.subr.bf16.mxu1 %v13524_v0 }
 0x6ad   : > { %v9462_v19 = vpack.c.bf16 %v9438_v63, %v9437_v35  ;;  %v9361_v6 = vadd.f32 %v9360_v42, %v9200_v34  ;;  %v12927_v63 = vpop.f32.mrf.mxu1  ;;  %v9224_v34 = vadd.f32 %v12911_v59, %v17601_v26  ;;  %13027 = vmatpush3.bf16.msra.mxu1 %v13524_v0 }
 0x6ae   : > { %v9362_v18 = vpop.f32.mrf.mxu0  ;;  %13028 = vmatprep.subr.bf16.mxu1 %v13525_v56 }
 0x6af   : > { %12995 = vmatmul.mubr.msk.bf16.gmra.mxu1 %vm9472_vm2, %v9462_v19  ;;  %v9439_v11 = vmax.f32 %v9361_v6, 0.0  ;;  %v17602_v6 = vld [vmem:[#allocation12_spill] sm:$0xff]  ;;  %v12928_v23 = vpop.f32.mrf.mxu1 }
 0x6b0   : > { %v9363_v47 = vpop.f32.mrf.mxu0  ;;  %v9227_v39 = vadd.f32 %v12914_v27, %v17602_v6  ;;  %v17606_v27 = vld [vmem:[#allocation16_spill] sm:$0xff] }
 0x6b1   : > { %v9364_v29 = vadd.f32 %v9363_v47, %v9203_v52  ;;  %v12917_v52 = vadd.f32 %v17468_v24, %v17463_v4  ;;  %13029 = vmatpush3.bf16.msra.mxu1 %v13525_v56  ;;  %v12923_v24 = vadd.f32 %v12922_v13, %v17483_v62 }
 0x6b2   : > { %v9365_v53 = vpop.f32.mrf.mxu0 }
 0x6b3   : > { %v9440_v44 = vmax.f32 %v9364_v29, 0.0  ;;  %v12920_v29 = vadd.f32 %v12919_v41, %v17474_v17  ;;  %v12926_v17 = vadd.f32 %v12925_v38, %v12924_v15 }
 0x6b4   : > { %v9368_v40 = vpop.f32.mrf.mxu0 }
 0x6b5   : > { %v9463_v54 = vpack.c.bf16 %v9440_v44, %v9439_v11  ;;  %v9369_v32 = vadd.f32 %v9368_v40, %v9208_v1  ;;  %v12930_v11 = vpop.f32.mrf.mxu1 }
 0x6b6   : > { %v9370_v20 = vpop.f32.mrf.mxu0 }
 0x6b7   : > { %12998 = vmatprep.mubr.msk.bf16.mxu1 %vm9472_vm2, %v9463_v54  ;;  %v9441_v55 = vmax.f32 %v9369_v32, 0.0  ;;  %v17603_v54 = vld [vmem:[#allocation13_spill] sm:$0xff]  ;;  %v17604_v32 = vld [vmem:[#allocation14_spill] sm:$0xff] }
 0x6b8   : > { %v9371_v60 = vpop.f32.mrf.mxu0  ;;  %v9232_v58 = vadd.f32 %v12917_v52, %v17603_v54  ;;  %v9235_v31 = vadd.f32 %v12920_v29, %v17604_v32 }
 0x6b9   : > { %v9372_v51 = vadd.f32 %v9371_v60, %v9211_v21  ;;  %v12931_v21 = vpop.f32.mrf.mxu1 }
 0x6ba   : > { %v9373_v5 = vpop.f32.mrf.mxu0  ;;  %v12932_v8 = vadd.f32 %v12931_v21, %v12930_v11 }
 0x6bb   : > { %v9442_v46 = vmax.f32 %v9372_v51, 0.0  ;;  %v12933_v5 = vpop.f32.mrf.mxu1 }
 0x6bc   : > { %v9376_v50 = vpop.f32.mrf.mxu0 }
 0x6bd   : > { %v9464_v3 = vpack.c.bf16 %v9442_v46, %v9441_v55  ;;  %v9377_v22 = vadd.f32 %v9376_v50, %v9216_v9  ;;  %v17605_v46 = vld [vmem:[#allocation15_spill] sm:$0xff]  ;;  %v9243_v9 = vadd.f32 %v12926_v17, %v17348_v48 }
 0x6be   : > { %v9378_v37 = vpop.f32.mrf.mxu0  ;;  %v9240_v50 = vadd.f32 %v12923_v24, %v17605_v46 }
 0x6bf   : > { %12999 = vmatmul.mubr.msk.bf16.gmra.mxu1 %vm9472_vm2, %v9464_v3  ;;  %v9443_v33 = vmax.f32 %v9377_v22, 0.0  ;;  %v12934_v37 = vpop.f32.mrf.mxu1  ;;  %v12929_v22 = vadd.f32 %v12928_v23, %v12927_v63 }
 0x6c0   : > { %v9379_v16 = vpop.f32.mrf.mxu0 }
 0x6c1   : > { %v9380_v28 = vadd.f32 %v9379_v16, %v9219_v2  ;;  %v12936_v38 = vpop.f32.mrf.mxu1 }
 0x6c2   : > { %v9381_v45 = vpop.f32.mrf.mxu0 }
 0x6c3   : > { %v9444_v35 = vmax.f32 %v9380_v28, 0.0  ;;  %v9248_v28 = vadd.f32 %v12929_v22, %v17353_v14  ;;  %v12937_v48 = vpop.f32.mrf.mxu1 }
 0x6c4   : > { %v9384_v42 = vpop.f32.mrf.mxu0  ;;  %v12938_v26 = vadd.f32 %v12937_v48, %v12936_v38 }
 0x6c5   : > { %v9465_v19 = vpack.c.bf16 %v9444_v35, %v9443_v33  ;;  %v9385_v18 = vadd.f32 %v9384_v42, %v9224_v34  ;;  %v9251_v33 = vadd.f32 %v12932_v8, %v17606_v27  ;;  %v12935_v42 = vadd.f32 %v12934_v37, %v12933_v5 }
 0x6c6   : > { %v9386_v61 = vpop.f32.mrf.mxu0  ;;  %v9259_v23 = vadd.f32 %v12938_v26, %v17372_v12 }
 0x6c7   : > { %13002 = vmatprep.mubr.msk.bf16.mxu1 %vm9472_vm2, %v9465_v19  ;;  %v9445_v53 = vmax.f32 %v9385_v18, 0.0  ;;  %v9256_v6 = vadd.f32 %v12935_v42, %v17365_v43 }
 0x6c8   : > { %v9387_v49 = vpop.f32.mrf.mxu0 }
 0x6c9   : > { %v9388_v47 = vadd.f32 %v9387_v49, %v9227_v39 }
 0x6ca   : > { %v9389_v25 = vpop.f32.mrf.mxu0 }
 0x6cb   : > { %v9446_v10 = vmax.f32 %v9388_v47, 0.0 }
 0x6cc   : > { %v9392_v44 = vpop.f32.mrf.mxu0 }
 0x6cd   : > { %v9466_v40 = vpack.c.bf16 %v9446_v10, %v9445_v53  ;;  %v9393_v20 = vadd.f32 %v9392_v44, %v9232_v58 }
 0x6ce   : > { %v9394_v1 = vpop.f32.mrf.mxu0 }
 0x6cf   : > { %13003 = vmatmul.mubr.msk.bf16.gmra.mxu1 %vm9472_vm2, %v9466_v40  ;;  %v9447_v41 = vmax.f32 %v9393_v20, 0.0 }
 0x6d0   : > { %v9395_v4 = vpop.f32.mrf.mxu0 }
 0x6d1   : > { %v9396_v60 = vadd.f32 %v9395_v4, %v9235_v31 }
 0x6d2   : > { %v9397_v36 = vpop.f32.mrf.mxu0 }
 0x6d3   : > { %v9448_v51 = vmax.f32 %v9396_v60, 0.0 }
 0x6d4   : > { %v9400_v30 = vpop.f32.mrf.mxu0 }
 0x6d5   : > { %v9467_v55 = vpack.c.bf16 %v9448_v51, %v9447_v41  ;;  %v9401_v7 = vadd.f32 %v9400_v30, %v9240_v50 }
 0x6d6   : > { %v9402_v3 = vpop.f32.mrf.mxu0 }
 0x6d7   : > { %13006 = vmatprep.mubr.msk.bf16.mxu1 %vm9472_vm2, %v9467_v55  ;;  %v9449_v15 = vmax.f32 %v9401_v7, 0.0 }
 0x6d8   : > { %v9403_v57 = vpop.f32.mrf.mxu0 }
 0x6d9   : > { %v9404_v62 = vadd.f32 %v9403_v57, %v9243_v9 }
 0x6da   : > { %v9405_v13 = vpop.f32.mrf.mxu0 }
 0x6db   : > { %v9450_v2 = vmax.f32 %v9404_v62, 0.0 }
 0x6dc   : > { %v9408_v16 = vpop.f32.mrf.mxu0 }
 0x6dd   : > { %v9468_v59 = vpack.c.bf16 %v9450_v2, %v9449_v15  ;;  %v9409_v0 = vadd.f32 %v9408_v16, %v9248_v28 }
 0x6de   : > { %v9410_v45 = vpop.f32.mrf.mxu0 }
 0x6df   : > { %13007 = vmatmul.mubr.msk.bf16.gmra.mxu1 %vm9472_vm2, %v9468_v59  ;;  %v9451_v34 = vmax.f32 %v9409_v0, 0.0 }
 0x6e0   : > { %v9411_v35 = vpop.f32.mrf.mxu0 }
 0x6e1   : > { %v9412_v63 = vadd.f32 %v9411_v35, %v9251_v33 }
 0x6e2   : > { %v9413_v19 = vpop.f32.mrf.mxu0 }
 0x6e3   : > { %v9452_v61 = vmax.f32 %v9412_v63, 0.0 }
 0x6e4   : > { %v9416_v56 = vpop.f32.mrf.mxu0 }
 0x6e5   : > { %v9469_v18 = vpack.c.bf16 %v9452_v61, %v9451_v34  ;;  %v9417_v14 = vadd.f32 %v9416_v56, %v9256_v6 }
 0x6e6   : > { %v9418_v39 = vpop.f32.mrf.mxu0 }
 0x6e7   : > { %13010 = vmatprep.mubr.msk.bf16.mxu1 %vm9472_vm2, %v9469_v18  ;;  %v9453_v25 = vmax.f32 %v9417_v14, 0.0 }
 0x6e8   : > { %v9419_v49 = vpop.f32.mrf.mxu0 }
 0x6e9   : > { %v9420_v52 = vadd.f32 %v9419_v49, %v9259_v23 }
 0x6ea   : > { %v9421_v47 = vpop.f32.mrf.mxu0 }
 0x6eb   : > { %v9454_v29 = vmax.f32 %v9420_v52, 0.0 }
 0x6ed   : > { %v9470_v53 = vpack.c.bf16 %v9454_v29, %v9453_v25 }
 0x6ef   : > { %13011 = vmatmul.mubr.msk.bf16.gmra.mxu1 %vm9472_vm2, %v9470_v53 }
 0x73f   : > { %v12984_v10 = vpop.f32.mrf.mxu1 }
 0x740   : > { %v9688_v1 = vmax.f32 %v12984_v10, 0.0 }
 0x741   : > { %v9559_v11 = vpop.f32.mrf.mxu1 }
 0x742   : > { %v9686_v43 = vmax.f32 %v9559_v11, 0.0 }
 0x743   : > { %v12985_v44 = vpop.f32.mrf.mxu1 }
 0x744   : > { %v9689_v40 = vmax.f32 %v12985_v44, 0.0 }
 0x745   : > { %v9562_v54 = vpop.f32.mrf.mxu1 }
 0x746   : > { %v9687_v58 = vmax.f32 %v9562_v54, 0.0  ;;  %v9719_v32 = vpack.c.bf16 %v9689_v40, %v9688_v1 }
 0x748   : > { %v9718_v20 = vpack.c.bf16 %v9687_v58, %v9686_v43 }
 0x74a   : > { %13030 = vmatprep.mubr.bf16.mxu1 %v9718_v20 }
 0x74b   : > { %13031 = vmatmul.mubr.bf16.vlgmr.msra.gmra.mxu1 %v9719_v32 }
 0x74f   : > { %v12988_v12 = vpop.f32.mrf.mxu1 }
 0x750   : > { %v9692_v17 = vmax.f32 %v12988_v12, 0.0 }
 0x751   : > { %v9575_v31 = vpop.f32.mrf.mxu1 }
 0x752   : > { %v9690_v60 = vmax.f32 %v9575_v31, 0.0 }
 0x753   : > { %v12989_v21 = vpop.f32.mrf.mxu1 }
 0x754   : > { %v9693_v4 = vmax.f32 %v12989_v21, 0.0 }
 0x755   : > { %v9578_v24 = vpop.f32.mrf.mxu1 }
 0x756   : > { %v9691_v36 = vmax.f32 %v9578_v24, 0.0  ;;  %v9721_v51 = vpack.c.bf16 %v9693_v4, %v9692_v17 }
 0x758   : > { %v9720_v41 = vpack.c.bf16 %v9691_v36, %v9690_v60 }
 0x75a   : > { %13034 = vmatprep.mubr.bf16.mxu1 %v9720_v41 }
 0x75b   : > { %13035 = vmatmul.mubr.bf16.gmra.mxu1 %v9721_v51 }
 0x75f   : > { %v12992_v5 = vpop.f32.mrf.mxu1 }
 0x760   : > { %v9696_v9 = vmax.f32 %v12992_v5, 0.0 }
 0x761   : > { %v9591_v30 = vpop.f32.mrf.mxu1 }
 0x762   : > { %v9694_v3 = vmax.f32 %v9591_v30, 0.0 }
 0x763   : > { %v12993_v55 = vpop.f32.mrf.mxu1 }
 0x764   : > { %v9697_v46 = vmax.f32 %v12993_v55, 0.0 }
 0x765   : > { %v9594_v50 = vpop.f32.mrf.mxu1 }
 0x766   : > { %v9695_v7 = vmax.f32 %v9594_v50, 0.0  ;;  %v9723_v57 = vpack.c.bf16 %v9697_v46, %v9696_v9 }
 0x768   : > { %v9722_v37 = vpack.c.bf16 %v9695_v7, %v9694_v3 }
 0x76a   : > { %13038 = vmatprep.mubr.bf16.mxu1 %v9722_v37 }
 0x76b   : > { %13039 = vmatmul.mubr.bf16.gmra.mxu1 %v9723_v57 }
 0x76f   : > { %v12996_v22 = vpop.f32.mrf.mxu1 }
 0x770   : > { %v9700_v16 = vmax.f32 %v12996_v22, 0.0 }
 0x771   : > { %v9607_v62 = vpop.f32.mrf.mxu1 }
 0x772   : > { %v9698_v2 = vmax.f32 %v9607_v62, 0.0 }
 0x773   : > { %v12997_v13 = vpop.f32.mrf.mxu1 }
 0x774   : > { %v9701_v8 = vmax.f32 %v12997_v13, 0.0 }
 0x775   : > { %v9610_v15 = vpop.f32.mrf.mxu1 }
 0x776   : > { %v9699_v38 = vmax.f32 %v9610_v15, 0.0  ;;  %v9725_v28 = vpack.c.bf16 %v9701_v8, %v9700_v16 }
 0x778   : > { %v9724_v59 = vpack.c.bf16 %v9699_v38, %v9698_v2 }
 0x77a   : > { %13042 = vmatprep.mubr.bf16.mxu1 %v9724_v59 }
 0x77b   : > { %13043 = vmatmul.mubr.bf16.gmra.mxu1 %v9725_v28 }
 0x77f   : > { %v13000_v45 = vpop.f32.mrf.mxu1 }
 0x780   : > { %v9704_v63 = vmax.f32 %v13000_v45, 0.0 }
 0x781   : > { %v9623_v0 = vpop.f32.mrf.mxu1 }
 0x782   : > { %v9702_v35 = vmax.f32 %v9623_v0, 0.0 }
 0x783   : > { %v13001_v27 = vpop.f32.mrf.mxu1 }
 0x784   : > { %v9705_v33 = vmax.f32 %v13001_v27, 0.0 }
 0x785   : > { %v9626_v48 = vpop.f32.mrf.mxu1 }
 0x786   : > { %v9703_v42 = vmax.f32 %v9626_v48, 0.0  ;;  %v9727_v26 = vpack.c.bf16 %v9705_v33, %v9704_v63 }
 0x788   : > { %v9726_v19 = vpack.c.bf16 %v9703_v42, %v9702_v35 }
 0x78a   : > { %13046 = vmatprep.mubr.bf16.mxu1 %v9726_v19 }
 0x78b   : > { %13047 = vmatmul.mubr.bf16.gmra.mxu1 %v9727_v26 }
 0x78f   : > { %v13004_v34 = vpop.f32.mrf.mxu1 }
 0x790   : > { %v9708_v23 = vmax.f32 %v13004_v34, 0.0 }
 0x791   : > { %v9639_v61 = vpop.f32.mrf.mxu1 }
 0x792   : > { %v9706_v39 = vmax.f32 %v9639_v61, 0.0 }
 0x793   : > { %v13005_v56 = vpop.f32.mrf.mxu1 }
 0x794   : > { %v9709_v18 = vmax.f32 %v13005_v56, 0.0 }
 0x795   : > { %v9642_v6 = vpop.f32.mrf.mxu1 }
 0x796   : > { %v9707_v14 = vmax.f32 %v9642_v6, 0.0  ;;  %v9729_v52 = vpack.c.bf16 %v9709_v18, %v9708_v23 }
 0x798   : > { %v9728_v49 = vpack.c.bf16 %v9707_v14, %v9706_v39 }
 0x79a   : > { %13050 = vmatprep.mubr.bf16.mxu1 %v9728_v49 }
 0x79b   : > { %13051 = vmatmul.mubr.bf16.gmra.mxu1 %v9729_v52 }
 0x79f   : > { %v13008_v47 = vpop.f32.mrf.mxu1 }
 0x7a0   : > { %v9712_v40 = vmax.f32 %v13008_v47, 0.0 }
 0x7a1   : > { %v9655_v25 = vpop.f32.mrf.mxu1 }
 0x7a2   : > { %v9710_v11 = vmax.f32 %v9655_v25, 0.0 }
 0x7a3   : > { %v13009_v29 = vpop.f32.mrf.mxu1 }
 0x7a4   : > { %v9713_v53 = vmax.f32 %v13009_v29, 0.0 }
 0x7a5   : > { %v9658_v10 = vpop.f32.mrf.mxu1 }
 0x7a6   : > { %v9711_v44 = vmax.f32 %v9658_v10, 0.0  ;;  %v9731_v43 = vpack.c.bf16 %v9713_v53, %v9712_v40 }
 0x7a8   : > { %v9730_v54 = vpack.c.bf16 %v9711_v44, %v9710_v11 }
 0x7aa   : > { %13054 = vmatprep.mubr.bf16.mxu1 %v9730_v54 }
 0x7ab   : > { %13055 = vmatmul.mubr.bf16.gmra.mxu1 %v9731_v43 }
 0x7af   : > { %v13012_v58 = vpop.f32.mrf.mxu1 }
 0x7b0   : > { %v9716_v4 = vmax.f32 %v13012_v58, 0.0 }
 0x7b1   : > { %v9671_v1 = vpop.f32.mrf.mxu1 }
 0x7b2   : > { %v9714_v31 = vmax.f32 %v9671_v1, 0.0 }
 0x7b3   : > { %v13013_v20 = vpop.f32.mrf.mxu1 }
 0x7b4   : > { %v9717_v32 = vmax.f32 %v13013_v20, 0.0 }
 0x7b5   : > { %v9674_v12 = vpop.f32.mrf.mxu1 }
 0x7b6   : > { %v9715_v21 = vmax.f32 %v9674_v12, 0.0  ;;  %v9733_v60 = vpack.c.bf16 %v9717_v32, %v9716_v4 }
 0x7b8   : > { %v9732_v24 = vpack.c.bf16 %v9715_v21, %v9714_v31 }
 0x7ba   : > { %13058 = vmatprep.mubr.bf16.mxu1 %v9732_v24 }
 0x7bb   : > { %13059 = vmatmul.mubr.bf16.gmra.mxu1 %v9733_v60 }
 0x80b   : > { %v13032_v36 = vpop.f32.mrf.mxu1 }
 0x80c   : > { %9961 = vst [vmem:[%s17533_s10 + $0x10] sm:$0xff] %v13032_v36 }
 0x80d   : > { %v9832_v17 = vpop.f32.mrf.mxu1 }
 0x80e   : > { %9959 = vst [vmem:[%s17533_s10] sm:$0xff] %v9832_v17 }
 0x80f   : > { %v13033_v41 = vpop.f32.mrf.mxu1 }
 0x810   : > { %9962 = vst [vmem:[%s17533_s10 + $0x18] sm:$0xff] %v13033_v41 }
 0x811   : > { %v9835_v51 = vpop.f32.mrf.mxu1 }
 0x812   : > { %9960 = vst [vmem:[%s17533_s10 + $0x8] sm:$0xff] %v9835_v51 }
 0x81b   : > { %v13036_v5 = vpop.f32.mrf.mxu1 }
 0x81c   : > { %9965 = vst [vmem:[%s17533_s10 + $0x30] sm:$0xff] %v13036_v5 }
 0x81d   : > { %v9848_v30 = vpop.f32.mrf.mxu1 }
 0x81e   : > { %9963 = vst [vmem:[%s17533_s10 + $0x20] sm:$0xff] %v9848_v30 }
 0x81f   : > { %v13037_v55 = vpop.f32.mrf.mxu1 }
 0x820   : > { %9966 = vst [vmem:[%s17533_s10 + $0x38] sm:$0xff] %v13037_v55 }
 0x821   : > { %v9851_v46 = vpop.f32.mrf.mxu1 }
 0x822   : > { %9964 = vst [vmem:[%s17533_s10 + $0x28] sm:$0xff] %v9851_v46 }
 0x82b   : > { %v13040_v50 = vpop.f32.mrf.mxu1 }
 0x82c   : > { %9969 = vst [vmem:[%s17533_s10 + $0x50] sm:$0xff] %v13040_v50 }
 0x82d   : > { %v9864_v3 = vpop.f32.mrf.mxu1 }
 0x82e   : > { %9967 = vst [vmem:[%s17533_s10 + $0x40] sm:$0xff] %v9864_v3 }
 0x82f   : > { %v13041_v7 = vpop.f32.mrf.mxu1 }
 0x830   : > { %9970 = vst [vmem:[%s17533_s10 + $0x58] sm:$0xff] %v13041_v7 }
 0x831   : > { %v9867_v9 = vpop.f32.mrf.mxu1 }
 0x832   : > { %9968 = vst [vmem:[%s17533_s10 + $0x48] sm:$0xff] %v9867_v9 }
 0x83b   : > { %v13044_v37 = vpop.f32.mrf.mxu1 }
 0x83c   : > { %9973 = vst [vmem:[%s17533_s10 + $0x70] sm:$0xff] %v13044_v37 }
 0x83d   : > { %v9880_v57 = vpop.f32.mrf.mxu1 }
 0x83e   : > { %9971 = vst [vmem:[%s17533_s10 + $0x60] sm:$0xff] %v9880_v57 }
 0x83f   : > { %v13045_v22 = vpop.f32.mrf.mxu1 }
 0x840   : > { %9974 = vst [vmem:[%s17533_s10 + $0x78] sm:$0xff] %v13045_v22 }
 0x841   : > { %v9883_v62 = vpop.f32.mrf.mxu1 }
 0x842   : > { %9972 = vst [vmem:[%s17533_s10 + $0x68] sm:$0xff] %v9883_v62 }
 0x84b   : > { %v13048_v13 = vpop.f32.mrf.mxu1 }
 0x84c   : > { %9977 = vst [vmem:[%s17533_s10 + $0x90] sm:$0xff] %v13048_v13 }
 0x84d   : > { %v9896_v8 = vpop.f32.mrf.mxu1 }
 0x84e   : > { %9975 = vst [vmem:[%s17533_s10 + $0x80] sm:$0xff] %v9896_v8 }
 0x84f   : > { %v13049_v15 = vpop.f32.mrf.mxu1 }
 0x850   : > { %9978 = vst [vmem:[%s17533_s10 + $0x98] sm:$0xff] %v13049_v15 }
 0x851   : > { %v9899_v2 = vpop.f32.mrf.mxu1 }
 0x852   : > { %9976 = vst [vmem:[%s17533_s10 + $0x88] sm:$0xff] %v9899_v2 }
 0x85b   : > { %v13052_v38 = vpop.f32.mrf.mxu1 }
 0x85c   : > { %9981 = vst [vmem:[%s17533_s10 + $0xb0] sm:$0xff] %v13052_v38 }
 0x85d   : > { %v9912_v16 = vpop.f32.mrf.mxu1 }
 0x85e   : > { %9979 = vst [vmem:[%s17533_s10 + $0xa0] sm:$0xff] %v9912_v16 }
 0x85f   : > { %v13053_v59 = vpop.f32.mrf.mxu1 }
 0x860   : > { %9982 = vst [vmem:[%s17533_s10 + $0xb8] sm:$0xff] %v13053_v59 }
 0x861   : > { %v9915_v28 = vpop.f32.mrf.mxu1 }
 0x862   : > { %9980 = vst [vmem:[%s17533_s10 + $0xa8] sm:$0xff] %v9915_v28 }
 0x86b   : > { %v13056_v45 = vpop.f32.mrf.mxu1 }
 0x86c   : > { %9985 = vst [vmem:[%s17533_s10 + $0xd0] sm:$0xff] %v13056_v45 }
 0x86d   : > { %v9928_v0 = vpop.f32.mrf.mxu1 }
 0x86e   : > { %9983 = vst [vmem:[%s17533_s10 + $0xc0] sm:$0xff] %v9928_v0 }
 0x86f   : > { %v13057_v27 = vpop.f32.mrf.mxu1 }
 0x870   : > { %9986 = vst [vmem:[%s17533_s10 + $0xd8] sm:$0xff] %v13057_v27 }
 0x871   : > { %v9931_v33 = vpop.f32.mrf.mxu1 }
 0x872   : > { %9984 = vst [vmem:[%s17533_s10 + $0xc8] sm:$0xff] %v9931_v33 }
 0x87b   : > { %v13060_v48 = vpop.f32.mrf.mxu1 }
 0x87c   : > { %9989 = vst [vmem:[%s17533_s10 + $0xf0] sm:$0xff] %v13060_v48 }
 0x87d   : > { %v9944_v35 = vpop.f32.mrf.mxu1 }
 0x87e   : > { %9987 = vst [vmem:[%s17533_s10 + $0xe0] sm:$0xff] %v9944_v35 }
 0x87f   : > { %v13061_v42 = vpop.f32.mrf.mxu1 }
 0x880   : > { %9990 = vst [vmem:[%s17533_s10 + $0xf8] sm:$0xff] %v13061_v42 }
 0x881   : > { %v9947_v63 = vpop.f32.mrf.mxu1 }
 0x882   : > { %9988 = vst [vmem:[%s17533_s10 + $0xe8] sm:$0xff] %v9947_v63 }
 0x883 PF: > { %s16_s21 = sadd.s32 1, %s13532_s21  }
 0x884   : > { %p13_p4 = scmp.ge.s32.totalorder %s16_s21, 4  }
 0x886   :  { %15 = sbr.rel (!%p13_p4) target bundleno = 1 (0x1), region = 77 }

</bundles_post_ra>
